<compile_context>
chip_gen: v6e
topology: v6e:2x2x1
jax: 0.10.0
libtpu: 0.0.40
codegen_flags: <defaults>
</compile_context>

<pallas_src>
import functools
import math

import jax
import jax.numpy as jnp
from jax.experimental import pallas as pl
from jax.experimental.pallas import tpu as pltpu


def _cdiv(a, b):
    return -(-a // b)


def _round_up(a, m):
    return _cdiv(a, m) * m


def _pad_rows(w, rows):
    return jnp.pad(w, ((0, rows - w.shape[0]), (0, 0)))


# ----------------------------------------------------------------------------
# Pallas kernel: fused N-layer per-point MLP (+ optional running-max pool)
# ----------------------------------------------------------------------------
def _make_point_kernel(num_layers, relu_flags, pool):
    def kernel(*refs):
        x_ref = refs[0]                                          # (TILE_N, C_in)
        layer_refs = [(refs[1 + 2 * l], refs[2 + 2 * l]) for l in range(num_layers)]
        o_ref = refs[1 + 2 * num_layers]
        acc_ref = refs[2 + 2 * num_layers] if pool else None     # (8, C_out) f32 scratch

        h = x_ref[...]
        for (w_ref, t_ref), do_relu in zip(layer_refs, relu_flags):
            w = w_ref[...]                                       # bf16 (C_in_l, C_out_l)
            # bf16 MXU matmul with f32 accumulation; bias-add / ReLU stay in f32 (VPU).
            h = jnp.dot(h.astype(w.dtype), w, preferred_element_type=jnp.float32)
            h = h + t_ref[...]
            if do_relu:
                h = jnp.maximum(h, 0.0)

        if pool:
            tn, co = h.shape
            # (TILE_N, C) -> (TILE_N//8, 8, C) max over the leading axis: pure VPU maxes,
            # no per-tile cross-sublane XLU reduce.
            tile_max8 = jnp.max(h.reshape(tn // 8, 8, co), axis=0)
            t = pl.program_id(1)

            @pl.when(t == 0)
            def _():
                acc_ref[...] = tile_max8

            @pl.when(t != 0)
            def _():
                acc_ref[...] = jnp.maximum(acc_ref[...], tile_max8)

            # One 8 -> 1 sublane reduce + store per batch (last point tile only).
            @pl.when(t == pl.num_programs(1) - 1)
            def _():
                o_ref[...] = jnp.max(acc_ref[...], axis=0, keepdims=True)
        else:
            o_ref[...] = h.astype(o_ref.dtype)

    return kernel


def point_mlp(x, ws, ts, relu_flags, *, pool=False, out_dtype=jnp.float32, tile_n=512):
    """Fused per-point MLP.

    x:          (B, N, C_in), channels-last (bf16 preferred).
    ws:         per-layer folded weights: (C_in_l, C_out_l) shared, or
                (B, C_in_l, C_out_l) per-batch (transform-folded). bf16.
    ts:         per-layer folded shifts, (1, C_out_l) f32.
    relu_flags: per-layer Python bools.
    pool=True:  per-batch max over points, (B, C_out) f32.
    pool=False: per-point output, (B, N, C_out) in out_dtype.
    """
    B, N, c_in = x.shape
    c_out = ws[-1].shape[-1]

    tile_n = min(int(tile_n), _round_up(N, 16))
    tile_n = max(16, (tile_n // 16) * 16)            # multiple of 16 for bf16 sublane packing
    n_tiles = _cdiv(N, tile_n)
    n_pad = n_tiles * tile_n
    if n_pad != N:
        # Pad with copies of the last point: max-pool invariant, sliced off otherwise.
        pad = jnp.broadcast_to(x[:, -1:, :], (B, n_pad - N, c_in))
        x = jnp.concatenate([x, pad], axis=1)

    in_specs = [pl.BlockSpec((None, tile_n, c_in), lambda b, t: (b, t, 0))]
    args = [x]
    for w, tv in zip(ws, ts):
        if w.ndim == 3:      # per-batch (transform-folded) first-layer weight
            in_specs.append(pl.BlockSpec((None,) + tuple(w.shape[1:]), lambda b, t: (b, 0, 0)))
        else:                # shared VMEM-resident weight
            in_specs.append(pl.BlockSpec(tuple(w.shape), lambda b, t: (0, 0)))
        in_specs.append(pl.BlockSpec(tuple(tv.shape), lambda b, t: (0, 0)))
        args += [w, tv]

    if pool:
        out_shape = jax.ShapeDtypeStruct((B, 1, c_out), jnp.float32)
        out_spec = pl.BlockSpec((None, 1, c_out), lambda b, t: (b, 0, 0))
        dim_sem = ("parallel", "arbitrary")          # running max over point tiles
        scratch = [pltpu.VMEM((8, c_out), jnp.float32)]
    else:
        out_shape = jax.ShapeDtypeStruct((B, n_pad, c_out), out_dtype)
        out_spec = pl.BlockSpec((None, tile_n, c_out), lambda b, t: (b, t, 0))
        dim_sem = ("parallel", "parallel")
        scratch = []

    kernel = _make_point_kernel(len(ws), tuple(bool(r) for r in relu_flags), pool)
    out = pl.pallas_call(
        kernel,
        grid=(B, n_tiles),
        in_specs=in_specs,
        out_specs=out_spec,
        out_shape=out_shape,
        scratch_shapes=scratch,
        compiler_params=pltpu.CompilerParams(
            dimension_semantics=dim_sem,
            # Known-safe on every generation (v7x has only 64 MiB VMEM/TC); bf16 weights
            # plus tile_n=512 keep the live footprint far below this cap.
            vmem_limit_bytes=32 * 1024 * 1024,
        ),
    )(*args)

    if pool:
        return out.reshape(B, c_out)
    return out[:, :N, :] if n_pad != N else out


# ----------------------------------------------------------------------------
# Parameter construction: fold bias + inference BatchNorm (+ identity) into weights
# ----------------------------------------------------------------------------
def _conv_bn_fold(key, in_c, out_c, eps=1e-5):
    """Conv/Linear followed by BatchNorm (running stats) -> (W' (in,out) f32, t' (1,out) f32)."""
    kw, kb, kg, kbe, km, kv = jax.random.split(key, 6)
    bound = 1.0 / math.sqrt(in_c)
    w = jax.random.uniform(kw, (out_c, in_c), jnp.float32, -bound, bound)
    b = jax.random.uniform(kb, (out_c,), jnp.float32, -bound, bound)
    gamma = 1.0 + 0.1 * jax.random.normal(kg, (out_c,), jnp.float32)
    beta = 0.1 * jax.random.normal(kbe, (out_c,), jnp.float32)
    mean = 0.1 * jax.random.normal(km, (out_c,), jnp.float32)
    var = 1.0 + 0.1 * jnp.abs(jax.random.normal(kv, (out_c,), jnp.float32))
    scale = gamma / jnp.sqrt(var + eps)
    shift = beta - mean * scale
    w_folded = (w * scale[:, None]).T                    # (in_c, out_c)
    t_folded = (scale * b + shift).reshape(1, out_c)
    return w_folded, t_folded


def _linear_fold(key, in_c, out_c, zero_init=False, extra_bias=None):
    """Plain Linear (no BN) -> (W' (in,out), t' (1,out)); optional folded extra bias."""
    if zero_init:
        w = jnp.zeros((out_c, in_c), jnp.float32)
        b = jnp.zeros((out_c,), jnp.float32)
    else:
        kw, kb = jax.random.split(key)
        bound = 1.0 / math.sqrt(in_c)
        w = jax.random.uniform(kw, (out_c, in_c), jnp.float32, -bound, bound)
        b = jax.random.uniform(kb, (out_c,), jnp.float32, -bound, bound)
    t = b.reshape(1, out_c)
    if extra_bias is not None:
        t = t + extra_bias.reshape(1, out_c)
    return w.T, t


def init_pointnet_params(key, num_classes=40):
    keys = iter(jax.random.split(key, 32))

    def tnet_params(k):
        pw, pt = [], []
        for cin, cout in [(k, 64), (64, 128), (128, 1024)]:       # conv1..3 + bn1..3
            w, t = _conv_bn_fold(next(keys), cin, cout)
            pw.append(w); pt.append(t)
        if k == 3:
            pw[0] = _pad_rows(pw[0], 8)                           # xyz padded 3 -> 8 channels
        pw = [w.astype(jnp.bfloat16) for w in pw]                 # bf16 once, in the wrapper
        hw, ht = [], []
        for cin, cout in [(1024, 512), (512, 256)]:               # fc1+bn4, fc2+bn5 (XLA, f32)
            w, t = _conv_bn_fold(next(keys), cin, cout)
            hw.append(w); ht.append(t)
        # fc3 is zero-initialised in torch; flattened eye(k) folded into its bias.
        w, t = _linear_fold(next(keys), 256, k * k, zero_init=True,
                            extra_bias=jnp.eye(k, dtype=jnp.float32).reshape(-1))
        hw.append(w); ht.append(t)
        return {"point_w": pw, "point_t": pt, "head_w": hw, "head_t": ht}

    params = {"tnet3": tnet_params(3), "tnet64": tnet_params(64)}

    # TransformNet conv1+bn1, conv2+bn2 kept f32 (they get the per-batch transform folded
    # in at forward time, then cast to bf16); conv3+bn3 cast to bf16 here.
    w1, t1 = _conv_bn_fold(next(keys), 3, 64)
    w2, t2 = _conv_bn_fold(next(keys), 64, 128)
    w3, t3 = _conv_bn_fold(next(keys), 128, 1024)
    params["tf"] = {"conv1_w": w1, "conv1_t": t1,
                    "conv2_w": w2, "conv2_t": t2,
                    "conv3_w": w3.astype(jnp.bfloat16), "conv3_t": t3}

    # PointNetCls classifier head: fc1+bn1, fc2+bn2, fc3 (XLA, f32)
    cw, ct = [], []
    for cin, cout in [(1024, 512), (512, 256)]:
        w, t = _conv_bn_fold(next(keys), cin, cout)
        cw.append(w); ct.append(t)
    w, t = _linear_fold(next(keys), 256, num_classes)
    cw.append(w); ct.append(t)
    params["cls"] = {"w": cw, "t": ct}
    return params


# ----------------------------------------------------------------------------
# Full PointNetCls forward
# ----------------------------------------------------------------------------
def _dense_chain(h, ws, ts, relu_flags):
    """Tiny FC heads in plain XLA (bad MXU shapes; keep out of the point kernel's VMEM)."""
    for w, t, r in zip(ws, ts, relu_flags):
        h = jnp.dot(h, w, preferred_element_type=jnp.float32) + t
        if r:
            h = jnp.maximum(h, 0.0)
    return h


def pointnet_cls_forward(x, params, *, tile_n=512):
    """x: (B, 3, N) f32 -> (log_probs (B, nc), matrix3x3 (B,3,3), matrix64x64 (B,64,64))."""
    B = x.shape[0]
    pts = jnp.transpose(x, (0, 2, 1))                                    # (B, N, 3)
    # Zero-pad 3 -> 8 channels (lane-friendlier first-layer blocks) and cast to bf16.
    pts8 = jnp.pad(pts, ((0, 0), (0, 0), (0, 5))).astype(jnp.bfloat16)   # (B, N, 8)

    # --- input transform TNet(k=3): point MLP + max-pool in Pallas, FC head in XLA ---
    p3 = params["tnet3"]
    feat = point_mlp(pts8, p3["point_w"], p3["point_t"], (True, True, True),
                     pool=True, tile_n=tile_n)                           # (B, 1024) f32
    m3 = _dense_chain(feat, p3["head_w"], p3["head_t"], (True, True, False)).reshape(B, 3, 3)

    # --- TransformNet conv1(+bn1+ReLU); 3x3 transform folded into conv1's weight ---
    tf = params["tf"]
    w0 = jnp.einsum("bij,jo->bio", m3, tf["conv1_w"])                    # (B, 3, 64) f32
    w0 = jnp.pad(w0, ((0, 0), (0, 5), (0, 0))).astype(jnp.bfloat16)      # (B, 8, 64) bf16
    y = point_mlp(pts8, [w0], [tf["conv1_t"]], (True,),
                  pool=False, out_dtype=jnp.bfloat16, tile_n=tile_n)     # (B, N, 64) bf16

    # --- feature transform TNet(k=64) ---
    p64 = params["tnet64"]
    feat = point_mlp(y, p64["point_w"], p64["point_t"], (True, True, True),
                     pool=True, tile_n=tile_n)                           # (B, 1024) f32
    m64 = _dense_chain(feat, p64["head_w"], p64["head_t"], (True, True, False)).reshape(B, 64, 64)

    # --- conv2(+bn2+ReLU), conv3(+bn3, no ReLU); 64x64 transform folded into conv2 ---
    w2b = jnp.einsum("bij,jo->bio", m64, tf["conv2_w"]).astype(jnp.bfloat16)  # (B, 64, 128)
    gfeat = point_mlp(y, [w2b, tf["conv3_w"]], [tf["conv2_t"], tf["conv3_t"]],
                      (True, False), pool=True, tile_n=tile_n)           # (B, 1024) f32

    # --- classifier head ---
    # TODO(synk): Dropout(p=0.3) is the inference-mode identity here.
    pc = params["cls"]
    logits = _dense_chain(gfeat, pc["w"], pc["t"], (True, True, False))  # (B, num_classes)
    return jax.nn.log_softmax(logits, axis=1), m3, m64


if __name__ == "__main__":
    B, N, num_classes = 2, 256, 40
    key = jax.random.PRNGKey(0)
    kp, kx = jax.random.split(key)
    params = init_pointnet_params(kp, num_classes=num_classes)
    x = jax.random.normal(kx, (B, 3, N), jnp.float32)      # torch layout (B, 3, num_points)

    fwd = jax.jit(functools.partial(pointnet_cls_forward, tile_n=512))
    log_probs, m3, m64 = jax.block_until_ready(fwd(x, params))

    assert log_probs.shape == (B, num_classes)
    assert m3.shape == (B, 3, 3) and m64.shape == (B, 64, 64)
    assert bool(jnp.all(jnp.isfinite(log_probs)))
    assert bool(jnp.all(jnp.isfinite(m3))) and bool(jnp.all(jnp.isfinite(m64)))
    # zero-initialised TNet fc3 => transform matrices are exactly the folded identity
    assert bool(jnp.allclose(m3, jnp.broadcast_to(jnp.eye(3), (B, 3, 3)), atol=1e-5))
    # log_softmax rows must normalise
    assert bool(jnp.allclose(jnp.exp(log_probs).sum(axis=1), 1.0, atol=1e-4))
    print("KERNEL_OK")
</pallas_src>

<mosaic_0001>
module attributes {stable_mosaic.version = 11 : i64} {
  func.func @kernel(%arg0: i32, %arg1: i32, %arg2: memref<1x256x8xbf16, #tpu.memory_space<vmem>>, %arg3: memref<8x64xbf16, #tpu.memory_space<vmem>>, %arg4: memref<1x64xf32, #tpu.memory_space<vmem>>, %arg5: memref<64x128xbf16, #tpu.memory_space<vmem>>, %arg6: memref<1x128xf32, #tpu.memory_space<vmem>>, %arg7: memref<128x1024xbf16, #tpu.memory_space<vmem>>, %arg8: memref<1x1024xf32, #tpu.memory_space<vmem>>, %arg9: memref<1x1x1024xf32, #tpu.memory_space<vmem>>, %arg10: memref<8x1024xf32, #tpu.memory_space<vmem>>) attributes {dimension_semantics = [#tpu.dimension_semantics<parallel>, #tpu.dimension_semantics<arbitrary>], iteration_bounds = array<i64: 2, 1>, scalar_prefetch = 0 : i64, scratch_operands = 1 : i64, tpu.core_type = #tpu.core_type<tc>, window_params = [{transform_indices = @transform_0, window_bounds = array<i64: 1, 256, 8>}, {pipeline_mode = #tpu.pipeline_mode<synchronous>, transform_indices = @transform_1, window_bounds = array<i64: 8, 64>}, {pipeline_mode = #tpu.pipeline_mode<synchronous>, transform_indices = @transform_2, window_bounds = array<i64: 1, 64>}, {pipeline_mode = #tpu.pipeline_mode<synchronous>, transform_indices = @transform_3, window_bounds = array<i64: 64, 128>}, {pipeline_mode = #tpu.pipeline_mode<synchronous>, transform_indices = @transform_4, window_bounds = array<i64: 1, 128>}, {pipeline_mode = #tpu.pipeline_mode<synchronous>, transform_indices = @transform_5, window_bounds = array<i64: 128, 1024>}, {pipeline_mode = #tpu.pipeline_mode<synchronous>, transform_indices = @transform_6, window_bounds = array<i64: 1, 1024>}, {transform_indices = @transform_7, window_bounds = array<i64: 1, 1, 1024>}]} {
    %c0 = arith.constant 0 : index
    %c0_0 = arith.constant 0 : index
    %c0_1 = arith.constant 0 : index
    %0 = vector.load %arg2[%c0, %c0_0, %c0_1] : memref<1x256x8xbf16, #tpu.memory_space<vmem>>, vector<1x256x8xbf16>
    %1 = vector.shape_cast %0 : vector<1x256x8xbf16> to vector<256x8xbf16>
    %c0_2 = arith.constant 0 : index
    %c0_3 = arith.constant 0 : index
    %2 = vector.load %arg3[%c0_2, %c0_3] : memref<8x64xbf16, #tpu.memory_space<vmem>>, vector<8x64xbf16>
    %cst = arith.constant dense<0.000000e+00> : vector<256x64xf32>
    %3 = tpu.matmul %1, %2, %cst {dimension_numbers = #tpu.dot_dimension_numbers<[1], [0], [0], [1], [0, 0, 1, 1], [], []>} : vector<256x8xbf16>, vector<8x64xbf16>, vector<256x64xf32> -> vector<256x64xf32>
    %c0_4 = arith.constant 0 : index
    %c0_5 = arith.constant 0 : index
    %4 = vector.load %arg4[%c0_4, %c0_5] : memref<1x64xf32, #tpu.memory_space<vmem>>, vector<1x64xf32>
    %5 = vector.broadcast %4 : vector<1x64xf32> to vector<256x64xf32>
    %6 = arith.addf %3, %5 : vector<256x64xf32>
    %cst_6 = arith.constant 0.000000e+00 : f32
    %7 = vector.broadcast %cst_6 : f32 to vector<256x64xf32>
    %8 = arith.maximumf %6, %7 : vector<256x64xf32>
    %c0_7 = arith.constant 0 : index
    %c0_8 = arith.constant 0 : index
    %9 = vector.load %arg5[%c0_7, %c0_8] : memref<64x128xbf16, #tpu.memory_space<vmem>>, vector<64x128xbf16>
    %10 = arith.truncf %8 : vector<256x64xf32> to vector<256x64xbf16>
    %cst_9 = arith.constant dense<0.000000e+00> : vector<256x128xf32>
    %11 = tpu.matmul %10, %9, %cst_9 {dimension_numbers = #tpu.dot_dimension_numbers<[1], [0], [0], [1], [0, 0, 1, 1], [], []>} : vector<256x64xbf16>, vector<64x128xbf16>, vector<256x128xf32> -> vector<256x128xf32>
    %c0_10 = arith.constant 0 : index
    %c0_11 = arith.constant 0 : index
    %12 = vector.load %arg6[%c0_10, %c0_11] : memref<1x128xf32, #tpu.memory_space<vmem>>, vector<1x128xf32>
    %13 = vector.broadcast %12 : vector<1x128xf32> to vector<256x128xf32>
    %14 = arith.addf %11, %13 : vector<256x128xf32>
    %cst_12 = arith.constant 0.000000e+00 : f32
    %15 = vector.broadcast %cst_12 : f32 to vector<256x128xf32>
    %16 = arith.maximumf %14, %15 : vector<256x128xf32>
    %c0_13 = arith.constant 0 : index
    %c0_14 = arith.constant 0 : index
    %17 = vector.load %arg7[%c0_13, %c0_14] : memref<128x1024xbf16, #tpu.memory_space<vmem>>, vector<128x1024xbf16>
    %18 = arith.truncf %16 : vector<256x128xf32> to vector<256x128xbf16>
    %cst_15 = arith.constant dense<0.000000e+00> : vector<256x1024xf32>
    %19 = tpu.matmul %18, %17, %cst_15 {dimension_numbers = #tpu.dot_dimension_numbers<[1], [0], [0], [1], [0, 0, 1, 1], [], []>} : vector<256x128xbf16>, vector<128x1024xbf16>, vector<256x1024xf32> -> vector<256x1024xf32>
    %c0_16 = arith.constant 0 : index
    %c0_17 = arith.constant 0 : index
    %20 = vector.load %arg8[%c0_16, %c0_17] : memref<1x1024xf32, #tpu.memory_space<vmem>>, vector<1x1024xf32>
    %21 = vector.broadcast %20 : vector<1x1024xf32> to vector<256x1024xf32>
    %22 = arith.addf %19, %21 : vector<256x1024xf32>
    %cst_18 = arith.constant 0.000000e+00 : f32
    %23 = vector.broadcast %cst_18 : f32 to vector<256x1024xf32>
    %24 = arith.maximumf %22, %23 : vector<256x1024xf32>
    %25 = vector.shape_cast %24 : vector<256x1024xf32> to vector<32x8x1024xf32>
    %cst_19 = arith.constant dense<0xFF800000> : vector<8x1024xf32>
    %26 = vector.multi_reduction <maximumf>, %25, %cst_19 [0] : vector<32x8x1024xf32> to vector<8x1024xf32>
    %c0_i32 = arith.constant 0 : i32
    %27 = arith.cmpi eq, %arg1, %c0_i32 : i32
    %28 = arith.extui %27 : i1 to i32
    %c0_i32_20 = arith.constant 0 : i32
    %29 = arith.cmpi ne, %28, %c0_i32_20 : i32
    scf.if %29 {
      %c0_25 = arith.constant 0 : index
      %c0_26 = arith.constant 0 : index
      %36 = vector.load %arg10[%c0_25, %c0_26] : memref<8x1024xf32, #tpu.memory_space<vmem>>, vector<8x1024xf32>
      tpu.vector_store %arg10[%c0_25, %c0_26], %26 {strides = array<i32>} : memref<8x1024xf32, #tpu.memory_space<vmem>>, vector<8x1024xf32>,
    } else {
    }
    %c0_i32_21 = arith.constant 0 : i32
    %30 = arith.cmpi ne, %arg1, %c0_i32_21 : i32
    %31 = arith.extui %30 : i1 to i32
    %c0_i32_22 = arith.constant 0 : i32
    %32 = arith.cmpi ne, %31, %c0_i32_22 : i32
    scf.if %32 {
      %c0_25 = arith.constant 0 : index
      %c0_26 = arith.constant 0 : index
      %36 = vector.load %arg10[%c0_25, %c0_26] : memref<8x1024xf32, #tpu.memory_space<vmem>>, vector<8x1024xf32>
      %37 = arith.maximumf %36, %26 : vector<8x1024xf32>
      %c0_27 = arith.constant 0 : index
      %c0_28 = arith.constant 0 : index
      %38 = vector.load %arg10[%c0_27, %c0_28] : memref<8x1024xf32, #tpu.memory_space<vmem>>, vector<8x1024xf32>
      tpu.vector_store %arg10[%c0_27, %c0_28], %37 {strides = array<i32>} : memref<8x1024xf32, #tpu.memory_space<vmem>>, vector<8x1024xf32>,
    } else {
    }
    %c0_i32_23 = arith.constant 0 : i32
    %33 = arith.cmpi eq, %arg1, %c0_i32_23 : i32
    %34 = arith.extui %33 : i1 to i32
    %c0_i32_24 = arith.constant 0 : i32
    %35 = arith.cmpi ne, %34, %c0_i32_24 : i32
    scf.if %35 {
      %c0_25 = arith.constant 0 : index
      %c0_26 = arith.constant 0 : index
      %36 = vector.load %arg10[%c0_25, %c0_26] : memref<8x1024xf32, #tpu.memory_space<vmem>>, vector<8x1024xf32>
      %cst_27 = arith.constant dense<0xFF800000> : vector<1024xf32>
      %37 = vector.multi_reduction <maximumf>, %36, %cst_27 [0] : vector<8x1024xf32> to vector<1024xf32>
      %38 = vector.shape_cast %37 : vector<1024xf32> to vector<1x1024xf32>
      %c0_28 = arith.constant 0 : index
      %c0_29 = arith.constant 0 : index
      %c0_30 = arith.constant 0 : index
      %39 = vector.load %arg9[%c0_28, %c0_29, %c0_30] : memref<1x1x1024xf32, #tpu.memory_space<vmem>>, vector<1x1x1024xf32>
      %40 = vector.shape_cast %39 : vector<1x1x1024xf32> to vector<1x1024xf32>
      %41 = vector.shape_cast %38 : vector<1x1024xf32> to vector<1x1x1024xf32>
      tpu.vector_store %arg9[%c0_28, %c0_29, %c0_30], %41 {strides = array<i32>} : memref<1x1x1024xf32, #tpu.memory_space<vmem>>, vector<1x1x1024xf32>,
    } else {
    }
    return
  }
  func.func @transform_0(%arg0: i32, %arg1: i32) -> (i32, i32, i32) {
    %c0_i32 = arith.constant 0 : i32
    %c0_i32_0 = arith.constant 0 : i32
    return %arg0, %arg1, %c0_i32 : i32, i32, i32
  }
  func.func @transform_1(%arg0: i32, %arg1: i32) -> (i32, i32) {
    %c0_i32 = arith.constant 0 : i32
    %c0_i32_0 = arith.constant 0 : i32
    %c0_i32_1 = arith.constant 0 : i32
    return %c0_i32, %c0_i32_0 : i32, i32
  }
  func.func @transform_2(%arg0: i32, %arg1: i32) -> (i32, i32) {
    %c0_i32 = arith.constant 0 : i32
    %c0_i32_0 = arith.constant 0 : i32
    %c0_i32_1 = arith.constant 0 : i32
    return %c0_i32, %c0_i32_0 : i32, i32
  }
  func.func @transform_3(%arg0: i32, %arg1: i32) -> (i32, i32) {
    %c0_i32 = arith.constant 0 : i32
    %c0_i32_0 = arith.constant 0 : i32
    %c0_i32_1 = arith.constant 0 : i32
    return %c0_i32, %c0_i32_0 : i32, i32
  }
  func.func @transform_4(%arg0: i32, %arg1: i32) -> (i32, i32) {
    %c0_i32 = arith.constant 0 : i32
    %c0_i32_0 = arith.constant 0 : i32
    %c0_i32_1 = arith.constant 0 : i32
    return %c0_i32, %c0_i32_0 : i32, i32
  }
  func.func @transform_5(%arg0: i32, %arg1: i32) -> (i32, i32) {
    %c0_i32 = arith.constant 0 : i32
    %c0_i32_0 = arith.constant 0 : i32
    %c0_i32_1 = arith.constant 0 : i32
    return %c0_i32, %c0_i32_0 : i32, i32
  }
  func.func @transform_6(%arg0: i32, %arg1: i32) -> (i32, i32) {
    %c0_i32 = arith.constant 0 : i32
    %c0_i32_0 = arith.constant 0 : i32
    %c0_i32_1 = arith.constant 0 : i32
    return %c0_i32, %c0_i32_0 : i32, i32
  }
  func.func @transform_7(%arg0: i32, %arg1: i32) -> (i32, i32, i32) {
    %c0_i32 = arith.constant 0 : i32
    %c0_i32_0 = arith.constant 0 : i32
    %c0_i32_1 = arith.constant 0 : i32
    return %arg0, %c0_i32, %c0_i32_0 : i32, i32, i32
  }
}

module attributes {stable_mosaic.version = 11 : i64} {
  func.func @kernel(%arg0: i32, %arg1: i32, %arg2: memref<1x256x64xbf16, #tpu.memory_space<vmem>>, %arg3: memref<64x64xbf16, #tpu.memory_space<vmem>>, %arg4: memref<1x64xf32, #tpu.memory_space<vmem>>, %arg5: memref<64x128xbf16, #tpu.memory_space<vmem>>, %arg6: memref<1x128xf32, #tpu.memory_space<vmem>>, %arg7: memref<128x1024xbf16, #tpu.memory_space<vmem>>, %arg8: memref<1x1024xf32, #tpu.memory_space<vmem>>, %arg9: memref<1x1x1024xf32, #tpu.memory_space<vmem>>, %arg10: memref<8x1024xf32, #tpu.memory_space<vmem>>) attributes {dimension_semantics = [#tpu.dimension_semantics<parallel>, #tpu.dimension_semantics<arbitrary>], iteration_bounds = array<i64: 2, 1>, scalar_prefetch = 0 : i64, scratch_operands = 1 : i64, tpu.core_type = #tpu.core_type<tc>, window_params = [{transform_indices = @transform_0, window_bounds = array<i64: 1, 256, 64>}, {pipeline_mode = #tpu.pipeline_mode<synchronous>, transform_indices = @transform_1, window_bounds = array<i64: 64, 64>}, {pipeline_mode = #tpu.pipeline_mode<synchronous>, transform_indices = @transform_2, window_bounds = array<i64: 1, 64>}, {pipeline_mode = #tpu.pipeline_mode<synchronous>, transform_indices = @transform_3, window_bounds = array<i64: 64, 128>}, {pipeline_mode = #tpu.pipeline_mode<synchronous>, transform_indices = @transform_4, window_bounds = array<i64: 1, 128>}, {pipeline_mode = #tpu.pipeline_mode<synchronous>, transform_indices = @transform_5, window_bounds = array<i64: 128, 1024>}, {pipeline_mode = #tpu.pipeline_mode<synchronous>, transform_indices = @transform_6, window_bounds = array<i64: 1, 1024>}, {transform_indices = @transform_7, window_bounds = array<i64: 1, 1, 1024>}]} {
    %c0 = arith.constant 0 : index
    %c0_0 = arith.constant 0 : index
    %c0_1 = arith.constant 0 : index
    %0 = vector.load %arg2[%c0, %c0_0, %c0_1] : memref<1x256x64xbf16, #tpu.memory_space<vmem>>, vector<1x256x64xbf16>
    %1 = vector.shape_cast %0 : vector<1x256x64xbf16> to vector<256x64xbf16>
    %c0_2 = arith.constant 0 : index
    %c0_3 = arith.constant 0 : index
    %2 = vector.load %arg3[%c0_2, %c0_3] : memref<64x64xbf16, #tpu.memory_space<vmem>>, vector<64x64xbf16>
    %cst = arith.constant dense<0.000000e+00> : vector<256x64xf32>
    %3 = tpu.matmul %1, %2, %cst {dimension_numbers = #tpu.dot_dimension_numbers<[1], [0], [0], [1], [0, 0, 1, 1], [], []>} : vector<256x64xbf16>, vector<64x64xbf16>, vector<256x64xf32> -> vector<256x64xf32>
    %c0_4 = arith.constant 0 : index
    %c0_5 = arith.constant 0 : index
    %4 = vector.load %arg4[%c0_4, %c0_5] : memref<1x64xf32, #tpu.memory_space<vmem>>, vector<1x64xf32>
    %5 = vector.broadcast %4 : vector<1x64xf32> to vector<256x64xf32>
    %6 = arith.addf %3, %5 : vector<256x64xf32>
    %cst_6 = arith.constant 0.000000e+00 : f32
    %7 = vector.broadcast %cst_6 : f32 to vector<256x64xf32>
    %8 = arith.maximumf %6, %7 : vector<256x64xf32>
    %c0_7 = arith.constant 0 : index
    %c0_8 = arith.constant 0 : index
    %9 = vector.load %arg5[%c0_7, %c0_8] : memref<64x128xbf16, #tpu.memory_space<vmem>>, vector<64x128xbf16>
    %10 = arith.truncf %8 : vector<256x64xf32> to vector<256x64xbf16>
    %cst_9 = arith.constant dense<0.000000e+00> : vector<256x128xf32>
    %11 = tpu.matmul %10, %9, %cst_9 {dimension_numbers = #tpu.dot_dimension_numbers<[1], [0], [0], [1], [0, 0, 1, 1], [], []>} : vector<256x64xbf16>, vector<64x128xbf16>, vector<256x128xf32> -> vector<256x128xf32>
    %c0_10 = arith.constant 0 : index
    %c0_11 = arith.constant 0 : index
    %12 = vector.load %arg6[%c0_10, %c0_11] : memref<1x128xf32, #tpu.memory_space<vmem>>, vector<1x128xf32>
    %13 = vector.broadcast %12 : vector<1x128xf32> to vector<256x128xf32>
    %14 = arith.addf %11, %13 : vector<256x128xf32>
    %cst_12 = arith.constant 0.000000e+00 : f32
    %15 = vector.broadcast %cst_12 : f32 to vector<256x128xf32>
    %16 = arith.maximumf %14, %15 : vector<256x128xf32>
    %c0_13 = arith.constant 0 : index
    %c0_14 = arith.constant 0 : index
    %17 = vector.load %arg7[%c0_13, %c0_14] : memref<128x1024xbf16, #tpu.memory_space<vmem>>, vector<128x1024xbf16>
    %18 = arith.truncf %16 : vector<256x128xf32> to vector<256x128xbf16>
    %cst_15 = arith.constant dense<0.000000e+00> : vector<256x1024xf32>
    %19 = tpu.matmul %18, %17, %cst_15 {dimension_numbers = #tpu.dot_dimension_numbers<[1], [0], [0], [1], [0, 0, 1, 1], [], []>} : vector<256x128xbf16>, vector<128x1024xbf16>, vector<256x1024xf32> -> vector<256x1024xf32>
    %c0_16 = arith.constant 0 : index
    %c0_17 = arith.constant 0 : index
    %20 = vector.load %arg8[%c0_16, %c0_17] : memref<1x1024xf32, #tpu.memory_space<vmem>>, vector<1x1024xf32>
    %21 = vector.broadcast %20 : vector<1x1024xf32> to vector<256x1024xf32>
    %22 = arith.addf %19, %21 : vector<256x1024xf32>
    %cst_18 = arith.constant 0.000000e+00 : f32
    %23 = vector.broadcast %cst_18 : f32 to vector<256x1024xf32>
    %24 = arith.maximumf %22, %23 : vector<256x1024xf32>
    %25 = vector.shape_cast %24 : vector<256x1024xf32> to vector<32x8x1024xf32>
    %cst_19 = arith.constant dense<0xFF800000> : vector<8x1024xf32>
    %26 = vector.multi_reduction <maximumf>, %25, %cst_19 [0] : vector<32x8x1024xf32> to vector<8x1024xf32>
    %c0_i32 = arith.constant 0 : i32
    %27 = arith.cmpi eq, %arg1, %c0_i32 : i32
    %28 = arith.extui %27 : i1 to i32
    %c0_i32_20 = arith.constant 0 : i32
    %29 = arith.cmpi ne, %28, %c0_i32_20 : i32
    scf.if %29 {
      %c0_25 = arith.constant 0 : index
      %c0_26 = arith.constant 0 : index
      %36 = vector.load %arg10[%c0_25, %c0_26] : memref<8x1024xf32, #tpu.memory_space<vmem>>, vector<8x1024xf32>
      tpu.vector_store %arg10[%c0_25, %c0_26], %26 {strides = array<i32>} : memref<8x1024xf32, #tpu.memory_space<vmem>>, vector<8x1024xf32>,
    } else {
    }
    %c0_i32_21 = arith.constant 0 : i32
    %30 = arith.cmpi ne, %arg1, %c0_i32_21 : i32
    %31 = arith.extui %30 : i1 to i32
    %c0_i32_22 = arith.constant 0 : i32
    %32 = arith.cmpi ne, %31, %c0_i32_22 : i32
    scf.if %32 {
      %c0_25 = arith.constant 0 : index
      %c0_26 = arith.constant 0 : index
      %36 = vector.load %arg10[%c0_25, %c0_26] : memref<8x1024xf32, #tpu.memory_space<vmem>>, vector<8x1024xf32>
      %37 = arith.maximumf %36, %26 : vector<8x1024xf32>
      %c0_27 = arith.constant 0 : index
      %c0_28 = arith.constant 0 : index
      %38 = vector.load %arg10[%c0_27, %c0_28] : memref<8x1024xf32, #tpu.memory_space<vmem>>, vector<8x1024xf32>
      tpu.vector_store %arg10[%c0_27, %c0_28], %37 {strides = array<i32>} : memref<8x1024xf32, #tpu.memory_space<vmem>>, vector<8x1024xf32>,
    } else {
    }
    %c0_i32_23 = arith.constant 0 : i32
    %33 = arith.cmpi eq, %arg1, %c0_i32_23 : i32
    %34 = arith.extui %33 : i1 to i32
    %c0_i32_24 = arith.constant 0 : i32
    %35 = arith.cmpi ne, %34, %c0_i32_24 : i32
    scf.if %35 {
      %c0_25 = arith.constant 0 : index
      %c0_26 = arith.constant 0 : index
      %36 = vector.load %arg10[%c0_25, %c0_26] : memref<8x1024xf32, #tpu.memory_space<vmem>>, vector<8x1024xf32>
      %cst_27 = arith.constant dense<0xFF800000> : vector<1024xf32>
      %37 = vector.multi_reduction <maximumf>, %36, %cst_27 [0] : vector<8x1024xf32> to vector<1024xf32>
      %38 = vector.shape_cast %37 : vector<1024xf32> to vector<1x1024xf32>
      %c0_28 = arith.constant 0 : index
      %c0_29 = arith.constant 0 : index
      %c0_30 = arith.constant 0 : index
      %39 = vector.load %arg9[%c0_28, %c0_29, %c0_30] : memref<1x1x1024xf32, #tpu.memory_space<vmem>>, vector<1x1x1024xf32>
      %40 = vector.shape_cast %39 : vector<1x1x1024xf32> to vector<1x1024xf32>
      %41 = vector.shape_cast %38 : vector<1x1024xf32> to vector<1x1x1024xf32>
      tpu.vector_store %arg9[%c0_28, %c0_29, %c0_30], %41 {strides = array<i32>} : memref<1x1x1024xf32, #tpu.memory_space<vmem>>, vector<1x1x1024xf32>,
    } else {
    }
    return
  }
  func.func @transform_0(%arg0: i32, %arg1: i32) -> (i32, i32, i32) {
    %c0_i32 = arith.constant 0 : i32
    %c0_i32_0 = arith.constant 0 : i32
    return %arg0, %arg1, %c0_i32 : i32, i32, i32
  }
  func.func @transform_1(%arg0: i32, %arg1: i32) -> (i32, i32) {
    %c0_i32 = arith.constant 0 : i32
    %c0_i32_0 = arith.constant 0 : i32
    %c0_i32_1 = arith.constant 0 : i32
    return %c0_i32, %c0_i32_0 : i32, i32
  }
  func.func @transform_2(%arg0: i32, %arg1: i32) -> (i32, i32) {
    %c0_i32 = arith.constant 0 : i32
    %c0_i32_0 = arith.constant 0 : i32
    %c0_i32_1 = arith.constant 0 : i32
    return %c0_i32, %c0_i32_0 : i32, i32
  }
  func.func @transform_3(%arg0: i32, %arg1: i32) -> (i32, i32) {
    %c0_i32 = arith.constant 0 : i32
    %c0_i32_0 = arith.constant 0 : i32
    %c0_i32_1 = arith.constant 0 : i32
    return %c0_i32, %c0_i32_0 : i32, i32
  }
  func.func @transform_4(%arg0: i32, %arg1: i32) -> (i32, i32) {
    %c0_i32 = arith.constant 0 : i32
    %c0_i32_0 = arith.constant 0 : i32
    %c0_i32_1 = arith.constant 0 : i32
    return %c0_i32, %c0_i32_0 : i32, i32
  }
  func.func @transform_5(%arg0: i32, %arg1: i32) -> (i32, i32) {
    %c0_i32 = arith.constant 0 : i32
    %c0_i32_0 = arith.constant 0 : i32
    %c0_i32_1 = arith.constant 0 : i32
    return %c0_i32, %c0_i32_0 : i32, i32
  }
  func.func @transform_6(%arg0: i32, %arg1: i32) -> (i32, i32) {
    %c0_i32 = arith.constant 0 : i32
    %c0_i32_0 = arith.constant 0 : i32
    %c0_i32_1 = arith.constant 0 : i32
    return %c0_i32, %c0_i32_0 : i32, i32
  }
  func.func @transform_7(%arg0: i32, %arg1: i32) -> (i32, i32, i32) {
    %c0_i32 = arith.constant 0 : i32
    %c0_i32_0 = arith.constant 0 : i32
    %c0_i32_1 = arith.constant 0 : i32
    return %arg0, %c0_i32, %c0_i32_0 : i32, i32, i32
  }
}

module attributes {stable_mosaic.version = 11 : i64} {
  func.func @kernel(%arg0: i32, %arg1: i32, %arg2: memref<1x256x8xbf16, #tpu.memory_space<vmem>>, %arg3: memref<1x8x64xbf16, #tpu.memory_space<vmem>>, %arg4: memref<1x64xf32, #tpu.memory_space<vmem>>, %arg5: memref<1x256x64xbf16, #tpu.memory_space<vmem>>) attributes {dimension_semantics = [#tpu.dimension_semantics<parallel>, #tpu.dimension_semantics<parallel>], iteration_bounds = array<i64: 2, 1>, scalar_prefetch = 0 : i64, scratch_operands = 0 : i64, tpu.core_type = #tpu.core_type<tc>, window_params = [{transform_indices = @transform_0, window_bounds = array<i64: 1, 256, 8>}, {transform_indices = @transform_1, window_bounds = array<i64: 1, 8, 64>}, {pipeline_mode = #tpu.pipeline_mode<synchronous>, transform_indices = @transform_2, window_bounds = array<i64: 1, 64>}, {transform_indices = @transform_3, window_bounds = array<i64: 1, 256, 64>}]} {
    %c0 = arith.constant 0 : index
    %c0_0 = arith.constant 0 : index
    %c0_1 = arith.constant 0 : index
    %0 = vector.load %arg2[%c0, %c0_0, %c0_1] : memref<1x256x8xbf16, #tpu.memory_space<vmem>>, vector<1x256x8xbf16>
    %1 = vector.shape_cast %0 : vector<1x256x8xbf16> to vector<256x8xbf16>
    %c0_2 = arith.constant 0 : index
    %c0_3 = arith.constant 0 : index
    %c0_4 = arith.constant 0 : index
    %2 = vector.load %arg3[%c0_2, %c0_3, %c0_4] : memref<1x8x64xbf16, #tpu.memory_space<vmem>>, vector<1x8x64xbf16>
    %3 = vector.shape_cast %2 : vector<1x8x64xbf16> to vector<8x64xbf16>
    %cst = arith.constant dense<0.000000e+00> : vector<256x64xf32>
    %4 = tpu.matmul %1, %3, %cst {dimension_numbers = #tpu.dot_dimension_numbers<[1], [0], [0], [1], [0, 0, 1, 1], [], []>} : vector<256x8xbf16>, vector<8x64xbf16>, vector<256x64xf32> -> vector<256x64xf32>
    %c0_5 = arith.constant 0 : index
    %c0_6 = arith.constant 0 : index
    %5 = vector.load %arg4[%c0_5, %c0_6] : memref<1x64xf32, #tpu.memory_space<vmem>>, vector<1x64xf32>
    %6 = vector.broadcast %5 : vector<1x64xf32> to vector<256x64xf32>
    %7 = arith.addf %4, %6 : vector<256x64xf32>
    %cst_7 = arith.constant 0.000000e+00 : f32
    %8 = vector.broadcast %cst_7 : f32 to vector<256x64xf32>
    %9 = arith.maximumf %7, %8 : vector<256x64xf32>
    %10 = arith.truncf %9 : vector<256x64xf32> to vector<256x64xbf16>
    %c0_8 = arith.constant 0 : index
    %c0_9 = arith.constant 0 : index
    %c0_10 = arith.constant 0 : index
    %11 = vector.load %arg5[%c0_8, %c0_9, %c0_10] : memref<1x256x64xbf16, #tpu.memory_space<vmem>>, vector<1x256x64xbf16>
    %12 = vector.shape_cast %11 : vector<1x256x64xbf16> to vector<256x64xbf16>
    %13 = vector.shape_cast %10 : vector<256x64xbf16> to vector<1x256x64xbf16>
    tpu.vector_store %arg5[%c0_8, %c0_9, %c0_10], %13 {strides = array<i32>} : memref<1x256x64xbf16, #tpu.memory_space<vmem>>, vector<1x256x64xbf16>,
    return
  }
  func.func @transform_0(%arg0: i32, %arg1: i32) -> (i32, i32, i32) {
    %c0_i32 = arith.constant 0 : i32
    %c0_i32_0 = arith.constant 0 : i32
    return %arg0, %arg1, %c0_i32 : i32, i32, i32
  }
  func.func @transform_1(%arg0: i32, %arg1: i32) -> (i32, i32, i32) {
    %c0_i32 = arith.constant 0 : i32
    %c0_i32_0 = arith.constant 0 : i32
    %c0_i32_1 = arith.constant 0 : i32
    return %arg0, %c0_i32, %c0_i32_0 : i32, i32, i32
  }
  func.func @transform_2(%arg0: i32, %arg1: i32) -> (i32, i32) {
    %c0_i32 = arith.constant 0 : i32
    %c0_i32_0 = arith.constant 0 : i32
    %c0_i32_1 = arith.constant 0 : i32
    return %c0_i32, %c0_i32_0 : i32, i32
  }
  func.func @transform_3(%arg0: i32, %arg1: i32) -> (i32, i32, i32) {
    %c0_i32 = arith.constant 0 : i32
    %c0_i32_0 = arith.constant 0 : i32
    return %arg0, %arg1, %c0_i32 : i32, i32, i32
  }
}

module attributes {stable_mosaic.version = 11 : i64} {
  func.func @kernel(%arg0: i32, %arg1: i32, %arg2: memref<1x256x64xbf16, #tpu.memory_space<vmem>>, %arg3: memref<1x64x128xbf16, #tpu.memory_space<vmem>>, %arg4: memref<1x128xf32, #tpu.memory_space<vmem>>, %arg5: memref<128x1024xbf16, #tpu.memory_space<vmem>>, %arg6: memref<1x1024xf32, #tpu.memory_space<vmem>>, %arg7: memref<1x1x1024xf32, #tpu.memory_space<vmem>>, %arg8: memref<8x1024xf32, #tpu.memory_space<vmem>>) attributes {dimension_semantics = [#tpu.dimension_semantics<parallel>, #tpu.dimension_semantics<arbitrary>], iteration_bounds = array<i64: 2, 1>, scalar_prefetch = 0 : i64, scratch_operands = 1 : i64, tpu.core_type = #tpu.core_type<tc>, window_params = [{transform_indices = @transform_0, window_bounds = array<i64: 1, 256, 64>}, {transform_indices = @transform_1, window_bounds = array<i64: 1, 64, 128>}, {pipeline_mode = #tpu.pipeline_mode<synchronous>, transform_indices = @transform_2, window_bounds = array<i64: 1, 128>}, {pipeline_mode = #tpu.pipeline_mode<synchronous>, transform_indices = @transform_3, window_bounds = array<i64: 128, 1024>}, {pipeline_mode = #tpu.pipeline_mode<synchronous>, transform_indices = @transform_4, window_bounds = array<i64: 1, 1024>}, {transform_indices = @transform_5, window_bounds = array<i64: 1, 1, 1024>}]} {
    %c0 = arith.constant 0 : index
    %c0_0 = arith.constant 0 : index
    %c0_1 = arith.constant 0 : index
    %0 = vector.load %arg2[%c0, %c0_0, %c0_1] : memref<1x256x64xbf16, #tpu.memory_space<vmem>>, vector<1x256x64xbf16>
    %1 = vector.shape_cast %0 : vector<1x256x64xbf16> to vector<256x64xbf16>
    %c0_2 = arith.constant 0 : index
    %c0_3 = arith.constant 0 : index
    %c0_4 = arith.constant 0 : index
    %2 = vector.load %arg3[%c0_2, %c0_3, %c0_4] : memref<1x64x128xbf16, #tpu.memory_space<vmem>>, vector<1x64x128xbf16>
    %3 = vector.shape_cast %2 : vector<1x64x128xbf16> to vector<64x128xbf16>
    %cst = arith.constant dense<0.000000e+00> : vector<256x128xf32>
    %4 = tpu.matmul %1, %3, %cst {dimension_numbers = #tpu.dot_dimension_numbers<[1], [0], [0], [1], [0, 0, 1, 1], [], []>} : vector<256x64xbf16>, vector<64x128xbf16>, vector<256x128xf32> -> vector<256x128xf32>
    %c0_5 = arith.constant 0 : index
    %c0_6 = arith.constant 0 : index
    %5 = vector.load %arg4[%c0_5, %c0_6] : memref<1x128xf32, #tpu.memory_space<vmem>>, vector<1x128xf32>
    %6 = vector.broadcast %5 : vector<1x128xf32> to vector<256x128xf32>
    %7 = arith.addf %4, %6 : vector<256x128xf32>
    %cst_7 = arith.constant 0.000000e+00 : f32
    %8 = vector.broadcast %cst_7 : f32 to vector<256x128xf32>
    %9 = arith.maximumf %7, %8 : vector<256x128xf32>
    %c0_8 = arith.constant 0 : index
    %c0_9 = arith.constant 0 : index
    %10 = vector.load %arg5[%c0_8, %c0_9] : memref<128x1024xbf16, #tpu.memory_space<vmem>>, vector<128x1024xbf16>
    %11 = arith.truncf %9 : vector<256x128xf32> to vector<256x128xbf16>
    %cst_10 = arith.constant dense<0.000000e+00> : vector<256x1024xf32>
    %12 = tpu.matmul %11, %10, %cst_10 {dimension_numbers = #tpu.dot_dimension_numbers<[1], [0], [0], [1], [0, 0, 1, 1], [], []>} : vector<256x128xbf16>, vector<128x1024xbf16>, vector<256x1024xf32> -> vector<256x1024xf32>
    %c0_11 = arith.constant 0 : index
    %c0_12 = arith.constant 0 : index
    %13 = vector.load %arg6[%c0_11, %c0_12] : memref<1x1024xf32, #tpu.memory_space<vmem>>, vector<1x1024xf32>
    %14 = vector.broadcast %13 : vector<1x1024xf32> to vector<256x1024xf32>
    %15 = arith.addf %12, %14 : vector<256x1024xf32>
    %16 = vector.shape_cast %15 : vector<256x1024xf32> to vector<32x8x1024xf32>
    %cst_13 = arith.constant dense<0xFF800000> : vector<8x1024xf32>
    %17 = vector.multi_reduction <maximumf>, %16, %cst_13 [0] : vector<32x8x1024xf32> to vector<8x1024xf32>
    %c0_i32 = arith.constant 0 : i32
    %18 = arith.cmpi eq, %arg1, %c0_i32 : i32
    %19 = arith.extui %18 : i1 to i32
    %c0_i32_14 = arith.constant 0 : i32
    %20 = arith.cmpi ne, %19, %c0_i32_14 : i32
    scf.if %20 {
      %c0_19 = arith.constant 0 : index
      %c0_20 = arith.constant 0 : index
      %27 = vector.load %arg8[%c0_19, %c0_20] : memref<8x1024xf32, #tpu.memory_space<vmem>>, vector<8x1024xf32>
      tpu.vector_store %arg8[%c0_19, %c0_20], %17 {strides = array<i32>} : memref<8x1024xf32, #tpu.memory_space<vmem>>, vector<8x1024xf32>,
    } else {
    }
    %c0_i32_15 = arith.constant 0 : i32
    %21 = arith.cmpi ne, %arg1, %c0_i32_15 : i32
    %22 = arith.extui %21 : i1 to i32
    %c0_i32_16 = arith.constant 0 : i32
    %23 = arith.cmpi ne, %22, %c0_i32_16 : i32
    scf.if %23 {
      %c0_19 = arith.constant 0 : index
      %c0_20 = arith.constant 0 : index
      %27 = vector.load %arg8[%c0_19, %c0_20] : memref<8x1024xf32, #tpu.memory_space<vmem>>, vector<8x1024xf32>
      %28 = arith.maximumf %27, %17 : vector<8x1024xf32>
      %c0_21 = arith.constant 0 : index
      %c0_22 = arith.constant 0 : index
      %29 = vector.load %arg8[%c0_21, %c0_22] : memref<8x1024xf32, #tpu.memory_space<vmem>>, vector<8x1024xf32>
      tpu.vector_store %arg8[%c0_21, %c0_22], %28 {strides = array<i32>} : memref<8x1024xf32, #tpu.memory_space<vmem>>, vector<8x1024xf32>,
    } else {
    }
    %c0_i32_17 = arith.constant 0 : i32
    %24 = arith.cmpi eq, %arg1, %c0_i32_17 : i32
    %25 = arith.extui %24 : i1 to i32
    %c0_i32_18 = arith.constant 0 : i32
    %26 = arith.cmpi ne, %25, %c0_i32_18 : i32
    scf.if %26 {
      %c0_19 = arith.constant 0 : index
      %c0_20 = arith.constant 0 : index
      %27 = vector.load %arg8[%c0_19, %c0_20] : memref<8x1024xf32, #tpu.memory_space<vmem>>, vector<8x1024xf32>
      %cst_21 = arith.constant dense<0xFF800000> : vector<1024xf32>
      %28 = vector.multi_reduction <maximumf>, %27, %cst_21 [0] : vector<8x1024xf32> to vector<1024xf32>
      %29 = vector.shape_cast %28 : vector<1024xf32> to vector<1x1024xf32>
      %c0_22 = arith.constant 0 : index
      %c0_23 = arith.constant 0 : index
      %c0_24 = arith.constant 0 : index
      %30 = vector.load %arg7[%c0_22, %c0_23, %c0_24] : memref<1x1x1024xf32, #tpu.memory_space<vmem>>, vector<1x1x1024xf32>
      %31 = vector.shape_cast %30 : vector<1x1x1024xf32> to vector<1x1024xf32>
      %32 = vector.shape_cast %29 : vector<1x1024xf32> to vector<1x1x1024xf32>
      tpu.vector_store %arg7[%c0_22, %c0_23, %c0_24], %32 {strides = array<i32>} : memref<1x1x1024xf32, #tpu.memory_space<vmem>>, vector<1x1x1024xf32>,
    } else {
    }
    return
  }
  func.func @transform_0(%arg0: i32, %arg1: i32) -> (i32, i32, i32) {
    %c0_i32 = arith.constant 0 : i32
    %c0_i32_0 = arith.constant 0 : i32
    return %arg0, %arg1, %c0_i32 : i32, i32, i32
  }
  func.func @transform_1(%arg0: i32, %arg1: i32) -> (i32, i32, i32) {
    %c0_i32 = arith.constant 0 : i32
    %c0_i32_0 = arith.constant 0 : i32
    %c0_i32_1 = arith.constant 0 : i32
    return %arg0, %c0_i32, %c0_i32_0 : i32, i32, i32
  }
  func.func @transform_2(%arg0: i32, %arg1: i32) -> (i32, i32) {
    %c0_i32 = arith.constant 0 : i32
    %c0_i32_0 = arith.constant 0 : i32
    %c0_i32_1 = arith.constant 0 : i32
    return %c0_i32, %c0_i32_0 : i32, i32
  }
  func.func @transform_3(%arg0: i32, %arg1: i32) -> (i32, i32) {
    %c0_i32 = arith.constant 0 : i32
    %c0_i32_0 = arith.constant 0 : i32
    %c0_i32_1 = arith.constant 0 : i32
    return %c0_i32, %c0_i32_0 : i32, i32
  }
  func.func @transform_4(%arg0: i32, %arg1: i32) -> (i32, i32) {
    %c0_i32 = arith.constant 0 : i32
    %c0_i32_0 = arith.constant 0 : i32
    %c0_i32_1 = arith.constant 0 : i32
    return %c0_i32, %c0_i32_0 : i32, i32
  }
  func.func @transform_5(%arg0: i32, %arg1: i32) -> (i32, i32, i32) {
    %c0_i32 = arith.constant 0 : i32
    %c0_i32_0 = arith.constant 0 : i32
    %c0_i32_1 = arith.constant 0 : i32
    return %arg0, %c0_i32, %c0_i32_0 : i32, i32, i32
  }
}

</mosaic_0001>

<bundles_post_ra>
// kernel: pointnet_cls_forward.4
= control target key start
LH: loop header
LB: loop body
LE: loop exit
PB: predicated region body
PF: predicated region fallthrough
CT: control target
= control target key end

     0   :  { %12 = vsyncpa [#allocation4], 0  ;;  %s4613_s0 = inlined_call_operand.vmem [shape: bf16[2,256,8], index: 0, kind: input, shape index: {}]   ;;  %s4614_s1 = inlined_call_operand.hbm [shape: bf16[8,64], index: 1, kind: input, shape index: {}]   ;;  %s4615_s2 = inlined_call_operand.hbm [shape: f32[1,64], index: 2, kind: input, shape index: {}]   ;;  %s4616_s3 = inlined_call_operand.hbm [shape: bf16[64,128], index: 3, kind: input, shape index: {}]   ;;  %s4617_s4 = inlined_call_operand.hbm [shape: f32[1,128], index: 4, kind: input, shape index: {}]   ;;  %s4618_s5 = inlined_call_operand.hbm [shape: bf16[128,1024], index: 5, kind: input, shape index: {}]   ;;  %s4619_s6 = inlined_call_operand.hbm [shape: f32[1,1024], index: 6, kind: input, shape index: {}]   ;;  %s4620_s7 = inlined_call_operand.vmem [shape: f32[2,1,1024], index: 7, kind: output, shape index: {}]  }
   0x1   :  { %13 = vsyncpa [#allocation6], 0 }
   0x2   :  { %14 = vsyncpa [#allocation9], 0 }
   0x3   :  { %15 = vsyncpa [#allocation12], 0  ;;  %s3666_s24 = smov 0   ;;  %s3668_s25 = smov 0  }
   0x4   :  { %s3670_s26 = smov 0  }
   0x5 LB: > { %s3614_s27 = smov [#allocation5]   ;;  %s3053_s29 = sadd.s32 4294967295, %s3612_s26   ;;  %s3612_s26 = sphi %s3670_s26, %s21_s26   ;;  %s3608_s25 = sphi %s3668_s25, %s4633_s25   ;;  %s3604_s24 = sphi %s3666_s24, %s4632_s24  }
   0x6   : > { %s242_s28 = sshll.u32 %s3614_s27, 4  ;;  %p3055_p0 = scmp.ge.s32.totalorder %s3612_s26, 1  ;;  %s243_s28 = int_to_ptr.vmem [resolvable:$true] %s242_s28 }
   0x7   : > { %p218_p1 = scmp.lt.s32.totalorder %s3612_s26, 3  ;;  %p3684_p2 = scmp.eq.s32.totalorder %s3053_s29, 0 }
   0x8   : > { %s3615_s9 = smov [#allocation8]   ;;  %s33_s12 = sadd.s32 1, %s3608_s25 }
   0x9   : > { %s4624_s30 = scalar_select %p3684_p2, 1, 0 }
   0xa   : > { %p3688_p3 = pnand %p3055_p0, %p218_p1  ;;  %s266_s10 = sshll.u32 %s3615_s9, 4  ;;  %s267_s10 = int_to_ptr.vmem [resolvable:$true] %s266_s10 }
   0xb   : > { %p3701_p6 = scmp.ge.s32.totalorder %s33_s12, 2  ;;  %s3429_s15 = scalar_lea.vmem %s243_s28, 16 }
   0xc   : > { %s4625_s8 = scalar_select %p3688_p3, 1, 0 }
   0xd   : > { %p3330_p4 = pneg %p3688_p3  ;;  %p3430_p8 = scmp.ne.s32.totalorder %s243_s28, %s3429_s15 }
   0xe   : > { %s4627_s13 = scalar_select %p3701_p6, 1, 0 }
   0xf   : > { %p3696_p5 = pnand %p3684_p2, %p3330_p4  ;;  %s3436_s16 = scalar_lea.vmem %s243_s28, 32 }
  0x10   : > { %p3437_p11 = scmp.lt.s32.totalorder %s243_s28, %s243_s28  ;;  %p3438_p12 = scmp.lt.s32.totalorder %s3436_s16, %s3429_s15 }
  0x11   : > { %p3707_p7 = pneg %p3696_p5 }
  0x12   : > { %p3439_p13 = por %p3438_p12, %p3437_p11 }
  0x13   : > { %p3432_p9 = pnand %p3430_p8, %p3707_p7 }
  0x15   : > { %p3433_p10 = pneg %p3432_p9 }
  0x17   : > { %p3440_p0 = pnand %p3439_p13, %p3433_p10 }
  0x19   : > { %3443 = shalt.err (!%p3440_p0)
}
  0x1a   : > { %3336 = dma.hbm_to_vmem [thread:$0]  (!%p3696_p5), %s4615_s2, 16, %s243_s28, [#allocation6]  }
  0x1b   : > { %s3455_s19 = scalar_lea.vmem %s267_s10, 16  ;;  %s3462_s20 = scalar_lea.vmem %s267_s10, 32 }
  0x1c   : > { %p3456_p1 = scmp.ne.s32.totalorder %s267_s10, %s3455_s19  ;;  %p3463_p8 = scmp.lt.s32.totalorder %s267_s10, %s267_s10 }
  0x1d   : > { %p3464_p9 = scmp.lt.s32.totalorder %s3462_s20, %s3455_s19 }
  0x1e   : > { %p3458_p4 = pnand %p3456_p1, %p3707_p7 }
  0x1f   : > { %p3465_p3 = por %p3464_p9, %p3463_p8 }
  0x20   : > { %p3459_p2 = pneg %p3458_p4 }
  0x22   : > { %p3466_p6 = pnand %p3465_p3, %p3459_p2 }
  0x24   : > { %3469 = shalt.err (!%p3466_p6)
}
  0x25   : > { %3342 = dma.hbm_to_vmem [thread:$0]  (!%p3696_p5), %s4617_s4, 16, %s267_s10, [#allocation9]  }
  0x26   : > { %p4629_p10 = scmp.ne.s32.totalorder %s4627_s13, 0  ;;  %s3616_s23 = smov [#allocation3]  }
  0x27   : > { %s231_s27 = sshll.u32 %s3616_s23, 4  ;;  %s3617_s28 = smov [#allocation7]   ;;  %s232_s27 = int_to_ptr.vmem [resolvable:$true] %s231_s27 }
  0x28   : > { %s4635_s12 = smov (%p4629_p10, %s33_s12), 0  ;;  %s252_s29 = sshll.u32 %s3617_s28, 4  ;;  %s253_s29 = int_to_ptr.vmem [resolvable:$true] %s252_s29 }
  0x29   : > { %s3481_s9 = scalar_lea.vmem %s232_s27, 64  ;;  %p3489_p6 = scmp.lt.s32.totalorder %s232_s27, %s232_s27 }
  0x2a   : > { %p3482_p11 = scmp.ne.s32.totalorder %s232_s27, %s3481_s9  ;;  %p3490_p12 = scmp.lt.s32.totalorder %s3481_s9, %s3481_s9 }
  0x2c   : > { %p3484_p2 = pnand %p3482_p11, %p3707_p7  ;;  %p3491_p13 = por %p3490_p12, %p3489_p6 }
  0x2e   : > { %p3485_p3 = pneg %p3484_p2 }
  0x30   : > { %p3492_p0 = pnand %p3491_p13, %p3485_p3 }
  0x32   : > { %3495 = shalt.err (!%p3492_p0)
}
  0x33   : > { %3333 = dma.hbm_to_vmem [thread:$0]  (!%p3696_p5), %s4614_s1, 64, %s232_s27, [#allocation4]  }
  0x34   : > { %s3507_s15 = scalar_lea.vmem %s253_s29, 512  ;;  %p3515_p9 = scmp.lt.s32.totalorder %s253_s29, %s253_s29 }
  0x35   : > { %p3508_p1 = scmp.ne.s32.totalorder %s253_s29, %s3507_s15  ;;  %p3516_p10 = scmp.lt.s32.totalorder %s3507_s15, %s3507_s15 }
  0x37   : > { %p3510_p4 = pnand %p3508_p1, %p3707_p7  ;;  %p3517_p11 = por %p3516_p10, %p3515_p9 }
  0x39   : > { %p3511_p8 = pneg %p3510_p4 }
  0x3b   : > { %p3518_p2 = pnand %p3517_p11, %p3511_p8 }
  0x3d   : > { %3521 = shalt.err (!%p3518_p2)
}
  0x3e   : > { %s3618_s16 = smov 64   ;;  %s3619_s17 = smov 4  }
  0x3f   : > { %3339 = dma.hbm_to_vmem [thread:$0]  (!%p3696_p5), %s4616_s3, 512, %s253_s29, [#allocation6], %s3618_s16, %s3618_s16, %s3619_s17  }
  0x40   : > { %s3620_s20 = smov [#allocation10]  }
  0x41   : > { %s276_s21 = sshll.u32 %s3620_s20, 4  ;;  %s277_s21 = int_to_ptr.vmem [resolvable:$true] %s276_s21 }
  0x42   : > { %s3533_s22 = scalar_lea.vmem %s277_s21, 8192  ;;  %p3541_p13 = scmp.lt.s32.totalorder %s277_s21, %s277_s21 }
  0x43   : > { %p3534_p3 = scmp.ne.s32.totalorder %s277_s21, %s3533_s22  ;;  %p3542_p0 = scmp.lt.s32.totalorder %s3533_s22, %s3533_s22 }
  0x45   : > { %p3536_p6 = pnand %p3534_p3, %p3707_p7  ;;  %p3543_p1 = por %p3542_p0, %p3541_p13 }
  0x47   : > { %p3537_p12 = pneg %p3536_p6 }
  0x49   : > { %p3544_p4 = pnand %p3543_p1, %p3537_p12 }
  0x4b   : > { %3547 = shalt.err (!%p3544_p4)
}
  0x4c   : > { %s3621_s23 = smov 512   ;;  %s3622_s27 = smov 32  }
  0x4d   : > { %3345 = dma.hbm_to_vmem [thread:$0]  (!%p3696_p5), %s4618_s5, 8192, %s277_s21, [#allocation9], %s3621_s23, %s3621_s23, %s3622_s27  }
  0x4e   : > { %s3623_s9 = smov [#allocation11]  }
  0x4f   : > { %s290_s10 = sshll.u32 %s3623_s9, 4  ;;  %s291_s10 = int_to_ptr.vmem [resolvable:$true] %s290_s10 }
  0x50   : > { %s3559_s13 = scalar_lea.vmem %s291_s10, 128  ;;  %p3567_p11 = scmp.lt.s32.totalorder %s291_s10, %s291_s10 }
  0x51   : > { %p3560_p8 = scmp.ne.s32.totalorder %s291_s10, %s3559_s13  ;;  %p3568_p2 = scmp.lt.s32.totalorder %s3559_s13, %s3559_s13 }
  0x53   : > { %p3562_p9 = pnand %p3560_p8, %p3707_p7  ;;  %p3569_p3 = por %p3568_p2, %p3567_p11 }
  0x55   : > { %p3563_p10 = pneg %p3562_p9 }
  0x57   : > { %p3570_p6 = pnand %p3569_p3, %p3563_p10 }
  0x59   : > { %3573 = shalt.err (!%p3570_p6)
}
  0x5a   : > { %3348 = dma.hbm_to_vmem [thread:$0]  (!%p3696_p5), %s4619_s6, 128, %s291_s10, [#allocation12]  }
  0x5b   : > { %p4630_p12 = scmp.ne.s32.totalorder %s4625_s8, 0 }
  0x5c   : > { %p4631_p13 = scmp.ne.s32.totalorder (!%p4630_p12), %s4624_s30, 0 }
  0x5d   : > { %316 = sbr.rel (%p4630_p12) target bundleno = 999 (0x3e7), region = 48 }
  0x62   : > { %3587 = dma.done.wait (%p4631_p13), [#allocation4], 64  }
  0x63   : > { %3589 = vsyncadd (%p4631_p13), [#allocation4], 4294967232 }
  0x64   : > { %3591 = dma.done.wait (%p4631_p13), [#allocation6], 528  }
  0x65   : > { %3593 = vsyncadd (%p4631_p13), [#allocation6], 4294966768 }
  0x66   : > { %3595 = dma.done.wait (%p4631_p13), [#allocation9], 8208  }
  0x67   : > { %3597 = vsyncadd (%p4631_p13), [#allocation9], 4294959088 }
  0x68   : > { %3599 = dma.done.wait (%p4631_p13), [#allocation12], 128  }
  0x69   : > { %3601 = vsyncadd (%p4631_p13), [#allocation12], 4294967168  ;;  %p372_p5 = scmp.lt.s32.totalorder %s3604_s24, 1  ;;  %vm555_vm0 = vcmask 1043456   ;;  %vm506_vm1 = vcmask 64512   ;;  %v3413_v9 = vld [vmem:[#allocation7 + $0x18] sm:$0xff]  }
  0x6a   : > { %v418_v0 = vld [vmem:[#allocation3] sm:$0xf]  ;;  %3265 = vmatprep.subr.bf16.mxu1 %v3413_v9  ;;  %v3414_v19 = vld [vmem:[#allocation7 + $0x10] sm:$0xff]   ;;  %v3415_v20 = vld [vmem:[#allocation7 + $0x8] sm:$0xff]   ;;  %vm807_vm2 = vcmask 523264  }
  0x6b   : > { %s4637_s24 = smov (!%p372_p5, %s3604_s24), 1  ;;  %3305 = vmatprep.subr.msk.bf16.mxu0 %vm555_vm0, %v418_v0  ;;  %v557_v1 = vsel %vm555_vm0, %v418_v0, 0  ;;  %3266 = vmatpush3.bf16.msra.mxu1 %v3413_v9  ;;  %v3416_v21 = vld [vmem:[#allocation7] sm:$0xff]   ;;  %v3817_v24 = vld [vmem:[#allocation10 + $0x1c8] sm:$0xff]  ;;  %v3825_v56 = vld [vmem:[#allocation5] ss:$0 sm:$0xff] }
  0x6c   : > { %s3193_s8 = sshll.u32 %s4637_s24, 7  ;;  %3232 = vmatpush3.bf16.msra.mxu0 %v557_v1  ;;  %3267 = vmatprep.subr.bf16.mxu1 %v3414_v19  ;;  %v1105_v22 = vld [vmem:[#allocation10 + $0x1c0] sm:$0xff]  ;;  %v3819_v27 = vld [vmem:[#allocation10 + $0x1e8] sm:$0xff]  ;;  %s3072_s30 = sshll.u32 %s4637_s24, 3 }
  0x6d   : > { %s3783_s17 = scalar_lea.vmem %s4613_s0, %s3193_s8  ;;  %v1109_v23 = vld [vmem:[#allocation10 + $0x1e0] sm:$0xff]  ;;  %v3185_v30 = vcombine.low %v3817_v24, %v3819_v27  ;;  %v3186_v31 = vcombine.high %v3817_v24, %v3819_v27  ;;  %s384_s20 = scalar_lea.vmem %s4620_s7, %s3072_s30 }
  0x6e   : > { %v3397_v2 = vld [vmem:[%s3783_s17] sm:$0xff]   ;;  %v3398_v3 = vld [vmem:[%s3783_s17 + $0x8] sm:$0xff]   ;;  %v3399_v4 = vld [vmem:[%s3783_s17 + $0x10] sm:$0xff]   ;;  %v3183_v25 = vcombine.low %v1105_v22, %v1109_v23  ;;  %v3184_v26 = vcombine.high %v1105_v22, %v1109_v23 }
  0x6f   : > { %3233 = vmatprep.mubr.msk.bf16.mxu0 %vm506_vm1, %v3397_v2  ;;  %v3400_v5 = vld [vmem:[%s3783_s17 + $0x18] sm:$0xff]   ;;  %v3401_v6 = vld [vmem:[%s3783_s17 + $0x20] sm:$0xff]   ;;  %v3402_v7 = vld [vmem:[%s3783_s17 + $0x28] sm:$0xff]   ;;  %3268 = vmatpush3.bf16.msra.mxu1 %v3414_v19 }
  0x70   : > { %3234 = vmatmul.mubr.msk.bf16.vlgmr.msra.gmra.mxu0 %vm506_vm1, %v3398_v3  ;;  %v3403_v8 = vld [vmem:[%s3783_s17 + $0x30] sm:$0xff]   ;;  %v3404_v10 = vld [vmem:[%s3783_s17 + $0x38] sm:$0xff]   ;;  %v3405_v11 = vld [vmem:[%s3783_s17 + $0x40] sm:$0xff]   ;;  %3269 = vmatprep.subr.bf16.mxu1 %v3415_v20 }
  0x71   : > { %3237 = vmatprep.mubr.msk.bf16.mxu0 %vm506_vm1, %v3399_v4  ;;  %v3406_v12 = vld [vmem:[%s3783_s17 + $0x48] sm:$0xff]   ;;  %v3407_v13 = vld [vmem:[%s3783_s17 + $0x50] sm:$0xff]   ;;  %v3408_v14 = vld [vmem:[%s3783_s17 + $0x58] sm:$0xff]   ;;  %1491 = vmatprep.subr.bf16.mxu0 %v3184_v26 }
  0x72   : > { %v3409_v15 = vld [vmem:[%s3783_s17 + $0x60] sm:$0xff]   ;;  %v3410_v16 = vld [vmem:[%s3783_s17 + $0x68] sm:$0xff]   ;;  %v3411_v17 = vld [vmem:[%s3783_s17 + $0x70] sm:$0xff]   ;;  %1492 = vmatpush1.bf16.msra.mxu0 %v3183_v25 }
  0x73   : > { %v3412_v18 = vld [vmem:[%s3783_s17 + $0x78] sm:$0xff]   ;;  %3270 = vmatpush3.bf16.msra.mxu1 %v3415_v20  ;;  %v1097_v28 = vld [vmem:[#allocation10 + $0x180] sm:$0xff]  ;;  %v1098_v3 = vld [vmem:[#allocation10 + $0x188] sm:$0xff] }
  0x74   : > { %3271 = vmatprep.subr.bf16.mxu1 %v3416_v21  ;;  %v1101_v29 = vld [vmem:[#allocation10 + $0x1a0] sm:$0xff]  ;;  %v1102_v4 = vld [vmem:[#allocation10 + $0x1a8] sm:$0xff] }
  0x75   : > { %v3176_v32 = vcombine.high %v1097_v28, %v1101_v29  ;;  %v1089_v33 = vld [vmem:[#allocation10 + $0x140] sm:$0xff]  ;;  %v3175_v35 = vcombine.low %v1097_v28, %v1101_v29  ;;  %v1082_v26 = vld [vmem:[#allocation10 + $0x108] sm:$0xff] }
  0x76   : > { %v1093_v34 = vld [vmem:[#allocation10 + $0x160] sm:$0xff]  ;;  %v1086_v28 = vld [vmem:[#allocation10 + $0x128] sm:$0xff] }
  0x77   : > { %3272 = vmatpush3.bf16.msra.mxu1 %v3416_v21  ;;  %1493 = vmatprep.subr.bf16.mxu0 %v3176_v32  ;;  %v3168_v36 = vcombine.high %v1089_v33, %v1093_v34  ;;  %v1081_v37 = vld [vmem:[#allocation10 + $0x100] sm:$0xff]  ;;  %v3167_v39 = vcombine.low %v1089_v33, %v1093_v34  ;;  %v3177_v21 = vcombine.low %v1098_v3, %v1102_v4 }
  0x78   : > { %3238 = vmatmul.mubr.msk.bf16.gmra.mxu0 %vm506_vm1, %v3400_v5  ;;  %1684 = vmatprep.subr.bf16.mxu1 %v3186_v31  ;;  %v1085_v38 = vld [vmem:[#allocation10 + $0x120] sm:$0xff]  ;;  %v3162_v24 = vcombine.high %v1082_v26, %v1086_v28 }
  0x79   : > { %3241 = vmatprep.mubr.msk.bf16.mxu0 %vm506_vm1, %v3401_v6  ;;  %1494 = vmatpush1.bf16.msra.mxu0 %v3175_v35  ;;  %v3160_v40 = vcombine.high %v1081_v37, %v1085_v38  ;;  %v1073_v41 = vld [vmem:[#allocation10 + $0xc0] sm:$0xff]  ;;  %v3159_v43 = vcombine.low %v1081_v37, %v1085_v38  ;;  %v1078_v37 = vld [vmem:[#allocation10 + $0xe8] sm:$0xff] }
  0x7a   : > { %1495 = vmatprep.subr.bf16.mxu0 %v3168_v36  ;;  %v1077_v42 = vld [vmem:[#allocation10 + $0xe0] sm:$0xff] }
  0x7b   : > { %v3152_v44 = vcombine.high %v1073_v41, %v1077_v42  ;;  %v1065_v45 = vld [vmem:[#allocation10 + $0x80] sm:$0xff]  ;;  %v3151_v47 = vcombine.low %v1073_v41, %v1077_v42 }
  0x7c   : > { %v1069_v46 = vld [vmem:[#allocation10 + $0xa0] sm:$0xff] }
  0x7d   : > { %1496 = vmatpush1.bf16.msra.mxu0 %v3167_v39  ;;  %v3144_v48 = vcombine.high %v1065_v45, %v1069_v46  ;;  %v1057_v49 = vld [vmem:[#allocation10 + $0x40] sm:$0xff]  ;;  %v3143_v51 = vcombine.low %v1065_v45, %v1069_v46 }
  0x7e   : > { %1497 = vmatprep.subr.bf16.mxu0 %v3160_v40  ;;  %v1061_v50 = vld [vmem:[#allocation10 + $0x60] sm:$0xff] }
  0x7f   : > { %v3136_v52 = vcombine.high %v1057_v49, %v1061_v50  ;;  %v3135_v53 = vcombine.low %v1057_v49, %v1061_v50 }
  0x80   : > { %3242 = vmatmul.mubr.msk.bf16.gmra.mxu0 %vm506_vm1, %v3402_v7 }
  0x81   : > { %3245 = vmatprep.mubr.msk.bf16.mxu0 %vm506_vm1, %v3403_v8  ;;  %1498 = vmatpush1.bf16.msra.mxu0 %v3159_v43  ;;  %v3161_v43 = vcombine.low %v1082_v26, %v1086_v28 }
  0x82   : > { %1499 = vmatprep.subr.bf16.mxu0 %v3152_v44 }
  0x85   : > { %1500 = vmatpush1.bf16.msra.mxu0 %v3151_v47  ;;  %v1066_v47 = vld [vmem:[#allocation10 + $0x88] sm:$0xff] }
  0x86   : > { %1501 = vmatprep.subr.bf16.mxu0 %v3144_v48  ;;  %v1070_v48 = vld [vmem:[#allocation10 + $0xa8] sm:$0xff] }
  0x88   : > { %3246 = vmatmul.mubr.msk.bf16.gmra.mxu0 %vm506_vm1, %v3404_v10 }
  0x89   : > { %3249 = vmatprep.mubr.msk.bf16.mxu0 %vm506_vm1, %v3405_v11  ;;  %1502 = vmatpush1.bf16.msra.mxu0 %v3143_v51 }
  0x8a   : > { %1503 = vmatprep.subr.bf16.mxu0 %v3136_v52 }
  0x8d   : > { %1504 = vmatpush1.bf16.msra.mxu0 %v3135_v53 }
  0x90   : > { %3250 = vmatmul.mubr.msk.bf16.gmra.mxu0 %vm506_vm1, %v3406_v12  ;;  %v3178_v12 = vcombine.high %v1098_v3, %v1102_v4 }
  0x91   : > { %3253 = vmatprep.mubr.msk.bf16.mxu0 %vm506_vm1, %v3407_v13 }
  0x98   : > { %3254 = vmatmul.mubr.msk.bf16.gmra.mxu0 %vm506_vm1, %v3408_v14  ;;  %v1090_v14 = vld [vmem:[#allocation10 + $0x148] sm:$0xff] }
  0x99   : > { %3257 = vmatprep.mubr.msk.bf16.mxu0 %vm506_vm1, %v3409_v15  ;;  %v1094_v15 = vld [vmem:[#allocation10 + $0x168] sm:$0xff] }
  0x9a   : > { %v3170_v23 = vcombine.high %v1090_v14, %v1094_v15  ;;  %v3169_v35 = vcombine.low %v1090_v14, %v1094_v15 }
  0xa0   : > { %3258 = vmatmul.mubr.msk.bf16.gmra.mxu0 %vm506_vm1, %v3410_v16 }
  0xa1   : > { %3261 = vmatprep.mubr.msk.bf16.mxu0 %vm506_vm1, %v3411_v17 }
  0xa8   : > { %3262 = vmatmul.mubr.msk.bf16.gmra.mxu0 %vm506_vm1, %v3412_v18 }
 0x130   : > { %v3235_v54 = vpop.f32.mrf.mxu0 }
 0x131   : > { %v602_v60 = vadd.f32 %v3235_v54, %v3825_v56 }
 0x132   : > { %v593_v55 = vpop.f32.mrf.mxu0 }
 0x133   : > { %v594_v58 = vadd.f32 %v3825_v56, %v593_v55  ;;  %v722_v5 = vmax.f32 %v602_v60, 0.0  ;;  %v1062_v60 = vld [vmem:[#allocation10 + $0x68] sm:$0xff] }
 0x134   : > { %v3236_v57 = vpop.f32.mrf.mxu0 }
 0x135   : > { %v605_v59 = vadd.f32 %v3236_v57, %v3825_v56  ;;  %v720_v1 = vmax.f32 %v594_v58, 0.0  ;;  %v3146_v57 = vcombine.high %v1066_v47, %v1070_v48 }
 0x136   : > { %v596_v61 = vpop.f32.mrf.mxu0 }
 0x137   : > { %v597_v62 = vadd.f32 %v3825_v56, %v596_v61  ;;  %v723_v63 = vmax.f32 %v605_v59, 0.0  ;;  %v1058_v59 = vld [vmem:[#allocation10 + $0x48] sm:$0xff] }
 0x138   : > { %v3239_v0 = vpop.f32.mrf.mxu0  ;;  %v3138_v4 = vcombine.high %v1058_v59, %v1062_v60 }
 0x139   : > { %v721_v2 = vmax.f32 %v597_v62, 0.0  ;;  %v618_v6 = vadd.f32 %v3239_v0, %v3825_v56  ;;  %v761_v10 = vpack.c.bf16 %v723_v63, %v722_v5 }
 0x13a   : > { %v609_v7 = vpop.f32.mrf.mxu0 }
 0x13b   : > { %v610_v8 = vadd.f32 %v3825_v56, %v609_v7  ;;  %v760_v9 = vpack.c.bf16 %v721_v2, %v720_v1  ;;  %v726_v16 = vmax.f32 %v618_v6, 0.0  ;;  %v3145_v2 = vcombine.low %v1066_v47, %v1070_v48 }
 0x13c   : > { %v3240_v11 = vpop.f32.mrf.mxu0 }
 0x13d   : > { %v621_v13 = vadd.f32 %v3240_v11, %v3825_v56  ;;  %3273 = vmatprep.mubr.msk.bf16.mxu1 %vm807_vm2, %v760_v9  ;;  %v724_v18 = vmax.f32 %v610_v8, 0.0  ;;  %v3137_v11 = vcombine.low %v1058_v59, %v1062_v60 }
 0x13e   : > { %v612_v17 = vpop.f32.mrf.mxu0  ;;  %3274 = vmatmul.mubr.msk.bf16.vlgmr.msra.gmra.mxu1 %vm807_vm2, %v761_v10 }
 0x13f   : > { %v727_v19 = vmax.f32 %v621_v13, 0.0  ;;  %v613_v20 = vadd.f32 %v3825_v56, %v612_v17  ;;  %1685 = vmatpush1.bf16.msra.mxu1 %v3185_v30  ;;  %v1074_v30 = vld [vmem:[#allocation10 + $0xc8] sm:$0xff] }
 0x140   : > { %v3243_v22 = vpop.f32.mrf.mxu0  ;;  %1686 = vmatprep.subr.bf16.mxu1 %v3178_v12  ;;  %v3154_v45 = vcombine.high %v1074_v30, %v1078_v37  ;;  %v3153_v54 = vcombine.low %v1074_v30, %v1078_v37 }
 0x141   : > { %v725_v25 = vmax.f32 %v613_v20, 0.0  ;;  %v763_v29 = vpack.c.bf16 %v727_v19, %v726_v16  ;;  %v634_v31 = vadd.f32 %v3243_v22, %v3825_v56 }
 0x142   : > { %v625_v32 = vpop.f32.mrf.mxu0 }
 0x143   : > { %v762_v33 = vpack.c.bf16 %v725_v25, %v724_v18  ;;  %v626_v34 = vadd.f32 %v3825_v56, %v625_v32  ;;  %1687 = vmatpush1.bf16.msra.mxu1 %v3177_v21  ;;  %v730_v38 = vmax.f32 %v634_v31, 0.0 }
 0x144   : > { %v3244_v36 = vpop.f32.mrf.mxu0  ;;  %1688 = vmatprep.subr.bf16.mxu1 %v3170_v23 }
 0x145   : > { %3277 = vmatprep.mubr.msk.bf16.mxu1 %vm807_vm2, %v762_v33  ;;  %v637_v27 = vadd.f32 %v3244_v36, %v3825_v56  ;;  %v728_v40 = vmax.f32 %v626_v34, 0.0 }
 0x146   : > { %3278 = vmatmul.mubr.msk.bf16.gmra.mxu1 %vm807_vm2, %v763_v29  ;;  %v628_v39 = vpop.f32.mrf.mxu0 }
 0x147   : > { %v731_v41 = vmax.f32 %v637_v27, 0.0  ;;  %v629_v42 = vadd.f32 %v3825_v56, %v628_v39  ;;  %1689 = vmatpush1.bf16.msra.mxu1 %v3169_v35 }
 0x148   : > { %v3247_v44 = vpop.f32.mrf.mxu0  ;;  %1690 = vmatprep.subr.bf16.mxu1 %v3162_v24 }
 0x149   : > { %v729_v46 = vmax.f32 %v629_v42, 0.0  ;;  %v765_v49 = vpack.c.bf16 %v731_v41, %v730_v38  ;;  %v650_v50 = vadd.f32 %v3247_v44, %v3825_v56 }
 0x14a   : > { %v641_v51 = vpop.f32.mrf.mxu0 }
 0x14b   : > { %v764_v52 = vpack.c.bf16 %v729_v46, %v728_v40  ;;  %v642_v53 = vadd.f32 %v3825_v56, %v641_v51  ;;  %1691 = vmatpush1.bf16.msra.mxu1 %v3161_v43  ;;  %v734_v61 = vmax.f32 %v650_v50, 0.0 }
 0x14c   : > { %v3248_v55 = vpop.f32.mrf.mxu0  ;;  %1692 = vmatprep.subr.bf16.mxu1 %v3154_v45 }
 0x14d   : > { %3281 = vmatprep.mubr.msk.bf16.mxu1 %vm807_vm2, %v764_v52  ;;  %v653_v58 = vadd.f32 %v3248_v55, %v3825_v56  ;;  %v732_v63 = vmax.f32 %v642_v53, 0.0 }
 0x14e   : > { %3282 = vmatmul.mubr.msk.bf16.gmra.mxu1 %vm807_vm2, %v765_v49  ;;  %v644_v62 = vpop.f32.mrf.mxu0 }
 0x14f   : > { %v735_v0 = vmax.f32 %v653_v58, 0.0  ;;  %v645_v1 = vadd.f32 %v3825_v56, %v644_v62  ;;  %1693 = vmatpush1.bf16.msra.mxu1 %v3153_v54 }
 0x150   : > { %v3251_v3 = vpop.f32.mrf.mxu0  ;;  %1694 = vmatprep.subr.bf16.mxu1 %v3146_v57 }
 0x151   : > { %v733_v5 = vmax.f32 %v645_v1, 0.0  ;;  %v767_v6 = vpack.c.bf16 %v735_v0, %v734_v61  ;;  %v666_v7 = vadd.f32 %v3251_v3, %v3825_v56  ;;  %v1049_v1 = vld [vmem:[#allocation10] sm:$0xff]  ;;  %v1050_v3 = vld [vmem:[#allocation10 + $0x8] sm:$0xff] }
 0x152   : > { %v657_v8 = vpop.f32.mrf.mxu0 }
 0x153   : > { %v766_v9 = vpack.c.bf16 %v733_v5, %v732_v63  ;;  %v658_v10 = vadd.f32 %v3825_v56, %v657_v8  ;;  %1695 = vmatpush1.bf16.msra.mxu1 %v3145_v2  ;;  %v738_v14 = vmax.f32 %v666_v7, 0.0  ;;  %v1053_v2 = vld [vmem:[#allocation10 + $0x20] sm:$0xff]  ;;  %v1054_v5 = vld [vmem:[#allocation10 + $0x28] sm:$0xff] }
 0x154   : > { %v3252_v12 = vpop.f32.mrf.mxu0  ;;  %1696 = vmatprep.subr.bf16.mxu1 %v3138_v4  ;;  %v3128_v4 = vcombine.high %v1049_v1, %v1053_v2  ;;  %v3129_v7 = vcombine.low %v1050_v3, %v1054_v5  ;;  %v3130_v8 = vcombine.high %v1050_v3, %v1054_v5 }
 0x155   : > { %3285 = vmatprep.mubr.msk.bf16.mxu1 %vm807_vm2, %v766_v9  ;;  %v669_v13 = vadd.f32 %v3252_v12, %v3825_v56  ;;  %v736_v16 = vmax.f32 %v658_v10, 0.0  ;;  %v1107_v9 = vld [vmem:[#allocation10 + $0x1d0] sm:$0xff] }
 0x156   : > { %3286 = vmatmul.mubr.msk.bf16.gmra.mxu1 %vm807_vm2, %v767_v6  ;;  %v660_v15 = vpop.f32.mrf.mxu0  ;;  %v3127_v6 = vcombine.low %v1049_v1, %v1053_v2  ;;  %1505 = vmatprep.subr.bf16.mxu0 %v3128_v4  ;;  %v1111_v10 = vld [vmem:[#allocation10 + $0x1f0] sm:$0xff]  ;;  %v1080_v1 = vld [vmem:[#allocation10 + $0xf8] sm:$0xff] }
 0x157   : > { %v739_v17 = vmax.f32 %v669_v13, 0.0  ;;  %v661_v18 = vadd.f32 %v3825_v56, %v660_v15  ;;  %1697 = vmatpush1.bf16.msra.mxu1 %v3137_v11  ;;  %v1108_v11 = vld [vmem:[#allocation10 + $0x1d8] sm:$0xff]  ;;  %v3187_v12 = vcombine.low %v1107_v9, %v1111_v10  ;;  %v3188_v13 = vcombine.high %v1107_v9, %v1111_v10  ;;  %v1071_v10 = vld [vmem:[#allocation10 + $0xb0] sm:$0xff] }
 0x158   : > { %v3255_v19 = vpop.f32.mrf.mxu0  ;;  %1698 = vmatprep.subr.bf16.mxu1 %v3130_v8  ;;  %1506 = vmatpush1.bf16.msra.mxu0 %v3127_v6  ;;  %v1067_v8 = vld [vmem:[#allocation10 + $0x90] sm:$0xff] }
 0x159   : > { %v737_v20 = vmax.f32 %v661_v18, 0.0  ;;  %v769_v21 = vpack.c.bf16 %v739_v17, %v738_v14  ;;  %v682_v22 = vadd.f32 %v3255_v19, %v3825_v56  ;;  %v1112_v14 = vld [vmem:[#allocation10 + $0x1f8] sm:$0xff]  ;;  %1877 = vmatprep.subr.bf16.mxu0 %v3188_v13 }
 0x15a   : > { %v673_v23 = vpop.f32.mrf.mxu0  ;;  %v3189_v15 = vcombine.low %v1108_v11, %v1112_v14  ;;  %v3880_v19 = vld [vmem:[#allocation8] ss:$0 sm:$0xff] }
 0x15b   : > { %v768_v25 = vpack.c.bf16 %v737_v20, %v736_v16  ;;  %v674_v26 = vadd.f32 %v3825_v56, %v673_v23  ;;  %v742_v31 = vmax.f32 %v682_v22, 0.0  ;;  %1699 = vmatpush1.bf16.msra.mxu1 %v3129_v7  ;;  %v3190_v16 = vcombine.high %v1108_v11, %v1112_v14  ;;  %v1068_v11 = vld [vmem:[#allocation10 + $0x98] sm:$0xff] }
 0x15c   : > { %v3256_v28 = vpop.f32.mrf.mxu0 }
 0x15d   : > { %3289 = vmatprep.mubr.msk.bf16.mxu1 %vm807_vm2, %v768_v25  ;;  %v685_v29 = vadd.f32 %v3256_v28, %v3825_v56  ;;  %v740_v33 = vmax.f32 %v674_v26, 0.0  ;;  %2070 = vmatprep.subr.bf16.mxu1 %v3190_v16  ;;  %v1099_v26 = vld [vmem:[#allocation10 + $0x190] sm:$0xff] }
 0x15e   : > { %3290 = vmatmul.mubr.msk.bf16.gmra.mxu1 %vm807_vm2, %v769_v21  ;;  %v676_v32 = vpop.f32.mrf.mxu0 }
 0x15f   : > { %v743_v34 = vmax.f32 %v685_v29, 0.0  ;;  %v677_v35 = vadd.f32 %v3825_v56, %v676_v32  ;;  %v1100_v32 = vld [vmem:[#allocation10 + $0x198] sm:$0xff] }
 0x160   : > { %v3259_v36 = vpop.f32.mrf.mxu0 }
 0x161   : > { %v741_v24 = vmax.f32 %v677_v35, 0.0  ;;  %v771_v27 = vpack.c.bf16 %v743_v34, %v742_v31  ;;  %v698_v30 = vadd.f32 %v3259_v36, %v3825_v56  ;;  %v1103_v31 = vld [vmem:[#allocation10 + $0x1b0] sm:$0xff] }
 0x162   : > { %v689_v37 = vpop.f32.mrf.mxu0 }
 0x163   : > { %v770_v38 = vpack.c.bf16 %v741_v24, %v740_v33  ;;  %v690_v39 = vadd.f32 %v3825_v56, %v689_v37  ;;  %v746_v42 = vmax.f32 %v698_v30, 0.0  ;;  %v1104_v33 = vld [vmem:[#allocation10 + $0x1b8] sm:$0xff]  ;;  %v1091_v24 = vld [vmem:[#allocation10 + $0x150] sm:$0xff]  ;;  %v3180_v30 = vcombine.high %v1099_v26, %v1103_v31 }
 0x164   : > { %v3260_v40 = vpop.f32.mrf.mxu0  ;;  %v3182_v37 = vcombine.high %v1100_v32, %v1104_v33 }
 0x165   : > { %3293 = vmatprep.mubr.msk.bf16.mxu1 %vm807_vm2, %v770_v38  ;;  %v701_v41 = vadd.f32 %v3260_v40, %v3825_v56  ;;  %v744_v44 = vmax.f32 %v690_v39, 0.0  ;;  %v1095_v38 = vld [vmem:[#allocation10 + $0x170] sm:$0xff]  ;;  %v1092_v39 = vld [vmem:[#allocation10 + $0x158] sm:$0xff] }
 0x166   : > { %3294 = vmatmul.mubr.msk.bf16.gmra.mxu1 %vm807_vm2, %v771_v27  ;;  %v692_v43 = vpop.f32.mrf.mxu0  ;;  %v1096_v40 = vld [vmem:[#allocation10 + $0x178] sm:$0xff] }
 0x167   : > { %v747_v45 = vmax.f32 %v701_v41, 0.0  ;;  %v693_v46 = vadd.f32 %v3825_v56, %v692_v43  ;;  %v3181_v43 = vcombine.low %v1100_v32, %v1104_v33 }
 0x168   : > { %v3263_v47 = vpop.f32.mrf.mxu0 }
 0x169   : > { %v745_v48 = vmax.f32 %v693_v46, 0.0  ;;  %v773_v49 = vpack.c.bf16 %v747_v45, %v746_v42  ;;  %v714_v50 = vadd.f32 %v3263_v47, %v3825_v56  ;;  %v3179_v42 = vcombine.low %v1099_v26, %v1103_v31  ;;  %v1060_v26 = vld [vmem:[#allocation10 + $0x58] sm:$0xff] }
 0x16a   : > { %v705_v51 = vpop.f32.mrf.mxu0  ;;  %v3172_v45 = vcombine.high %v1091_v24, %v1095_v38  ;;  %v3174_v46 = vcombine.high %v1092_v39, %v1096_v40  ;;  %v3147_v31 = vcombine.low %v1067_v8, %v1071_v10 }
 0x16b   : > { %v772_v52 = vpack.c.bf16 %v745_v48, %v744_v44  ;;  %v706_v53 = vadd.f32 %v3825_v56, %v705_v51  ;;  %v750_v57 = vmax.f32 %v714_v50, 0.0  ;;  %v1083_v48 = vld [vmem:[#allocation10 + $0x110] sm:$0xff]  ;;  %v1084_v51 = vld [vmem:[#allocation10 + $0x118] sm:$0xff] }
 0x16c   : > { %v3264_v54 = vpop.f32.mrf.mxu0  ;;  %v1087_v50 = vld [vmem:[#allocation10 + $0x130] sm:$0xff] }
 0x16d   : > { %3297 = vmatprep.mubr.msk.bf16.mxu1 %vm807_vm2, %v772_v52  ;;  %v717_v55 = vadd.f32 %v3264_v54, %v3825_v56  ;;  %v748_v59 = vmax.f32 %v706_v53, 0.0  ;;  %v1088_v52 = vld [vmem:[#allocation10 + $0x138] sm:$0xff]  ;;  %v3171_v53 = vcombine.low %v1091_v24, %v1095_v38  ;;  %v3163_v3 = vcombine.low %v1083_v48, %v1087_v50 }
 0x16e   : > { %3298 = vmatmul.mubr.msk.bf16.gmra.mxu1 %vm807_vm2, %v773_v49  ;;  %v708_v58 = vpop.f32.mrf.mxu0  ;;  %v3165_v4 = vcombine.low %v1084_v51, %v1088_v52 }
 0x16f   : > { %v751_v60 = vmax.f32 %v717_v55, 0.0  ;;  %v709_v61 = vadd.f32 %v3825_v56, %v708_v58  ;;  %v3624_v56 = vmov 0  }
 0x170   : > { %1523 = vmatprep.mubr.bf16.mxu0 %v3624_v56 }
 0x171   : > { %v749_v62 = vmax.f32 %v709_v61, 0.0  ;;  %v775_v63 = vpack.c.bf16 %v751_v60, %v750_v57  ;;  %v3173_v57 = vcombine.low %v1092_v39, %v1096_v40  ;;  %v3166_v60 = vcombine.high %v1084_v51, %v1088_v52  ;;  %v1075_v61 = vld [vmem:[#allocation10 + $0xd0] sm:$0xff] }
 0x173   : > { %v774_v0 = vpack.c.bf16 %v749_v62, %v748_v59  ;;  %v3164_v59 = vcombine.high %v1083_v48, %v1087_v50 }
 0x175   : > { %3301 = vmatprep.mubr.msk.bf16.mxu1 %vm807_vm2, %v774_v0  ;;  %v1076_v0 = vld [vmem:[#allocation10 + $0xd8] sm:$0xff] }
 0x176   : > { %3302 = vmatmul.mubr.msk.bf16.gmra.mxu1 %vm807_vm2, %v775_v63  ;;  %v1079_v63 = vld [vmem:[#allocation10 + $0xf0] sm:$0xff]  ;;  %v3158_v7 = vcombine.high %v1076_v0, %v1080_v1  ;;  %v3157_v16 = vcombine.low %v1076_v0, %v1080_v1 }
 0x177   : > { %1716 = vmatprep.mubr.bf16.mxu1 %v3624_v56  ;;  %v3156_v6 = vcombine.high %v1075_v61, %v1079_v63  ;;  %v3155_v13 = vcombine.low %v1075_v61, %v1079_v63 }
 0x1fe   : > { %v3275_v17 = vpop.f32.mrf.mxu1 }
 0x1ff   : > { %v899_v41 = vadd.f32 %v3275_v17, %v3880_v19 }
 0x200   : > { %v890_v18 = vpop.f32.mrf.mxu1 }
 0x201   : > { %v891_v21 = vadd.f32 %v3880_v19, %v890_v18  ;;  %v1019_v49 = vmax.f32 %v899_v41, 0.0  ;;  %v3148_v18 = vcombine.high %v1067_v8, %v1071_v10 }
 0x202   : > { %v3276_v20 = vpop.f32.mrf.mxu1 }
 0x203   : > { %v1017_v28 = vmax.f32 %v891_v21, 0.0  ;;  %v902_v35 = vadd.f32 %v3276_v20, %v3880_v19  ;;  %v1059_v21 = vld [vmem:[#allocation10 + $0x50] sm:$0xff] }
 0x204   : > { %v893_v22 = vpop.f32.mrf.mxu1 }
 0x205   : > { %v894_v23 = vadd.f32 %v3880_v19, %v893_v22  ;;  %v1020_v44 = vmax.f32 %v902_v35, 0.0  ;;  %v1051_v35 = vld [vmem:[#allocation10 + $0x10] sm:$0xff] }
 0x206   : > { %v3884_v25 = vpop.f32.mrf.mxu1 }
 0x207   : > { %v1018_v29 = vmax.f32 %v894_v23, 0.0  ;;  %v3894_v54 = vpack.c.bf16 %v1020_v44, %v1019_v49  ;;  %v915_v22 = vadd.f32 %v3884_v25, %v3880_v19  ;;  %v1063_v23 = vld [vmem:[#allocation10 + $0x70] sm:$0xff] }
 0x208   : > { %v906_v34 = vpop.f32.mrf.mxu1  ;;  %v3140_v25 = vcombine.high %v1059_v21, %v1063_v23  ;;  %v3139_v38 = vcombine.low %v1059_v21, %v1063_v23 }
 0x209   : > { %v3887_v36 = vpack.c.bf16 %v1018_v29, %v1017_v28  ;;  %v907_v62 = vadd.f32 %v3880_v19, %v906_v34  ;;  %v1064_v28 = vld [vmem:[#allocation10 + $0x78] sm:$0xff]  ;;  %v1023_v24 = vmax.f32 %v915_v22, 0.0 }
 0x20a   : > { %v3280_v27 = vpop.f32.mrf.mxu1  ;;  %v3142_v34 = vcombine.high %v1060_v26, %v1064_v28  ;;  %v3141_v39 = vcombine.low %v1060_v26, %v1064_v28 }
 0x20b   : > { %1524 = vmatmul.mubr.bf16.vlgmr.msra.gmra.mxu0 %v3887_v36  ;;  %1717 = vmatmul.mubr.bf16.vlgmr.msra.gmra.mxu1 %v3887_v36  ;;  %v1021_v9 = vmax.f32 %v907_v62, 0.0  ;;  %v918_v14 = vadd.f32 %v3280_v27, %v3880_v19  ;;  %v1055_v27 = vld [vmem:[#allocation10 + $0x30] sm:$0xff] }
 0x20c   : > { %1878 = vmatpush1.bf16.msra.mxu0 %v3187_v12  ;;  %2071 = vmatpush1.bf16.msra.mxu1 %v3189_v15  ;;  %v909_v47 = vpop.f32.mrf.mxu1  ;;  %v1072_v12 = vld [vmem:[#allocation10 + $0xb8] sm:$0xff]  ;;  %v3132_v44 = vcombine.high %v1051_v35, %v1055_v27  ;;  %v3131_v48 = vcombine.low %v1051_v35, %v1055_v27 }
 0x20d   : > { %1533 = vmatprep.mubr.bf16.mxu0 %v3624_v56  ;;  %1726 = vmatprep.mubr.bf16.mxu1 %v3624_v56  ;;  %v910_v55 = vadd.f32 %v3880_v19, %v909_v47  ;;  %v3150_v20 = vcombine.high %v1068_v11, %v1072_v12  ;;  %v1024_v29 = vmax.f32 %v918_v14, 0.0  ;;  %v3149_v32 = vcombine.low %v1068_v11, %v1072_v12 }
 0x20e   : > { %1879 = vmatprep.subr.bf16.mxu0 %v3180_v30  ;;  %2072 = vmatprep.subr.bf16.mxu1 %v3182_v37  ;;  %v3897_v58 = vpop.f32.mrf.mxu1  ;;  %v1052_v30 = vld [vmem:[#allocation10 + $0x18] sm:$0xff] }
 0x20f   : > { %v1022_v2 = vmax.f32 %v910_v55, 0.0  ;;  %v1056_v37 = vld [vmem:[#allocation10 + $0x38] sm:$0xff]  ;;  %v3913_v40 = vpack.c.bf16 %v1024_v29, %v1023_v24  ;;  %v931_v51 = vadd.f32 %v3897_v58, %v3880_v19 }
 0x210   : > { %1880 = vmatpush1.bf16.msra.mxu0 %v3179_v42  ;;  %2073 = vmatpush1.bf16.msra.mxu1 %v3181_v43  ;;  %v922_v5 = vpop.f32.mrf.mxu1  ;;  %v3133_v49 = vcombine.low %v1052_v30, %v1056_v37 }
 0x211   : > { %1881 = vmatprep.subr.bf16.mxu0 %v3172_v45  ;;  %2074 = vmatprep.subr.bf16.mxu1 %v3174_v46  ;;  %v3905_v15 = vpack.c.bf16 %v1022_v2, %v1021_v9  ;;  %v923_v41 = vadd.f32 %v3880_v19, %v922_v5  ;;  %v3134_v45 = vcombine.high %v1052_v30, %v1056_v37 }
 0x212   : > { %v3284_v17 = vpop.f32.mrf.mxu1 }
 0x213   : > { %1534 = vmatmul.mubr.bf16.gmra.mxu0 %v3894_v54  ;;  %1727 = vmatmul.mubr.bf16.gmra.mxu1 %v3894_v54  ;;  %v1025_v46 = vmax.f32 %v923_v41, 0.0  ;;  %v934_v52 = vadd.f32 %v3284_v17, %v3880_v19 }
 0x214   : > { %1543 = vmatprep.mubr.bf16.mxu0 %v3624_v56  ;;  %1736 = vmatprep.mubr.bf16.mxu1 %v3624_v56  ;;  %v925_v33 = vpop.f32.mrf.mxu1 }
 0x215   : > { %1882 = vmatpush1.bf16.msra.mxu0 %v3171_v53  ;;  %2075 = vmatpush1.bf16.msra.mxu1 %v3173_v57  ;;  %v926_v42 = vadd.f32 %v3880_v19, %v925_v33  ;;  %v1027_v57 = vmax.f32 %v931_v51, 0.0 }
 0x216   : > { %1883 = vmatprep.subr.bf16.mxu0 %v3164_v59  ;;  %2076 = vmatprep.subr.bf16.mxu1 %v3166_v60  ;;  %v3287_v43 = vpop.f32.mrf.mxu1  ;;  %v1028_v59 = vmax.f32 %v934_v52, 0.0 }
 0x217   : > { %v1026_v47 = vmax.f32 %v926_v42, 0.0 }
 0x218   : > { %v938_v50 = vpop.f32.mrf.mxu1  ;;  %v3930_v61 = vpack.c.bf16 %v1028_v59, %v1027_v57 }
 0x219   : > { %1884 = vmatpush1.bf16.msra.mxu0 %v3163_v3  ;;  %2077 = vmatpush1.bf16.msra.mxu1 %v3165_v4  ;;  %v3924_v53 = vpack.c.bf16 %v1026_v47, %v1025_v46  ;;  %v939_v58 = vadd.f32 %v3880_v19, %v938_v50  ;;  %v947_v3 = vadd.f32 %v3287_v43, %v3880_v19 }
 0x21a   : > { %1885 = vmatprep.subr.bf16.mxu0 %v3156_v6  ;;  %2078 = vmatprep.subr.bf16.mxu1 %v3158_v7  ;;  %v3288_v55 = vpop.f32.mrf.mxu1 }
 0x21b   : > { %1544 = vmatmul.mubr.bf16.gmra.mxu0 %v3905_v15  ;;  %1737 = vmatmul.mubr.bf16.gmra.mxu1 %v3905_v15  ;;  %v1029_v0 = vmax.f32 %v939_v58, 0.0  ;;  %v950_v4 = vadd.f32 %v3288_v55, %v3880_v19  ;;  %v1031_v7 = vmax.f32 %v947_v3, 0.0 }
 0x21c   : > { %1553 = vmatprep.mubr.bf16.mxu0 %v3624_v56  ;;  %1746 = vmatprep.mubr.bf16.mxu1 %v3624_v56  ;;  %v941_v60 = vpop.f32.mrf.mxu1 }
 0x21d   : > { %1886 = vmatpush1.bf16.msra.mxu0 %v3155_v13  ;;  %2079 = vmatpush1.bf16.msra.mxu1 %v3157_v16  ;;  %v942_v62 = vadd.f32 %v3880_v19, %v941_v60  ;;  %v1032_v8 = vmax.f32 %v950_v4, 0.0 }
 0x21e   : > { %1887 = vmatprep.subr.bf16.mxu0 %v3148_v18  ;;  %2080 = vmatprep.subr.bf16.mxu1 %v3150_v20  ;;  %v3291_v63 = vpop.f32.mrf.mxu1 }
 0x21f   : > { %v1030_v1 = vmax.f32 %v942_v62, 0.0  ;;  %v3946_v10 = vpack.c.bf16 %v1032_v8, %v1031_v7  ;;  %v963_v18 = vadd.f32 %v3291_v63, %v3880_v19 }
 0x220   : > { %v954_v2 = vpop.f32.mrf.mxu1 }
 0x221   : > { %1888 = vmatpush1.bf16.msra.mxu0 %v3147_v31  ;;  %2081 = vmatpush1.bf16.msra.mxu1 %v3149_v32  ;;  %v3940_v5 = vpack.c.bf16 %v1030_v1, %v1029_v0  ;;  %v955_v11 = vadd.f32 %v3880_v19, %v954_v2  ;;  %v1035_v23 = vmax.f32 %v963_v18, 0.0 }
 0x222   : > { %1889 = vmatprep.subr.bf16.mxu0 %v3140_v25  ;;  %2082 = vmatprep.subr.bf16.mxu1 %v3142_v34  ;;  %v3292_v6 = vpop.f32.mrf.mxu1 }
 0x223   : > { %1554 = vmatmul.mubr.bf16.gmra.mxu0 %v3913_v40  ;;  %1747 = vmatmul.mubr.bf16.gmra.mxu1 %v3913_v40  ;;  %v1033_v14 = vmax.f32 %v955_v11, 0.0  ;;  %v966_v20 = vadd.f32 %v3292_v6, %v3880_v19 }
 0x224   : > { %1563 = vmatprep.mubr.bf16.mxu0 %v3624_v56  ;;  %1756 = vmatprep.mubr.bf16.mxu1 %v3624_v56  ;;  %v957_v9 = vpop.f32.mrf.mxu1 }
 0x225   : > { %1890 = vmatpush1.bf16.msra.mxu0 %v3139_v38  ;;  %2083 = vmatpush1.bf16.msra.mxu1 %v3141_v39  ;;  %v958_v12 = vadd.f32 %v3880_v19, %v957_v9  ;;  %v1036_v26 = vmax.f32 %v966_v20, 0.0 }
 0x226   : > { %1891 = vmatprep.subr.bf16.mxu0 %v3132_v44  ;;  %2084 = vmatprep.subr.bf16.mxu1 %v3134_v45  ;;  %v3295_v13 = vpop.f32.mrf.mxu1 }
 0x227   : > { %v1034_v16 = vmax.f32 %v958_v12, 0.0  ;;  %v3962_v29 = vpack.c.bf16 %v1036_v26, %v1035_v23  ;;  %v979_v24 = vadd.f32 %v3295_v13, %v3880_v19 }
 0x228   : > { %v970_v17 = vpop.f32.mrf.mxu1 }
 0x229   : > { %1892 = vmatpush1.bf16.msra.mxu0 %v3131_v48  ;;  %2085 = vmatpush1.bf16.msra.mxu1 %v3133_v49  ;;  %v3956_v21 = vpack.c.bf16 %v1034_v16, %v1033_v14  ;;  %v971_v31 = vadd.f32 %v3880_v19, %v970_v17  ;;  %v1039_v38 = vmax.f32 %v979_v24, 0.0 }
 0x22a   : > { %v3296_v22 = vpop.f32.mrf.mxu1 }
 0x22b   : > { %1564 = vmatmul.mubr.bf16.gmra.mxu0 %v3924_v53  ;;  %1757 = vmatmul.mubr.bf16.gmra.mxu1 %v3924_v53  ;;  %v1037_v25 = vmax.f32 %v971_v31, 0.0  ;;  %v982_v27 = vadd.f32 %v3296_v22, %v3880_v19 }
 0x22c   : > { %1573 = vmatprep.mubr.bf16.mxu0 %v3624_v56  ;;  %1766 = vmatprep.mubr.bf16.mxu1 %v3624_v56  ;;  %v973_v28 = vpop.f32.mrf.mxu1 }
 0x22d   : > { %v974_v32 = vadd.f32 %v3880_v19, %v973_v28  ;;  %v1040_v39 = vmax.f32 %v982_v27, 0.0 }
 0x22e   : > { %v3299_v33 = vpop.f32.mrf.mxu1 }
 0x22f   : > { %v1038_v34 = vmax.f32 %v974_v32, 0.0  ;;  %v3978_v42 = vpack.c.bf16 %v1040_v39, %v1039_v38  ;;  %v995_v49 = vadd.f32 %v3299_v33, %v3880_v19 }
 0x230   : > { %v986_v35 = vpop.f32.mrf.mxu1 }
 0x231   : > { %v3972_v30 = vpack.c.bf16 %v1038_v34, %v1037_v25  ;;  %v987_v43 = vadd.f32 %v3880_v19, %v986_v35  ;;  %v1043_v55 = vmax.f32 %v995_v49, 0.0 }
 0x232   : > { %v3300_v37 = vpop.f32.mrf.mxu1 }
 0x233   : > { %1574 = vmatmul.mubr.bf16.gmra.mxu0 %v3930_v61  ;;  %1767 = vmatmul.mubr.bf16.gmra.mxu1 %v3930_v61  ;;  %v1041_v46 = vmax.f32 %v987_v43, 0.0  ;;  %v998_v50 = vadd.f32 %v3300_v37, %v3880_v19 }
 0x234   : > { %1583 = vmatprep.mubr.bf16.mxu0 %v3624_v56  ;;  %1776 = vmatprep.mubr.bf16.mxu1 %v3624_v56  ;;  %v989_v41 = vpop.f32.mrf.mxu1 }
 0x235   : > { %v990_v44 = vadd.f32 %v3880_v19, %v989_v41  ;;  %v1044_v57 = vmax.f32 %v998_v50, 0.0 }
 0x236   : > { %v3303_v45 = vpop.f32.mrf.mxu1 }
 0x237   : > { %v1042_v47 = vmax.f32 %v990_v44, 0.0  ;;  %v3994_v60 = vpack.c.bf16 %v1044_v57, %v1043_v55  ;;  %v1011_v1 = vadd.f32 %v3303_v45, %v3880_v19 }
 0x238   : > { %v1002_v48 = vpop.f32.mrf.mxu1 }
 0x239   : > { %v3988_v51 = vpack.c.bf16 %v1042_v47, %v1041_v46  ;;  %v1003_v58 = vadd.f32 %v3880_v19, %v1002_v48  ;;  %v1047_v4 = vmax.f32 %v1011_v1, 0.0 }
 0x23a   : > { %v3304_v52 = vpop.f32.mrf.mxu1 }
 0x23b   : > { %1584 = vmatmul.mubr.bf16.gmra.mxu0 %v3940_v5  ;;  %1777 = vmatmul.mubr.bf16.gmra.mxu1 %v3940_v5  ;;  %v1045_v63 = vmax.f32 %v1003_v58, 0.0  ;;  %v1014_v2 = vadd.f32 %v3304_v52, %v3880_v19 }
 0x23c   : > { %1593 = vmatprep.mubr.bf16.mxu0 %v3624_v56  ;;  %1786 = vmatprep.mubr.bf16.mxu1 %v3624_v56  ;;  %v1005_v59 = vpop.f32.mrf.mxu1 }
 0x23d   : > { %v1006_v62 = vadd.f32 %v3880_v19, %v1005_v59  ;;  %v1048_v6 = vmax.f32 %v1014_v2, 0.0  ;;  %v1131_v19 = vlaneseq }
 0x23f   : > { %v1046_v0 = vmax.f32 %v1006_v62, 0.0  ;;  %v4010_v7 = vpack.c.bf16 %v1048_v6, %v1047_v4 }
 0x241   : > { %v4004_v3 = vpack.c.bf16 %v1046_v0, %v1045_v63 }
 0x243   : > { %1594 = vmatmul.mubr.bf16.gmra.mxu0 %v3946_v10  ;;  %1787 = vmatmul.mubr.bf16.gmra.mxu1 %v3946_v10 }
 0x244   : > { %1603 = vmatprep.mubr.bf16.mxu0 %v3624_v56  ;;  %1796 = vmatprep.mubr.bf16.mxu1 %v3624_v56 }
 0x24b   : > { %1604 = vmatmul.mubr.bf16.gmra.mxu0 %v3956_v21  ;;  %1797 = vmatmul.mubr.bf16.gmra.mxu1 %v3956_v21 }
 0x24c   : > { %1613 = vmatprep.mubr.bf16.mxu0 %v3624_v56  ;;  %1806 = vmatprep.mubr.bf16.mxu1 %v3624_v56 }
 0x253   : > { %1614 = vmatmul.mubr.bf16.gmra.mxu0 %v3962_v29  ;;  %1807 = vmatmul.mubr.bf16.gmra.mxu1 %v3962_v29 }
 0x254   : > { %1623 = vmatprep.mubr.bf16.mxu0 %v3624_v56  ;;  %1816 = vmatprep.mubr.bf16.mxu1 %v3624_v56 }
 0x25b   : > { %1624 = vmatmul.mubr.bf16.gmra.mxu0 %v3972_v30  ;;  %1817 = vmatmul.mubr.bf16.gmra.mxu1 %v3972_v30 }
 0x25c   : > { %1633 = vmatprep.mubr.bf16.mxu0 %v3624_v56  ;;  %1826 = vmatprep.mubr.bf16.mxu1 %v3624_v56 }
 0x263   : > { %1634 = vmatmul.mubr.bf16.gmra.mxu0 %v3978_v42  ;;  %1827 = vmatmul.mubr.bf16.gmra.mxu1 %v3978_v42 }
 0x264   : > { %1643 = vmatprep.mubr.bf16.mxu0 %v3624_v56  ;;  %1836 = vmatprep.mubr.bf16.mxu1 %v3624_v56 }
 0x26b   : > { %1644 = vmatmul.mubr.bf16.gmra.mxu0 %v3988_v51  ;;  %1837 = vmatmul.mubr.bf16.gmra.mxu1 %v3988_v51 }
 0x26c   : > { %1653 = vmatprep.mubr.bf16.mxu0 %v3624_v56  ;;  %1846 = vmatprep.mubr.bf16.mxu1 %v3624_v56 }
 0x273   : > { %1654 = vmatmul.mubr.bf16.gmra.mxu0 %v3994_v60  ;;  %1847 = vmatmul.mubr.bf16.gmra.mxu1 %v3994_v60 }
 0x274   : > { %1663 = vmatprep.mubr.bf16.mxu0 %v3624_v56  ;;  %1856 = vmatprep.mubr.bf16.mxu1 %v3624_v56 }
 0x27b   : > { %1664 = vmatmul.mubr.bf16.gmra.mxu0 %v4004_v3  ;;  %1857 = vmatmul.mubr.bf16.gmra.mxu1 %v4004_v3 }
 0x27c   : > { %1673 = vmatprep.mubr.bf16.mxu0 %v3624_v56  ;;  %1866 = vmatprep.mubr.bf16.mxu1 %v3624_v56 }
 0x283   : > { %1674 = vmatmul.mubr.bf16.gmra.mxu0 %v4010_v7  ;;  %1867 = vmatmul.mubr.bf16.gmra.mxu1 %v4010_v7 }
 0x284   : > { %1909 = vmatprep.mubr.bf16.mxu0 %v3624_v56  ;;  %2102 = vmatprep.mubr.bf16.mxu1 %v3624_v56 }
 0x28b   : > { %1910 = vmatmul.mubr.bf16.vlgmr.msra.gmra.mxu0 %v3887_v36  ;;  %2103 = vmatmul.mubr.bf16.vlgmr.msra.gmra.mxu1 %v3887_v36  ;;  %v4044_v36 = vshrl.u32 %v1131_v19, 7 }
 0x28c   : > { %1919 = vmatprep.mubr.bf16.mxu0 %v3624_v56  ;;  %2112 = vmatprep.mubr.bf16.mxu1 %v3624_v56 }
 0x293   : > { %1920 = vmatmul.mubr.bf16.gmra.mxu0 %v3894_v54  ;;  %2113 = vmatmul.mubr.bf16.gmra.mxu1 %v3894_v54  ;;  %v1133_v54 = vsub.s32 0, %v4044_v36 }
 0x294   : > { %1929 = vmatprep.mubr.bf16.mxu0 %v3624_v56  ;;  %2122 = vmatprep.mubr.bf16.mxu1 %v3624_v56 }
 0x29b   : > { %1930 = vmatmul.mubr.bf16.gmra.mxu0 %v3905_v15  ;;  %2123 = vmatmul.mubr.bf16.gmra.mxu1 %v3905_v15  ;;  %v1141_v15 = vsub.s32 2, %v4044_v36 }
 0x29c   : > { %1939 = vmatprep.mubr.bf16.mxu0 %v3624_v56  ;;  %2132 = vmatprep.mubr.bf16.mxu1 %v3624_v56 }
 0x2a3   : > { %1940 = vmatmul.mubr.bf16.gmra.mxu0 %v3913_v40  ;;  %2133 = vmatmul.mubr.bf16.gmra.mxu1 %v3913_v40  ;;  %v1129_v40 = vld [vmem:[#allocation11] sm:$0xff] }
 0x2a4   : > { %1949 = vmatprep.mubr.bf16.mxu0 %v3624_v56  ;;  %2142 = vmatprep.mubr.bf16.mxu1 %v3624_v56  ;;  %v4056_v8 = vrot.slane %v1129_v40, %v1141_v15 }
 0x2ab   : > { %1950 = vmatmul.mubr.bf16.gmra.mxu0 %v3924_v53  ;;  %2143 = vmatmul.mubr.bf16.gmra.mxu1 %v3924_v53  ;;  %v1137_v53 = vsub.s32 1, %v4044_v36 }
 0x2ac   : > { %1959 = vmatprep.mubr.bf16.mxu0 %v3624_v56  ;;  %2152 = vmatprep.mubr.bf16.mxu1 %v3624_v56 }
 0x2b3   : > { %1960 = vmatmul.mubr.bf16.gmra.mxu0 %v3930_v61  ;;  %2153 = vmatmul.mubr.bf16.gmra.mxu1 %v3930_v61  ;;  %v1145_v61 = vsub.s32 3, %v4044_v36 }
 0x2b4   : > { %1969 = vmatprep.mubr.bf16.mxu0 %v3624_v56  ;;  %2162 = vmatprep.mubr.bf16.mxu1 %v3624_v56 }
 0x2b5   : > { %v4062_v12 = vrot.slane %v1129_v40, %v1145_v61 }
 0x2bb   : > { %1970 = vmatmul.mubr.bf16.gmra.mxu0 %v3940_v5  ;;  %2163 = vmatmul.mubr.bf16.gmra.mxu1 %v3940_v5  ;;  %v4054_v5 = vrot.slane %v1129_v40, %v1133_v54 }
 0x2bc   : > { %1979 = vmatprep.mubr.bf16.mxu0 %v3624_v56  ;;  %2172 = vmatprep.mubr.bf16.mxu1 %v3624_v56 }
 0x2c3   : > { %1980 = vmatmul.mubr.bf16.gmra.mxu0 %v3946_v10  ;;  %2173 = vmatmul.mubr.bf16.gmra.mxu1 %v3946_v10  ;;  %v4060_v10 = vrot.slane %v1129_v40, %v1137_v53 }
 0x2c4   : > { %1989 = vmatprep.mubr.bf16.mxu0 %v3624_v56  ;;  %2182 = vmatprep.mubr.bf16.mxu1 %v3624_v56 }
 0x2cb   : > { %v1525_v9 = vpop.f32.mrf.mxu0  ;;  %v1718_v11 = vpop.f32.mrf.mxu1  ;;  %1990 = vmatmul.mubr.bf16.gmra.mxu0 %v3956_v21  ;;  %2183 = vmatmul.mubr.bf16.gmra.mxu1 %v3956_v21 }
 0x2cc   : > { %1999 = vmatprep.mubr.bf16.mxu0 %v3624_v56  ;;  %2192 = vmatprep.mubr.bf16.mxu1 %v3624_v56  ;;  %v1526_v13 = vadd.f32 %v1525_v9, %v4054_v5  ;;  %v1719_v14 = vadd.f32 %v1718_v11, %v4056_v8 }
 0x2cd   : > { %v1527_v16 = vpop.f32.mrf.mxu0  ;;  %v1720_v17 = vpop.f32.mrf.mxu1 }
 0x2ce   : > { %v1528_v18 = vadd.f32 %v1527_v16, %v4060_v10  ;;  %v1721_v20 = vadd.f32 %v1720_v17, %v4062_v12  ;;  %v2263_v28 = vmax.f32 %v1526_v13, 0.0  ;;  %v2265_v31 = vmax.f32 %v1719_v14, 0.0 }
 0x2cf   : > { %v1529_v22 = vpop.f32.mrf.mxu0  ;;  %v1722_v21 = vpop.f32.mrf.mxu1 }
 0x2d0   : > { %v1530_v23 = vadd.f32 %v1529_v22, %v4054_v5  ;;  %v1723_v26 = vadd.f32 %v1722_v21, %v4056_v8  ;;  %v2264_v27 = vmax.f32 %v1528_v18, 0.0  ;;  %v2266_v37 = vmax.f32 %v1721_v20, 0.0 }
 0x2d1   : > { %v1531_v32 = vpop.f32.mrf.mxu0  ;;  %v1724_v33 = vpop.f32.mrf.mxu1 }
 0x2d2   : > { %v2271_v25 = vmax.f32 %v1530_v23, 0.0  ;;  %v2273_v34 = vmax.f32 %v1723_v26, 0.0  ;;  %v1532_v35 = vadd.f32 %v1531_v32, %v4060_v10  ;;  %v1725_v24 = vadd.f32 %v1724_v33, %v4062_v12 }
 0x2d3   : > { %v1535_v38 = vpop.f32.mrf.mxu0  ;;  %v1728_v39 = vpop.f32.mrf.mxu1  ;;  %2000 = vmatmul.mubr.bf16.gmra.mxu0 %v3962_v29  ;;  %2193 = vmatmul.mubr.bf16.gmra.mxu1 %v3962_v29 }
 0x2d4   : > { %v2519_v41 = vmax.f32 %v2263_v28, %v2271_v25  ;;  %v2581_v43 = vmax.f32 %v2265_v31, %v2273_v34  ;;  %v2272_v44 = vmax.f32 %v1532_v35, 0.0  ;;  %v2274_v45 = vmax.f32 %v1725_v24, 0.0  ;;  %2009 = vmatprep.mubr.bf16.mxu0 %v3624_v56  ;;  %2202 = vmatprep.mubr.bf16.mxu1 %v3624_v56 }
 0x2d5   : > { %v1536_v46 = vadd.f32 %v1535_v38, %v4054_v5  ;;  %v1729_v47 = vadd.f32 %v1728_v39, %v4056_v8  ;;  %v1537_v48 = vpop.f32.mrf.mxu0  ;;  %v1730_v49 = vpop.f32.mrf.mxu1 }
 0x2d6   : > { %v2550_v50 = vmax.f32 %v2264_v27, %v2272_v44  ;;  %v2612_v52 = vmax.f32 %v2266_v37, %v2274_v45  ;;  %v1538_v55 = vadd.f32 %v1537_v48, %v4060_v10  ;;  %v1731_v29 = vadd.f32 %v1730_v49, %v4062_v12 }
 0x2d7   : > { %v2279_v57 = vmax.f32 %v1536_v46, 0.0  ;;  %v2281_v59 = vmax.f32 %v1729_v47, 0.0  ;;  %v1539_v58 = vpop.f32.mrf.mxu0  ;;  %v1732_v62 = vpop.f32.mrf.mxu1 }
 0x2d8   : > { %v2280_v63 = vmax.f32 %v1538_v55, 0.0  ;;  %v2282_v0 = vmax.f32 %v1731_v29, 0.0  ;;  %v1540_v1 = vadd.f32 %v1539_v58, %v4054_v5  ;;  %v1733_v2 = vadd.f32 %v1732_v62, %v4056_v8 }
 0x2d9   : > { %v2520_v4 = vmax.f32 %v2519_v41, %v2279_v57  ;;  %v2582_v6 = vmax.f32 %v2581_v43, %v2281_v59  ;;  %v1541_v19 = vpop.f32.mrf.mxu0  ;;  %v1734_v54 = vpop.f32.mrf.mxu1 }
 0x2da   : > { %v2551_v15 = vmax.f32 %v2550_v50, %v2280_v63  ;;  %v2613_v40 = vmax.f32 %v2612_v52, %v2282_v0  ;;  %v2287_v53 = vmax.f32 %v1540_v1, 0.0  ;;  %v2289_v61 = vmax.f32 %v1733_v2, 0.0 }
 0x2db   : > { %v1542_v9 = vadd.f32 %v1541_v19, %v4060_v10  ;;  %v1735_v11 = vadd.f32 %v1734_v54, %v4062_v12  ;;  %v1545_v13 = vpop.f32.mrf.mxu0  ;;  %v1738_v14 = vpop.f32.mrf.mxu1  ;;  %2010 = vmatmul.mubr.bf16.gmra.mxu0 %v3972_v30  ;;  %2203 = vmatmul.mubr.bf16.gmra.mxu1 %v3972_v30 }
 0x2dc   : > { %v2521_v16 = vmax.f32 %v2520_v4, %v2287_v53  ;;  %v2583_v17 = vmax.f32 %v2582_v6, %v2289_v61  ;;  %v1546_v18 = vadd.f32 %v1545_v13, %v4054_v5  ;;  %v1739_v20 = vadd.f32 %v1738_v14, %v4056_v8  ;;  %2019 = vmatprep.mubr.bf16.mxu0 %v3624_v56 }
 0x2dd   : > { %v2288_v22 = vmax.f32 %v1542_v9, 0.0  ;;  %v2290_v21 = vmax.f32 %v1735_v11, 0.0  ;;  %v1547_v23 = vpop.f32.mrf.mxu0  ;;  %v1740_v26 = vpop.f32.mrf.mxu1  ;;  %2212 = vmatprep.mubr.bf16.mxu1 %v3624_v56 }
 0x2de   : > { %v2295_v28 = vmax.f32 %v1546_v18, 0.0  ;;  %v2297_v31 = vmax.f32 %v1739_v20, 0.0  ;;  %v1548_v32 = vadd.f32 %v1547_v23, %v4060_v10  ;;  %v1741_v30 = vadd.f32 %v1740_v26, %v4062_v12 }
 0x2df   : > { %v2552_v33 = vmax.f32 %v2551_v15, %v2288_v22  ;;  %v2614_v25 = vmax.f32 %v2613_v40, %v2290_v21  ;;  %v1549_v34 = vpop.f32.mrf.mxu0  ;;  %v1742_v35 = vpop.f32.mrf.mxu1 }
 0x2e0   : > { %v2522_v24 = vmax.f32 %v2521_v16, %v2295_v28  ;;  %v2584_v27 = vmax.f32 %v2583_v17, %v2297_v31  ;;  %v2296_v37 = vmax.f32 %v1548_v32, 0.0  ;;  %v2298_v38 = vmax.f32 %v1741_v30, 0.0 }
 0x2e1   : > { %v1550_v39 = vadd.f32 %v1549_v34, %v4054_v5  ;;  %v1743_v41 = vadd.f32 %v1742_v35, %v4056_v8  ;;  %v1551_v43 = vpop.f32.mrf.mxu0  ;;  %v1744_v44 = vpop.f32.mrf.mxu1 }
 0x2e2   : > { %v2553_v45 = vmax.f32 %v2552_v33, %v2296_v37  ;;  %v2615_v46 = vmax.f32 %v2614_v25, %v2298_v38  ;;  %v1552_v47 = vadd.f32 %v1551_v43, %v4060_v10  ;;  %v1745_v48 = vadd.f32 %v1744_v44, %v4062_v12 }
 0x2e3   : > { %v2303_v49 = vmax.f32 %v1550_v39, 0.0  ;;  %v2305_v50 = vmax.f32 %v1743_v41, 0.0  ;;  %v1555_v52 = vpop.f32.mrf.mxu0  ;;  %v1748_v55 = vpop.f32.mrf.mxu1  ;;  %2020 = vmatmul.mubr.bf16.gmra.mxu0 %v3978_v42  ;;  %2213 = vmatmul.mubr.bf16.gmra.mxu1 %v3978_v42 }
 0x2e4   : > { %v2304_v29 = vmax.f32 %v1552_v47, 0.0  ;;  %v2306_v57 = vmax.f32 %v1745_v48, 0.0  ;;  %v1556_v59 = vadd.f32 %v1555_v52, %v4054_v5  ;;  %v1749_v58 = vadd.f32 %v1748_v55, %v4056_v8  ;;  %2029 = vmatprep.mubr.bf16.mxu0 %v3624_v56  ;;  %2222 = vmatprep.mubr.bf16.mxu1 %v3624_v56 }
 0x2e5   : > { %v2523_v62 = vmax.f32 %v2522_v24, %v2303_v49  ;;  %v2585_v63 = vmax.f32 %v2584_v27, %v2305_v50  ;;  %v1557_v0 = vpop.f32.mrf.mxu0  ;;  %v1750_v1 = vpop.f32.mrf.mxu1 }
 0x2e6   : > { %v2554_v2 = vmax.f32 %v2553_v45, %v2304_v29  ;;  %v2616_v4 = vmax.f32 %v2615_v46, %v2306_v57  ;;  %v2311_v6 = vmax.f32 %v1556_v59, 0.0  ;;  %v2313_v19 = vmax.f32 %v1749_v58, 0.0 }
 0x2e7   : > { %v1558_v42 = vadd.f32 %v1557_v0, %v4060_v10  ;;  %v1751_v54 = vadd.f32 %v1750_v1, %v4062_v12  ;;  %v1559_v15 = vpop.f32.mrf.mxu0  ;;  %v1752_v40 = vpop.f32.mrf.mxu1 }
 0x2e8   : > { %v2524_v53 = vmax.f32 %v2523_v62, %v2311_v6  ;;  %v2586_v61 = vmax.f32 %v2585_v63, %v2313_v19  ;;  %v1560_v9 = vadd.f32 %v1559_v15, %v4054_v5  ;;  %v1753_v11 = vadd.f32 %v1752_v40, %v4056_v8 }
 0x2e9   : > { %v2312_v13 = vmax.f32 %v1558_v42, 0.0  ;;  %v2314_v14 = vmax.f32 %v1751_v54, 0.0  ;;  %v1561_v16 = vpop.f32.mrf.mxu0  ;;  %v1754_v17 = vpop.f32.mrf.mxu1 }
 0x2ea   : > { %v2319_v18 = vmax.f32 %v1560_v9, 0.0  ;;  %v2321_v20 = vmax.f32 %v1753_v11, 0.0  ;;  %v1562_v22 = vadd.f32 %v1561_v16, %v4060_v10  ;;  %v1755_v21 = vadd.f32 %v1754_v17, %v4062_v12 }
 0x2eb   : > { %v2555_v23 = vmax.f32 %v2554_v2, %v2312_v13  ;;  %v2617_v26 = vmax.f32 %v2616_v4, %v2314_v14  ;;  %v1565_v28 = vpop.f32.mrf.mxu0  ;;  %v1758_v31 = vpop.f32.mrf.mxu1  ;;  %2030 = vmatmul.mubr.bf16.gmra.mxu0 %v3988_v51  ;;  %2223 = vmatmul.mubr.bf16.gmra.mxu1 %v3988_v51 }
 0x2ec   : > { %v2525_v32 = vmax.f32 %v2524_v53, %v2319_v18  ;;  %v2587_v30 = vmax.f32 %v2586_v61, %v2321_v20  ;;  %v2320_v33 = vmax.f32 %v1562_v22, 0.0  ;;  %v2322_v25 = vmax.f32 %v1755_v21, 0.0  ;;  %2039 = vmatprep.mubr.bf16.mxu0 %v3624_v56  ;;  %2232 = vmatprep.mubr.bf16.mxu1 %v3624_v56 }
 0x2ed   : > { %v1566_v34 = vadd.f32 %v1565_v28, %v4054_v5  ;;  %v1759_v35 = vadd.f32 %v1758_v31, %v4056_v8  ;;  %v1567_v24 = vpop.f32.mrf.mxu0  ;;  %v1760_v27 = vpop.f32.mrf.mxu1 }
 0x2ee   : > { %v2556_v37 = vmax.f32 %v2555_v23, %v2320_v33  ;;  %v2618_v38 = vmax.f32 %v2617_v26, %v2322_v25  ;;  %v1568_v39 = vadd.f32 %v1567_v24, %v4060_v10  ;;  %v1761_v51 = vadd.f32 %v1760_v27, %v4062_v12 }
 0x2ef   : > { %v2327_v41 = vmax.f32 %v1566_v34, 0.0  ;;  %v2329_v43 = vmax.f32 %v1759_v35, 0.0  ;;  %v1569_v44 = vpop.f32.mrf.mxu0  ;;  %v1762_v45 = vpop.f32.mrf.mxu1 }
 0x2f0   : > { %v2328_v46 = vmax.f32 %v1568_v39, 0.0  ;;  %v2330_v47 = vmax.f32 %v1761_v51, 0.0  ;;  %v1570_v48 = vadd.f32 %v1569_v44, %v4054_v5  ;;  %v1763_v49 = vadd.f32 %v1762_v45, %v4056_v8 }
 0x2f1   : > { %v2526_v50 = vmax.f32 %v2525_v32, %v2327_v41  ;;  %v2588_v52 = vmax.f32 %v2587_v30, %v2329_v43  ;;  %v1571_v55 = vpop.f32.mrf.mxu0  ;;  %v1764_v29 = vpop.f32.mrf.mxu1 }
 0x2f2   : > { %v2557_v57 = vmax.f32 %v2556_v37, %v2328_v46  ;;  %v2619_v59 = vmax.f32 %v2618_v38, %v2330_v47  ;;  %v2335_v58 = vmax.f32 %v1570_v48, 0.0  ;;  %v2337_v62 = vmax.f32 %v1763_v49, 0.0 }
 0x2f3   : > { %v1572_v63 = vadd.f32 %v1571_v55, %v4060_v10  ;;  %v1765_v0 = vadd.f32 %v1764_v29, %v4062_v12  ;;  %v1575_v1 = vpop.f32.mrf.mxu0  ;;  %v1768_v2 = vpop.f32.mrf.mxu1  ;;  %2040 = vmatmul.mubr.bf16.gmra.mxu0 %v3994_v60  ;;  %2233 = vmatmul.mubr.bf16.gmra.mxu1 %v3994_v60 }
 0x2f4   : > { %v2527_v4 = vmax.f32 %v2526_v50, %v2335_v58  ;;  %v2589_v6 = vmax.f32 %v2588_v52, %v2337_v62  ;;  %v1576_v19 = vadd.f32 %v1575_v1, %v4054_v5  ;;  %v1769_v42 = vadd.f32 %v1768_v2, %v4056_v8  ;;  %2049 = vmatprep.mubr.bf16.mxu0 %v3624_v56 }
 0x2f5   : > { %v2336_v54 = vmax.f32 %v1572_v63, 0.0  ;;  %v2338_v15 = vmax.f32 %v1765_v0, 0.0  ;;  %v1577_v40 = vpop.f32.mrf.mxu0  ;;  %v1770_v53 = vpop.f32.mrf.mxu1  ;;  %2242 = vmatprep.mubr.bf16.mxu1 %v3624_v56 }
 0x2f6   : > { %v2343_v61 = vmax.f32 %v1576_v19, 0.0  ;;  %v2345_v9 = vmax.f32 %v1769_v42, 0.0  ;;  %v1578_v11 = vadd.f32 %v1577_v40, %v4060_v10  ;;  %v1771_v60 = vadd.f32 %v1770_v53, %v4062_v12 }
 0x2f7   : > { %v2558_v13 = vmax.f32 %v2557_v57, %v2336_v54  ;;  %v2620_v14 = vmax.f32 %v2619_v59, %v2338_v15  ;;  %v1579_v16 = vpop.f32.mrf.mxu0  ;;  %v1772_v17 = vpop.f32.mrf.mxu1 }
 0x2f8   : > { %v2528_v18 = vmax.f32 %v2527_v4, %v2343_v61  ;;  %v2590_v20 = vmax.f32 %v2589_v6, %v2345_v9  ;;  %v2344_v22 = vmax.f32 %v1578_v11, 0.0  ;;  %v2346_v21 = vmax.f32 %v1771_v60, 0.0 }
 0x2f9   : > { %v1580_v23 = vadd.f32 %v1579_v16, %v4054_v5  ;;  %v1773_v26 = vadd.f32 %v1772_v17, %v4056_v8  ;;  %v1581_v28 = vpop.f32.mrf.mxu0  ;;  %v1774_v31 = vpop.f32.mrf.mxu1 }
 0x2fa   : > { %v2559_v32 = vmax.f32 %v2558_v13, %v2344_v22  ;;  %v2621_v30 = vmax.f32 %v2620_v14, %v2346_v21  ;;  %v1582_v33 = vadd.f32 %v1581_v28, %v4060_v10  ;;  %v1775_v25 = vadd.f32 %v1774_v31, %v4062_v12 }
 0x2fb   : > { %v2351_v34 = vmax.f32 %v1580_v23, 0.0  ;;  %v2353_v35 = vmax.f32 %v1773_v26, 0.0  ;;  %v1585_v24 = vpop.f32.mrf.mxu0  ;;  %v1778_v27 = vpop.f32.mrf.mxu1  ;;  %2050 = vmatmul.mubr.bf16.gmra.mxu0 %v4004_v3  ;;  %2243 = vmatmul.mubr.bf16.gmra.mxu1 %v4004_v3 }
 0x2fc   : > { %v2352_v37 = vmax.f32 %v1582_v33, 0.0  ;;  %v2354_v38 = vmax.f32 %v1775_v25, 0.0  ;;  %v1586_v39 = vadd.f32 %v1585_v24, %v4054_v5  ;;  %v1779_v51 = vadd.f32 %v1778_v27, %v4056_v8  ;;  %2059 = vmatprep.mubr.bf16.mxu0 %v3624_v56  ;;  %2252 = vmatprep.mubr.bf16.mxu1 %v3624_v56 }
 0x2fd   : > { %v2529_v41 = vmax.f32 %v2528_v18, %v2351_v34  ;;  %v2591_v43 = vmax.f32 %v2590_v20, %v2353_v35  ;;  %v1587_v44 = vpop.f32.mrf.mxu0  ;;  %v1780_v45 = vpop.f32.mrf.mxu1 }
 0x2fe   : > { %v2560_v46 = vmax.f32 %v2559_v32, %v2352_v37  ;;  %v2622_v47 = vmax.f32 %v2621_v30, %v2354_v38  ;;  %v2359_v48 = vmax.f32 %v1586_v39, 0.0  ;;  %v2361_v49 = vmax.f32 %v1779_v51, 0.0 }
 0x2ff   : > { %v1588_v3 = vadd.f32 %v1587_v44, %v4060_v10  ;;  %v1781_v50 = vadd.f32 %v1780_v45, %v4062_v12  ;;  %v1589_v52 = vpop.f32.mrf.mxu0  ;;  %v1782_v55 = vpop.f32.mrf.mxu1 }
 0x300   : > { %v2530_v29 = vmax.f32 %v2529_v41, %v2359_v48  ;;  %v2592_v57 = vmax.f32 %v2591_v43, %v2361_v49  ;;  %v1590_v59 = vadd.f32 %v1589_v52, %v4054_v5  ;;  %v1783_v56 = vadd.f32 %v1782_v55, %v4056_v8 }
 0x301   : > { %v2360_v58 = vmax.f32 %v1588_v3, 0.0  ;;  %v2362_v62 = vmax.f32 %v1781_v50, 0.0  ;;  %v1591_v63 = vpop.f32.mrf.mxu0  ;;  %v1784_v0 = vpop.f32.mrf.mxu1 }
 0x302   : > { %v2367_v1 = vmax.f32 %v1590_v59, 0.0  ;;  %v2369_v2 = vmax.f32 %v1783_v56, 0.0  ;;  %v1592_v4 = vadd.f32 %v1591_v63, %v4060_v10  ;;  %v1785_v6 = vadd.f32 %v1784_v0, %v4062_v12 }
 0x303   : > { %v2561_v19 = vmax.f32 %v2560_v46, %v2360_v58  ;;  %v2623_v42 = vmax.f32 %v2622_v47, %v2362_v62  ;;  %v1595_v54 = vpop.f32.mrf.mxu0  ;;  %v1788_v15 = vpop.f32.mrf.mxu1  ;;  %2060 = vmatmul.mubr.bf16.gmra.mxu0 %v4010_v7  ;;  %2253 = vmatmul.mubr.bf16.gmra.mxu1 %v4010_v7 }
 0x304   : > { %v2531_v40 = vmax.f32 %v2530_v29, %v2367_v1  ;;  %v2593_v53 = vmax.f32 %v2592_v57, %v2369_v2  ;;  %v2368_v61 = vmax.f32 %v1592_v4, 0.0  ;;  %v2370_v9 = vmax.f32 %v1785_v6, 0.0 }
 0x305   : > { %v1596_v11 = vadd.f32 %v1595_v54, %v4054_v5  ;;  %v1789_v60 = vadd.f32 %v1788_v15, %v4056_v8  ;;  %v1597_v13 = vpop.f32.mrf.mxu0  ;;  %v1790_v14 = vpop.f32.mrf.mxu1 }
 0x306   : > { %v2562_v16 = vmax.f32 %v2561_v19, %v2368_v61  ;;  %v2624_v17 = vmax.f32 %v2623_v42, %v2370_v9  ;;  %v1598_v18 = vadd.f32 %v1597_v13, %v4060_v10  ;;  %v1791_v20 = vadd.f32 %v1790_v14, %v4062_v12 }
 0x307   : > { %v2375_v22 = vmax.f32 %v1596_v11, 0.0  ;;  %v2377_v21 = vmax.f32 %v1789_v60, 0.0  ;;  %v1599_v23 = vpop.f32.mrf.mxu0  ;;  %v1792_v7 = vpop.f32.mrf.mxu1 }
 0x308   : > { %v2376_v26 = vmax.f32 %v1598_v18, 0.0  ;;  %v2378_v28 = vmax.f32 %v1791_v20, 0.0  ;;  %v1600_v31 = vadd.f32 %v1599_v23, %v4054_v5  ;;  %v1793_v32 = vadd.f32 %v1792_v7, %v4056_v8 }
 0x309   : > { %v2532_v30 = vmax.f32 %v2531_v40, %v2375_v22  ;;  %v2594_v33 = vmax.f32 %v2593_v53, %v2377_v21  ;;  %v1601_v25 = vpop.f32.mrf.mxu0  ;;  %v1794_v34 = vpop.f32.mrf.mxu1 }
 0x30a   : > { %v2563_v35 = vmax.f32 %v2562_v16, %v2376_v26  ;;  %v2625_v24 = vmax.f32 %v2624_v17, %v2378_v28  ;;  %v2383_v27 = vmax.f32 %v1600_v31, 0.0  ;;  %v2385_v37 = vmax.f32 %v1793_v32, 0.0 }
 0x30b   : > { %v1602_v38 = vadd.f32 %v1601_v25, %v4060_v10  ;;  %v1795_v39 = vadd.f32 %v1794_v34, %v4062_v12  ;;  %v1605_v51 = vpop.f32.mrf.mxu0  ;;  %v1798_v41 = vpop.f32.mrf.mxu1 }
 0x30c   : > { %v2533_v43 = vmax.f32 %v2532_v30, %v2383_v27  ;;  %v2595_v44 = vmax.f32 %v2594_v33, %v2385_v37  ;;  %v1606_v45 = vadd.f32 %v1605_v51, %v4054_v5  ;;  %v1799_v46 = vadd.f32 %v1798_v41, %v4056_v8 }
 0x30d   : > { %v2384_v47 = vmax.f32 %v1602_v38, 0.0  ;;  %v2386_v48 = vmax.f32 %v1795_v39, 0.0  ;;  %v1607_v49 = vpop.f32.mrf.mxu0  ;;  %v1800_v3 = vpop.f32.mrf.mxu1 }
 0x30e   : > { %v2391_v50 = vmax.f32 %v1606_v45, 0.0  ;;  %v2393_v52 = vmax.f32 %v1799_v46, 0.0  ;;  %v1608_v55 = vadd.f32 %v1607_v49, %v4060_v10  ;;  %v1801_v29 = vadd.f32 %v1800_v3, %v4062_v12 }
 0x30f   : > { %v2564_v57 = vmax.f32 %v2563_v35, %v2384_v47  ;;  %v2626_v59 = vmax.f32 %v2625_v24, %v2386_v48  ;;  %v1609_v56 = vpop.f32.mrf.mxu0  ;;  %v1802_v58 = vpop.f32.mrf.mxu1 }
 0x310   : > { %v2534_v62 = vmax.f32 %v2533_v43, %v2391_v50  ;;  %v2596_v63 = vmax.f32 %v2595_v44, %v2393_v52  ;;  %v2392_v0 = vmax.f32 %v1608_v55, 0.0  ;;  %v2394_v1 = vmax.f32 %v1801_v29, 0.0 }
 0x311   : > { %v1610_v2 = vadd.f32 %v1609_v56, %v4054_v5  ;;  %v1803_v4 = vadd.f32 %v1802_v58, %v4056_v8  ;;  %v1611_v6 = vpop.f32.mrf.mxu0  ;;  %v1804_v19 = vpop.f32.mrf.mxu1 }
 0x312   : > { %v2565_v42 = vmax.f32 %v2564_v57, %v2392_v0  ;;  %v2627_v54 = vmax.f32 %v2626_v59, %v2394_v1  ;;  %v1612_v15 = vadd.f32 %v1611_v6, %v4060_v10  ;;  %v1805_v40 = vadd.f32 %v1804_v19, %v4062_v12 }
 0x313   : > { %v2399_v53 = vmax.f32 %v1610_v2, 0.0  ;;  %v2401_v61 = vmax.f32 %v1803_v4, 0.0  ;;  %v1615_v9 = vpop.f32.mrf.mxu0  ;;  %v1808_v11 = vpop.f32.mrf.mxu1 }
 0x314   : > { %v2400_v60 = vmax.f32 %v1612_v15, 0.0  ;;  %v2402_v13 = vmax.f32 %v1805_v40, 0.0  ;;  %v1616_v14 = vadd.f32 %v1615_v9, %v4054_v5  ;;  %v1809_v16 = vadd.f32 %v1808_v11, %v4056_v8 }
 0x315   : > { %v2535_v17 = vmax.f32 %v2534_v62, %v2399_v53  ;;  %v2597_v18 = vmax.f32 %v2596_v63, %v2401_v61  ;;  %v1617_v20 = vpop.f32.mrf.mxu0  ;;  %v1810_v22 = vpop.f32.mrf.mxu1 }
 0x316   : > { %v2566_v21 = vmax.f32 %v2565_v42, %v2400_v60  ;;  %v2628_v23 = vmax.f32 %v2627_v54, %v2402_v13  ;;  %v2407_v7 = vmax.f32 %v1616_v14, 0.0  ;;  %v2409_v26 = vmax.f32 %v1809_v16, 0.0 }
 0x317   : > { %v1618_v28 = vadd.f32 %v1617_v20, %v4060_v10  ;;  %v1811_v31 = vadd.f32 %v1810_v22, %v4062_v12  ;;  %v1619_v32 = vpop.f32.mrf.mxu0  ;;  %v1812_v30 = vpop.f32.mrf.mxu1 }
 0x318   : > { %v2536_v33 = vmax.f32 %v2535_v17, %v2407_v7  ;;  %v2598_v25 = vmax.f32 %v2597_v18, %v2409_v26  ;;  %v1620_v34 = vadd.f32 %v1619_v32, %v4054_v5  ;;  %v1813_v35 = vadd.f32 %v1812_v30, %v4056_v8 }
 0x319   : > { %v2408_v24 = vmax.f32 %v1618_v28, 0.0  ;;  %v2410_v27 = vmax.f32 %v1811_v31, 0.0  ;;  %v1621_v37 = vpop.f32.mrf.mxu0  ;;  %v1814_v38 = vpop.f32.mrf.mxu1 }
 0x31a   : > { %v2415_v39 = vmax.f32 %v1620_v34, 0.0  ;;  %v2417_v51 = vmax.f32 %v1813_v35, 0.0  ;;  %v1622_v41 = vadd.f32 %v1621_v37, %v4060_v10  ;;  %v1815_v43 = vadd.f32 %v1814_v38, %v4062_v12 }
 0x31b   : > { %v2567_v44 = vmax.f32 %v2566_v21, %v2408_v24  ;;  %v2629_v45 = vmax.f32 %v2628_v23, %v2410_v27  ;;  %v1625_v46 = vpop.f32.mrf.mxu0  ;;  %v1818_v47 = vpop.f32.mrf.mxu1 }
 0x31c   : > { %v2537_v48 = vmax.f32 %v2536_v33, %v2415_v39  ;;  %v2599_v49 = vmax.f32 %v2598_v25, %v2417_v51  ;;  %v2416_v3 = vmax.f32 %v1622_v41, 0.0  ;;  %v2418_v50 = vmax.f32 %v1815_v43, 0.0 }
 0x31d   : > { %v1626_v52 = vadd.f32 %v1625_v46, %v4054_v5  ;;  %v1819_v55 = vadd.f32 %v1818_v47, %v4056_v8  ;;  %v1627_v29 = vpop.f32.mrf.mxu0  ;;  %v1820_v57 = vpop.f32.mrf.mxu1 }
 0x31e   : > { %v2568_v59 = vmax.f32 %v2567_v44, %v2416_v3  ;;  %v2630_v56 = vmax.f32 %v2629_v45, %v2418_v50  ;;  %v1628_v58 = vadd.f32 %v1627_v29, %v4060_v10  ;;  %v1821_v62 = vadd.f32 %v1820_v57, %v4062_v12 }
 0x31f   : > { %v2423_v63 = vmax.f32 %v1626_v52, 0.0  ;;  %v2425_v0 = vmax.f32 %v1819_v55, 0.0  ;;  %v1629_v1 = vpop.f32.mrf.mxu0  ;;  %v1822_v2 = vpop.f32.mrf.mxu1 }
 0x320   : > { %v2424_v4 = vmax.f32 %v1628_v58, 0.0  ;;  %v2426_v6 = vmax.f32 %v1821_v62, 0.0  ;;  %v1630_v19 = vadd.f32 %v1629_v1, %v4054_v5  ;;  %v1823_v42 = vadd.f32 %v1822_v2, %v4056_v8 }
 0x321   : > { %v2538_v54 = vmax.f32 %v2537_v48, %v2423_v63  ;;  %v2600_v15 = vmax.f32 %v2599_v49, %v2425_v0  ;;  %v1631_v40 = vpop.f32.mrf.mxu0  ;;  %v1824_v53 = vpop.f32.mrf.mxu1 }
 0x322   : > { %v2569_v61 = vmax.f32 %v2568_v59, %v2424_v4  ;;  %v2631_v9 = vmax.f32 %v2630_v56, %v2426_v6  ;;  %v2431_v11 = vmax.f32 %v1630_v19, 0.0  ;;  %v2433_v60 = vmax.f32 %v1823_v42, 0.0 }
 0x323   : > { %v1632_v13 = vadd.f32 %v1631_v40, %v4060_v10  ;;  %v1825_v14 = vadd.f32 %v1824_v53, %v4062_v12  ;;  %v1635_v16 = vpop.f32.mrf.mxu0  ;;  %v1828_v17 = vpop.f32.mrf.mxu1 }
 0x324   : > { %v2539_v18 = vmax.f32 %v2538_v54, %v2431_v11  ;;  %v2601_v20 = vmax.f32 %v2600_v15, %v2433_v60  ;;  %v1636_v22 = vadd.f32 %v1635_v16, %v4054_v5  ;;  %v1829_v21 = vadd.f32 %v1828_v17, %v4056_v8 }
 0x325   : > { %v2432_v23 = vmax.f32 %v1632_v13, 0.0  ;;  %v2434_v7 = vmax.f32 %v1825_v14, 0.0  ;;  %v1637_v26 = vpop.f32.mrf.mxu0  ;;  %v1830_v28 = vpop.f32.mrf.mxu1 }
 0x326   : > { %v2439_v31 = vmax.f32 %v1636_v22, 0.0  ;;  %v2441_v32 = vmax.f32 %v1829_v21, 0.0  ;;  %v1638_v30 = vadd.f32 %v1637_v26, %v4060_v10  ;;  %v1831_v33 = vadd.f32 %v1830_v28, %v4062_v12 }
 0x327   : > { %v2570_v25 = vmax.f32 %v2569_v61, %v2432_v23  ;;  %v2632_v34 = vmax.f32 %v2631_v9, %v2434_v7  ;;  %v1639_v35 = vpop.f32.mrf.mxu0  ;;  %v1832_v24 = vpop.f32.mrf.mxu1 }
 0x328   : > { %v2540_v27 = vmax.f32 %v2539_v18, %v2439_v31  ;;  %v2602_v37 = vmax.f32 %v2601_v20, %v2441_v32  ;;  %v2440_v38 = vmax.f32 %v1638_v30, 0.0  ;;  %v2442_v39 = vmax.f32 %v1831_v33, 0.0 }
 0x329   : > { %v1640_v51 = vadd.f32 %v1639_v35, %v4054_v5  ;;  %v1833_v41 = vadd.f32 %v1832_v24, %v4056_v8  ;;  %v1641_v43 = vpop.f32.mrf.mxu0  ;;  %v1834_v44 = vpop.f32.mrf.mxu1 }
 0x32a   : > { %v2571_v45 = vmax.f32 %v2570_v25, %v2440_v38  ;;  %v2633_v46 = vmax.f32 %v2632_v34, %v2442_v39  ;;  %v1642_v47 = vadd.f32 %v1641_v43, %v4060_v10  ;;  %v1835_v48 = vadd.f32 %v1834_v44, %v4062_v12 }
 0x32b   : > { %v2447_v49 = vmax.f32 %v1640_v51, 0.0  ;;  %v2449_v3 = vmax.f32 %v1833_v41, 0.0  ;;  %v1645_v50 = vpop.f32.mrf.mxu0  ;;  %v1838_v52 = vpop.f32.mrf.mxu1 }
 0x32c   : > { %v2448_v55 = vmax.f32 %v1642_v47, 0.0  ;;  %v2450_v29 = vmax.f32 %v1835_v48, 0.0  ;;  %v1646_v57 = vadd.f32 %v1645_v50, %v4054_v5  ;;  %v1839_v59 = vadd.f32 %v1838_v52, %v4056_v8 }
 0x32d   : > { %v2541_v56 = vmax.f32 %v2540_v27, %v2447_v49  ;;  %v2603_v58 = vmax.f32 %v2602_v37, %v2449_v3  ;;  %v1647_v62 = vpop.f32.mrf.mxu0  ;;  %v1840_v63 = vpop.f32.mrf.mxu1 }
 0x32e   : > { %v2572_v0 = vmax.f32 %v2571_v45, %v2448_v55  ;;  %v2634_v1 = vmax.f32 %v2633_v46, %v2450_v29  ;;  %v2455_v2 = vmax.f32 %v1646_v57, 0.0  ;;  %v2457_v4 = vmax.f32 %v1839_v59, 0.0 }
 0x32f   : > { %v1648_v6 = vadd.f32 %v1647_v62, %v4060_v10  ;;  %v1841_v19 = vadd.f32 %v1840_v63, %v4062_v12  ;;  %v1649_v42 = vpop.f32.mrf.mxu0  ;;  %v1842_v54 = vpop.f32.mrf.mxu1 }
 0x330   : > { %v2542_v15 = vmax.f32 %v2541_v56, %v2455_v2  ;;  %v2604_v40 = vmax.f32 %v2603_v58, %v2457_v4  ;;  %v1650_v53 = vadd.f32 %v1649_v42, %v4054_v5  ;;  %v1843_v61 = vadd.f32 %v1842_v54, %v4056_v8 }
 0x331   : > { %v2456_v9 = vmax.f32 %v1648_v6, 0.0  ;;  %v2458_v11 = vmax.f32 %v1841_v19, 0.0  ;;  %v1651_v60 = vpop.f32.mrf.mxu0  ;;  %v1844_v13 = vpop.f32.mrf.mxu1 }
 0x332   : > { %v2463_v14 = vmax.f32 %v1650_v53, 0.0  ;;  %v2465_v16 = vmax.f32 %v1843_v61, 0.0  ;;  %v1652_v17 = vadd.f32 %v1651_v60, %v4060_v10  ;;  %v1845_v18 = vadd.f32 %v1844_v13, %v4062_v12 }
 0x333   : > { %v2573_v20 = vmax.f32 %v2572_v0, %v2456_v9  ;;  %v2635_v22 = vmax.f32 %v2634_v1, %v2458_v11  ;;  %v1655_v21 = vpop.f32.mrf.mxu0  ;;  %v1848_v23 = vpop.f32.mrf.mxu1 }
 0x334   : > { %v2543_v7 = vmax.f32 %v2542_v15, %v2463_v14  ;;  %v2605_v26 = vmax.f32 %v2604_v40, %v2465_v16  ;;  %v2464_v28 = vmax.f32 %v1652_v17, 0.0  ;;  %v2466_v31 = vmax.f32 %v1845_v18, 0.0 }
 0x335   : > { %v1656_v32 = vadd.f32 %v1655_v21, %v4054_v5  ;;  %v1849_v30 = vadd.f32 %v1848_v23, %v4056_v8  ;;  %v1657_v33 = vpop.f32.mrf.mxu0  ;;  %v1850_v25 = vpop.f32.mrf.mxu1 }
 0x336   : > { %v2574_v34 = vmax.f32 %v2573_v20, %v2464_v28  ;;  %v2636_v35 = vmax.f32 %v2635_v22, %v2466_v31  ;;  %v1658_v24 = vadd.f32 %v1657_v33, %v4060_v10  ;;  %v1851_v27 = vadd.f32 %v1850_v25, %v4062_v12 }
 0x337   : > { %v2471_v37 = vmax.f32 %v1656_v32, 0.0  ;;  %v2473_v38 = vmax.f32 %v1849_v30, 0.0  ;;  %v1659_v39 = vpop.f32.mrf.mxu0  ;;  %v1852_v51 = vpop.f32.mrf.mxu1 }
 0x338   : > { %v2472_v41 = vmax.f32 %v1658_v24, 0.0  ;;  %v2474_v43 = vmax.f32 %v1851_v27, 0.0  ;;  %v1660_v44 = vadd.f32 %v1659_v39, %v4054_v5  ;;  %v1853_v45 = vadd.f32 %v1852_v51, %v4056_v8 }
 0x339   : > { %v2544_v46 = vmax.f32 %v2543_v7, %v2471_v37  ;;  %v2606_v47 = vmax.f32 %v2605_v26, %v2473_v38  ;;  %v1661_v48 = vpop.f32.mrf.mxu0  ;;  %v1854_v49 = vpop.f32.mrf.mxu1 }
 0x33a   : > { %v2575_v3 = vmax.f32 %v2574_v34, %v2472_v41  ;;  %v2637_v50 = vmax.f32 %v2636_v35, %v2474_v43  ;;  %v2479_v52 = vmax.f32 %v1660_v44, 0.0  ;;  %v2481_v55 = vmax.f32 %v1853_v45, 0.0 }
 0x33b   : > { %v1662_v29 = vadd.f32 %v1661_v48, %v4060_v10  ;;  %v1855_v57 = vadd.f32 %v1854_v49, %v4062_v12  ;;  %v1665_v59 = vpop.f32.mrf.mxu0  ;;  %v1858_v56 = vpop.f32.mrf.mxu1 }
 0x33c   : > { %v2545_v58 = vmax.f32 %v2544_v46, %v2479_v52  ;;  %v2607_v62 = vmax.f32 %v2606_v47, %v2481_v55  ;;  %v1666_v63 = vadd.f32 %v1665_v59, %v4054_v5  ;;  %v1859_v0 = vadd.f32 %v1858_v56, %v4056_v8 }
 0x33d   : > { %v2480_v1 = vmax.f32 %v1662_v29, 0.0  ;;  %v2482_v2 = vmax.f32 %v1855_v57, 0.0  ;;  %v1667_v4 = vpop.f32.mrf.mxu0  ;;  %v1860_v6 = vpop.f32.mrf.mxu1 }
 0x33e   : > { %v2487_v19 = vmax.f32 %v1666_v63, 0.0  ;;  %v2489_v42 = vmax.f32 %v1859_v0, 0.0  ;;  %v1668_v54 = vadd.f32 %v1667_v4, %v4060_v10  ;;  %v1861_v15 = vadd.f32 %v1860_v6, %v4062_v12 }
 0x33f   : > { %v2576_v40 = vmax.f32 %v2575_v3, %v2480_v1  ;;  %v2638_v53 = vmax.f32 %v2637_v50, %v2482_v2  ;;  %v1669_v61 = vpop.f32.mrf.mxu0  ;;  %v1862_v9 = vpop.f32.mrf.mxu1 }
 0x340   : > { %v2546_v11 = vmax.f32 %v2545_v58, %v2487_v19  ;;  %v2608_v60 = vmax.f32 %v2607_v62, %v2489_v42  ;;  %v2488_v13 = vmax.f32 %v1668_v54, 0.0  ;;  %v2490_v14 = vmax.f32 %v1861_v15, 0.0 }
 0x341   : > { %v1670_v16 = vadd.f32 %v1669_v61, %v4054_v5  ;;  %v1863_v17 = vadd.f32 %v1862_v9, %v4056_v8  ;;  %v1671_v18 = vpop.f32.mrf.mxu0  ;;  %v1864_v20 = vpop.f32.mrf.mxu1 }
 0x342   : > { %v2577_v22 = vmax.f32 %v2576_v40, %v2488_v13  ;;  %v2639_v21 = vmax.f32 %v2638_v53, %v2490_v14  ;;  %v1672_v23 = vadd.f32 %v1671_v18, %v4060_v10  ;;  %v1865_v7 = vadd.f32 %v1864_v20, %v4062_v12 }
 0x343   : > { %v2495_v26 = vmax.f32 %v1670_v16, 0.0  ;;  %v2497_v28 = vmax.f32 %v1863_v17, 0.0  ;;  %v1675_v31 = vpop.f32.mrf.mxu0  ;;  %v1868_v32 = vpop.f32.mrf.mxu1 }
 0x344   : > { %v2496_v30 = vmax.f32 %v1672_v23, 0.0  ;;  %v2498_v33 = vmax.f32 %v1865_v7, 0.0  ;;  %v1676_v25 = vadd.f32 %v1675_v31, %v4054_v5  ;;  %v1869_v34 = vadd.f32 %v1868_v32, %v4056_v8 }
 0x345   : > { %v2547_v35 = vmax.f32 %v2546_v11, %v2495_v26  ;;  %v2609_v24 = vmax.f32 %v2608_v60, %v2497_v28  ;;  %v1677_v27 = vpop.f32.mrf.mxu0  ;;  %v1870_v37 = vpop.f32.mrf.mxu1  ;;  %v3625_v60 = vmov 1966171168  }
 0x346   : > { %v2578_v38 = vmax.f32 %v2577_v22, %v2496_v30  ;;  %v2640_v39 = vmax.f32 %v2639_v21, %v2498_v33  ;;  %v2503_v51 = vmax.f32 %v1676_v25, 0.0  ;;  %v2505_v41 = vmax.f32 %v1869_v34, 0.0 }
 0x347   : > { %v1678_v43 = vadd.f32 %v1677_v27, %v4060_v10  ;;  %v1871_v44 = vadd.f32 %v1870_v37, %v4062_v12  ;;  %v1679_v45 = vpop.f32.mrf.mxu0  ;;  %v1872_v46 = vpop.f32.mrf.mxu1  ;;  %v2879_v13 = vunpack.c.l.s4 %v3625_v60  ;;  %v3417_v60 = vld [vmem:[#allocation11] sm:$0xff] }
 0x348   : > { %v2548_v47 = vmax.f32 %v2547_v35, %v2503_v51  ;;  %v2610_v48 = vmax.f32 %v2609_v24, %v2505_v41  ;;  %v1680_v49 = vadd.f32 %v1679_v45, %v4054_v5  ;;  %v1873_v3 = vadd.f32 %v1872_v46, %v4056_v8 }
 0x349   : > { %v2504_v50 = vmax.f32 %v1678_v43, 0.0  ;;  %v2506_v52 = vmax.f32 %v1871_v44, 0.0  ;;  %v1681_v55 = vpop.f32.mrf.mxu0  ;;  %v1874_v29 = vpop.f32.mrf.mxu1  ;;  %v2880_v32 = vunpack.c.0.s8 %v2879_v13 }
 0x34a   : > { %v2511_v57 = vmax.f32 %v1680_v49, 0.0  ;;  %v2513_v59 = vmax.f32 %v1873_v3, 0.0  ;;  %v1682_v56 = vadd.f32 %v1681_v55, %v4060_v10  ;;  %v1875_v58 = vadd.f32 %v1874_v29, %v4062_v12 }
 0x34b   : > { %v2579_v62 = vmax.f32 %v2578_v38, %v2504_v50  ;;  %v2641_v63 = vmax.f32 %v2640_v39, %v2506_v52  ;;  %v4220_v0 = vpop.f32.mrf.mxu0  ;;  %v4222_v1 = vpop.f32.mrf.mxu1  ;;  %v4249_v51 = vsub.s32 %v2880_v32, %v4044_v36 }
 0x34c   : > { %v2549_v2 = vmax.f32 %v2548_v47, %v2511_v57  ;;  %v2611_v5 = vmax.f32 %v2610_v48, %v2513_v59  ;;  %v2512_v4 = vmax.f32 %v1682_v56, 0.0  ;;  %v2514_v8 = vmax.f32 %v1875_v58, 0.0 }
 0x34d   : > { %v4224_v6 = vpop.f32.mrf.mxu0  ;;  %v4226_v19 = vpop.f32.mrf.mxu1 }
 0x34e   : > { %v2818_v42 = vrot.slane %v2549_v2, 4  ;;  %v2830_v54 = vrot.slane %v2611_v5, 4  ;;  %v2580_v15 = vmax.f32 %v2579_v62, %v2512_v4  ;;  %v2642_v10 = vmax.f32 %v2641_v63, %v2514_v8 }
 0x34f   : > { %v4228_v40 = vpop.f32.mrf.mxu0  ;;  %v4230_v12 = vpop.f32.mrf.mxu1 }
 0x350   : > { %v2819_v53 = vmax.f32 %v2549_v2, %v2818_v42  ;;  %v2831_v61 = vmax.f32 %v2611_v5, %v2830_v54  ;;  %v2824_v9 = vrot.slane %v2580_v15, 4  ;;  %v2836_v11 = vrot.slane %v2642_v10, 4 }
 0x351   : > { %v4232_v14 = vpop.f32.mrf.mxu0  ;;  %v4234_v16 = vpop.f32.mrf.mxu1  ;;  %v1149_v42 = vsub.s32 4, %v4044_v36  ;;  %v1157_v54 = vsub.s32 6, %v4044_v36 }
 0x352   : > { %v2820_v17 = vrot.slane %v2819_v53, 2  ;;  %v2832_v18 = vrot.slane %v2831_v61, 2  ;;  %v2825_v20 = vmax.f32 %v2580_v15, %v2824_v9  ;;  %v2837_v22 = vmax.f32 %v2642_v10, %v2836_v11 }
 0x353   : > { %v4236_v21 = vpop.f32.mrf.mxu0  ;;  %v4238_v23 = vpop.f32.mrf.mxu1  ;;  %v4299_v13 = vrot.slane %v3417_v60, %v1149_v42 }
 0x354   : > { %v2821_v7 = vmax.f32 %v2819_v53, %v2820_v17  ;;  %v2833_v26 = vmax.f32 %v2831_v61, %v2832_v18  ;;  %v2826_v28 = vrot.slane %v2825_v20, 2  ;;  %v2838_v31 = vrot.slane %v2837_v22, 2 }
 0x355   : > { %v4240_v30 = vpop.f32.mrf.mxu0  ;;  %v4242_v33 = vpop.f32.mrf.mxu1  ;;  %v1153_v53 = vsub.s32 5, %v4044_v36  ;;  %v1161_v61 = vsub.s32 7, %v4044_v36  ;;  %v4301_v17 = vrot.slane %v3417_v60, %v1157_v54  ;;  %v1916_v36 = vadd.f32 %v4228_v40, %v4299_v13 }
 0x356   : > { %v2822_v25 = vrot.slane %v2821_v7, 1  ;;  %v2834_v34 = vrot.slane %v2833_v26, 1  ;;  %v2827_v35 = vmax.f32 %v2825_v20, %v2826_v28  ;;  %v2839_v24 = vmax.f32 %v2837_v22, %v2838_v31 }
 0x357   : > { %v4244_v27 = vpop.f32.mrf.mxu0  ;;  %v4246_v37 = vpop.f32.mrf.mxu1  ;;  %v4307_v22 = vrot.slane %v3417_v60, %v1153_v53  ;;  %v1912_v32 = vadd.f32 %v4220_v0, %v4299_v13  ;;  %v1922_v0 = vadd.f32 %v4236_v21, %v4299_v13 }
 0x358   : > { %v2828_v38 = vrot.slane %v2827_v35, 1  ;;  %v2840_v39 = vrot.slane %v2839_v24, 1  ;;  %v2823_v44 = vmax.f32 %v2821_v7, %v2822_v25  ;;  %v2835_v45 = vmax.f32 %v2833_v26, %v2834_v34 }
 0x359   : > { %v4251_v41 = vpop.f32.mrf.mxu0  ;;  %v4253_v43 = vpop.f32.mrf.mxu1  ;;  %v4309_v7 = vrot.slane %v3417_v60, %v1161_v61  ;;  %v2109_v26 = vadd.f32 %v4230_v12, %v4301_v17  ;;  %v2105_v25 = vadd.f32 %v4222_v1, %v4301_v17  ;;  %v1918_v34 = vadd.f32 %v4232_v14, %v4307_v22 }
 0x35a   : > { %v2829_v46 = vmax.f32 %v2827_v35, %v2828_v38  ;;  %v2841_v47 = vmax.f32 %v2839_v24, %v2840_v39  ;;  %v1914_v12 = vadd.f32 %v4224_v6, %v4307_v22  ;;  %v2115_v1 = vadd.f32 %v4238_v23, %v4301_v17 }
 0x35b   : > { %v4255_v48 = vpop.f32.mrf.mxu0  ;;  %v4257_v49 = vpop.f32.mrf.mxu1  ;;  %v2111_v35 = vadd.f32 %v4234_v16, %v4309_v7  ;;  %v2107_v38 = vadd.f32 %v4226_v19, %v4309_v7  ;;  %v2275_v14 = vmax.f32 %v1916_v36, 0.0  ;;  %v2277_v39 = vmax.f32 %v2109_v26, 0.0 }
 0x35c   : > { %v2874_v3 = vcombine.low %v2823_v44, %v2829_v46  ;;  %v2875_v50 = vcombine.low %v2835_v45, %v2841_v47  ;;  %v1924_v45 = vadd.f32 %v4240_v30, %v4307_v22  ;;  %v2117_v6 = vadd.f32 %v4242_v33, %v4309_v7 }
 0x35d   : > { %v4259_v52 = vpop.f32.mrf.mxu0  ;;  %v4261_v55 = vpop.f32.mrf.mxu1  ;;  %v1926_v19 = vadd.f32 %v4244_v27, %v4299_v13  ;;  %v2119_v21 = vadd.f32 %v4246_v37, %v4301_v17  ;;  %v2267_v46 = vmax.f32 %v1912_v32, 0.0  ;;  %v2269_v23 = vmax.f32 %v2105_v25, 0.0 }
 0x35e   : > { %v4264_v29 = vrot.slane %v2874_v3, %v4249_v51  ;;  %v4267_v57 = vrot.slane %v2875_v50, %v4249_v51  ;;  %v2276_v47 = vmax.f32 %v1918_v34, 0.0  ;;  %v2278_v3 = vmax.f32 %v2111_v35, 0.0 }
 0x35f   : > { %v4269_v59 = vpop.f32.mrf.mxu0  ;;  %v4271_v56 = vpop.f32.mrf.mxu1  ;;  %v2268_v54 = vmax.f32 %v1914_v12, 0.0  ;;  %v2270_v53 = vmax.f32 %v2107_v38, 0.0  ;;  %v2283_v30 = vmax.f32 %v1922_v0, 0.0  ;;  %v2285_v61 = vmax.f32 %v2115_v1, 0.0 }
 0x360   : > { %v2906_v58 = vcombine.low %v4264_v29, %v4267_v57  ;;  %v2643_v60 = vmax.f32 %v2267_v46, %v2275_v14  ;;  %v2705_v33 = vmax.f32 %v2269_v23, %v2277_v39  ;;  %v1928_v27 = vadd.f32 %v4251_v41, %v4307_v22 }
 0x361   : > { %v4275_v62 = vpop.f32.mrf.mxu0  ;;  %v4277_v63 = vpop.f32.mrf.mxu1  ;;  %v2121_v37 = vadd.f32 %v4253_v43, %v4309_v7  ;;  %v2284_v32 = vmax.f32 %v1924_v45, 0.0  ;;  %v2286_v25 = vmax.f32 %v2117_v6, 0.0  ;;  %v2291_v34 = vmax.f32 %v1926_v19, 0.0 }
 0x362   : > { %v2293_v35 = vmax.f32 %v2119_v21, 0.0  ;;  %v2674_v12 = vmax.f32 %v2268_v54, %v2276_v47  ;;  %v2736_v38 = vmax.f32 %v2270_v53, %v2278_v3  ;;  %v1932_v0 = vadd.f32 %v4255_v48, %v4299_v13 }
 0x363   : > { %v4279_v2 = vpop.f32.mrf.mxu0  ;;  %v4281_v5 = vpop.f32.mrf.mxu1  ;;  %v2125_v1 = vadd.f32 %v4257_v49, %v4301_v17  ;;  %v2644_v43 = vmax.f32 %v2643_v60, %v2283_v30  ;;  %v2706_v39 = vmax.f32 %v2705_v33, %v2285_v61  ;;  %v1934_v45 = vadd.f32 %v4259_v52, %v4307_v22 }
 0x364   : > { %v2127_v6 = vadd.f32 %v4261_v55, %v4309_v7  ;;  %v2292_v19 = vmax.f32 %v1928_v27, 0.0  ;;  %v2294_v21 = vmax.f32 %v2121_v37, 0.0  ;;  %v1936_v48 = vadd.f32 %v4269_v59, %v4299_v13 }
 0x365   : > { %v4283_v4 = vpop.f32.mrf.mxu0  ;;  %v4285_v8 = vpop.f32.mrf.mxu1  ;;  %v2129_v49 = vadd.f32 %v4271_v56, %v4301_v17  ;;  %v2675_v47 = vmax.f32 %v2674_v12, %v2284_v32  ;;  %v2737_v3 = vmax.f32 %v2736_v38, %v2286_v25  ;;  %v2645_v54 = vmax.f32 %v2644_v43, %v2291_v34 }
 0x366   : > { %v2707_v53 = vmax.f32 %v2706_v39, %v2293_v35  ;;  %v2299_v52 = vmax.f32 %v1932_v0, 0.0  ;;  %v2301_v30 = vmax.f32 %v2125_v1, 0.0  ;;  %v1938_v55 = vadd.f32 %v4275_v62, %v4307_v22 }
 0x367   : > { %v4289_v15 = vpop.f32.mrf.mxu0  ;;  %v4291_v10 = vpop.f32.mrf.mxu1  ;;  %v2131_v61 = vadd.f32 %v4277_v63, %v4309_v7  ;;  %v2300_v56 = vmax.f32 %v1934_v45, 0.0  ;;  %v2302_v33 = vmax.f32 %v2127_v6, 0.0  ;;  %v1942_v27 = vadd.f32 %v4279_v2, %v4299_v13 }
 0x368   : > { %v2135_v37 = vadd.f32 %v4281_v5, %v4301_v17  ;;  %v2676_v32 = vmax.f32 %v2675_v47, %v2292_v19  ;;  %v2738_v25 = vmax.f32 %v2737_v3, %v2294_v21  ;;  %v2307_v34 = vmax.f32 %v1936_v48, 0.0 }
 0x369   : > { %v4295_v9 = vpop.f32.mrf.mxu0  ;;  %v4297_v11 = vpop.f32.mrf.mxu1  ;;  %v2309_v35 = vmax.f32 %v2129_v49, 0.0  ;;  %v1944_v63 = vadd.f32 %v4283_v4, %v4307_v22  ;;  %v2137_v38 = vadd.f32 %v4285_v8, %v4309_v7  ;;  %v1946_v2 = vadd.f32 %v4289_v15, %v4299_v13 }
 0x36a   : > { %v2139_v5 = vadd.f32 %v4291_v10, %v4301_v17  ;;  %v2646_v0 = vmax.f32 %v2645_v54, %v2299_v52  ;;  %v2708_v1 = vmax.f32 %v2707_v53, %v2301_v30  ;;  %v2308_v43 = vmax.f32 %v1938_v55, 0.0 }
 0x36b   : > { %v4303_v18 = vpop.f32.mrf.mxu0  ;;  %v4305_v20 = vpop.f32.mrf.mxu1  ;;  %v2310_v39 = vmax.f32 %v2131_v61, 0.0  ;;  %v2677_v19 = vmax.f32 %v2676_v32, %v2300_v56  ;;  %v2739_v21 = vmax.f32 %v2738_v25, %v2302_v33  ;;  %v2315_v4 = vmax.f32 %v1942_v27, 0.0 }
 0x36c   : > { %v2317_v48 = vmax.f32 %v2135_v37, 0.0  ;;  %v2647_v49 = vmax.f32 %v2646_v0, %v2307_v34  ;;  %v2709_v8 = vmax.f32 %v2708_v1, %v2309_v35  ;;  %v1948_v15 = vadd.f32 %v4295_v9, %v4307_v22 }
 0x36d   : > { %v4315_v28 = vpop.f32.mrf.mxu0  ;;  %v4317_v31 = vpop.f32.mrf.mxu1  ;;  %v2141_v10 = vadd.f32 %v4297_v11, %v4309_v7  ;;  %v2316_v54 = vmax.f32 %v1944_v63, 0.0  ;;  %v2318_v53 = vmax.f32 %v2137_v38, 0.0  ;;  %v2323_v52 = vmax.f32 %v1946_v2, 0.0 }
 0x36e   : > { %v2325_v30 = vmax.f32 %v2139_v5, 0.0  ;;  %v2678_v55 = vmax.f32 %v2677_v19, %v2308_v43  ;;  %v2740_v61 = vmax.f32 %v2739_v21, %v2310_v39  ;;  %v1952_v56 = vadd.f32 %v4303_v18, %v4299_v13 }
 0x36f   : > { %v4327_v40 = vpop.f32.mrf.mxu0  ;;  %v4329_v24 = vpop.f32.mrf.mxu1  ;;  %v2145_v33 = vadd.f32 %v4305_v20, %v4301_v17  ;;  %v2648_v11 = vmax.f32 %v2647_v49, %v2315_v4  ;;  %v2710_v37 = vmax.f32 %v2709_v8, %v2317_v48  ;;  %v1954_v32 = vadd.f32 %v4315_v28, %v4307_v22 }
 0x370   : > { %v2147_v25 = vadd.f32 %v4317_v31, %v4309_v7  ;;  %v2324_v34 = vmax.f32 %v1948_v15, 0.0  ;;  %v2326_v35 = vmax.f32 %v2141_v10, 0.0  ;;  %v1956_v18 = vadd.f32 %v4327_v40, %v4299_v13 }
 0x371   : > { %v4339_v44 = vpop.f32.mrf.mxu0  ;;  %v4341_v16 = vpop.f32.mrf.mxu1  ;;  %v2149_v20 = vadd.f32 %v4329_v24, %v4301_v17  ;;  %v2679_v2 = vmax.f32 %v2678_v55, %v2316_v54  ;;  %v2741_v5 = vmax.f32 %v2740_v61, %v2318_v53  ;;  %v2649_v0 = vmax.f32 %v2648_v11, %v2323_v52 }
 0x372   : > { %v2711_v1 = vmax.f32 %v2710_v37, %v2325_v30  ;;  %v2331_v28 = vmax.f32 %v1952_v56, 0.0  ;;  %v2333_v43 = vmax.f32 %v2145_v33, 0.0  ;;  %v1958_v31 = vadd.f32 %v4339_v44, %v4307_v22 }
 0x373   : > { %v4351_v50 = vpop.f32.mrf.mxu0  ;;  %v4353_v42 = vpop.f32.mrf.mxu1  ;;  %v2151_v39 = vadd.f32 %v4341_v16, %v4309_v7  ;;  %v2332_v24 = vmax.f32 %v1954_v32, 0.0  ;;  %v2334_v21 = vmax.f32 %v2147_v25, 0.0  ;;  %v2680_v49 = vmax.f32 %v2679_v2, %v2324_v34 }
 0x374   : > { %v1962_v4 = vadd.f32 %v4351_v50, %v4299_v13  ;;  %v2155_v48 = vadd.f32 %v4353_v42, %v4301_v17  ;;  %v2742_v8 = vmax.f32 %v2741_v5, %v2326_v35  ;;  %v2339_v15 = vmax.f32 %v1956_v18, 0.0 }
 0x375   : > { %v4359_v36 = vpop.f32.mrf.mxu0  ;;  %v4361_v26 = vpop.f32.mrf.mxu1  ;;  %v2341_v10 = vmax.f32 %v2149_v20, 0.0  ;;  %v2650_v52 = vmax.f32 %v2649_v0, %v2331_v28  ;;  %v2712_v30 = vmax.f32 %v2711_v1, %v2333_v43  ;;  %v2340_v55 = vmax.f32 %v1958_v31, 0.0 }
 0x376   : > { %v1964_v16 = vadd.f32 %v4359_v36, %v4307_v22  ;;  %v2157_v53 = vadd.f32 %v4361_v26, %v4309_v7  ;;  %v2342_v61 = vmax.f32 %v2151_v39, 0.0  ;;  %v2681_v11 = vmax.f32 %v2680_v49, %v2332_v24 }
 0x377   : > { %v4367_v41 = vpop.f32.mrf.mxu0  ;;  %v4369_v14 = vpop.f32.mrf.mxu1  ;;  %v2743_v37 = vmax.f32 %v2742_v8, %v2334_v21  ;;  %v2347_v36 = vmax.f32 %v1962_v4, 0.0  ;;  %v2349_v32 = vmax.f32 %v2155_v48, 0.0  ;;  %v2651_v25 = vmax.f32 %v2650_v52, %v2339_v15 }
 0x378   : > { %v1966_v50 = vadd.f32 %v4367_v41, %v4299_v13  ;;  %v2159_v42 = vadd.f32 %v4369_v14, %v4301_v17  ;;  %v2713_v26 = vmax.f32 %v2712_v30, %v2341_v10  ;;  %v2348_v18 = vmax.f32 %v1964_v16, 0.0 }
 0x379   : > { %v4379_v46 = vpop.f32.mrf.mxu0  ;;  %v4381_v23 = vpop.f32.mrf.mxu1  ;;  %v2350_v20 = vmax.f32 %v2157_v53, 0.0  ;;  %v2682_v0 = vmax.f32 %v2681_v11, %v2340_v55  ;;  %v2744_v1 = vmax.f32 %v2743_v37, %v2342_v61 }
 0x37a   : > { %v1968_v41 = vadd.f32 %v4379_v46, %v4307_v22  ;;  %v2161_v14 = vadd.f32 %v4381_v23, %v4309_v7  ;;  %v2355_v2 = vmax.f32 %v1966_v50, 0.0  ;;  %v2357_v5 = vmax.f32 %v2159_v42, 0.0 }
 0x37b   : > { %v4387_v59 = vpop.f32.mrf.mxu0  ;;  %v4389_v60 = vpop.f32.mrf.mxu1  ;;  %v2652_v23 = vmax.f32 %v2651_v25, %v2347_v36  ;;  %v2714_v39 = vmax.f32 %v2713_v26, %v2349_v32  ;;  %v2683_v15 = vmax.f32 %v2682_v0, %v2348_v18  ;;  %v2745_v10 = vmax.f32 %v2744_v1, %v2350_v20 }
 0x37c   : > { %v1972_v28 = vadd.f32 %v4387_v59, %v4299_v13  ;;  %v2165_v43 = vadd.f32 %v4389_v60, %v4301_v17  ;;  %v2356_v4 = vmax.f32 %v1968_v41, 0.0  ;;  %v2358_v48 = vmax.f32 %v2161_v14, 0.0 }
 0x37d   : > { %v4395_v62 = vpop.f32.mrf.mxu0  ;;  %v4397_v12 = vpop.f32.mrf.mxu1  ;;  %v2653_v16 = vmax.f32 %v2652_v23, %v2355_v2  ;;  %v2715_v53 = vmax.f32 %v2714_v39, %v2357_v5 }
 0x37e   : > { %v1974_v24 = vadd.f32 %v4395_v62, %v4307_v22  ;;  %v2167_v21 = vadd.f32 %v4397_v12, %v4309_v7  ;;  %v2363_v62 = vmax.f32 %v1972_v28, 0.0  ;;  %v2365_v50 = vmax.f32 %v2165_v43, 0.0 }
 0x37f   : > { %v4407_v45 = vpop.f32.mrf.mxu0  ;;  %v4409_v6 = vpop.f32.mrf.mxu1  ;;  %v2684_v11 = vmax.f32 %v2683_v15, %v2356_v4  ;;  %v2746_v37 = vmax.f32 %v2745_v10, %v2358_v48 }
 0x380   : > { %v1976_v59 = vadd.f32 %v4407_v45, %v4299_v13  ;;  %v2169_v60 = vadd.f32 %v4409_v6, %v4301_v17  ;;  %v2364_v6 = vmax.f32 %v1974_v24, 0.0  ;;  %v2366_v30 = vmax.f32 %v2167_v21, 0.0 }
 0x381   : > { %v4415_v47 = vpop.f32.mrf.mxu0  ;;  %v4417_v3 = vpop.f32.mrf.mxu1  ;;  %v2654_v14 = vmax.f32 %v2653_v16, %v2363_v62 }
 0x382   : > { %v1978_v12 = vadd.f32 %v4415_v47, %v4307_v22  ;;  %v2171_v42 = vadd.f32 %v4417_v3, %v4309_v7  ;;  %v2371_v36 = vmax.f32 %v1976_v59, 0.0  ;;  %v2373_v32 = vmax.f32 %v2169_v60, 0.0 }
 0x383   : > { %v4423_v9 = vpop.f32.mrf.mxu0  ;;  %v4425_v27 = vpop.f32.mrf.mxu1  ;;  %v2685_v0 = vmax.f32 %v2684_v11, %v2364_v6  ;;  %v2747_v1 = vmax.f32 %v2746_v37, %v2366_v30 }
 0x384   : > { %v1982_v55 = vadd.f32 %v4423_v9, %v4299_v13  ;;  %v2175_v61 = vadd.f32 %v4425_v27, %v4301_v17  ;;  %v2716_v27 = vmax.f32 %v2715_v53, %v2365_v50  ;;  %v2372_v18 = vmax.f32 %v1978_v12, 0.0 }
 0x385   : > { %v4435_v63 = vpop.f32.mrf.mxu0  ;;  %v4437_v38 = vpop.f32.mrf.mxu1  ;;  %v2374_v20 = vmax.f32 %v2171_v42, 0.0 }
 0x386   : > { %v1984_v3 = vadd.f32 %v4435_v63, %v4307_v22  ;;  %v2177_v26 = vadd.f32 %v4437_v38, %v4309_v7  ;;  %v2379_v28 = vmax.f32 %v1982_v55, 0.0  ;;  %v2381_v43 = vmax.f32 %v2175_v61, 0.0 }
 0x387   : > { %v4443_v40 = vpop.f32.mrf.mxu0  ;;  %v4445_v19 = vpop.f32.mrf.mxu1  ;;  %v2655_v63 = vmax.f32 %v2654_v14, %v2371_v36  ;;  %v2717_v23 = vmax.f32 %v2716_v27, %v2373_v32  ;;  %v2686_v59 = vmax.f32 %v2685_v0, %v2372_v18  ;;  %v2748_v60 = vmax.f32 %v2747_v1, %v2374_v20 }
 0x388   : > { %v1986_v41 = vadd.f32 %v4443_v40, %v4299_v13  ;;  %v2179_v9 = vadd.f32 %v4445_v19, %v4301_v17  ;;  %v2380_v24 = vmax.f32 %v1984_v3, 0.0  ;;  %v2382_v21 = vmax.f32 %v2177_v26, 0.0 }
 0x389   : > { %v4451_v44 = vpop.f32.mrf.mxu0  ;;  %v4453_v54 = vpop.f32.mrf.mxu1  ;;  %v2718_v62 = vmax.f32 %v2717_v23, %v2381_v43 }
 0x38a   : > { %v1988_v38 = vadd.f32 %v4451_v44, %v4307_v22  ;;  %v2181_v40 = vadd.f32 %v4453_v54, %v4309_v7  ;;  %v2387_v4 = vmax.f32 %v1986_v41, 0.0  ;;  %v2389_v48 = vmax.f32 %v2179_v9, 0.0 }
 0x38b   : > { %v4463_v56 = vpop.f32.mrf.mxu0  ;;  %v4465_v33 = vpop.f32.mrf.mxu1  ;;  %v2656_v44 = vmax.f32 %v2655_v63, %v2379_v28  ;;  %v2687_v55 = vmax.f32 %v2686_v59, %v2380_v24  ;;  %v2749_v61 = vmax.f32 %v2748_v60, %v2382_v21 }
 0x38c   : > { %v1992_v15 = vadd.f32 %v4463_v56, %v4299_v13  ;;  %v2185_v10 = vadd.f32 %v4465_v33, %v4301_v17  ;;  %v2388_v12 = vmax.f32 %v1988_v38, 0.0  ;;  %v2390_v42 = vmax.f32 %v2181_v40, 0.0 }
 0x38d   : > { %v4471_v34 = vpop.f32.mrf.mxu0  ;;  %v4473_v35 = vpop.f32.mrf.mxu1  ;;  %v2657_v11 = vmax.f32 %v2656_v44, %v2387_v4  ;;  %v2719_v37 = vmax.f32 %v2718_v62, %v2389_v48 }
 0x38e   : > { %v1994_v54 = vadd.f32 %v4471_v34, %v4307_v22  ;;  %v2187_v50 = vadd.f32 %v4473_v35, %v4309_v7  ;;  %v2395_v36 = vmax.f32 %v1992_v15, 0.0  ;;  %v2397_v32 = vmax.f32 %v2185_v10, 0.0 }
 0x38f   : > { %v4479_v46 = vpop.f32.mrf.mxu0  ;;  %v4481_v31 = vpop.f32.mrf.mxu1  ;;  %v2688_v14 = vmax.f32 %v2687_v55, %v2388_v12  ;;  %v2750_v27 = vmax.f32 %v2749_v61, %v2390_v42 }
 0x390   : > { %v1996_v6 = vadd.f32 %v4479_v46, %v4299_v13  ;;  %v2189_v56 = vadd.f32 %v4481_v31, %v4301_v17  ;;  %v2396_v46 = vmax.f32 %v1994_v54, 0.0  ;;  %v2398_v41 = vmax.f32 %v2187_v50, 0.0 }
 0x391   : > { %v4491_v49 = vpop.f32.mrf.mxu0  ;;  %v4493_v8 = vpop.f32.mrf.mxu1  ;;  %v2658_v63 = vmax.f32 %v2657_v11, %v2395_v36  ;;  %v2720_v23 = vmax.f32 %v2719_v37, %v2397_v32 }
 0x392   : > { %v1998_v34 = vadd.f32 %v4491_v49, %v4307_v22  ;;  %v2191_v35 = vadd.f32 %v4493_v8, %v4309_v7  ;;  %v2403_v18 = vmax.f32 %v1996_v6, 0.0  ;;  %v2405_v20 = vmax.f32 %v2189_v56, 0.0 }
 0x393   : > { %v4499_v45 = vpop.f32.mrf.mxu0  ;;  %v4501_v52 = vpop.f32.mrf.mxu1  ;;  %v2689_v24 = vmax.f32 %v2688_v14, %v2396_v46  ;;  %v2751_v21 = vmax.f32 %v2750_v27, %v2398_v41 }
 0x394   : > { %v2002_v31 = vadd.f32 %v4499_v45, %v4299_v13  ;;  %v2195_v9 = vadd.f32 %v4501_v52, %v4301_v17  ;;  %v2404_v45 = vmax.f32 %v1998_v34, 0.0  ;;  %v2406_v38 = vmax.f32 %v2191_v35, 0.0 }
 0x395   : > { %v2003_v47 = vpop.f32.mrf.mxu0  ;;  %v2196_v25 = vpop.f32.mrf.mxu1  ;;  %v2659_v59 = vmax.f32 %v2658_v63, %v2403_v18  ;;  %v2721_v60 = vmax.f32 %v2720_v23, %v2405_v20 }
 0x396   : > { %v2004_v49 = vadd.f32 %v2003_v47, %v4307_v22  ;;  %v2197_v8 = vadd.f32 %v2196_v25, %v4309_v7  ;;  %v2411_v4 = vmax.f32 %v2002_v31, 0.0  ;;  %v2413_v48 = vmax.f32 %v2195_v9, 0.0 }
 0x397   : > { %v2005_v2 = vpop.f32.mrf.mxu0  ;;  %v2198_v5 = vpop.f32.mrf.mxu1  ;;  %v2690_v54 = vmax.f32 %v2689_v24, %v2404_v45  ;;  %v2752_v50 = vmax.f32 %v2751_v21, %v2406_v38 }
 0x398   : > { %v2006_v28 = vadd.f32 %v2005_v2, %v4299_v13  ;;  %v2199_v43 = vadd.f32 %v2198_v5, %v4301_v17  ;;  %v2412_v10 = vmax.f32 %v2004_v49, 0.0  ;;  %v2414_v5 = vmax.f32 %v2197_v8, 0.0 }
 0x399   : > { %v2007_v39 = vpop.f32.mrf.mxu0  ;;  %v2200_v19 = vpop.f32.mrf.mxu1  ;;  %v2660_v55 = vmax.f32 %v2659_v59, %v2411_v4  ;;  %v2722_v61 = vmax.f32 %v2721_v60, %v2413_v48 }
 0x39a   : > { %v2008_v47 = vadd.f32 %v2007_v39, %v4307_v22  ;;  %v2201_v25 = vadd.f32 %v2200_v19, %v4309_v7  ;;  %v2419_v44 = vmax.f32 %v2006_v28, 0.0  ;;  %v2421_v62 = vmax.f32 %v2199_v43, 0.0 }
 0x39b   : > { %v2011_v16 = vpop.f32.mrf.mxu0  ;;  %v2204_v53 = vpop.f32.mrf.mxu1  ;;  %v2691_v46 = vmax.f32 %v2690_v54, %v2412_v10 }
 0x39c   : > { %v2012_v12 = vadd.f32 %v2011_v16, %v4299_v13  ;;  %v2205_v42 = vadd.f32 %v2204_v53, %v4301_v17  ;;  %v2420_v11 = vmax.f32 %v2008_v47, 0.0  ;;  %v2422_v37 = vmax.f32 %v2201_v25, 0.0 }
 0x39d   : > { %v2013_v30 = vpop.f32.mrf.mxu0  ;;  %v2206_v33 = vpop.f32.mrf.mxu1  ;;  %v2753_v16 = vmax.f32 %v2752_v50, %v2414_v5  ;;  %v2661_v41 = vmax.f32 %v2660_v55, %v2419_v44  ;;  %v2723_v53 = vmax.f32 %v2722_v61, %v2421_v62 }
 0x39e   : > { %v2014_v39 = vadd.f32 %v2013_v30, %v4307_v22  ;;  %v2207_v19 = vadd.f32 %v2206_v33, %v4309_v7  ;;  %v2427_v31 = vmax.f32 %v2012_v12, 0.0  ;;  %v2429_v9 = vmax.f32 %v2205_v42, 0.0 }
 0x39f   : > { %v2015_v3 = vpop.f32.mrf.mxu0  ;;  %v2208_v26 = vpop.f32.mrf.mxu1  ;;  %v2692_v49 = vmax.f32 %v2691_v46, %v2420_v11  ;;  %v2754_v8 = vmax.f32 %v2753_v16, %v2422_v37 }
 0x3a0   : > { %v2016_v36 = vadd.f32 %v2015_v3, %v4299_v13  ;;  %v2209_v32 = vadd.f32 %v2208_v26, %v4301_v17  ;;  %v2428_v18 = vmax.f32 %v2014_v39, 0.0  ;;  %v2430_v20 = vmax.f32 %v2207_v19, 0.0 }
 0x3a1   : > { %v2017_v0 = vpop.f32.mrf.mxu0  ;;  %v2210_v1 = vpop.f32.mrf.mxu1  ;;  %v2662_v24 = vmax.f32 %v2661_v41, %v2427_v31  ;;  %v2724_v21 = vmax.f32 %v2723_v53, %v2429_v9 }
 0x3a2   : > { %v2018_v14 = vadd.f32 %v2017_v0, %v4307_v22  ;;  %v2211_v30 = vadd.f32 %v2210_v1, %v4309_v7  ;;  %v2435_v28 = vmax.f32 %v2016_v36, 0.0  ;;  %v2437_v43 = vmax.f32 %v2209_v32, 0.0 }
 0x3a3   : > { %v2021_v40 = vpop.f32.mrf.mxu0  ;;  %v2214_v52 = vpop.f32.mrf.mxu1  ;;  %v2693_v59 = vmax.f32 %v2692_v49, %v2428_v18  ;;  %v2755_v60 = vmax.f32 %v2754_v8, %v2430_v20 }
 0x3a4   : > { %v2022_v3 = vadd.f32 %v2021_v40, %v4299_v13  ;;  %v2215_v26 = vadd.f32 %v2214_v52, %v4301_v17  ;;  %v2436_v4 = vmax.f32 %v2018_v14, 0.0  ;;  %v2438_v40 = vmax.f32 %v2211_v30, 0.0 }
 0x3a5   : > { %v2023_v15 = vpop.f32.mrf.mxu0  ;;  %v2216_v2 = vpop.f32.mrf.mxu1  ;;  %v2663_v10 = vmax.f32 %v2662_v24, %v2435_v28  ;;  %v2725_v5 = vmax.f32 %v2724_v21, %v2437_v43 }
 0x3a6   : > { %v2024_v45 = vadd.f32 %v2023_v15, %v4307_v22  ;;  %v2217_v0 = vadd.f32 %v2216_v2, %v4309_v7  ;;  %v2443_v47 = vmax.f32 %v2022_v3, 0.0  ;;  %v2445_v25 = vmax.f32 %v2215_v26, 0.0 }
 0x3a7   : > { %v2025_v6 = vpop.f32.mrf.mxu0  ;;  %v2218_v56 = vpop.f32.mrf.mxu1 }
 0x3a8   : > { %v2026_v1 = vadd.f32 %v2025_v6, %v4299_v13  ;;  %v2219_v38 = vadd.f32 %v2218_v56, %v4301_v17  ;;  %v2444_v54 = vmax.f32 %v2024_v45, 0.0  ;;  %v2446_v50 = vmax.f32 %v2217_v0, 0.0 }
 0x3a9   : > { %v2027_v34 = vpop.f32.mrf.mxu0  ;;  %v2220_v35 = vpop.f32.mrf.mxu1  ;;  %v2694_v6 = vmax.f32 %v2693_v59, %v2436_v4  ;;  %v2756_v56 = vmax.f32 %v2755_v60, %v2438_v40  ;;  %v2664_v11 = vmax.f32 %v2663_v10, %v2443_v47  ;;  %v2726_v37 = vmax.f32 %v2725_v5, %v2445_v25 }
 0x3aa   : > { %v2028_v15 = vadd.f32 %v2027_v34, %v4307_v22  ;;  %v2221_v2 = vadd.f32 %v2220_v35, %v4309_v7  ;;  %v2451_v12 = vmax.f32 %v2026_v1, 0.0  ;;  %v2453_v42 = vmax.f32 %v2219_v38, 0.0 }
 0x3ab   : > { %v2031_v27 = vpop.f32.mrf.mxu0  ;;  %v2224_v33 = vpop.f32.mrf.mxu1  ;;  %v2695_v31 = vmax.f32 %v2694_v6, %v2444_v54  ;;  %v2757_v9 = vmax.f32 %v2756_v56, %v2446_v50 }
 0x3ac   : > { %v2032_v55 = vadd.f32 %v2031_v27, %v4299_v13  ;;  %v2225_v61 = vadd.f32 %v2224_v33, %v4301_v17  ;;  %v2452_v34 = vmax.f32 %v2028_v15, 0.0  ;;  %v2454_v35 = vmax.f32 %v2221_v2, 0.0 }
 0x3ad   : > { %v2033_v63 = vpop.f32.mrf.mxu0  ;;  %v2226_v23 = vpop.f32.mrf.mxu1  ;;  %v2665_v14 = vmax.f32 %v2664_v11, %v2451_v12  ;;  %v2727_v30 = vmax.f32 %v2726_v37, %v2453_v42 }
 0x3ae   : > { %v2034_v36 = vadd.f32 %v2033_v63, %v4307_v22  ;;  %v2227_v32 = vadd.f32 %v2226_v23, %v4309_v7  ;;  %v2459_v27 = vmax.f32 %v2032_v55, 0.0  ;;  %v2461_v33 = vmax.f32 %v2225_v61, 0.0 }
 0x3af   : > { %v2035_v48 = vpop.f32.mrf.mxu0  ;;  %v2228_v52 = vpop.f32.mrf.mxu1  ;;  %v2696_v63 = vmax.f32 %v2695_v31, %v2452_v34  ;;  %v2758_v23 = vmax.f32 %v2757_v9, %v2454_v35 }
 0x3b0   : > { %v2036_v46 = vadd.f32 %v2035_v48, %v4299_v13  ;;  %v2229_v16 = vadd.f32 %v2228_v52, %v4301_v17  ;;  %v2460_v49 = vmax.f32 %v2034_v36, 0.0  ;;  %v2462_v8 = vmax.f32 %v2227_v32, 0.0 }
 0x3b1   : > { %v2037_v44 = vpop.f32.mrf.mxu0  ;;  %v2230_v62 = vpop.f32.mrf.mxu1  ;;  %v2666_v48 = vmax.f32 %v2665_v14, %v2459_v27  ;;  %v2728_v52 = vmax.f32 %v2727_v30, %v2461_v33 }
 0x3b2   : > { %v2038_v18 = vadd.f32 %v2037_v44, %v4307_v22  ;;  %v2231_v20 = vadd.f32 %v2230_v62, %v4309_v7  ;;  %v2467_v45 = vmax.f32 %v2036_v46, 0.0  ;;  %v2469_v0 = vmax.f32 %v2229_v16, 0.0 }
 0x3b3   : > { %v2041_v39 = vpop.f32.mrf.mxu0  ;;  %v2234_v19 = vpop.f32.mrf.mxu1  ;;  %v2697_v10 = vmax.f32 %v2696_v63, %v2460_v49  ;;  %v2759_v5 = vmax.f32 %v2758_v23, %v2462_v8 }
 0x3b4   : > { %v2042_v28 = vadd.f32 %v2041_v39, %v4299_v13  ;;  %v2235_v43 = vadd.f32 %v2234_v19, %v4301_v17  ;;  %v2468_v59 = vmax.f32 %v2038_v18, 0.0  ;;  %v2470_v60 = vmax.f32 %v2231_v20, 0.0 }
 0x3b5   : > { %v2043_v41 = vpop.f32.mrf.mxu0  ;;  %v2236_v53 = vpop.f32.mrf.mxu1  ;;  %v2667_v44 = vmax.f32 %v2666_v48, %v2467_v45  ;;  %v2729_v62 = vmax.f32 %v2728_v52, %v2469_v0 }
 0x3b6   : > { %v2044_v24 = vadd.f32 %v2043_v41, %v4307_v22  ;;  %v2237_v21 = vadd.f32 %v2236_v53, %v4309_v7  ;;  %v2475_v15 = vmax.f32 %v2042_v28, 0.0  ;;  %v2477_v2 = vmax.f32 %v2235_v43, 0.0 }
 0x3b7   : > { %v2045_v3 = vpop.f32.mrf.mxu0  ;;  %v2238_v26 = vpop.f32.mrf.mxu1  ;;  %v2698_v39 = vmax.f32 %v2697_v10, %v2468_v59  ;;  %v2760_v19 = vmax.f32 %v2759_v5, %v2470_v60 }
 0x3b8   : > { %v2046_v4 = vadd.f32 %v2045_v3, %v4299_v13  ;;  %v2239_v40 = vadd.f32 %v2238_v26, %v4301_v17  ;;  %v2476_v6 = vmax.f32 %v2044_v24, 0.0  ;;  %v2478_v56 = vmax.f32 %v2237_v21, 0.0 }
 0x3b9   : > { %v2047_v1 = vpop.f32.mrf.mxu0  ;;  %v2240_v38 = vpop.f32.mrf.mxu1  ;;  %v2668_v34 = vmax.f32 %v2667_v44, %v2475_v15  ;;  %v2730_v35 = vmax.f32 %v2729_v62, %v2477_v2 }
 0x3ba   : > { %v2048_v54 = vadd.f32 %v2047_v1, %v4307_v22  ;;  %v2241_v50 = vadd.f32 %v2240_v38, %v4309_v7  ;;  %v2483_v55 = vmax.f32 %v2046_v4, 0.0  ;;  %v2485_v61 = vmax.f32 %v2239_v40, 0.0 }
 0x3bb   : > { %v2051_v47 = vpop.f32.mrf.mxu0  ;;  %v2244_v25 = vpop.f32.mrf.mxu1  ;;  %v2699_v27 = vmax.f32 %v2698_v39, %v2476_v6  ;;  %v2761_v33 = vmax.f32 %v2760_v19, %v2478_v56 }
 0x3bc   : > { %v2052_v11 = vadd.f32 %v2051_v47, %v4299_v13  ;;  %v2245_v37 = vadd.f32 %v2244_v25, %v4301_v17  ;;  %v2484_v41 = vmax.f32 %v2048_v54, 0.0  ;;  %v2486_v53 = vmax.f32 %v2241_v50, 0.0 }
 0x3bd   : > { %v2053_v12 = vpop.f32.mrf.mxu0  ;;  %v2246_v42 = vpop.f32.mrf.mxu1  ;;  %v2669_v18 = vmax.f32 %v2668_v34, %v2483_v55  ;;  %v2731_v20 = vmax.f32 %v2730_v35, %v2485_v61 }
 0x3be   : > { %v2054_v46 = vadd.f32 %v2053_v12, %v4307_v22  ;;  %v2247_v16 = vadd.f32 %v2246_v42, %v4309_v7  ;;  %v2491_v3 = vmax.f32 %v2052_v11, 0.0  ;;  %v2493_v26 = vmax.f32 %v2245_v37, 0.0 }
 0x3bf   : > { %v2055_v36 = vpop.f32.mrf.mxu0  ;;  %v2248_v32 = vpop.f32.mrf.mxu1  ;;  %v2700_v1 = vmax.f32 %v2699_v27, %v2484_v41  ;;  %v2762_v38 = vmax.f32 %v2761_v33, %v2486_v53 }
 0x3c0   : > { %v2056_v31 = vadd.f32 %v2055_v36, %v4299_v13  ;;  %v2249_v9 = vadd.f32 %v2248_v32, %v4301_v17  ;;  %v2492_v63 = vmax.f32 %v2054_v46, 0.0  ;;  %v2494_v23 = vmax.f32 %v2247_v16, 0.0 }
 0x3c1   : > { %v2057_v14 = vpop.f32.mrf.mxu0  ;;  %v2250_v30 = vpop.f32.mrf.mxu1  ;;  %v2670_v47 = vmax.f32 %v2669_v18, %v2491_v3  ;;  %v2732_v25 = vmax.f32 %v2731_v20, %v2493_v26 }
 0x3c2   : > { %v2058_v49 = vadd.f32 %v2057_v14, %v4307_v22  ;;  %v2251_v8 = vadd.f32 %v2250_v30, %v4309_v7  ;;  %v2499_v24 = vmax.f32 %v2056_v31, 0.0  ;;  %v2501_v21 = vmax.f32 %v2249_v9, 0.0 }
 0x3c3   : > { %v2061_v28 = vpop.f32.mrf.mxu0  ;;  %v2254_v43 = vpop.f32.mrf.mxu1  ;;  %v2701_v44 = vmax.f32 %v2700_v1, %v2492_v63  ;;  %v2763_v62 = vmax.f32 %v2762_v38, %v2494_v23 }
 0x3c4   : > { %v2062_v45 = vadd.f32 %v2061_v28, %v4299_v13  ;;  %v2255_v0 = vadd.f32 %v2254_v43, %v4301_v17  ;;  %v2500_v48 = vmax.f32 %v2058_v49, 0.0  ;;  %v2502_v52 = vmax.f32 %v2251_v8, 0.0 }
 0x3c5   : > { %v2063_v4 = vpop.f32.mrf.mxu0  ;;  %v2256_v40 = vpop.f32.mrf.mxu1  ;;  %v2671_v12 = vmax.f32 %v2670_v47, %v2499_v24  ;;  %v2733_v42 = vmax.f32 %v2732_v25, %v2501_v21  ;;  %v2914_v25 = vrot.slane %v2906_v58, %v4249_v51 }
 0x3c6   : > { %v2064_v59 = vadd.f32 %v2063_v4, %v4307_v22  ;;  %v2257_v60 = vadd.f32 %v2256_v40, %v4309_v7  ;;  %v2507_v10 = vmax.f32 %v2062_v45, 0.0  ;;  %v2509_v5 = vmax.f32 %v2255_v0, 0.0 }
 0x3c7   : > { %v2065_v15 = vpop.f32.mrf.mxu0  ;;  %v2258_v2 = vpop.f32.mrf.mxu1  ;;  %v2702_v39 = vmax.f32 %v2701_v44, %v2500_v48  ;;  %v2764_v19 = vmax.f32 %v2763_v62, %v2502_v52 }
 0x3c8   : > { %v2508_v54 = vmax.f32 %v2064_v59, 0.0  ;;  %v2510_v50 = vmax.f32 %v2257_v60, 0.0  ;;  %v2066_v6 = vadd.f32 %v2065_v15, %v4299_v13  ;;  %v2259_v56 = vadd.f32 %v2258_v2, %v4301_v17 }
 0x3c9   : > { %v2067_v55 = vpop.f32.mrf.mxu0  ;;  %v2260_v61 = vpop.f32.mrf.mxu1  ;;  %v2672_v36 = vmax.f32 %v2671_v12, %v2507_v10  ;;  %v2734_v32 = vmax.f32 %v2733_v42, %v2509_v5 }
 0x3ca   : > { %v2068_v11 = vadd.f32 %v2067_v55, %v4307_v22  ;;  %v2261_v37 = vadd.f32 %v2260_v61, %v4309_v7  ;;  %v2515_v34 = vmax.f32 %v2066_v6, 0.0  ;;  %v2517_v35 = vmax.f32 %v2259_v56, 0.0 }
 0x3cb   : > { %v2703_v46 = vmax.f32 %v2702_v39, %v2508_v54  ;;  %v2765_v16 = vmax.f32 %v2764_v19, %v2510_v50 }
 0x3cc   : > { %v2516_v41 = vmax.f32 %v2068_v11, 0.0  ;;  %v2518_v53 = vmax.f32 %v2261_v37, 0.0  ;;  %v2673_v31 = vmax.f32 %v2672_v36, %v2515_v34  ;;  %v2735_v13 = vmax.f32 %v2734_v32, %v2517_v35 }
 0x3ce   : > { %v2704_v9 = vmax.f32 %v2703_v46, %v2516_v41  ;;  %v2766_v17 = vmax.f32 %v2765_v16, %v2518_v53  ;;  %v2842_v14 = vrot.slane %v2673_v31, 4  ;;  %v2854_v30 = vrot.slane %v2735_v13, 4 }
 0x3d0   : > { %v2848_v27 = vrot.slane %v2704_v9, 4  ;;  %v2860_v33 = vrot.slane %v2766_v17, 4  ;;  %v2843_v18 = vmax.f32 %v2673_v31, %v2842_v14  ;;  %v2855_v22 = vmax.f32 %v2735_v13, %v2854_v30 }
 0x3d2   : > { %v2849_v20 = vmax.f32 %v2704_v9, %v2848_v27  ;;  %v2861_v7 = vmax.f32 %v2766_v17, %v2860_v33  ;;  %v2844_v3 = vrot.slane %v2843_v18, 2  ;;  %v2856_v26 = vrot.slane %v2855_v22, 2 }
 0x3d4   : > { %v2850_v49 = vrot.slane %v2849_v20, 2  ;;  %v2862_v8 = vrot.slane %v2861_v7, 2  ;;  %v2845_v28 = vmax.f32 %v2843_v18, %v2844_v3  ;;  %v2857_v43 = vmax.f32 %v2855_v22, %v2856_v26 }
 0x3d6   : > { %v2851_v63 = vmax.f32 %v2849_v20, %v2850_v49  ;;  %v2863_v23 = vmax.f32 %v2861_v7, %v2862_v8  ;;  %v2846_v45 = vrot.slane %v2845_v28, 1  ;;  %v2858_v0 = vrot.slane %v2857_v43, 1 }
 0x3d8   : > { %v2852_v1 = vrot.slane %v2851_v63, 1  ;;  %v2864_v38 = vrot.slane %v2863_v23, 1  ;;  %v2847_v24 = vmax.f32 %v2845_v28, %v2846_v45  ;;  %v2859_v21 = vmax.f32 %v2857_v43, %v2858_v0 }
 0x3da   : > { %v2853_v4 = vmax.f32 %v2851_v63, %v2852_v1  ;;  %v2865_v40 = vmax.f32 %v2863_v23, %v2864_v38 }
 0x3dc   : > { %v2876_v48 = vcombine.low %v2847_v24, %v2853_v4  ;;  %v2877_v52 = vcombine.low %v2859_v21, %v2865_v40 }
 0x3de   : > { %v2898_v59 = vrot.slane %v2876_v48, %v4249_v51  ;;  %v2905_v60 = vrot.slane %v2877_v52, %v4249_v51 }
 0x3e0   : > { %v2907_v47 = vcombine.low %v2898_v59, %v2905_v60 }
 0x3e2   : > { %v2921_v10 = vrot.slane %v2907_v47, %v4249_v51 }
 0x3e4   : > { %v2922_v5 = vcombine.low %v2914_v25, %v2921_v10 }
 0x3e6   : > { %2924 = vst [vmem:[%s384_s20] sm:$0xff] %v2922_v5 }
 0x3e7 PF: > { %s21_s26 = sadd.s32 1, %s3612_s26   ;;  %s4632_s24 = smov %s3608_s25 }
 0x3e8   : > { %p18_p7 = scmp.ge.s32.totalorder %s21_s26, 4   ;;  %s4633_s25 = smov %s4635_s12 }
 0x3ea   :  { %20 = sbr.rel (!%p18_p7) target bundleno = 5 (0x5), region = 115 }
 0x3ef   :  { %2944 = vsyncpa [#allocation4], 1 }
 0x3f0   :  { %2946 = vsyncpa [#allocation4 + $0x1], 1 }
 0x3f1   :  { %2947 = vsyncpa [#allocation6], 1 }
 0x3f2   :  { %2948 = vsyncpa [#allocation9], 1 }
 0x3f3   :  { %2949 = vsyncpa [#allocation12], 1 }

// kernel: pointnet_cls_forward.5
= control target key start
LH: loop header
LB: loop body
LE: loop exit
PB: predicated region body
PF: predicated region fallthrough
CT: control target
= control target key end

     0   :  { %s1104_s12 = smov 0   ;;  %s1106_s13 = smov 0   ;;  %s1285_s0 = inlined_call_operand.vmem [shape: bf16[2,256,8], index: 0, kind: input, shape index: {}]   ;;  %s1286_s1 = inlined_call_operand.vmem [shape: bf16[2,8,64], index: 1, kind: input, shape index: {}]   ;;  %s1287_s2 = inlined_call_operand.vmem [shape: f32[1,64], index: 2, kind: input, shape index: {}]   ;;  %s1288_s3 = inlined_call_operand.vmem [shape: bf16[2,256,64], index: 3, kind: output, shape index: {}]  }
   0x1   :  { %s1108_s14 = smov 0  }
   0x2 LB: > { %s25_s15 = sadd.s32 1, %s1078_s13  ;;  %p858_p0 = scmp.ge.s32.totalorder %s1082_s14, 1  ;;  %s1082_s14 = sphi %s1108_s14, %s13_s14   ;;  %s1078_s13 = sphi %s1106_s13, %s1290_s13   ;;  %s1074_s12 = sphi %s1104_s12, %s1289_s12  }
   0x3   : > { %p27_p1 = scmp.ge.s32.totalorder %s25_s15, 2  ;;  %p167_p2 = scmp.lt.s32.totalorder %s1082_s14, 3 }
   0x5   : > { %s1292_s15 = smov (%p27_p1, %s25_s15), 0  ;;  %p168_p3 = pnand %p858_p0, %p167_p2 }
   0x6   : > { %p204_p4 = scmp.lt.s32.totalorder (!%p168_p3), %s1074_s12, 1 }
   0x7   : > { %171 = sbr.rel (%p168_p3) target bundleno = 250 (0xfa), region = 32 }
   0xc   : > { %s1294_s12 = smov (!%p204_p4, %s1074_s12), 1  ;;  %vm397_vm0 = vcmask 1043456   ;;  %vm348_vm1 = vcmask 64512   ;;  %v1171_v18 = vld [vmem:[%s1287_s2] ss:$0 sm:$0xff]  ;;  %vm722_vm2 = vcmask 519168  }
   0xd   : > { %s931_s16 = sshll.u32 %s1294_s12, 7  ;;  %s861_s17 = sshll.u32 %s1294_s12, 2 }
   0xe   : > { %s1131_s20 = scalar_lea.vmem %s1285_s0, %s931_s16  ;;  %s216_s23 = scalar_lea.vmem %s1286_s1, %s861_s17 }
   0xf   : > { %v260_v0 = vld [vmem:[%s216_s23] sm:$0xf]  ;;  %v1046_v4 = vld [vmem:[%s1131_s20 + $0x8] sm:$0xff]   ;;  %v1048_v6 = vld [vmem:[%s1131_s20 + $0x10] sm:$0xff]   ;;  %s1181_s28 = scalar_lea.vmem %s1288_s3, %s931_s16 }
  0x10   : > { %1018 = vmatprep.subr.msk.bf16.mxu0 %vm397_vm0, %v260_v0  ;;  %1019 = vmatprep.subr.msk.bf16.mxu1 %vm397_vm0, %v260_v0  ;;  %v399_v1 = vsel %vm397_vm0, %v260_v0, 0  ;;  %v1044_v2 = vld [vmem:[%s1131_s20] sm:$0xff]   ;;  %v1047_v5 = vld [vmem:[%s1131_s20 + $0x48] sm:$0xff]   ;;  %v1049_v7 = vld [vmem:[%s1131_s20 + $0x50] sm:$0xff]  }
  0x11   : > { %983 = vmatpush3.bf16.msra.mxu0 %v399_v1  ;;  %1017 = vmatpush3.bf16.msra.mxu1 %v399_v1  ;;  %v1045_v3 = vld [vmem:[%s1131_s20 + $0x40] sm:$0xff]   ;;  %v1050_v8 = vld [vmem:[%s1131_s20 + $0x18] sm:$0xff]   ;;  %v1054_v12 = vld [vmem:[%s1131_s20 + $0x28] sm:$0xff]  }
  0x12   : > { %984 = vmatprep.mubr.msk.bf16.mxu0 %vm348_vm1, %v1044_v2  ;;  %1000 = vmatprep.mubr.msk.bf16.mxu1 %vm348_vm1, %v1045_v3  ;;  %v1051_v9 = vld [vmem:[%s1131_s20 + $0x58] sm:$0xff]   ;;  %v1052_v10 = vld [vmem:[%s1131_s20 + $0x20] sm:$0xff]   ;;  %v1055_v13 = vld [vmem:[%s1131_s20 + $0x68] sm:$0xff]  }
  0x13   : > { %v1053_v11 = vld [vmem:[%s1131_s20 + $0x60] sm:$0xff]   ;;  %v1056_v14 = vld [vmem:[%s1131_s20 + $0x30] sm:$0xff]   ;;  %v1058_v16 = vld [vmem:[%s1131_s20 + $0x38] sm:$0xff]  }
  0x14   : > { %985 = vmatmul.mubr.msk.bf16.vlgmr.msra.gmra.mxu0 %vm348_vm1, %v1046_v4  ;;  %1001 = vmatmul.mubr.msk.bf16.vlgmr.msra.gmra.mxu1 %vm348_vm1, %v1047_v5  ;;  %v1057_v15 = vld [vmem:[%s1131_s20 + $0x70] sm:$0xff]   ;;  %v1059_v17 = vld [vmem:[%s1131_s20 + $0x78] sm:$0xff]  }
  0x15   : > { %988 = vmatprep.mubr.msk.bf16.mxu0 %vm348_vm1, %v1048_v6  ;;  %1004 = vmatprep.mubr.msk.bf16.mxu1 %vm348_vm1, %v1049_v7 }
  0x1c   : > { %989 = vmatmul.mubr.msk.bf16.gmra.mxu0 %vm348_vm1, %v1050_v8  ;;  %1005 = vmatmul.mubr.msk.bf16.gmra.mxu1 %vm348_vm1, %v1051_v9 }
  0x1d   : > { %992 = vmatprep.mubr.msk.bf16.mxu0 %vm348_vm1, %v1052_v10  ;;  %1008 = vmatprep.mubr.msk.bf16.mxu1 %vm348_vm1, %v1053_v11 }
  0x24   : > { %993 = vmatmul.mubr.msk.bf16.gmra.mxu0 %vm348_vm1, %v1054_v12  ;;  %1009 = vmatmul.mubr.msk.bf16.gmra.mxu1 %vm348_vm1, %v1055_v13 }
  0x25   : > { %996 = vmatprep.mubr.msk.bf16.mxu0 %vm348_vm1, %v1056_v14  ;;  %1012 = vmatprep.mubr.msk.bf16.mxu1 %vm348_vm1, %v1057_v15 }
  0x2c   : > { %997 = vmatmul.mubr.msk.bf16.gmra.mxu0 %vm348_vm1, %v1058_v16  ;;  %1013 = vmatmul.mubr.msk.bf16.gmra.mxu1 %vm348_vm1, %v1059_v17 }
  0xd4   : > { %v986_v19 = vpop.f32.mrf.mxu0  ;;  %v1002_v21 = vpop.f32.mrf.mxu1 }
  0xd5   : > { %v444_v20 = vadd.f32 %v986_v19, %v1171_v18  ;;  %v508_v22 = vadd.f32 %v1002_v21, %v1171_v18 }
  0xd6   : > { %v435_v23 = vpop.f32.mrf.mxu0  ;;  %v499_v26 = vpop.f32.mrf.mxu1 }
  0xd7   : > { %v564_v24 = vmax.f32 %v444_v20, 0.0  ;;  %v436_v25 = vadd.f32 %v1171_v18, %v435_v23  ;;  %v580_v27 = vmax.f32 %v508_v22, 0.0  ;;  %v500_v28 = vadd.f32 %v1171_v18, %v499_v26 }
  0xd8   : > { %v987_v29 = vpop.f32.mrf.mxu0  ;;  %v1003_v33 = vpop.f32.mrf.mxu1 }
  0xd9   : > { %v935_v30 = vpack.c.bf16 %v564_v24, %v564_v24  ;;  %v562_v31 = vmax.f32 %v436_v25, 0.0  ;;  %v447_v32 = vadd.f32 %v987_v29, %v1171_v18  ;;  %v951_v34 = vpack.c.bf16 %v580_v27, %v580_v27 }
  0xda   : > { %v578_v35 = vmax.f32 %v500_v28, 0.0  ;;  %v511_v36 = vadd.f32 %v1003_v33, %v1171_v18  ;;  %v438_v37 = vpop.f32.mrf.mxu0  ;;  %v502_v41 = vpop.f32.mrf.mxu1 }
  0xdb   : > { %725 = vst.msk [vmem:[%s1181_s28 + $0x8] sm:$0xf] %vm722_vm2, %v935_v30  ;;  %v933_v38 = vpack.c.bf16 %v562_v31, %v562_v31  ;;  %v565_v39 = vmax.f32 %v447_v32, 0.0  ;;  %v439_v40 = vadd.f32 %v1171_v18, %v438_v37  ;;  %741 = vst.msk [vmem:[%s1181_s28 + $0x48] sm:$0xf] %vm722_vm2, %v951_v34  ;;  %v503_v44 = vadd.f32 %v1171_v18, %v502_v41 }
  0xdc   : > { %v949_v42 = vpack.c.bf16 %v578_v35, %v578_v35  ;;  %v581_v43 = vmax.f32 %v511_v36, 0.0  ;;  %v990_v45 = vpop.f32.mrf.mxu0  ;;  %v1006_v49 = vpop.f32.mrf.mxu1 }
  0xdd   : > { %723 = vst.msk [vmem:[%s1181_s28] sm:$0xf] %vm722_vm2, %v933_v38  ;;  %v936_v46 = vpack.c.bf16 %v565_v39, %v565_v39  ;;  %v563_v47 = vmax.f32 %v439_v40, 0.0  ;;  %v460_v48 = vadd.f32 %v990_v45, %v1171_v18  ;;  %v579_v51 = vmax.f32 %v503_v44, 0.0 }
  0xde   : > { %739 = vst.msk [vmem:[%s1181_s28 + $0x40] sm:$0xf] %vm722_vm2, %v949_v42  ;;  %v952_v50 = vpack.c.bf16 %v581_v43, %v581_v43  ;;  %v524_v52 = vadd.f32 %v1006_v49, %v1171_v18  ;;  %v451_v53 = vpop.f32.mrf.mxu0  ;;  %v515_v57 = vpop.f32.mrf.mxu1 }
  0xdf   : > { %726 = vst.msk [vmem:[%s1181_s28 + $0xc] sm:$0xf] %vm722_vm2, %v936_v46  ;;  %v934_v54 = vpack.c.bf16 %v563_v47, %v563_v47  ;;  %v568_v55 = vmax.f32 %v460_v48, 0.0  ;;  %v452_v56 = vadd.f32 %v1171_v18, %v451_v53  ;;  %v950_v58 = vpack.c.bf16 %v579_v51, %v579_v51 }
  0xe0   : > { %742 = vst.msk [vmem:[%s1181_s28 + $0x4c] sm:$0xf] %vm722_vm2, %v952_v50  ;;  %v584_v59 = vmax.f32 %v524_v52, 0.0  ;;  %v516_v60 = vadd.f32 %v1171_v18, %v515_v57  ;;  %v991_v61 = vpop.f32.mrf.mxu0  ;;  %v1007_v1 = vpop.f32.mrf.mxu1 }
  0xe1   : > { %724 = vst.msk [vmem:[%s1181_s28 + $0x4] sm:$0xf] %vm722_vm2, %v934_v54  ;;  %v939_v62 = vpack.c.bf16 %v568_v55, %v568_v55  ;;  %v566_v63 = vmax.f32 %v452_v56, 0.0  ;;  %v463_v0 = vadd.f32 %v991_v61, %v1171_v18  ;;  %740 = vst.msk [vmem:[%s1181_s28 + $0x44] sm:$0xf] %vm722_vm2, %v950_v58  ;;  %v527_v4 = vadd.f32 %v1007_v1, %v1171_v18 }
  0xe2   : > { %v955_v2 = vpack.c.bf16 %v584_v59, %v584_v59  ;;  %v582_v3 = vmax.f32 %v516_v60, 0.0  ;;  %v454_v5 = vpop.f32.mrf.mxu0  ;;  %v518_v9 = vpop.f32.mrf.mxu1 }
  0xe3   : > { %729 = vst.msk [vmem:[%s1181_s28 + $0x18] sm:$0xf] %vm722_vm2, %v939_v62  ;;  %v937_v6 = vpack.c.bf16 %v566_v63, %v566_v63  ;;  %v569_v7 = vmax.f32 %v463_v0, 0.0  ;;  %v455_v8 = vadd.f32 %v1171_v18, %v454_v5  ;;  %v585_v11 = vmax.f32 %v527_v4, 0.0 }
  0xe4   : > { %745 = vst.msk [vmem:[%s1181_s28 + $0x58] sm:$0xf] %vm722_vm2, %v955_v2  ;;  %v953_v10 = vpack.c.bf16 %v582_v3, %v582_v3  ;;  %v519_v12 = vadd.f32 %v1171_v18, %v518_v9  ;;  %v994_v13 = vpop.f32.mrf.mxu0  ;;  %v1010_v17 = vpop.f32.mrf.mxu1 }
  0xe5   : > { %727 = vst.msk [vmem:[%s1181_s28 + $0x10] sm:$0xf] %vm722_vm2, %v937_v6  ;;  %v940_v14 = vpack.c.bf16 %v569_v7, %v569_v7  ;;  %v567_v15 = vmax.f32 %v455_v8, 0.0  ;;  %v476_v16 = vadd.f32 %v994_v13, %v1171_v18  ;;  %v956_v19 = vpack.c.bf16 %v585_v11, %v585_v11 }
  0xe6   : > { %743 = vst.msk [vmem:[%s1181_s28 + $0x50] sm:$0xf] %vm722_vm2, %v953_v10  ;;  %v583_v20 = vmax.f32 %v519_v12, 0.0  ;;  %v540_v21 = vadd.f32 %v1010_v17, %v1171_v18  ;;  %v467_v22 = vpop.f32.mrf.mxu0  ;;  %v531_v26 = vpop.f32.mrf.mxu1 }
  0xe7   : > { %730 = vst.msk [vmem:[%s1181_s28 + $0x1c] sm:$0xf] %vm722_vm2, %v940_v14  ;;  %v938_v23 = vpack.c.bf16 %v567_v15, %v567_v15  ;;  %v572_v24 = vmax.f32 %v476_v16, 0.0  ;;  %v468_v25 = vadd.f32 %v1171_v18, %v467_v22  ;;  %746 = vst.msk [vmem:[%s1181_s28 + $0x5c] sm:$0xf] %vm722_vm2, %v956_v19  ;;  %v532_v29 = vadd.f32 %v1171_v18, %v531_v26 }
  0xe8   : > { %v954_v27 = vpack.c.bf16 %v583_v20, %v583_v20  ;;  %v588_v28 = vmax.f32 %v540_v21, 0.0  ;;  %v995_v30 = vpop.f32.mrf.mxu0  ;;  %v1011_v34 = vpop.f32.mrf.mxu1 }
  0xe9   : > { %728 = vst.msk [vmem:[%s1181_s28 + $0x14] sm:$0xf] %vm722_vm2, %v938_v23  ;;  %v943_v31 = vpack.c.bf16 %v572_v24, %v572_v24  ;;  %v570_v32 = vmax.f32 %v468_v25, 0.0  ;;  %v479_v33 = vadd.f32 %v995_v30, %v1171_v18  ;;  %v586_v36 = vmax.f32 %v532_v29, 0.0 }
  0xea   : > { %744 = vst.msk [vmem:[%s1181_s28 + $0x54] sm:$0xf] %vm722_vm2, %v954_v27  ;;  %v959_v35 = vpack.c.bf16 %v588_v28, %v588_v28  ;;  %v543_v37 = vadd.f32 %v1011_v34, %v1171_v18  ;;  %v470_v38 = vpop.f32.mrf.mxu0  ;;  %v534_v42 = vpop.f32.mrf.mxu1 }
  0xeb   : > { %733 = vst.msk [vmem:[%s1181_s28 + $0x28] sm:$0xf] %vm722_vm2, %v943_v31  ;;  %v941_v39 = vpack.c.bf16 %v570_v32, %v570_v32  ;;  %v573_v40 = vmax.f32 %v479_v33, 0.0  ;;  %v471_v41 = vadd.f32 %v1171_v18, %v470_v38  ;;  %v957_v43 = vpack.c.bf16 %v586_v36, %v586_v36 }
  0xec   : > { %749 = vst.msk [vmem:[%s1181_s28 + $0x68] sm:$0xf] %vm722_vm2, %v959_v35  ;;  %v589_v44 = vmax.f32 %v543_v37, 0.0  ;;  %v535_v45 = vadd.f32 %v1171_v18, %v534_v42  ;;  %v998_v46 = vpop.f32.mrf.mxu0  ;;  %v1014_v50 = vpop.f32.mrf.mxu1 }
  0xed   : > { %731 = vst.msk [vmem:[%s1181_s28 + $0x20] sm:$0xf] %vm722_vm2, %v941_v39  ;;  %v944_v47 = vpack.c.bf16 %v573_v40, %v573_v40  ;;  %v571_v48 = vmax.f32 %v471_v41, 0.0  ;;  %v492_v49 = vadd.f32 %v998_v46, %v1171_v18  ;;  %747 = vst.msk [vmem:[%s1181_s28 + $0x60] sm:$0xf] %vm722_vm2, %v957_v43  ;;  %v556_v53 = vadd.f32 %v1014_v50, %v1171_v18 }
  0xee   : > { %v960_v51 = vpack.c.bf16 %v589_v44, %v589_v44  ;;  %v587_v52 = vmax.f32 %v535_v45, 0.0  ;;  %v483_v54 = vpop.f32.mrf.mxu0  ;;  %v547_v58 = vpop.f32.mrf.mxu1 }
  0xef   : > { %734 = vst.msk [vmem:[%s1181_s28 + $0x2c] sm:$0xf] %vm722_vm2, %v944_v47  ;;  %v942_v55 = vpack.c.bf16 %v571_v48, %v571_v48  ;;  %v576_v56 = vmax.f32 %v492_v49, 0.0  ;;  %v484_v57 = vadd.f32 %v1171_v18, %v483_v54  ;;  %v592_v60 = vmax.f32 %v556_v53, 0.0 }
  0xf0   : > { %750 = vst.msk [vmem:[%s1181_s28 + $0x6c] sm:$0xf] %vm722_vm2, %v960_v51  ;;  %v958_v59 = vpack.c.bf16 %v587_v52, %v587_v52  ;;  %v548_v61 = vadd.f32 %v1171_v18, %v547_v58  ;;  %v999_v62 = vpop.f32.mrf.mxu0  ;;  %v1015_v2 = vpop.f32.mrf.mxu1 }
  0xf1   : > { %732 = vst.msk [vmem:[%s1181_s28 + $0x24] sm:$0xf] %vm722_vm2, %v942_v55  ;;  %v947_v63 = vpack.c.bf16 %v576_v56, %v576_v56  ;;  %v574_v0 = vmax.f32 %v484_v57, 0.0  ;;  %v495_v1 = vadd.f32 %v999_v62, %v1171_v18  ;;  %v963_v3 = vpack.c.bf16 %v592_v60, %v592_v60 }
  0xf2   : > { %748 = vst.msk [vmem:[%s1181_s28 + $0x64] sm:$0xf] %vm722_vm2, %v958_v59  ;;  %v590_v4 = vmax.f32 %v548_v61, 0.0  ;;  %v559_v5 = vadd.f32 %v1015_v2, %v1171_v18  ;;  %v486_v6 = vpop.f32.mrf.mxu0  ;;  %v550_v10 = vpop.f32.mrf.mxu1 }
  0xf3   : > { %737 = vst.msk [vmem:[%s1181_s28 + $0x38] sm:$0xf] %vm722_vm2, %v947_v63  ;;  %v945_v7 = vpack.c.bf16 %v574_v0, %v574_v0  ;;  %v577_v8 = vmax.f32 %v495_v1, 0.0  ;;  %v487_v9 = vadd.f32 %v1171_v18, %v486_v6  ;;  %753 = vst.msk [vmem:[%s1181_s28 + $0x78] sm:$0xf] %vm722_vm2, %v963_v3  ;;  %v551_v13 = vadd.f32 %v1171_v18, %v550_v10 }
  0xf4   : > { %v961_v11 = vpack.c.bf16 %v590_v4, %v590_v4  ;;  %v593_v12 = vmax.f32 %v559_v5, 0.0 }
  0xf5   : > { %735 = vst.msk [vmem:[%s1181_s28 + $0x30] sm:$0xf] %vm722_vm2, %v945_v7  ;;  %v948_v14 = vpack.c.bf16 %v577_v8, %v577_v8  ;;  %v575_v15 = vmax.f32 %v487_v9, 0.0  ;;  %v591_v17 = vmax.f32 %v551_v13, 0.0 }
  0xf6   : > { %751 = vst.msk [vmem:[%s1181_s28 + $0x70] sm:$0xf] %vm722_vm2, %v961_v11  ;;  %v964_v16 = vpack.c.bf16 %v593_v12, %v593_v12 }
  0xf7   : > { %738 = vst.msk [vmem:[%s1181_s28 + $0x3c] sm:$0xf] %vm722_vm2, %v948_v14  ;;  %v946_v19 = vpack.c.bf16 %v575_v15, %v575_v15  ;;  %v962_v20 = vpack.c.bf16 %v591_v17, %v591_v17 }
  0xf8   : > { %754 = vst.msk [vmem:[%s1181_s28 + $0x7c] sm:$0xf] %vm722_vm2, %v964_v16 }
  0xf9   : > { %736 = vst.msk [vmem:[%s1181_s28 + $0x34] sm:$0xf] %vm722_vm2, %v946_v19  ;;  %752 = vst.msk [vmem:[%s1181_s28 + $0x74] sm:$0xf] %vm722_vm2, %v962_v20 }
  0xfa PF: > { %s13_s14 = sadd.s32 1, %s1082_s14   ;;  %s1289_s12 = smov %s1078_s13 }
  0xfb   : > { %p10_p5 = scmp.ge.s32.totalorder %s13_s14, 4   ;;  %s1290_s13 = smov %s1292_s15 }
  0xfd   :  { %12 = sbr.rel (!%p10_p5) target bundleno = 2 (0x2), region = 65 }

// kernel: pointnet_cls_forward.6
= control target key start
LH: loop header
LB: loop body
LE: loop exit
PB: predicated region body
PF: predicated region fallthrough
CT: control target
= control target key end

     0   :  { %s3308_s24 = smov 0   ;;  %s3310_s25 = smov 0   ;;  %s4390_s0 = inlined_call_operand.vmem [shape: bf16[2,256,64], index: 0, kind: input, shape index: {}]   ;;  %s4391_s1 = inlined_call_operand.vmem [shape: bf16[64,64], index: 1, kind: input, shape index: {}]   ;;  %s4392_s2 = inlined_call_operand.vmem [shape: f32[1,64], index: 2, kind: input, shape index: {}]   ;;  %s4393_s3 = inlined_call_operand.vmem [shape: bf16[64,128], index: 3, kind: input, shape index: {}]   ;;  %s4394_s4 = inlined_call_operand.vmem [shape: f32[1,128], index: 4, kind: input, shape index: {}]   ;;  %s4395_s5 = inlined_call_operand.vmem [shape: bf16[128,1024], index: 5, kind: input, shape index: {}]   ;;  %s4396_s6 = inlined_call_operand.vmem [shape: f32[1,1024], index: 6, kind: input, shape index: {}]   ;;  %s4397_s7 = inlined_call_operand.vmem [shape: f32[2,1,1024], index: 7, kind: output, shape index: {}]  }
   0x1   :  { %s3312_s26 = smov 0  }
   0x2 LB: > { %s29_s27 = sadd.s32 1, %s3260_s25  ;;  %p2942_p0 = scmp.ge.s32.totalorder %s3264_s26, 1  ;;  %s3264_s26 = sphi %s3312_s26, %s17_s26   ;;  %s3260_s25 = sphi %s3310_s25, %s4399_s25   ;;  %s3256_s24 = sphi %s3308_s24, %s4398_s24  }
   0x3   : > { %p31_p1 = scmp.ge.s32.totalorder %s29_s27, 2  ;;  %p256_p2 = scmp.lt.s32.totalorder %s3264_s26, 3 }
   0x5   : > { %s4401_s27 = smov (%p31_p1, %s29_s27), 0  ;;  %p257_p3 = pnand %p2942_p0, %p256_p2 }
   0x6   : > { %p292_p4 = scmp.lt.s32.totalorder (!%p257_p3), %s3256_s24, 1 }
   0x7   : > { %260 = sbr.rel (%p257_p3) target bundleno = 916 (0x394), region = 48 }
   0xc   : > { %v3217_v0 = vld [vmem:[%s4391_s1 + $0x18] sm:$0xff]   ;;  %v3218_v1 = vld [vmem:[%s4391_s1 + $0x10] sm:$0xff]   ;;  %s4403_s24 = smov (!%p292_p4, %s3256_s24), 1  ;;  %v3219_v2 = vld [vmem:[%s4391_s1 + $0x8] sm:$0xff]   ;;  %vm457_vm0 = vcmask 523264  }
   0xd   : > { %3111 = vmatprep.subr.bf16.mxu0 %v3217_v0  ;;  %s3070_s11 = sshll.u32 %s4403_s24, 7  ;;  %v3237_v3 = vld [vmem:[%s4393_s3 + $0x18] sm:$0xff]   ;;  %v3220_v5 = vld [vmem:[%s4391_s1] sm:$0xff]   ;;  %v3238_v21 = vld [vmem:[%s4393_s3 + $0x10] sm:$0xff]   ;;  %s2945_s9 = sshll.u32 %s4403_s24, 3 }
   0xe   : > { %3112 = vmatpush3.bf16.msra.mxu0 %v3217_v0  ;;  %s3344_s16 = scalar_lea.vmem %s4390_s0, %s3070_s11  ;;  %3151 = vmatprep.subr.bf16.mxu1 %v3237_v3  ;;  %v3239_v22 = vld [vmem:[%s4393_s3 + $0x8] sm:$0xff]   ;;  %v3240_v23 = vld [vmem:[%s4393_s3] sm:$0xff]   ;;  %s304_s12 = scalar_lea.vmem %s4397_s7, %s2945_s9 }
   0xf   : > { %3113 = vmatprep.subr.bf16.mxu0 %v3218_v1  ;;  %v3221_v4 = vld [vmem:[%s3344_s16] sm:$0xff]   ;;  %3152 = vmatpush3.bf16.msra.mxu1 %v3237_v3  ;;  %v3222_v6 = vld [vmem:[%s3344_s16 + $0x8] sm:$0xff]   ;;  %v3223_v7 = vld [vmem:[%s3344_s16 + $0x10] sm:$0xff]  }
  0x10   : > { %3119 = vmatprep.mubr.msk.bf16.mxu0 %vm457_vm0, %v3221_v4  ;;  %v3224_v8 = vld [vmem:[%s3344_s16 + $0x18] sm:$0xff]   ;;  %v3225_v9 = vld [vmem:[%s3344_s16 + $0x20] sm:$0xff]   ;;  %v3226_v10 = vld [vmem:[%s3344_s16 + $0x28] sm:$0xff]   ;;  %3153 = vmatprep.subr.bf16.mxu1 %v3238_v21 }
  0x11   : > { %v3227_v11 = vld [vmem:[%s3344_s16 + $0x30] sm:$0xff]   ;;  %v3228_v12 = vld [vmem:[%s3344_s16 + $0x38] sm:$0xff]   ;;  %v3229_v13 = vld [vmem:[%s3344_s16 + $0x40] sm:$0xff]  }
  0x12   : > { %3114 = vmatpush3.bf16.msra.mxu0 %v3218_v1  ;;  %v3230_v14 = vld [vmem:[%s3344_s16 + $0x48] sm:$0xff]   ;;  %v3231_v15 = vld [vmem:[%s3344_s16 + $0x50] sm:$0xff]   ;;  %v3232_v16 = vld [vmem:[%s3344_s16 + $0x58] sm:$0xff]  }
  0x13   : > { %3115 = vmatprep.subr.bf16.mxu0 %v3219_v2  ;;  %v3233_v17 = vld [vmem:[%s3344_s16 + $0x60] sm:$0xff]   ;;  %v3234_v18 = vld [vmem:[%s3344_s16 + $0x68] sm:$0xff]   ;;  %v3235_v19 = vld [vmem:[%s3344_s16 + $0x70] sm:$0xff]   ;;  %3154 = vmatpush3.bf16.msra.mxu1 %v3238_v21 }
  0x14   : > { %v3236_v20 = vld [vmem:[%s3344_s16 + $0x78] sm:$0xff]   ;;  %3155 = vmatprep.subr.bf16.mxu1 %v3239_v22  ;;  %v1051_v24 = vld [vmem:[%s4395_s5 + $0x1c0] sm:$0xff]  ;;  %v3399_v26 = vld [vmem:[%s4395_s5 + $0x1c8] sm:$0xff] }
  0x15   : > { %v1055_v25 = vld [vmem:[%s4395_s5 + $0x1e0] sm:$0xff]  ;;  %v3404_v29 = vld [vmem:[%s4395_s5 + $0x1e8] sm:$0xff] }
  0x16   : > { %3116 = vmatpush3.bf16.msra.mxu0 %v3219_v2  ;;  %v3060_v27 = vcombine.low %v1051_v24, %v1055_v25  ;;  %v3061_v28 = vcombine.high %v1051_v24, %v1055_v25  ;;  %v1043_v30 = vld [vmem:[%s4395_s5 + $0x180] sm:$0xff]  ;;  %v3062_v32 = vcombine.low %v3399_v26, %v3404_v29  ;;  %v3063_v33 = vcombine.high %v3399_v26, %v3404_v29 }
  0x17   : > { %3117 = vmatprep.subr.bf16.mxu0 %v3220_v5  ;;  %3156 = vmatpush3.bf16.msra.mxu1 %v3239_v22  ;;  %v1047_v31 = vld [vmem:[%s4395_s5 + $0x1a0] sm:$0xff] }
  0x18   : > { %3157 = vmatprep.subr.bf16.mxu1 %v3240_v23  ;;  %v3053_v34 = vcombine.high %v1043_v30, %v1047_v31  ;;  %v1035_v35 = vld [vmem:[%s4395_s5 + $0x140] sm:$0xff]  ;;  %v3052_v37 = vcombine.low %v1043_v30, %v1047_v31  ;;  %v1032_v30 = vld [vmem:[%s4395_s5 + $0x128] sm:$0xff] }
  0x19   : > { %v1039_v36 = vld [vmem:[%s4395_s5 + $0x160] sm:$0xff] }
  0x1a   : > { %3118 = vmatpush3.bf16.msra.mxu0 %v3220_v5  ;;  %v3045_v38 = vcombine.high %v1035_v35, %v1039_v36  ;;  %v1027_v39 = vld [vmem:[%s4395_s5 + $0x100] sm:$0xff]  ;;  %v3044_v41 = vcombine.low %v1035_v35, %v1039_v36  ;;  %v1044_v5 = vld [vmem:[%s4395_s5 + $0x188] sm:$0xff] }
  0x1b   : > { %3158 = vmatpush3.bf16.msra.mxu1 %v3240_v23  ;;  %1437 = vmatprep.subr.bf16.mxu0 %v3061_v28  ;;  %v1031_v40 = vld [vmem:[%s4395_s5 + $0x120] sm:$0xff]  ;;  %v1028_v28 = vld [vmem:[%s4395_s5 + $0x108] sm:$0xff] }
  0x1c   : > { %1630 = vmatprep.subr.bf16.mxu1 %v3063_v33  ;;  %v3037_v42 = vcombine.high %v1027_v39, %v1031_v40  ;;  %v1019_v43 = vld [vmem:[%s4395_s5 + $0xc0] sm:$0xff]  ;;  %v3036_v45 = vcombine.low %v1027_v39, %v1031_v40  ;;  %v3039_v36 = vcombine.high %v1028_v28, %v1032_v30  ;;  %v1024_v39 = vld [vmem:[%s4395_s5 + $0xe8] sm:$0xff] }
  0x1d   : > { %3120 = vmatmul.mubr.msk.bf16.vlgmr.msra.gmra.mxu0 %vm457_vm0, %v3222_v6  ;;  %v1023_v44 = vld [vmem:[%s4395_s5 + $0xe0] sm:$0xff]  ;;  %v1048_v6 = vld [vmem:[%s4395_s5 + $0x1a8] sm:$0xff] }
  0x1e   : > { %3123 = vmatprep.mubr.msk.bf16.mxu0 %vm457_vm0, %v3223_v7  ;;  %1438 = vmatpush1.bf16.msra.mxu0 %v3060_v27  ;;  %v3029_v46 = vcombine.high %v1019_v43, %v1023_v44  ;;  %v1011_v47 = vld [vmem:[%s4395_s5 + $0x80] sm:$0xff]  ;;  %v3028_v49 = vcombine.low %v1019_v43, %v1023_v44  ;;  %v3054_v23 = vcombine.low %v1044_v5, %v1048_v6 }
  0x1f   : > { %1439 = vmatprep.subr.bf16.mxu0 %v3053_v34  ;;  %v1015_v48 = vld [vmem:[%s4395_s5 + $0xa0] sm:$0xff] }
  0x20   : > { %v3021_v50 = vcombine.high %v1011_v47, %v1015_v48  ;;  %v1003_v51 = vld [vmem:[%s4395_s5 + $0x40] sm:$0xff]  ;;  %v3020_v53 = vcombine.low %v1011_v47, %v1015_v48 }
  0x21   : > { %v1007_v52 = vld [vmem:[%s4395_s5 + $0x60] sm:$0xff] }
  0x22   : > { %1440 = vmatpush1.bf16.msra.mxu0 %v3052_v37  ;;  %v3013_v54 = vcombine.high %v1003_v51, %v1007_v52  ;;  %v3012_v55 = vcombine.low %v1003_v51, %v1007_v52  ;;  %v3449_v58 = vld [vmem:[%s4392_s2] ss:$0 sm:$0xff] }
  0x23   : > { %1441 = vmatprep.subr.bf16.mxu0 %v3045_v38  ;;  %v1020_v38 = vld [vmem:[%s4395_s5 + $0xc8] sm:$0xff] }
  0x24   : > { %v3031_v47 = vcombine.high %v1020_v38, %v1024_v39 }
  0x25   : > { %3124 = vmatmul.mubr.msk.bf16.gmra.mxu0 %vm457_vm0, %v3224_v8 }
  0x26   : > { %3127 = vmatprep.mubr.msk.bf16.mxu0 %vm457_vm0, %v3225_v9  ;;  %1442 = vmatpush1.bf16.msra.mxu0 %v3044_v41 }
  0x27   : > { %1443 = vmatprep.subr.bf16.mxu0 %v3037_v42 }
  0x2a   : > { %1444 = vmatpush1.bf16.msra.mxu0 %v3036_v45  ;;  %v3038_v45 = vcombine.low %v1028_v28, %v1032_v30 }
  0x2b   : > { %1445 = vmatprep.subr.bf16.mxu0 %v3029_v46 }
  0x2d   : > { %3128 = vmatmul.mubr.msk.bf16.gmra.mxu0 %vm457_vm0, %v3226_v10 }
  0x2e   : > { %3131 = vmatprep.mubr.msk.bf16.mxu0 %vm457_vm0, %v3227_v11  ;;  %1446 = vmatpush1.bf16.msra.mxu0 %v3028_v49  ;;  %v1012_v49 = vld [vmem:[%s4395_s5 + $0x88] sm:$0xff] }
  0x2f   : > { %1447 = vmatprep.subr.bf16.mxu0 %v3021_v50  ;;  %v1016_v50 = vld [vmem:[%s4395_s5 + $0xa8] sm:$0xff] }
  0x32   : > { %1448 = vmatpush1.bf16.msra.mxu0 %v3020_v53 }
  0x33   : > { %1449 = vmatprep.subr.bf16.mxu0 %v3013_v54 }
  0x35   : > { %3132 = vmatmul.mubr.msk.bf16.gmra.mxu0 %vm457_vm0, %v3228_v12 }
  0x36   : > { %3135 = vmatprep.mubr.msk.bf16.mxu0 %vm457_vm0, %v3229_v13  ;;  %1450 = vmatpush1.bf16.msra.mxu0 %v3012_v55 }
  0x3d   : > { %3136 = vmatmul.mubr.msk.bf16.gmra.mxu0 %vm457_vm0, %v3230_v14  ;;  %v3055_v14 = vcombine.high %v1044_v5, %v1048_v6 }
  0x3e   : > { %3139 = vmatprep.mubr.msk.bf16.mxu0 %vm457_vm0, %v3231_v15 }
  0x45   : > { %3140 = vmatmul.mubr.msk.bf16.gmra.mxu0 %vm457_vm0, %v3232_v16  ;;  %v1036_v16 = vld [vmem:[%s4395_s5 + $0x148] sm:$0xff] }
  0x46   : > { %3143 = vmatprep.mubr.msk.bf16.mxu0 %vm457_vm0, %v3233_v17  ;;  %v1040_v17 = vld [vmem:[%s4395_s5 + $0x168] sm:$0xff] }
  0x47   : > { %v3047_v25 = vcombine.high %v1036_v16, %v1040_v17  ;;  %v3046_v29 = vcombine.low %v1036_v16, %v1040_v17 }
  0x4d   : > { %3144 = vmatmul.mubr.msk.bf16.gmra.mxu0 %vm457_vm0, %v3234_v18 }
  0x4e   : > { %3147 = vmatprep.mubr.msk.bf16.mxu0 %vm457_vm0, %v3235_v19 }
  0x55   : > { %3148 = vmatmul.mubr.msk.bf16.gmra.mxu0 %vm457_vm0, %v3236_v20 }
  0xdd   : > { %v3121_v56 = vpop.f32.mrf.mxu0 }
  0xde   : > { %v549_v62 = vadd.f32 %v3121_v56, %v3449_v58  ;;  %v3030_v56 = vcombine.low %v1020_v38, %v1024_v39 }
  0xdf   : > { %v540_v57 = vpop.f32.mrf.mxu0 }
  0xe0   : > { %v541_v60 = vadd.f32 %v3449_v58, %v540_v57  ;;  %v669_v7 = vmax.f32 %v549_v62, 0.0  ;;  %v1008_v62 = vld [vmem:[%s4395_s5 + $0x68] sm:$0xff] }
  0xe1   : > { %v3122_v59 = vpop.f32.mrf.mxu0 }
  0xe2   : > { %v552_v61 = vadd.f32 %v3122_v59, %v3449_v58  ;;  %v667_v3 = vmax.f32 %v541_v60, 0.0  ;;  %v3023_v59 = vcombine.high %v1012_v49, %v1016_v50 }
  0xe3   : > { %v543_v63 = vpop.f32.mrf.mxu0 }
  0xe4   : > { %v544_v0 = vadd.f32 %v3449_v58, %v543_v63  ;;  %v670_v1 = vmax.f32 %v552_v61, 0.0  ;;  %v1004_v61 = vld [vmem:[%s4395_s5 + $0x48] sm:$0xff] }
  0xe5   : > { %v3125_v2 = vpop.f32.mrf.mxu0  ;;  %v3015_v6 = vcombine.high %v1004_v61, %v1008_v62 }
  0xe6   : > { %v668_v4 = vmax.f32 %v544_v0, 0.0  ;;  %v565_v8 = vadd.f32 %v3125_v2, %v3449_v58  ;;  %v708_v12 = vpack.c.bf16 %v670_v1, %v669_v7 }
  0xe7   : > { %v556_v9 = vpop.f32.mrf.mxu0 }
  0xe8   : > { %v557_v10 = vadd.f32 %v3449_v58, %v556_v9  ;;  %v707_v11 = vpack.c.bf16 %v668_v4, %v667_v3  ;;  %v673_v18 = vmax.f32 %v565_v8, 0.0  ;;  %v3022_v4 = vcombine.low %v1012_v49, %v1016_v50 }
  0xe9   : > { %v3126_v13 = vpop.f32.mrf.mxu0 }
  0xea   : > { %v568_v15 = vadd.f32 %v3126_v13, %v3449_v58  ;;  %3159 = vmatprep.mubr.msk.bf16.mxu1 %vm457_vm0, %v707_v11  ;;  %v671_v20 = vmax.f32 %v557_v10, 0.0  ;;  %v3014_v13 = vcombine.low %v1004_v61, %v1008_v62 }
  0xeb   : > { %v559_v19 = vpop.f32.mrf.mxu0  ;;  %3160 = vmatmul.mubr.msk.bf16.vlgmr.msra.gmra.mxu1 %vm457_vm0, %v708_v12 }
  0xec   : > { %v674_v21 = vmax.f32 %v568_v15, 0.0  ;;  %v560_v22 = vadd.f32 %v3449_v58, %v559_v19  ;;  %1631 = vmatpush1.bf16.msra.mxu1 %v3062_v32 }
  0xed   : > { %v3129_v24 = vpop.f32.mrf.mxu0  ;;  %1632 = vmatprep.subr.bf16.mxu1 %v3055_v14 }
  0xee   : > { %v672_v27 = vmax.f32 %v560_v22, 0.0  ;;  %v710_v31 = vpack.c.bf16 %v674_v21, %v673_v18  ;;  %v581_v33 = vadd.f32 %v3129_v24, %v3449_v58 }
  0xef   : > { %v572_v34 = vpop.f32.mrf.mxu0 }
  0xf0   : > { %v709_v35 = vpack.c.bf16 %v672_v27, %v671_v20  ;;  %v573_v26 = vadd.f32 %v3449_v58, %v572_v34  ;;  %1633 = vmatpush1.bf16.msra.mxu1 %v3054_v23  ;;  %v677_v40 = vmax.f32 %v581_v33, 0.0 }
  0xf1   : > { %v3130_v32 = vpop.f32.mrf.mxu0  ;;  %1634 = vmatprep.subr.bf16.mxu1 %v3047_v25 }
  0xf2   : > { %3163 = vmatprep.mubr.msk.bf16.mxu1 %vm457_vm0, %v709_v35  ;;  %v584_v37 = vadd.f32 %v3130_v32, %v3449_v58  ;;  %v675_v42 = vmax.f32 %v573_v26, 0.0 }
  0xf3   : > { %3164 = vmatmul.mubr.msk.bf16.gmra.mxu1 %vm457_vm0, %v710_v31  ;;  %v575_v41 = vpop.f32.mrf.mxu0 }
  0xf4   : > { %v678_v43 = vmax.f32 %v584_v37, 0.0  ;;  %v576_v44 = vadd.f32 %v3449_v58, %v575_v41  ;;  %1635 = vmatpush1.bf16.msra.mxu1 %v3046_v29 }
  0xf5   : > { %v3133_v46 = vpop.f32.mrf.mxu0  ;;  %1636 = vmatprep.subr.bf16.mxu1 %v3039_v36 }
  0xf6   : > { %v676_v48 = vmax.f32 %v576_v44, 0.0  ;;  %v712_v51 = vpack.c.bf16 %v678_v43, %v677_v40  ;;  %v597_v52 = vadd.f32 %v3133_v46, %v3449_v58 }
  0xf7   : > { %v588_v53 = vpop.f32.mrf.mxu0 }
  0xf8   : > { %v711_v54 = vpack.c.bf16 %v676_v48, %v675_v42  ;;  %v589_v55 = vadd.f32 %v3449_v58, %v588_v53  ;;  %1637 = vmatpush1.bf16.msra.mxu1 %v3038_v45  ;;  %v681_v63 = vmax.f32 %v597_v52, 0.0 }
  0xf9   : > { %v3134_v57 = vpop.f32.mrf.mxu0  ;;  %1638 = vmatprep.subr.bf16.mxu1 %v3031_v47 }
  0xfa   : > { %3167 = vmatprep.mubr.msk.bf16.mxu1 %vm457_vm0, %v711_v54  ;;  %v600_v60 = vadd.f32 %v3134_v57, %v3449_v58  ;;  %v679_v1 = vmax.f32 %v589_v55, 0.0 }
  0xfb   : > { %3168 = vmatmul.mubr.msk.bf16.gmra.mxu1 %vm457_vm0, %v712_v51  ;;  %v591_v0 = vpop.f32.mrf.mxu0 }
  0xfc   : > { %v682_v2 = vmax.f32 %v600_v60, 0.0  ;;  %v592_v3 = vadd.f32 %v3449_v58, %v591_v0  ;;  %1639 = vmatpush1.bf16.msra.mxu1 %v3030_v56 }
  0xfd   : > { %v3137_v5 = vpop.f32.mrf.mxu0  ;;  %1640 = vmatprep.subr.bf16.mxu1 %v3023_v59 }
  0xfe   : > { %v680_v7 = vmax.f32 %v592_v3, 0.0  ;;  %v714_v8 = vpack.c.bf16 %v682_v2, %v681_v63  ;;  %v613_v9 = vadd.f32 %v3137_v5, %v3449_v58  ;;  %v995_v3 = vld [vmem:[%s4395_s5] sm:$0xff]  ;;  %v996_v5 = vld [vmem:[%s4395_s5 + $0x8] sm:$0xff] }
  0xff   : > { %v604_v10 = vpop.f32.mrf.mxu0 }
 0x100   : > { %v713_v11 = vpack.c.bf16 %v680_v7, %v679_v1  ;;  %v605_v12 = vadd.f32 %v3449_v58, %v604_v10  ;;  %1641 = vmatpush1.bf16.msra.mxu1 %v3022_v4  ;;  %v685_v16 = vmax.f32 %v613_v9, 0.0  ;;  %v999_v4 = vld [vmem:[%s4395_s5 + $0x20] sm:$0xff]  ;;  %v3266_v10 = vmov 0  }
 0x101   : > { %v3138_v14 = vpop.f32.mrf.mxu0  ;;  %1642 = vmatprep.subr.bf16.mxu1 %v3015_v6  ;;  %v1000_v6 = vld [vmem:[%s4395_s5 + $0x28] sm:$0xff]  ;;  %v3004_v7 = vcombine.low %v995_v3, %v999_v4  ;;  %1469 = vmatprep.mubr.bf16.mxu0 %v3266_v10 }
 0x102   : > { %3171 = vmatprep.mubr.msk.bf16.mxu1 %vm457_vm0, %v713_v11  ;;  %v616_v15 = vadd.f32 %v3138_v14, %v3449_v58  ;;  %v683_v18 = vmax.f32 %v605_v12, 0.0  ;;  %v3007_v9 = vcombine.high %v996_v5, %v1000_v6  ;;  %v1053_v11 = vld [vmem:[%s4395_s5 + $0x1d0] sm:$0xff] }
 0x103   : > { %3172 = vmatmul.mubr.msk.bf16.gmra.mxu1 %vm457_vm0, %v714_v8  ;;  %v607_v17 = vpop.f32.mrf.mxu0  ;;  %v3006_v8 = vcombine.low %v996_v5, %v1000_v6  ;;  %v1057_v12 = vld [vmem:[%s4395_s5 + $0x1f0] sm:$0xff] }
 0x104   : > { %v686_v19 = vmax.f32 %v616_v15, 0.0  ;;  %v608_v20 = vadd.f32 %v3449_v58, %v607_v17  ;;  %1643 = vmatpush1.bf16.msra.mxu1 %v3014_v13  ;;  %v1054_v13 = vld [vmem:[%s4395_s5 + $0x1d8] sm:$0xff]  ;;  %v3064_v14 = vcombine.low %v1053_v11, %v1057_v12  ;;  %v3065_v15 = vcombine.high %v1053_v11, %v1057_v12  ;;  %v1017_v12 = vld [vmem:[%s4395_s5 + $0xb0] sm:$0xff] }
 0x105   : > { %v3141_v21 = vpop.f32.mrf.mxu0  ;;  %1644 = vmatprep.subr.bf16.mxu1 %v3007_v9  ;;  %v1013_v9 = vld [vmem:[%s4395_s5 + $0x90] sm:$0xff] }
 0x106   : > { %v684_v22 = vmax.f32 %v608_v20, 0.0  ;;  %v716_v23 = vpack.c.bf16 %v686_v19, %v685_v16  ;;  %v629_v24 = vadd.f32 %v3141_v21, %v3449_v58  ;;  %v1058_v16 = vld [vmem:[%s4395_s5 + $0x1f8] sm:$0xff]  ;;  %v3567_v21 = vld [vmem:[%s4394_s4] ss:$0 sm:$0xff] }
 0x107   : > { %v620_v25 = vpop.f32.mrf.mxu0  ;;  %v3066_v17 = vcombine.low %v1054_v13, %v1058_v16 }
 0x108   : > { %v715_v27 = vpack.c.bf16 %v684_v22, %v683_v18  ;;  %v621_v28 = vadd.f32 %v3449_v58, %v620_v25  ;;  %v689_v33 = vmax.f32 %v629_v24, 0.0  ;;  %1645 = vmatpush1.bf16.msra.mxu1 %v3006_v8  ;;  %v3067_v18 = vcombine.high %v1054_v13, %v1058_v16  ;;  %v1014_v13 = vld [vmem:[%s4395_s5 + $0x98] sm:$0xff] }
 0x109   : > { %v3142_v30 = vpop.f32.mrf.mxu0 }
 0x10a   : > { %3175 = vmatprep.mubr.msk.bf16.mxu1 %vm457_vm0, %v715_v27  ;;  %v632_v31 = vadd.f32 %v3142_v30, %v3449_v58  ;;  %v687_v35 = vmax.f32 %v621_v28, 0.0  ;;  %2016 = vmatprep.subr.bf16.mxu1 %v3067_v18  ;;  %v1045_v28 = vld [vmem:[%s4395_s5 + $0x190] sm:$0xff] }
 0x10b   : > { %3176 = vmatmul.mubr.msk.bf16.gmra.mxu1 %vm457_vm0, %v716_v23  ;;  %v623_v34 = vpop.f32.mrf.mxu0 }
 0x10c   : > { %v690_v26 = vmax.f32 %v632_v31, 0.0  ;;  %v624_v29 = vadd.f32 %v3449_v58, %v623_v34  ;;  %v1046_v34 = vld [vmem:[%s4395_s5 + $0x198] sm:$0xff] }
 0x10d   : > { %v3145_v32 = vpop.f32.mrf.mxu0 }
 0x10e   : > { %v688_v36 = vmax.f32 %v624_v29, 0.0  ;;  %v718_v37 = vpack.c.bf16 %v690_v26, %v689_v33  ;;  %v645_v38 = vadd.f32 %v3145_v32, %v3449_v58  ;;  %v1049_v33 = vld [vmem:[%s4395_s5 + $0x1b0] sm:$0xff] }
 0x10f   : > { %v636_v39 = vpop.f32.mrf.mxu0 }
 0x110   : > { %v717_v40 = vpack.c.bf16 %v688_v36, %v687_v35  ;;  %v637_v41 = vadd.f32 %v3449_v58, %v636_v39  ;;  %v693_v44 = vmax.f32 %v645_v38, 0.0  ;;  %v1050_v35 = vld [vmem:[%s4395_s5 + $0x1b8] sm:$0xff]  ;;  %v1037_v36 = vld [vmem:[%s4395_s5 + $0x150] sm:$0xff]  ;;  %v3057_v38 = vcombine.high %v1045_v28, %v1049_v33 }
 0x111   : > { %v3146_v42 = vpop.f32.mrf.mxu0  ;;  %v3059_v39 = vcombine.high %v1046_v34, %v1050_v35 }
 0x112   : > { %3179 = vmatprep.mubr.msk.bf16.mxu1 %vm457_vm0, %v717_v40  ;;  %v648_v43 = vadd.f32 %v3146_v42, %v3449_v58  ;;  %v691_v46 = vmax.f32 %v637_v41, 0.0  ;;  %v1041_v40 = vld [vmem:[%s4395_s5 + $0x170] sm:$0xff]  ;;  %v1038_v41 = vld [vmem:[%s4395_s5 + $0x158] sm:$0xff] }
 0x113   : > { %3180 = vmatmul.mubr.msk.bf16.gmra.mxu1 %vm457_vm0, %v718_v37  ;;  %v639_v45 = vpop.f32.mrf.mxu0  ;;  %v1042_v42 = vld [vmem:[%s4395_s5 + $0x178] sm:$0xff] }
 0x114   : > { %v694_v47 = vmax.f32 %v648_v43, 0.0  ;;  %v640_v48 = vadd.f32 %v3449_v58, %v639_v45  ;;  %v3058_v45 = vcombine.low %v1046_v34, %v1050_v35 }
 0x115   : > { %v3149_v49 = vpop.f32.mrf.mxu0 }
 0x116   : > { %v692_v50 = vmax.f32 %v640_v48, 0.0  ;;  %v720_v51 = vpack.c.bf16 %v694_v47, %v693_v44  ;;  %v661_v52 = vadd.f32 %v3149_v49, %v3449_v58  ;;  %v3056_v44 = vcombine.low %v1045_v28, %v1049_v33  ;;  %v1006_v28 = vld [vmem:[%s4395_s5 + $0x58] sm:$0xff] }
 0x117   : > { %v652_v53 = vpop.f32.mrf.mxu0  ;;  %v3049_v47 = vcombine.high %v1037_v36, %v1041_v40  ;;  %v3051_v48 = vcombine.high %v1038_v41, %v1042_v42 }
 0x118   : > { %v719_v54 = vpack.c.bf16 %v692_v50, %v691_v46  ;;  %v653_v55 = vadd.f32 %v3449_v58, %v652_v53  ;;  %v697_v59 = vmax.f32 %v661_v52, 0.0  ;;  %v1029_v50 = vld [vmem:[%s4395_s5 + $0x110] sm:$0xff]  ;;  %v1030_v53 = vld [vmem:[%s4395_s5 + $0x118] sm:$0xff] }
 0x119   : > { %v3150_v56 = vpop.f32.mrf.mxu0  ;;  %v1033_v52 = vld [vmem:[%s4395_s5 + $0x130] sm:$0xff] }
 0x11a   : > { %3183 = vmatprep.mubr.msk.bf16.mxu1 %vm457_vm0, %v719_v54  ;;  %v664_v57 = vadd.f32 %v3150_v56, %v3449_v58  ;;  %v695_v61 = vmax.f32 %v653_v55, 0.0  ;;  %v1034_v54 = vld [vmem:[%s4395_s5 + $0x138] sm:$0xff]  ;;  %v3048_v55 = vcombine.low %v1037_v36, %v1041_v40  ;;  %v3040_v5 = vcombine.low %v1029_v50, %v1033_v52 }
 0x11b   : > { %3184 = vmatmul.mubr.msk.bf16.gmra.mxu1 %vm457_vm0, %v720_v51  ;;  %v655_v60 = vpop.f32.mrf.mxu0 }
 0x11c   : > { %v698_v62 = vmax.f32 %v664_v57, 0.0  ;;  %v656_v63 = vadd.f32 %v3449_v58, %v655_v60  ;;  %v3005_v58 = vcombine.high %v995_v3, %v999_v4  ;;  %v1026_v3 = vld [vmem:[%s4395_s5 + $0xf8] sm:$0xff] }
 0x11e   : > { %v696_v0 = vmax.f32 %v656_v63, 0.0  ;;  %v722_v1 = vpack.c.bf16 %v698_v62, %v697_v59  ;;  %1451 = vmatprep.subr.bf16.mxu0 %v3005_v58  ;;  %v3050_v59 = vcombine.low %v1038_v41, %v1042_v42  ;;  %v3043_v62 = vcombine.high %v1030_v53, %v1034_v54  ;;  %v1021_v63 = vld [vmem:[%s4395_s5 + $0xd0] sm:$0xff] }
 0x11f   : > { %1452 = vmatpush1.bf16.msra.mxu0 %v3004_v7  ;;  %v3042_v58 = vcombine.low %v1030_v53, %v1034_v54 }
 0x120   : > { %v721_v2 = vpack.c.bf16 %v696_v0, %v695_v61  ;;  %1823 = vmatprep.subr.bf16.mxu0 %v3065_v15  ;;  %v3041_v61 = vcombine.high %v1029_v50, %v1033_v52 }
 0x122   : > { %3187 = vmatprep.mubr.msk.bf16.mxu1 %vm457_vm0, %v721_v2  ;;  %v1022_v2 = vld [vmem:[%s4395_s5 + $0xd8] sm:$0xff] }
 0x123   : > { %3188 = vmatmul.mubr.msk.bf16.gmra.mxu1 %vm457_vm0, %v722_v1  ;;  %v1025_v1 = vld [vmem:[%s4395_s5 + $0xf0] sm:$0xff]  ;;  %v3035_v8 = vcombine.high %v1022_v2, %v1026_v3  ;;  %v3034_v18 = vcombine.low %v1022_v2, %v1026_v3 }
 0x124   : > { %1662 = vmatprep.mubr.bf16.mxu1 %v3266_v10  ;;  %v3033_v7 = vcombine.high %v1021_v63, %v1025_v1  ;;  %v3032_v15 = vcombine.low %v1021_v63, %v1025_v1 }
 0x1ab   : > { %v3161_v19 = vpop.f32.mrf.mxu1 }
 0x1ac   : > { %v845_v43 = vadd.f32 %v3161_v19, %v3567_v21 }
 0x1ad   : > { %v836_v20 = vpop.f32.mrf.mxu1 }
 0x1ae   : > { %v837_v23 = vadd.f32 %v3567_v21, %v836_v20  ;;  %v965_v51 = vmax.f32 %v845_v43, 0.0  ;;  %v3025_v20 = vcombine.high %v1013_v9, %v1017_v12 }
 0x1af   : > { %v3162_v22 = vpop.f32.mrf.mxu1 }
 0x1b0   : > { %v963_v30 = vmax.f32 %v837_v23, 0.0  ;;  %v848_v29 = vadd.f32 %v3162_v22, %v3567_v21  ;;  %v1005_v23 = vld [vmem:[%s4395_s5 + $0x50] sm:$0xff] }
 0x1b1   : > { %v839_v24 = vpop.f32.mrf.mxu1 }
 0x1b2   : > { %v840_v25 = vadd.f32 %v3567_v21, %v839_v24  ;;  %v966_v46 = vmax.f32 %v848_v29, 0.0  ;;  %v997_v29 = vld [vmem:[%s4395_s5 + $0x10] sm:$0xff] }
 0x1b3   : > { %v3571_v27 = vpop.f32.mrf.mxu1 }
 0x1b4   : > { %v964_v31 = vmax.f32 %v840_v25, 0.0  ;;  %v3617_v56 = vpack.c.bf16 %v966_v46, %v965_v51  ;;  %v861_v24 = vadd.f32 %v3571_v27, %v3567_v21  ;;  %v1009_v25 = vld [vmem:[%s4395_s5 + $0x70] sm:$0xff] }
 0x1b5   : > { %v852_v26 = vpop.f32.mrf.mxu1  ;;  %v3017_v35 = vcombine.high %v1005_v23, %v1009_v25  ;;  %v3016_v40 = vcombine.low %v1005_v23, %v1009_v25 }
 0x1b6   : > { %v3586_v32 = vpack.c.bf16 %v964_v31, %v963_v30  ;;  %v853_v0 = vadd.f32 %v3567_v21, %v852_v26  ;;  %v1010_v30 = vld [vmem:[%s4395_s5 + $0x78] sm:$0xff]  ;;  %v3024_v31 = vcombine.low %v1013_v9, %v1017_v12  ;;  %v969_v36 = vmax.f32 %v861_v24, 0.0 }
 0x1b7   : > { %v3166_v37 = vpop.f32.mrf.mxu1  ;;  %v3019_v26 = vcombine.high %v1006_v28, %v1010_v30  ;;  %v3018_v41 = vcombine.low %v1006_v28, %v1010_v30 }
 0x1b8   : > { %1470 = vmatmul.mubr.bf16.vlgmr.msra.gmra.mxu0 %v3586_v32  ;;  %1663 = vmatmul.mubr.bf16.vlgmr.msra.gmra.mxu1 %v3586_v32  ;;  %v967_v11 = vmax.f32 %v853_v0, 0.0  ;;  %v864_v16 = vadd.f32 %v3166_v37, %v3567_v21  ;;  %v1001_v37 = vld [vmem:[%s4395_s5 + $0x30] sm:$0xff] }
 0x1b9   : > { %1824 = vmatpush1.bf16.msra.mxu0 %v3064_v14  ;;  %2017 = vmatpush1.bf16.msra.mxu1 %v3066_v17  ;;  %v855_v49 = vpop.f32.mrf.mxu1  ;;  %v1018_v14 = vld [vmem:[%s4395_s5 + $0xb8] sm:$0xff]  ;;  %v3009_v46 = vcombine.high %v997_v29, %v1001_v37  ;;  %v3008_v50 = vcombine.low %v997_v29, %v1001_v37 }
 0x1ba   : > { %1479 = vmatprep.mubr.bf16.mxu0 %v3266_v10  ;;  %1672 = vmatprep.mubr.bf16.mxu1 %v3266_v10  ;;  %v856_v57 = vadd.f32 %v3567_v21, %v855_v49  ;;  %v3027_v22 = vcombine.high %v1014_v13, %v1018_v14  ;;  %v970_v27 = vmax.f32 %v864_v16, 0.0  ;;  %v3026_v33 = vcombine.low %v1014_v13, %v1018_v14 }
 0x1bb   : > { %1825 = vmatprep.subr.bf16.mxu0 %v3057_v38  ;;  %2018 = vmatprep.subr.bf16.mxu1 %v3059_v39  ;;  %v3620_v60 = vpop.f32.mrf.mxu1  ;;  %v998_v38 = vld [vmem:[%s4395_s5 + $0x18] sm:$0xff] }
 0x1bc   : > { %v968_v4 = vmax.f32 %v856_v57, 0.0  ;;  %v1002_v39 = vld [vmem:[%s4395_s5 + $0x38] sm:$0xff]  ;;  %v3684_v42 = vpack.c.bf16 %v970_v27, %v969_v36  ;;  %v877_v53 = vadd.f32 %v3620_v60, %v3567_v21 }
 0x1bd   : > { %1826 = vmatpush1.bf16.msra.mxu0 %v3056_v44  ;;  %2019 = vmatpush1.bf16.msra.mxu1 %v3058_v45  ;;  %v868_v6 = vpop.f32.mrf.mxu1  ;;  %v3010_v51 = vcombine.low %v998_v38, %v1002_v39 }
 0x1be   : > { %1827 = vmatprep.subr.bf16.mxu0 %v3049_v47  ;;  %2020 = vmatprep.subr.bf16.mxu1 %v3051_v48  ;;  %v3652_v17 = vpack.c.bf16 %v968_v4, %v967_v11  ;;  %v869_v43 = vadd.f32 %v3567_v21, %v868_v6  ;;  %v3011_v47 = vcombine.high %v998_v38, %v1002_v39 }
 0x1bf   : > { %v3170_v19 = vpop.f32.mrf.mxu1 }
 0x1c0   : > { %1480 = vmatmul.mubr.bf16.gmra.mxu0 %v3617_v56  ;;  %1673 = vmatmul.mubr.bf16.gmra.mxu1 %v3617_v56  ;;  %v971_v48 = vmax.f32 %v869_v43, 0.0  ;;  %v880_v54 = vadd.f32 %v3170_v19, %v3567_v21 }
 0x1c1   : > { %1489 = vmatprep.mubr.bf16.mxu0 %v3266_v10  ;;  %1682 = vmatprep.mubr.bf16.mxu1 %v3266_v10  ;;  %v871_v34 = vpop.f32.mrf.mxu1 }
 0x1c2   : > { %1828 = vmatpush1.bf16.msra.mxu0 %v3048_v55  ;;  %2021 = vmatpush1.bf16.msra.mxu1 %v3050_v59  ;;  %v872_v44 = vadd.f32 %v3567_v21, %v871_v34  ;;  %v973_v59 = vmax.f32 %v877_v53, 0.0 }
 0x1c3   : > { %1829 = vmatprep.subr.bf16.mxu0 %v3041_v61  ;;  %2022 = vmatprep.subr.bf16.mxu1 %v3043_v62  ;;  %v3173_v45 = vpop.f32.mrf.mxu1  ;;  %v974_v61 = vmax.f32 %v880_v54, 0.0 }
 0x1c4   : > { %v972_v49 = vmax.f32 %v872_v44, 0.0 }
 0x1c5   : > { %v884_v52 = vpop.f32.mrf.mxu1  ;;  %v3701_v63 = vpack.c.bf16 %v974_v61, %v973_v59 }
 0x1c6   : > { %1830 = vmatpush1.bf16.msra.mxu0 %v3040_v5  ;;  %2023 = vmatpush1.bf16.msra.mxu1 %v3042_v58  ;;  %v3695_v55 = vpack.c.bf16 %v972_v49, %v971_v48  ;;  %v885_v60 = vadd.f32 %v3567_v21, %v884_v52  ;;  %v893_v5 = vadd.f32 %v3173_v45, %v3567_v21 }
 0x1c7   : > { %1831 = vmatprep.subr.bf16.mxu0 %v3033_v7  ;;  %2024 = vmatprep.subr.bf16.mxu1 %v3035_v8  ;;  %v3174_v57 = vpop.f32.mrf.mxu1 }
 0x1c8   : > { %1490 = vmatmul.mubr.bf16.gmra.mxu0 %v3652_v17  ;;  %1683 = vmatmul.mubr.bf16.gmra.mxu1 %v3652_v17  ;;  %v975_v2 = vmax.f32 %v885_v60, 0.0  ;;  %v896_v58 = vadd.f32 %v3174_v57, %v3567_v21  ;;  %v977_v8 = vmax.f32 %v893_v5, 0.0 }
 0x1c9   : > { %1499 = vmatprep.mubr.bf16.mxu0 %v3266_v10  ;;  %1692 = vmatprep.mubr.bf16.mxu1 %v3266_v10  ;;  %v887_v62 = vpop.f32.mrf.mxu1 }
 0x1ca   : > { %1832 = vmatpush1.bf16.msra.mxu0 %v3032_v15  ;;  %2025 = vmatpush1.bf16.msra.mxu1 %v3034_v18  ;;  %v888_v0 = vadd.f32 %v3567_v21, %v887_v62  ;;  %v978_v9 = vmax.f32 %v896_v58, 0.0 }
 0x1cb   : > { %1833 = vmatprep.subr.bf16.mxu0 %v3025_v20  ;;  %2026 = vmatprep.subr.bf16.mxu1 %v3027_v22  ;;  %v3177_v1 = vpop.f32.mrf.mxu1 }
 0x1cc   : > { %v976_v3 = vmax.f32 %v888_v0, 0.0  ;;  %v3717_v12 = vpack.c.bf16 %v978_v9, %v977_v8  ;;  %v909_v20 = vadd.f32 %v3177_v1, %v3567_v21 }
 0x1cd   : > { %v900_v4 = vpop.f32.mrf.mxu1 }
 0x1ce   : > { %1834 = vmatpush1.bf16.msra.mxu0 %v3024_v31  ;;  %2027 = vmatpush1.bf16.msra.mxu1 %v3026_v33  ;;  %v3711_v6 = vpack.c.bf16 %v976_v3, %v975_v2  ;;  %v901_v13 = vadd.f32 %v3567_v21, %v900_v4  ;;  %v981_v25 = vmax.f32 %v909_v20, 0.0 }
 0x1cf   : > { %1835 = vmatprep.subr.bf16.mxu0 %v3017_v35  ;;  %2028 = vmatprep.subr.bf16.mxu1 %v3019_v26  ;;  %v3178_v7 = vpop.f32.mrf.mxu1 }
 0x1d0   : > { %1500 = vmatmul.mubr.bf16.gmra.mxu0 %v3684_v42  ;;  %1693 = vmatmul.mubr.bf16.gmra.mxu1 %v3684_v42  ;;  %v979_v16 = vmax.f32 %v901_v13, 0.0  ;;  %v912_v22 = vadd.f32 %v3178_v7, %v3567_v21 }
 0x1d1   : > { %1509 = vmatprep.mubr.bf16.mxu0 %v3266_v10  ;;  %1702 = vmatprep.mubr.bf16.mxu1 %v3266_v10  ;;  %v903_v11 = vpop.f32.mrf.mxu1 }
 0x1d2   : > { %1836 = vmatpush1.bf16.msra.mxu0 %v3016_v40  ;;  %2029 = vmatpush1.bf16.msra.mxu1 %v3018_v41  ;;  %v904_v14 = vadd.f32 %v3567_v21, %v903_v11  ;;  %v982_v28 = vmax.f32 %v912_v22, 0.0 }
 0x1d3   : > { %1837 = vmatprep.subr.bf16.mxu0 %v3009_v46  ;;  %2030 = vmatprep.subr.bf16.mxu1 %v3011_v47  ;;  %v3181_v15 = vpop.f32.mrf.mxu1 }
 0x1d4   : > { %v980_v18 = vmax.f32 %v904_v14, 0.0  ;;  %v3733_v27 = vpack.c.bf16 %v982_v28, %v981_v25  ;;  %v925_v36 = vadd.f32 %v3181_v15, %v3567_v21 }
 0x1d5   : > { %v916_v19 = vpop.f32.mrf.mxu1 }
 0x1d6   : > { %1838 = vmatpush1.bf16.msra.mxu0 %v3008_v50  ;;  %2031 = vmatpush1.bf16.msra.mxu1 %v3010_v51  ;;  %v3727_v23 = vpack.c.bf16 %v980_v18, %v979_v16  ;;  %v917_v31 = vadd.f32 %v3567_v21, %v916_v19  ;;  %v985_v40 = vmax.f32 %v925_v36, 0.0 }
 0x1d7   : > { %v3182_v24 = vpop.f32.mrf.mxu1 }
 0x1d8   : > { %1510 = vmatmul.mubr.bf16.gmra.mxu0 %v3695_v55  ;;  %1703 = vmatmul.mubr.bf16.gmra.mxu1 %v3695_v55  ;;  %v983_v35 = vmax.f32 %v917_v31, 0.0  ;;  %v928_v37 = vadd.f32 %v3182_v24, %v3567_v21 }
 0x1d9   : > { %1519 = vmatprep.mubr.bf16.mxu0 %v3266_v10  ;;  %1712 = vmatprep.mubr.bf16.mxu1 %v3266_v10  ;;  %v919_v30 = vpop.f32.mrf.mxu1 }
 0x1da   : > { %v920_v33 = vadd.f32 %v3567_v21, %v919_v30  ;;  %v986_v41 = vmax.f32 %v928_v37, 0.0 }
 0x1db   : > { %v3185_v34 = vpop.f32.mrf.mxu1 }
 0x1dc   : > { %v984_v26 = vmax.f32 %v920_v33, 0.0  ;;  %v3749_v44 = vpack.c.bf16 %v986_v41, %v985_v40  ;;  %v941_v51 = vadd.f32 %v3185_v34, %v3567_v21 }
 0x1dd   : > { %v932_v29 = vpop.f32.mrf.mxu1 }
 0x1de   : > { %v3743_v38 = vpack.c.bf16 %v984_v26, %v983_v35  ;;  %v933_v45 = vadd.f32 %v3567_v21, %v932_v29  ;;  %v989_v57 = vmax.f32 %v941_v51, 0.0 }
 0x1df   : > { %v3186_v39 = vpop.f32.mrf.mxu1 }
 0x1e0   : > { %1520 = vmatmul.mubr.bf16.gmra.mxu0 %v3701_v63  ;;  %1713 = vmatmul.mubr.bf16.gmra.mxu1 %v3701_v63  ;;  %v987_v48 = vmax.f32 %v933_v45, 0.0  ;;  %v944_v52 = vadd.f32 %v3186_v39, %v3567_v21 }
 0x1e1   : > { %1529 = vmatprep.mubr.bf16.mxu0 %v3266_v10  ;;  %1722 = vmatprep.mubr.bf16.mxu1 %v3266_v10  ;;  %v935_v43 = vpop.f32.mrf.mxu1 }
 0x1e2   : > { %v936_v46 = vadd.f32 %v3567_v21, %v935_v43  ;;  %v990_v59 = vmax.f32 %v944_v52, 0.0 }
 0x1e3   : > { %v3189_v47 = vpop.f32.mrf.mxu1 }
 0x1e4   : > { %v988_v49 = vmax.f32 %v936_v46, 0.0  ;;  %v3765_v62 = vpack.c.bf16 %v990_v59, %v989_v57  ;;  %v957_v3 = vadd.f32 %v3189_v47, %v3567_v21 }
 0x1e5   : > { %v948_v50 = vpop.f32.mrf.mxu1 }
 0x1e6   : > { %v3759_v53 = vpack.c.bf16 %v988_v49, %v987_v48  ;;  %v949_v60 = vadd.f32 %v3567_v21, %v948_v50  ;;  %v993_v58 = vmax.f32 %v957_v3, 0.0 }
 0x1e7   : > { %v3190_v54 = vpop.f32.mrf.mxu1 }
 0x1e8   : > { %1530 = vmatmul.mubr.bf16.gmra.mxu0 %v3711_v6  ;;  %1723 = vmatmul.mubr.bf16.gmra.mxu1 %v3711_v6  ;;  %v991_v1 = vmax.f32 %v949_v60, 0.0  ;;  %v960_v4 = vadd.f32 %v3190_v54, %v3567_v21 }
 0x1e9   : > { %1539 = vmatprep.mubr.bf16.mxu0 %v3266_v10  ;;  %1732 = vmatprep.mubr.bf16.mxu1 %v3266_v10  ;;  %v951_v61 = vpop.f32.mrf.mxu1 }
 0x1ea   : > { %v952_v0 = vadd.f32 %v3567_v21, %v951_v61  ;;  %v994_v7 = vmax.f32 %v960_v4, 0.0  ;;  %v1077_v21 = vlaneseq }
 0x1ec   : > { %v992_v2 = vmax.f32 %v952_v0, 0.0  ;;  %v3781_v8 = vpack.c.bf16 %v994_v7, %v993_v58 }
 0x1ee   : > { %v3775_v5 = vpack.c.bf16 %v992_v2, %v991_v1 }
 0x1f0   : > { %1540 = vmatmul.mubr.bf16.gmra.mxu0 %v3717_v12  ;;  %1733 = vmatmul.mubr.bf16.gmra.mxu1 %v3717_v12 }
 0x1f1   : > { %1549 = vmatprep.mubr.bf16.mxu0 %v3266_v10  ;;  %1742 = vmatprep.mubr.bf16.mxu1 %v3266_v10 }
 0x1f8   : > { %1550 = vmatmul.mubr.bf16.gmra.mxu0 %v3727_v23  ;;  %1743 = vmatmul.mubr.bf16.gmra.mxu1 %v3727_v23 }
 0x1f9   : > { %1559 = vmatprep.mubr.bf16.mxu0 %v3266_v10  ;;  %1752 = vmatprep.mubr.bf16.mxu1 %v3266_v10 }
 0x200   : > { %1560 = vmatmul.mubr.bf16.gmra.mxu0 %v3733_v27  ;;  %1753 = vmatmul.mubr.bf16.gmra.mxu1 %v3733_v27 }
 0x201   : > { %1569 = vmatprep.mubr.bf16.mxu0 %v3266_v10  ;;  %1762 = vmatprep.mubr.bf16.mxu1 %v3266_v10 }
 0x208   : > { %1570 = vmatmul.mubr.bf16.gmra.mxu0 %v3743_v38  ;;  %1763 = vmatmul.mubr.bf16.gmra.mxu1 %v3743_v38 }
 0x209   : > { %1579 = vmatprep.mubr.bf16.mxu0 %v3266_v10  ;;  %1772 = vmatprep.mubr.bf16.mxu1 %v3266_v10 }
 0x210   : > { %1580 = vmatmul.mubr.bf16.gmra.mxu0 %v3749_v44  ;;  %1773 = vmatmul.mubr.bf16.gmra.mxu1 %v3749_v44 }
 0x211   : > { %1589 = vmatprep.mubr.bf16.mxu0 %v3266_v10  ;;  %1782 = vmatprep.mubr.bf16.mxu1 %v3266_v10 }
 0x218   : > { %1590 = vmatmul.mubr.bf16.gmra.mxu0 %v3759_v53  ;;  %1783 = vmatmul.mubr.bf16.gmra.mxu1 %v3759_v53 }
 0x219   : > { %1599 = vmatprep.mubr.bf16.mxu0 %v3266_v10  ;;  %1792 = vmatprep.mubr.bf16.mxu1 %v3266_v10 }
 0x220   : > { %1600 = vmatmul.mubr.bf16.gmra.mxu0 %v3765_v62  ;;  %1793 = vmatmul.mubr.bf16.gmra.mxu1 %v3765_v62 }
 0x221   : > { %1609 = vmatprep.mubr.bf16.mxu0 %v3266_v10  ;;  %1802 = vmatprep.mubr.bf16.mxu1 %v3266_v10 }
 0x228   : > { %1610 = vmatmul.mubr.bf16.gmra.mxu0 %v3775_v5  ;;  %1803 = vmatmul.mubr.bf16.gmra.mxu1 %v3775_v5 }
 0x229   : > { %1619 = vmatprep.mubr.bf16.mxu0 %v3266_v10  ;;  %1812 = vmatprep.mubr.bf16.mxu1 %v3266_v10 }
 0x230   : > { %1620 = vmatmul.mubr.bf16.gmra.mxu0 %v3781_v8  ;;  %1813 = vmatmul.mubr.bf16.gmra.mxu1 %v3781_v8 }
 0x231   : > { %1855 = vmatprep.mubr.bf16.mxu0 %v3266_v10  ;;  %2048 = vmatprep.mubr.bf16.mxu1 %v3266_v10 }
 0x238   : > { %1856 = vmatmul.mubr.bf16.vlgmr.msra.gmra.mxu0 %v3586_v32  ;;  %2049 = vmatmul.mubr.bf16.vlgmr.msra.gmra.mxu1 %v3586_v32  ;;  %v3815_v32 = vshrl.u32 %v1077_v21, 7 }
 0x239   : > { %1865 = vmatprep.mubr.bf16.mxu0 %v3266_v10  ;;  %2058 = vmatprep.mubr.bf16.mxu1 %v3266_v10 }
 0x240   : > { %1866 = vmatmul.mubr.bf16.gmra.mxu0 %v3617_v56  ;;  %2059 = vmatmul.mubr.bf16.gmra.mxu1 %v3617_v56  ;;  %v1079_v56 = vsub.s32 0, %v3815_v32 }
 0x241   : > { %1875 = vmatprep.mubr.bf16.mxu0 %v3266_v10  ;;  %2068 = vmatprep.mubr.bf16.mxu1 %v3266_v10 }
 0x248   : > { %1876 = vmatmul.mubr.bf16.gmra.mxu0 %v3652_v17  ;;  %2069 = vmatmul.mubr.bf16.gmra.mxu1 %v3652_v17  ;;  %v1087_v17 = vsub.s32 2, %v3815_v32 }
 0x249   : > { %1885 = vmatprep.mubr.bf16.mxu0 %v3266_v10  ;;  %2078 = vmatprep.mubr.bf16.mxu1 %v3266_v10 }
 0x250   : > { %1886 = vmatmul.mubr.bf16.gmra.mxu0 %v3684_v42  ;;  %2079 = vmatmul.mubr.bf16.gmra.mxu1 %v3684_v42  ;;  %v1075_v42 = vld [vmem:[%s4396_s6] sm:$0xff] }
 0x251   : > { %1895 = vmatprep.mubr.bf16.mxu0 %v3266_v10  ;;  %2088 = vmatprep.mubr.bf16.mxu1 %v3266_v10  ;;  %v3830_v9 = vrot.slane %v1075_v42, %v1087_v17 }
 0x258   : > { %1896 = vmatmul.mubr.bf16.gmra.mxu0 %v3695_v55  ;;  %2089 = vmatmul.mubr.bf16.gmra.mxu1 %v3695_v55  ;;  %v1083_v55 = vsub.s32 1, %v3815_v32 }
 0x259   : > { %1905 = vmatprep.mubr.bf16.mxu0 %v3266_v10  ;;  %2098 = vmatprep.mubr.bf16.mxu1 %v3266_v10 }
 0x25a   : > { %v3834_v13 = vrot.slane %v1075_v42, %v1083_v55 }
 0x260   : > { %1906 = vmatmul.mubr.bf16.gmra.mxu0 %v3701_v63  ;;  %2099 = vmatmul.mubr.bf16.gmra.mxu1 %v3701_v63  ;;  %v1091_v63 = vsub.s32 3, %v3815_v32 }
 0x261   : > { %1915 = vmatprep.mubr.bf16.mxu0 %v3266_v10  ;;  %2108 = vmatprep.mubr.bf16.mxu1 %v3266_v10 }
 0x262   : > { %v3836_v14 = vrot.slane %v1075_v42, %v1091_v63 }
 0x268   : > { %1916 = vmatmul.mubr.bf16.gmra.mxu0 %v3711_v6  ;;  %2109 = vmatmul.mubr.bf16.gmra.mxu1 %v3711_v6  ;;  %v3828_v6 = vrot.slane %v1075_v42, %v1079_v56 }
 0x269   : > { %1925 = vmatprep.mubr.bf16.mxu0 %v3266_v10  ;;  %2118 = vmatprep.mubr.bf16.mxu1 %v3266_v10 }
 0x270   : > { %1926 = vmatmul.mubr.bf16.gmra.mxu0 %v3717_v12  ;;  %2119 = vmatmul.mubr.bf16.gmra.mxu1 %v3717_v12 }
 0x271   : > { %1935 = vmatprep.mubr.bf16.mxu0 %v3266_v10  ;;  %2128 = vmatprep.mubr.bf16.mxu1 %v3266_v10 }
 0x278   : > { %v1471_v11 = vpop.f32.mrf.mxu0  ;;  %v1664_v12 = vpop.f32.mrf.mxu1  ;;  %1936 = vmatmul.mubr.bf16.gmra.mxu0 %v3727_v23  ;;  %2129 = vmatmul.mubr.bf16.gmra.mxu1 %v3727_v23 }
 0x279   : > { %1945 = vmatprep.mubr.bf16.mxu0 %v3266_v10  ;;  %2138 = vmatprep.mubr.bf16.mxu1 %v3266_v10  ;;  %v1472_v15 = vadd.f32 %v1471_v11, %v3828_v6  ;;  %v1665_v16 = vadd.f32 %v1664_v12, %v3830_v9 }
 0x27a   : > { %v1473_v18 = vpop.f32.mrf.mxu0  ;;  %v1666_v19 = vpop.f32.mrf.mxu1 }
 0x27b   : > { %v1474_v20 = vadd.f32 %v1473_v18, %v3834_v13  ;;  %v1667_v22 = vadd.f32 %v1666_v19, %v3836_v14  ;;  %v2209_v30 = vmax.f32 %v1472_v15, 0.0  ;;  %v2211_v31 = vmax.f32 %v1665_v16, 0.0 }
 0x27c   : > { %v1475_v24 = vpop.f32.mrf.mxu0  ;;  %v1668_v23 = vpop.f32.mrf.mxu1 }
 0x27d   : > { %v1476_v25 = vadd.f32 %v1475_v24, %v3828_v6  ;;  %v1669_v28 = vadd.f32 %v1668_v23, %v3830_v9  ;;  %v2210_v37 = vmax.f32 %v1474_v20, 0.0  ;;  %v2212_v39 = vmax.f32 %v1667_v22, 0.0 }
 0x27e   : > { %v1477_v33 = vpop.f32.mrf.mxu0  ;;  %v1670_v34 = vpop.f32.mrf.mxu1 }
 0x27f   : > { %v2217_v35 = vmax.f32 %v1476_v25, 0.0  ;;  %v2219_v26 = vmax.f32 %v1669_v28, 0.0  ;;  %v1478_v29 = vadd.f32 %v1477_v33, %v3834_v13  ;;  %v1671_v36 = vadd.f32 %v1670_v34, %v3836_v14 }
 0x280   : > { %v1481_v40 = vpop.f32.mrf.mxu0  ;;  %v1674_v41 = vpop.f32.mrf.mxu1  ;;  %1946 = vmatmul.mubr.bf16.gmra.mxu0 %v3733_v27  ;;  %2139 = vmatmul.mubr.bf16.gmra.mxu1 %v3733_v27 }
 0x281   : > { %v2465_v43 = vmax.f32 %v2209_v30, %v2217_v35  ;;  %v2527_v45 = vmax.f32 %v2211_v31, %v2219_v26  ;;  %v2218_v46 = vmax.f32 %v1478_v29, 0.0  ;;  %v2220_v47 = vmax.f32 %v1671_v36, 0.0  ;;  %1955 = vmatprep.mubr.bf16.mxu0 %v3266_v10  ;;  %2148 = vmatprep.mubr.bf16.mxu1 %v3266_v10 }
 0x282   : > { %v1482_v48 = vadd.f32 %v1481_v40, %v3828_v6  ;;  %v1675_v49 = vadd.f32 %v1674_v41, %v3830_v9  ;;  %v1483_v50 = vpop.f32.mrf.mxu0  ;;  %v1676_v51 = vpop.f32.mrf.mxu1 }
 0x283   : > { %v2496_v52 = vmax.f32 %v2210_v37, %v2218_v46  ;;  %v2558_v54 = vmax.f32 %v2212_v39, %v2220_v47  ;;  %v1484_v57 = vadd.f32 %v1483_v50, %v3834_v13  ;;  %v1677_v27 = vadd.f32 %v1676_v51, %v3836_v14 }
 0x284   : > { %v2225_v59 = vmax.f32 %v1482_v48, 0.0  ;;  %v2227_v61 = vmax.f32 %v1675_v49, 0.0  ;;  %v1485_v60 = vpop.f32.mrf.mxu0  ;;  %v1678_v0 = vpop.f32.mrf.mxu1 }
 0x285   : > { %v2226_v1 = vmax.f32 %v1484_v57, 0.0  ;;  %v2228_v2 = vmax.f32 %v1677_v27, 0.0  ;;  %v1486_v3 = vadd.f32 %v1485_v60, %v3828_v6  ;;  %v1679_v4 = vadd.f32 %v1678_v0, %v3830_v9 }
 0x286   : > { %v2466_v58 = vmax.f32 %v2465_v43, %v2225_v59  ;;  %v2528_v7 = vmax.f32 %v2527_v45, %v2227_v61  ;;  %v1487_v21 = vpop.f32.mrf.mxu0  ;;  %v1680_v56 = vpop.f32.mrf.mxu1 }
 0x287   : > { %v2497_v17 = vmax.f32 %v2496_v52, %v2226_v1  ;;  %v2559_v42 = vmax.f32 %v2558_v54, %v2228_v2  ;;  %v2233_v55 = vmax.f32 %v1486_v3, 0.0  ;;  %v2235_v63 = vmax.f32 %v1679_v4, 0.0 }
 0x288   : > { %v1488_v11 = vadd.f32 %v1487_v21, %v3834_v13  ;;  %v1681_v12 = vadd.f32 %v1680_v56, %v3836_v14  ;;  %v1491_v15 = vpop.f32.mrf.mxu0  ;;  %v1684_v16 = vpop.f32.mrf.mxu1  ;;  %1956 = vmatmul.mubr.bf16.gmra.mxu0 %v3743_v38  ;;  %2149 = vmatmul.mubr.bf16.gmra.mxu1 %v3743_v38 }
 0x289   : > { %v2467_v18 = vmax.f32 %v2466_v58, %v2233_v55  ;;  %v2529_v19 = vmax.f32 %v2528_v7, %v2235_v63  ;;  %v1492_v20 = vadd.f32 %v1491_v15, %v3828_v6  ;;  %v1685_v22 = vadd.f32 %v1684_v16, %v3830_v9  ;;  %1965 = vmatprep.mubr.bf16.mxu0 %v3266_v10 }
 0x28a   : > { %v2234_v24 = vmax.f32 %v1488_v11, 0.0  ;;  %v2236_v23 = vmax.f32 %v1681_v12, 0.0  ;;  %v1493_v25 = vpop.f32.mrf.mxu0  ;;  %v1686_v28 = vpop.f32.mrf.mxu1  ;;  %2158 = vmatprep.mubr.bf16.mxu1 %v3266_v10 }
 0x28b   : > { %v2241_v30 = vmax.f32 %v1492_v20, 0.0  ;;  %v2243_v31 = vmax.f32 %v1685_v22, 0.0  ;;  %v1494_v33 = vadd.f32 %v1493_v25, %v3834_v13  ;;  %v1687_v38 = vadd.f32 %v1686_v28, %v3836_v14 }
 0x28c   : > { %v2498_v34 = vmax.f32 %v2497_v17, %v2234_v24  ;;  %v2560_v35 = vmax.f32 %v2559_v42, %v2236_v23  ;;  %v1495_v26 = vpop.f32.mrf.mxu0  ;;  %v1688_v29 = vpop.f32.mrf.mxu1 }
 0x28d   : > { %v2468_v36 = vmax.f32 %v2467_v18, %v2241_v30  ;;  %v2530_v37 = vmax.f32 %v2529_v19, %v2243_v31  ;;  %v2242_v39 = vmax.f32 %v1494_v33, 0.0  ;;  %v2244_v40 = vmax.f32 %v1687_v38, 0.0 }
 0x28e   : > { %v1496_v41 = vadd.f32 %v1495_v26, %v3828_v6  ;;  %v1689_v43 = vadd.f32 %v1688_v29, %v3830_v9  ;;  %v1497_v45 = vpop.f32.mrf.mxu0  ;;  %v1690_v46 = vpop.f32.mrf.mxu1 }
 0x28f   : > { %v2499_v47 = vmax.f32 %v2498_v34, %v2242_v39  ;;  %v2561_v48 = vmax.f32 %v2560_v35, %v2244_v40  ;;  %v1498_v49 = vadd.f32 %v1497_v45, %v3834_v13  ;;  %v1691_v50 = vadd.f32 %v1690_v46, %v3836_v14 }
 0x290   : > { %v2249_v51 = vmax.f32 %v1496_v41, 0.0  ;;  %v2251_v52 = vmax.f32 %v1689_v43, 0.0  ;;  %v1501_v54 = vpop.f32.mrf.mxu0  ;;  %v1694_v57 = vpop.f32.mrf.mxu1  ;;  %1966 = vmatmul.mubr.bf16.gmra.mxu0 %v3749_v44  ;;  %2159 = vmatmul.mubr.bf16.gmra.mxu1 %v3749_v44 }
 0x291   : > { %v2250_v27 = vmax.f32 %v1498_v49, 0.0  ;;  %v2252_v59 = vmax.f32 %v1691_v50, 0.0  ;;  %v1502_v61 = vadd.f32 %v1501_v54, %v3828_v6  ;;  %v1695_v60 = vadd.f32 %v1694_v57, %v3830_v9  ;;  %1975 = vmatprep.mubr.bf16.mxu0 %v3266_v10  ;;  %2168 = vmatprep.mubr.bf16.mxu1 %v3266_v10 }
 0x292   : > { %v2469_v0 = vmax.f32 %v2468_v36, %v2249_v51  ;;  %v2531_v1 = vmax.f32 %v2530_v37, %v2251_v52  ;;  %v1503_v2 = vpop.f32.mrf.mxu0  ;;  %v1696_v3 = vpop.f32.mrf.mxu1 }
 0x293   : > { %v2500_v4 = vmax.f32 %v2499_v47, %v2250_v27  ;;  %v2562_v58 = vmax.f32 %v2561_v48, %v2252_v59  ;;  %v2257_v7 = vmax.f32 %v1502_v61, 0.0  ;;  %v2259_v21 = vmax.f32 %v1695_v60, 0.0 }
 0x294   : > { %v1504_v44 = vadd.f32 %v1503_v2, %v3834_v13  ;;  %v1697_v56 = vadd.f32 %v1696_v3, %v3836_v14  ;;  %v1505_v17 = vpop.f32.mrf.mxu0  ;;  %v1698_v42 = vpop.f32.mrf.mxu1 }
 0x295   : > { %v2470_v55 = vmax.f32 %v2469_v0, %v2257_v7  ;;  %v2532_v63 = vmax.f32 %v2531_v1, %v2259_v21  ;;  %v1506_v11 = vadd.f32 %v1505_v17, %v3828_v6  ;;  %v1699_v12 = vadd.f32 %v1698_v42, %v3830_v9 }
 0x296   : > { %v2258_v15 = vmax.f32 %v1504_v44, 0.0  ;;  %v2260_v16 = vmax.f32 %v1697_v56, 0.0  ;;  %v1507_v18 = vpop.f32.mrf.mxu0  ;;  %v1700_v19 = vpop.f32.mrf.mxu1 }
 0x297   : > { %v2265_v20 = vmax.f32 %v1506_v11, 0.0  ;;  %v2267_v22 = vmax.f32 %v1699_v12, 0.0  ;;  %v1508_v24 = vadd.f32 %v1507_v18, %v3834_v13  ;;  %v1701_v23 = vadd.f32 %v1700_v19, %v3836_v14 }
 0x298   : > { %v2501_v25 = vmax.f32 %v2500_v4, %v2258_v15  ;;  %v2563_v28 = vmax.f32 %v2562_v58, %v2260_v16  ;;  %v1511_v30 = vpop.f32.mrf.mxu0  ;;  %v1704_v31 = vpop.f32.mrf.mxu1  ;;  %1976 = vmatmul.mubr.bf16.gmra.mxu0 %v3759_v53  ;;  %2169 = vmatmul.mubr.bf16.gmra.mxu1 %v3759_v53 }
 0x299   : > { %v2471_v33 = vmax.f32 %v2470_v55, %v2265_v20  ;;  %v2533_v38 = vmax.f32 %v2532_v63, %v2267_v22  ;;  %v2266_v34 = vmax.f32 %v1508_v24, 0.0  ;;  %v2268_v35 = vmax.f32 %v1701_v23, 0.0  ;;  %1985 = vmatprep.mubr.bf16.mxu0 %v3266_v10  ;;  %2178 = vmatprep.mubr.bf16.mxu1 %v3266_v10 }
 0x29a   : > { %v1512_v26 = vadd.f32 %v1511_v30, %v3828_v6  ;;  %v1705_v29 = vadd.f32 %v1704_v31, %v3830_v9  ;;  %v1513_v36 = vpop.f32.mrf.mxu0  ;;  %v1706_v37 = vpop.f32.mrf.mxu1 }
 0x29b   : > { %v2502_v39 = vmax.f32 %v2501_v25, %v2266_v34  ;;  %v2564_v40 = vmax.f32 %v2563_v28, %v2268_v35  ;;  %v1514_v41 = vadd.f32 %v1513_v36, %v3834_v13  ;;  %v1707_v53 = vadd.f32 %v1706_v37, %v3836_v14 }
 0x29c   : > { %v2273_v43 = vmax.f32 %v1512_v26, 0.0  ;;  %v2275_v45 = vmax.f32 %v1705_v29, 0.0  ;;  %v1515_v46 = vpop.f32.mrf.mxu0  ;;  %v1708_v47 = vpop.f32.mrf.mxu1 }
 0x29d   : > { %v2274_v48 = vmax.f32 %v1514_v41, 0.0  ;;  %v2276_v49 = vmax.f32 %v1707_v53, 0.0  ;;  %v1516_v50 = vadd.f32 %v1515_v46, %v3828_v6  ;;  %v1709_v51 = vadd.f32 %v1708_v47, %v3830_v9 }
 0x29e   : > { %v2472_v52 = vmax.f32 %v2471_v33, %v2273_v43  ;;  %v2534_v54 = vmax.f32 %v2533_v38, %v2275_v45  ;;  %v1517_v57 = vpop.f32.mrf.mxu0  ;;  %v1710_v27 = vpop.f32.mrf.mxu1 }
 0x29f   : > { %v2503_v59 = vmax.f32 %v2502_v39, %v2274_v48  ;;  %v2565_v61 = vmax.f32 %v2564_v40, %v2276_v49  ;;  %v2281_v60 = vmax.f32 %v1516_v50, 0.0  ;;  %v2283_v0 = vmax.f32 %v1709_v51, 0.0 }
 0x2a0   : > { %v1518_v1 = vadd.f32 %v1517_v57, %v3834_v13  ;;  %v1711_v2 = vadd.f32 %v1710_v27, %v3836_v14  ;;  %v1521_v3 = vpop.f32.mrf.mxu0  ;;  %v1714_v4 = vpop.f32.mrf.mxu1  ;;  %1986 = vmatmul.mubr.bf16.gmra.mxu0 %v3765_v62  ;;  %2179 = vmatmul.mubr.bf16.gmra.mxu1 %v3765_v62 }
 0x2a1   : > { %v2473_v58 = vmax.f32 %v2472_v52, %v2281_v60  ;;  %v2535_v7 = vmax.f32 %v2534_v54, %v2283_v0  ;;  %v1522_v21 = vadd.f32 %v1521_v3, %v3828_v6  ;;  %v1715_v44 = vadd.f32 %v1714_v4, %v3830_v9  ;;  %1995 = vmatprep.mubr.bf16.mxu0 %v3266_v10 }
 0x2a2   : > { %v2282_v56 = vmax.f32 %v1518_v1, 0.0  ;;  %v2284_v17 = vmax.f32 %v1711_v2, 0.0  ;;  %v1523_v42 = vpop.f32.mrf.mxu0  ;;  %v1716_v55 = vpop.f32.mrf.mxu1  ;;  %2188 = vmatprep.mubr.bf16.mxu1 %v3266_v10 }
 0x2a3   : > { %v2289_v63 = vmax.f32 %v1522_v21, 0.0  ;;  %v2291_v11 = vmax.f32 %v1715_v44, 0.0  ;;  %v1524_v12 = vadd.f32 %v1523_v42, %v3834_v13  ;;  %v1717_v62 = vadd.f32 %v1716_v55, %v3836_v14 }
 0x2a4   : > { %v2504_v15 = vmax.f32 %v2503_v59, %v2282_v56  ;;  %v2566_v16 = vmax.f32 %v2565_v61, %v2284_v17  ;;  %v1525_v18 = vpop.f32.mrf.mxu0  ;;  %v1718_v19 = vpop.f32.mrf.mxu1 }
 0x2a5   : > { %v2474_v20 = vmax.f32 %v2473_v58, %v2289_v63  ;;  %v2536_v22 = vmax.f32 %v2535_v7, %v2291_v11  ;;  %v2290_v24 = vmax.f32 %v1524_v12, 0.0  ;;  %v2292_v23 = vmax.f32 %v1717_v62, 0.0 }
 0x2a6   : > { %v1526_v25 = vadd.f32 %v1525_v18, %v3828_v6  ;;  %v1719_v28 = vadd.f32 %v1718_v19, %v3830_v9  ;;  %v1527_v30 = vpop.f32.mrf.mxu0  ;;  %v1720_v31 = vpop.f32.mrf.mxu1 }
 0x2a7   : > { %v2505_v33 = vmax.f32 %v2504_v15, %v2290_v24  ;;  %v2567_v38 = vmax.f32 %v2566_v16, %v2292_v23  ;;  %v1528_v34 = vadd.f32 %v1527_v30, %v3834_v13  ;;  %v1721_v35 = vadd.f32 %v1720_v31, %v3836_v14 }
 0x2a8   : > { %v2297_v26 = vmax.f32 %v1526_v25, 0.0  ;;  %v2299_v29 = vmax.f32 %v1719_v28, 0.0  ;;  %v1531_v36 = vpop.f32.mrf.mxu0  ;;  %v1724_v37 = vpop.f32.mrf.mxu1  ;;  %1996 = vmatmul.mubr.bf16.gmra.mxu0 %v3775_v5  ;;  %2189 = vmatmul.mubr.bf16.gmra.mxu1 %v3775_v5 }
 0x2a9   : > { %v2298_v39 = vmax.f32 %v1528_v34, 0.0  ;;  %v2300_v40 = vmax.f32 %v1721_v35, 0.0  ;;  %v1532_v41 = vadd.f32 %v1531_v36, %v3828_v6  ;;  %v1725_v53 = vadd.f32 %v1724_v37, %v3830_v9  ;;  %2005 = vmatprep.mubr.bf16.mxu0 %v3266_v10  ;;  %2198 = vmatprep.mubr.bf16.mxu1 %v3266_v10 }
 0x2aa   : > { %v2475_v43 = vmax.f32 %v2474_v20, %v2297_v26  ;;  %v2537_v45 = vmax.f32 %v2536_v22, %v2299_v29  ;;  %v1533_v46 = vpop.f32.mrf.mxu0  ;;  %v1726_v47 = vpop.f32.mrf.mxu1 }
 0x2ab   : > { %v2506_v48 = vmax.f32 %v2505_v33, %v2298_v39  ;;  %v2568_v49 = vmax.f32 %v2567_v38, %v2300_v40  ;;  %v2305_v50 = vmax.f32 %v1532_v41, 0.0  ;;  %v2307_v51 = vmax.f32 %v1725_v53, 0.0 }
 0x2ac   : > { %v1534_v5 = vadd.f32 %v1533_v46, %v3834_v13  ;;  %v1727_v52 = vadd.f32 %v1726_v47, %v3836_v14  ;;  %v1535_v54 = vpop.f32.mrf.mxu0  ;;  %v1728_v57 = vpop.f32.mrf.mxu1 }
 0x2ad   : > { %v2476_v27 = vmax.f32 %v2475_v43, %v2305_v50  ;;  %v2538_v59 = vmax.f32 %v2537_v45, %v2307_v51  ;;  %v1536_v61 = vadd.f32 %v1535_v54, %v3828_v6  ;;  %v1729_v10 = vadd.f32 %v1728_v57, %v3830_v9 }
 0x2ae   : > { %v2306_v60 = vmax.f32 %v1534_v5, 0.0  ;;  %v2308_v0 = vmax.f32 %v1727_v52, 0.0  ;;  %v1537_v1 = vpop.f32.mrf.mxu0  ;;  %v1730_v2 = vpop.f32.mrf.mxu1 }
 0x2af   : > { %v2313_v3 = vmax.f32 %v1536_v61, 0.0  ;;  %v2315_v4 = vmax.f32 %v1729_v10, 0.0  ;;  %v1538_v58 = vadd.f32 %v1537_v1, %v3834_v13  ;;  %v1731_v7 = vadd.f32 %v1730_v2, %v3836_v14 }
 0x2b0   : > { %v2507_v21 = vmax.f32 %v2506_v48, %v2306_v60  ;;  %v2569_v44 = vmax.f32 %v2568_v49, %v2308_v0  ;;  %v1541_v56 = vpop.f32.mrf.mxu0  ;;  %v1734_v17 = vpop.f32.mrf.mxu1  ;;  %2006 = vmatmul.mubr.bf16.gmra.mxu0 %v3781_v8  ;;  %2199 = vmatmul.mubr.bf16.gmra.mxu1 %v3781_v8 }
 0x2b1   : > { %v2477_v42 = vmax.f32 %v2476_v27, %v2313_v3  ;;  %v2539_v55 = vmax.f32 %v2538_v59, %v2315_v4  ;;  %v2314_v63 = vmax.f32 %v1538_v58, 0.0  ;;  %v2316_v11 = vmax.f32 %v1731_v7, 0.0 }
 0x2b2   : > { %v1542_v12 = vadd.f32 %v1541_v56, %v3828_v6  ;;  %v1735_v62 = vadd.f32 %v1734_v17, %v3830_v9  ;;  %v1543_v15 = vpop.f32.mrf.mxu0  ;;  %v1736_v16 = vpop.f32.mrf.mxu1 }
 0x2b3   : > { %v2508_v18 = vmax.f32 %v2507_v21, %v2314_v63  ;;  %v2570_v19 = vmax.f32 %v2569_v44, %v2316_v11  ;;  %v1544_v20 = vadd.f32 %v1543_v15, %v3834_v13  ;;  %v1737_v22 = vadd.f32 %v1736_v16, %v3836_v14 }
 0x2b4   : > { %v2321_v24 = vmax.f32 %v1542_v12, 0.0  ;;  %v2323_v23 = vmax.f32 %v1735_v62, 0.0  ;;  %v1545_v25 = vpop.f32.mrf.mxu0  ;;  %v1738_v8 = vpop.f32.mrf.mxu1 }
 0x2b5   : > { %v2322_v28 = vmax.f32 %v1544_v20, 0.0  ;;  %v2324_v30 = vmax.f32 %v1737_v22, 0.0  ;;  %v1546_v31 = vadd.f32 %v1545_v25, %v3828_v6  ;;  %v1739_v33 = vadd.f32 %v1738_v8, %v3830_v9 }
 0x2b6   : > { %v2478_v38 = vmax.f32 %v2477_v42, %v2321_v24  ;;  %v2540_v34 = vmax.f32 %v2539_v55, %v2323_v23  ;;  %v1547_v35 = vpop.f32.mrf.mxu0  ;;  %v1740_v26 = vpop.f32.mrf.mxu1 }
 0x2b7   : > { %v2509_v29 = vmax.f32 %v2508_v18, %v2322_v28  ;;  %v2571_v36 = vmax.f32 %v2570_v19, %v2324_v30  ;;  %v2329_v37 = vmax.f32 %v1546_v31, 0.0  ;;  %v2331_v39 = vmax.f32 %v1739_v33, 0.0 }
 0x2b8   : > { %v1548_v40 = vadd.f32 %v1547_v35, %v3834_v13  ;;  %v1741_v41 = vadd.f32 %v1740_v26, %v3836_v14  ;;  %v1551_v53 = vpop.f32.mrf.mxu0  ;;  %v1744_v43 = vpop.f32.mrf.mxu1 }
 0x2b9   : > { %v2479_v45 = vmax.f32 %v2478_v38, %v2329_v37  ;;  %v2541_v46 = vmax.f32 %v2540_v34, %v2331_v39  ;;  %v1552_v47 = vadd.f32 %v1551_v53, %v3828_v6  ;;  %v1745_v48 = vadd.f32 %v1744_v43, %v3830_v9 }
 0x2ba   : > { %v2330_v49 = vmax.f32 %v1548_v40, 0.0  ;;  %v2332_v50 = vmax.f32 %v1741_v41, 0.0  ;;  %v1553_v51 = vpop.f32.mrf.mxu0  ;;  %v1746_v5 = vpop.f32.mrf.mxu1 }
 0x2bb   : > { %v2337_v52 = vmax.f32 %v1552_v47, 0.0  ;;  %v2339_v54 = vmax.f32 %v1745_v48, 0.0  ;;  %v1554_v57 = vadd.f32 %v1553_v51, %v3834_v13  ;;  %v1747_v27 = vadd.f32 %v1746_v5, %v3836_v14 }
 0x2bc   : > { %v2510_v59 = vmax.f32 %v2509_v29, %v2330_v49  ;;  %v2572_v61 = vmax.f32 %v2571_v36, %v2332_v50  ;;  %v1555_v10 = vpop.f32.mrf.mxu0  ;;  %v1748_v60 = vpop.f32.mrf.mxu1 }
 0x2bd   : > { %v2480_v0 = vmax.f32 %v2479_v45, %v2337_v52  ;;  %v2542_v1 = vmax.f32 %v2541_v46, %v2339_v54  ;;  %v2338_v2 = vmax.f32 %v1554_v57, 0.0  ;;  %v2340_v3 = vmax.f32 %v1747_v27, 0.0 }
 0x2be   : > { %v1556_v4 = vadd.f32 %v1555_v10, %v3828_v6  ;;  %v1749_v58 = vadd.f32 %v1748_v60, %v3830_v9  ;;  %v1557_v7 = vpop.f32.mrf.mxu0  ;;  %v1750_v21 = vpop.f32.mrf.mxu1 }
 0x2bf   : > { %v2511_v44 = vmax.f32 %v2510_v59, %v2338_v2  ;;  %v2573_v56 = vmax.f32 %v2572_v61, %v2340_v3  ;;  %v1558_v17 = vadd.f32 %v1557_v7, %v3834_v13  ;;  %v1751_v42 = vadd.f32 %v1750_v21, %v3836_v14 }
 0x2c0   : > { %v2345_v55 = vmax.f32 %v1556_v4, 0.0  ;;  %v2347_v63 = vmax.f32 %v1749_v58, 0.0  ;;  %v1561_v11 = vpop.f32.mrf.mxu0  ;;  %v1754_v12 = vpop.f32.mrf.mxu1 }
 0x2c1   : > { %v2346_v62 = vmax.f32 %v1558_v17, 0.0  ;;  %v2348_v15 = vmax.f32 %v1751_v42, 0.0  ;;  %v1562_v16 = vadd.f32 %v1561_v11, %v3828_v6  ;;  %v1755_v18 = vadd.f32 %v1754_v12, %v3830_v9 }
 0x2c2   : > { %v2481_v19 = vmax.f32 %v2480_v0, %v2345_v55  ;;  %v2543_v20 = vmax.f32 %v2542_v1, %v2347_v63  ;;  %v1563_v22 = vpop.f32.mrf.mxu0  ;;  %v1756_v24 = vpop.f32.mrf.mxu1 }
 0x2c3   : > { %v2512_v23 = vmax.f32 %v2511_v44, %v2346_v62  ;;  %v2574_v25 = vmax.f32 %v2573_v56, %v2348_v15  ;;  %v2353_v8 = vmax.f32 %v1562_v16, 0.0  ;;  %v2355_v28 = vmax.f32 %v1755_v18, 0.0 }
 0x2c4   : > { %v1564_v30 = vadd.f32 %v1563_v22, %v3834_v13  ;;  %v1757_v31 = vadd.f32 %v1756_v24, %v3836_v14  ;;  %v1565_v33 = vpop.f32.mrf.mxu0  ;;  %v1758_v38 = vpop.f32.mrf.mxu1 }
 0x2c5   : > { %v2482_v34 = vmax.f32 %v2481_v19, %v2353_v8  ;;  %v2544_v35 = vmax.f32 %v2543_v20, %v2355_v28  ;;  %v1566_v26 = vadd.f32 %v1565_v33, %v3828_v6  ;;  %v1759_v29 = vadd.f32 %v1758_v38, %v3830_v9 }
 0x2c6   : > { %v2354_v36 = vmax.f32 %v1564_v30, 0.0  ;;  %v2356_v37 = vmax.f32 %v1757_v31, 0.0  ;;  %v1567_v39 = vpop.f32.mrf.mxu0  ;;  %v1760_v40 = vpop.f32.mrf.mxu1 }
 0x2c7   : > { %v2361_v41 = vmax.f32 %v1566_v26, 0.0  ;;  %v2363_v53 = vmax.f32 %v1759_v29, 0.0  ;;  %v1568_v43 = vadd.f32 %v1567_v39, %v3834_v13  ;;  %v1761_v45 = vadd.f32 %v1760_v40, %v3836_v14 }
 0x2c8   : > { %v2513_v46 = vmax.f32 %v2512_v23, %v2354_v36  ;;  %v2575_v47 = vmax.f32 %v2574_v25, %v2356_v37  ;;  %v1571_v48 = vpop.f32.mrf.mxu0  ;;  %v1764_v49 = vpop.f32.mrf.mxu1 }
 0x2c9   : > { %v2483_v50 = vmax.f32 %v2482_v34, %v2361_v41  ;;  %v2545_v51 = vmax.f32 %v2544_v35, %v2363_v53  ;;  %v2362_v5 = vmax.f32 %v1568_v43, 0.0  ;;  %v2364_v52 = vmax.f32 %v1761_v45, 0.0 }
 0x2ca   : > { %v1572_v54 = vadd.f32 %v1571_v48, %v3828_v6  ;;  %v1765_v57 = vadd.f32 %v1764_v49, %v3830_v9  ;;  %v1573_v27 = vpop.f32.mrf.mxu0  ;;  %v1766_v59 = vpop.f32.mrf.mxu1 }
 0x2cb   : > { %v2514_v61 = vmax.f32 %v2513_v46, %v2362_v5  ;;  %v2576_v10 = vmax.f32 %v2575_v47, %v2364_v52  ;;  %v1574_v60 = vadd.f32 %v1573_v27, %v3834_v13  ;;  %v1767_v0 = vadd.f32 %v1766_v59, %v3836_v14 }
 0x2cc   : > { %v2369_v1 = vmax.f32 %v1572_v54, 0.0  ;;  %v2371_v2 = vmax.f32 %v1765_v57, 0.0  ;;  %v1575_v3 = vpop.f32.mrf.mxu0  ;;  %v1768_v4 = vpop.f32.mrf.mxu1 }
 0x2cd   : > { %v2370_v58 = vmax.f32 %v1574_v60, 0.0  ;;  %v2372_v7 = vmax.f32 %v1767_v0, 0.0  ;;  %v1576_v21 = vadd.f32 %v1575_v3, %v3828_v6  ;;  %v1769_v44 = vadd.f32 %v1768_v4, %v3830_v9 }
 0x2ce   : > { %v2484_v56 = vmax.f32 %v2483_v50, %v2369_v1  ;;  %v2546_v17 = vmax.f32 %v2545_v51, %v2371_v2  ;;  %v1577_v42 = vpop.f32.mrf.mxu0  ;;  %v1770_v55 = vpop.f32.mrf.mxu1 }
 0x2cf   : > { %v2515_v63 = vmax.f32 %v2514_v61, %v2370_v58  ;;  %v2577_v11 = vmax.f32 %v2576_v10, %v2372_v7  ;;  %v2377_v12 = vmax.f32 %v1576_v21, 0.0  ;;  %v2379_v62 = vmax.f32 %v1769_v44, 0.0 }
 0x2d0   : > { %v1578_v15 = vadd.f32 %v1577_v42, %v3834_v13  ;;  %v1771_v16 = vadd.f32 %v1770_v55, %v3836_v14  ;;  %v1581_v18 = vpop.f32.mrf.mxu0  ;;  %v1774_v19 = vpop.f32.mrf.mxu1 }
 0x2d1   : > { %v2485_v20 = vmax.f32 %v2484_v56, %v2377_v12  ;;  %v2547_v22 = vmax.f32 %v2546_v17, %v2379_v62  ;;  %v1582_v24 = vadd.f32 %v1581_v18, %v3828_v6  ;;  %v1775_v23 = vadd.f32 %v1774_v19, %v3830_v9 }
 0x2d2   : > { %v2378_v25 = vmax.f32 %v1578_v15, 0.0  ;;  %v2380_v8 = vmax.f32 %v1771_v16, 0.0  ;;  %v1583_v28 = vpop.f32.mrf.mxu0  ;;  %v1776_v30 = vpop.f32.mrf.mxu1 }
 0x2d3   : > { %v2385_v31 = vmax.f32 %v1582_v24, 0.0  ;;  %v2387_v33 = vmax.f32 %v1775_v23, 0.0  ;;  %v1584_v38 = vadd.f32 %v1583_v28, %v3834_v13  ;;  %v1777_v34 = vadd.f32 %v1776_v30, %v3836_v14 }
 0x2d4   : > { %v2516_v35 = vmax.f32 %v2515_v63, %v2378_v25  ;;  %v2578_v26 = vmax.f32 %v2577_v11, %v2380_v8  ;;  %v1585_v29 = vpop.f32.mrf.mxu0  ;;  %v1778_v36 = vpop.f32.mrf.mxu1 }
 0x2d5   : > { %v2486_v37 = vmax.f32 %v2485_v20, %v2385_v31  ;;  %v2548_v39 = vmax.f32 %v2547_v22, %v2387_v33  ;;  %v2386_v40 = vmax.f32 %v1584_v38, 0.0  ;;  %v2388_v41 = vmax.f32 %v1777_v34, 0.0 }
 0x2d6   : > { %v1586_v53 = vadd.f32 %v1585_v29, %v3828_v6  ;;  %v1779_v43 = vadd.f32 %v1778_v36, %v3830_v9  ;;  %v1587_v45 = vpop.f32.mrf.mxu0  ;;  %v1780_v46 = vpop.f32.mrf.mxu1 }
 0x2d7   : > { %v2517_v47 = vmax.f32 %v2516_v35, %v2386_v40  ;;  %v2579_v48 = vmax.f32 %v2578_v26, %v2388_v41  ;;  %v1588_v49 = vadd.f32 %v1587_v45, %v3834_v13  ;;  %v1781_v50 = vadd.f32 %v1780_v46, %v3836_v14 }
 0x2d8   : > { %v2393_v51 = vmax.f32 %v1586_v53, 0.0  ;;  %v2395_v5 = vmax.f32 %v1779_v43, 0.0  ;;  %v1591_v52 = vpop.f32.mrf.mxu0  ;;  %v1784_v54 = vpop.f32.mrf.mxu1 }
 0x2d9   : > { %v2394_v57 = vmax.f32 %v1588_v49, 0.0  ;;  %v2396_v27 = vmax.f32 %v1781_v50, 0.0  ;;  %v1592_v59 = vadd.f32 %v1591_v52, %v3828_v6  ;;  %v1785_v61 = vadd.f32 %v1784_v54, %v3830_v9 }
 0x2da   : > { %v2487_v10 = vmax.f32 %v2486_v37, %v2393_v51  ;;  %v2549_v60 = vmax.f32 %v2548_v39, %v2395_v5  ;;  %v1593_v0 = vpop.f32.mrf.mxu0  ;;  %v1786_v1 = vpop.f32.mrf.mxu1 }
 0x2db   : > { %v2518_v2 = vmax.f32 %v2517_v47, %v2394_v57  ;;  %v2580_v3 = vmax.f32 %v2579_v48, %v2396_v27  ;;  %v2401_v4 = vmax.f32 %v1592_v59, 0.0  ;;  %v2403_v58 = vmax.f32 %v1785_v61, 0.0 }
 0x2dc   : > { %v1594_v7 = vadd.f32 %v1593_v0, %v3834_v13  ;;  %v1787_v21 = vadd.f32 %v1786_v1, %v3836_v14  ;;  %v1595_v44 = vpop.f32.mrf.mxu0  ;;  %v1788_v56 = vpop.f32.mrf.mxu1 }
 0x2dd   : > { %v2488_v17 = vmax.f32 %v2487_v10, %v2401_v4  ;;  %v2550_v42 = vmax.f32 %v2549_v60, %v2403_v58  ;;  %v1596_v55 = vadd.f32 %v1595_v44, %v3828_v6  ;;  %v1789_v63 = vadd.f32 %v1788_v56, %v3830_v9 }
 0x2de   : > { %v2402_v11 = vmax.f32 %v1594_v7, 0.0  ;;  %v2404_v12 = vmax.f32 %v1787_v21, 0.0  ;;  %v1597_v62 = vpop.f32.mrf.mxu0  ;;  %v1790_v15 = vpop.f32.mrf.mxu1 }
 0x2df   : > { %v2409_v16 = vmax.f32 %v1596_v55, 0.0  ;;  %v2411_v18 = vmax.f32 %v1789_v63, 0.0  ;;  %v1598_v19 = vadd.f32 %v1597_v62, %v3834_v13  ;;  %v1791_v20 = vadd.f32 %v1790_v15, %v3836_v14 }
 0x2e0   : > { %v2519_v22 = vmax.f32 %v2518_v2, %v2402_v11  ;;  %v2581_v24 = vmax.f32 %v2580_v3, %v2404_v12  ;;  %v1601_v23 = vpop.f32.mrf.mxu0  ;;  %v1794_v25 = vpop.f32.mrf.mxu1 }
 0x2e1   : > { %v2489_v8 = vmax.f32 %v2488_v17, %v2409_v16  ;;  %v2551_v28 = vmax.f32 %v2550_v42, %v2411_v18  ;;  %v2410_v30 = vmax.f32 %v1598_v19, 0.0  ;;  %v2412_v31 = vmax.f32 %v1791_v20, 0.0 }
 0x2e2   : > { %v1602_v33 = vadd.f32 %v1601_v23, %v3828_v6  ;;  %v1795_v38 = vadd.f32 %v1794_v25, %v3830_v9  ;;  %v1603_v34 = vpop.f32.mrf.mxu0  ;;  %v1796_v35 = vpop.f32.mrf.mxu1 }
 0x2e3   : > { %v2520_v26 = vmax.f32 %v2519_v22, %v2410_v30  ;;  %v2582_v29 = vmax.f32 %v2581_v24, %v2412_v31  ;;  %v1604_v36 = vadd.f32 %v1603_v34, %v3834_v13  ;;  %v1797_v37 = vadd.f32 %v1796_v35, %v3836_v14 }
 0x2e4   : > { %v2417_v39 = vmax.f32 %v1602_v33, 0.0  ;;  %v2419_v40 = vmax.f32 %v1795_v38, 0.0  ;;  %v1605_v41 = vpop.f32.mrf.mxu0  ;;  %v1798_v53 = vpop.f32.mrf.mxu1 }
 0x2e5   : > { %v2418_v43 = vmax.f32 %v1604_v36, 0.0  ;;  %v2420_v45 = vmax.f32 %v1797_v37, 0.0  ;;  %v1606_v46 = vadd.f32 %v1605_v41, %v3828_v6  ;;  %v1799_v47 = vadd.f32 %v1798_v53, %v3830_v9 }
 0x2e6   : > { %v2490_v48 = vmax.f32 %v2489_v8, %v2417_v39  ;;  %v2552_v49 = vmax.f32 %v2551_v28, %v2419_v40  ;;  %v1607_v50 = vpop.f32.mrf.mxu0  ;;  %v1800_v51 = vpop.f32.mrf.mxu1 }
 0x2e7   : > { %v2521_v5 = vmax.f32 %v2520_v26, %v2418_v43  ;;  %v2583_v52 = vmax.f32 %v2582_v29, %v2420_v45  ;;  %v2425_v54 = vmax.f32 %v1606_v46, 0.0  ;;  %v2427_v57 = vmax.f32 %v1799_v47, 0.0 }
 0x2e8   : > { %v1608_v27 = vadd.f32 %v1607_v50, %v3834_v13  ;;  %v1801_v59 = vadd.f32 %v1800_v51, %v3836_v14  ;;  %v1611_v61 = vpop.f32.mrf.mxu0  ;;  %v1804_v10 = vpop.f32.mrf.mxu1 }
 0x2e9   : > { %v2491_v60 = vmax.f32 %v2490_v48, %v2425_v54  ;;  %v2553_v0 = vmax.f32 %v2552_v49, %v2427_v57  ;;  %v1612_v1 = vadd.f32 %v1611_v61, %v3828_v6  ;;  %v1805_v2 = vadd.f32 %v1804_v10, %v3830_v9 }
 0x2ea   : > { %v2426_v3 = vmax.f32 %v1608_v27, 0.0  ;;  %v2428_v4 = vmax.f32 %v1801_v59, 0.0  ;;  %v1613_v58 = vpop.f32.mrf.mxu0  ;;  %v1806_v7 = vpop.f32.mrf.mxu1 }
 0x2eb   : > { %v2433_v21 = vmax.f32 %v1612_v1, 0.0  ;;  %v2435_v44 = vmax.f32 %v1805_v2, 0.0  ;;  %v1614_v56 = vadd.f32 %v1613_v58, %v3834_v13  ;;  %v1807_v17 = vadd.f32 %v1806_v7, %v3836_v14 }
 0x2ec   : > { %v2522_v42 = vmax.f32 %v2521_v5, %v2426_v3  ;;  %v2584_v55 = vmax.f32 %v2583_v52, %v2428_v4  ;;  %v1615_v63 = vpop.f32.mrf.mxu0  ;;  %v1808_v11 = vpop.f32.mrf.mxu1 }
 0x2ed   : > { %v2492_v12 = vmax.f32 %v2491_v60, %v2433_v21  ;;  %v2554_v62 = vmax.f32 %v2553_v0, %v2435_v44  ;;  %v2434_v15 = vmax.f32 %v1614_v56, 0.0  ;;  %v2436_v16 = vmax.f32 %v1807_v17, 0.0 }
 0x2ee   : > { %v1616_v18 = vadd.f32 %v1615_v63, %v3828_v6  ;;  %v1809_v19 = vadd.f32 %v1808_v11, %v3830_v9  ;;  %v1617_v20 = vpop.f32.mrf.mxu0  ;;  %v1810_v22 = vpop.f32.mrf.mxu1 }
 0x2ef   : > { %v2523_v24 = vmax.f32 %v2522_v42, %v2434_v15  ;;  %v2585_v23 = vmax.f32 %v2584_v55, %v2436_v16  ;;  %v1618_v25 = vadd.f32 %v1617_v20, %v3834_v13  ;;  %v1811_v8 = vadd.f32 %v1810_v22, %v3836_v14 }
 0x2f0   : > { %v2441_v28 = vmax.f32 %v1616_v18, 0.0  ;;  %v2443_v30 = vmax.f32 %v1809_v19, 0.0  ;;  %v1621_v31 = vpop.f32.mrf.mxu0  ;;  %v1814_v33 = vpop.f32.mrf.mxu1 }
 0x2f1   : > { %v2442_v38 = vmax.f32 %v1618_v25, 0.0  ;;  %v2444_v34 = vmax.f32 %v1811_v8, 0.0  ;;  %v1622_v35 = vadd.f32 %v1621_v31, %v3828_v6  ;;  %v1815_v26 = vadd.f32 %v1814_v33, %v3830_v9 }
 0x2f2   : > { %v2493_v29 = vmax.f32 %v2492_v12, %v2441_v28  ;;  %v2555_v36 = vmax.f32 %v2554_v62, %v2443_v30  ;;  %v1623_v37 = vpop.f32.mrf.mxu0  ;;  %v1816_v39 = vpop.f32.mrf.mxu1  ;;  %v3267_v62 = vmov 1966171168  }
 0x2f3   : > { %v2524_v40 = vmax.f32 %v2523_v24, %v2442_v38  ;;  %v2586_v41 = vmax.f32 %v2585_v23, %v2444_v34  ;;  %v2449_v53 = vmax.f32 %v1622_v35, 0.0  ;;  %v2451_v43 = vmax.f32 %v1815_v26, 0.0 }
 0x2f4   : > { %v1624_v45 = vadd.f32 %v1623_v37, %v3834_v13  ;;  %v1817_v46 = vadd.f32 %v1816_v39, %v3836_v14  ;;  %v1625_v47 = vpop.f32.mrf.mxu0  ;;  %v1818_v48 = vpop.f32.mrf.mxu1  ;;  %v2825_v15 = vunpack.c.l.s4 %v3267_v62  ;;  %v3241_v62 = vld [vmem:[%s4396_s6] sm:$0xff] }
 0x2f5   : > { %v2494_v49 = vmax.f32 %v2493_v29, %v2449_v53  ;;  %v2556_v50 = vmax.f32 %v2555_v36, %v2451_v43  ;;  %v1626_v51 = vadd.f32 %v1625_v47, %v3828_v6  ;;  %v1819_v5 = vadd.f32 %v1818_v48, %v3830_v9 }
 0x2f6   : > { %v2450_v52 = vmax.f32 %v1624_v45, 0.0  ;;  %v2452_v54 = vmax.f32 %v1817_v46, 0.0  ;;  %v1627_v57 = vpop.f32.mrf.mxu0  ;;  %v1820_v27 = vpop.f32.mrf.mxu1  ;;  %v2826_v33 = vunpack.c.0.s8 %v2825_v15 }
 0x2f7   : > { %v2457_v59 = vmax.f32 %v1626_v51, 0.0  ;;  %v2459_v61 = vmax.f32 %v1819_v5, 0.0  ;;  %v1628_v10 = vadd.f32 %v1627_v57, %v3834_v13  ;;  %v1821_v60 = vadd.f32 %v1820_v27, %v3836_v14 }
 0x2f8   : > { %v2525_v0 = vmax.f32 %v2524_v40, %v2450_v52  ;;  %v2587_v1 = vmax.f32 %v2586_v41, %v2452_v54  ;;  %v3994_v2 = vpop.f32.mrf.mxu0  ;;  %v3996_v3 = vpop.f32.mrf.mxu1  ;;  %v4023_v53 = vsub.s32 %v2826_v33, %v3815_v32 }
 0x2f9   : > { %v2495_v4 = vmax.f32 %v2494_v49, %v2457_v59  ;;  %v2557_v6 = vmax.f32 %v2556_v50, %v2459_v61  ;;  %v2458_v58 = vmax.f32 %v1628_v10, 0.0  ;;  %v2460_v9 = vmax.f32 %v1821_v60, 0.0 }
 0x2fa   : > { %v3998_v7 = vpop.f32.mrf.mxu0  ;;  %v4000_v21 = vpop.f32.mrf.mxu1 }
 0x2fb   : > { %v2764_v44 = vrot.slane %v2495_v4, 4  ;;  %v2776_v56 = vrot.slane %v2557_v6, 4  ;;  %v2526_v17 = vmax.f32 %v2525_v0, %v2458_v58  ;;  %v2588_v13 = vmax.f32 %v2587_v1, %v2460_v9 }
 0x2fc   : > { %v4002_v42 = vpop.f32.mrf.mxu0  ;;  %v4004_v14 = vpop.f32.mrf.mxu1 }
 0x2fd   : > { %v2765_v55 = vmax.f32 %v2495_v4, %v2764_v44  ;;  %v2777_v63 = vmax.f32 %v2557_v6, %v2776_v56  ;;  %v2770_v11 = vrot.slane %v2526_v17, 4  ;;  %v2782_v12 = vrot.slane %v2588_v13, 4 }
 0x2fe   : > { %v4006_v16 = vpop.f32.mrf.mxu0  ;;  %v4008_v18 = vpop.f32.mrf.mxu1  ;;  %v1095_v44 = vsub.s32 4, %v3815_v32  ;;  %v1103_v56 = vsub.s32 6, %v3815_v32 }
 0x2ff   : > { %v2766_v19 = vrot.slane %v2765_v55, 2  ;;  %v2778_v20 = vrot.slane %v2777_v63, 2  ;;  %v2771_v22 = vmax.f32 %v2526_v17, %v2770_v11  ;;  %v2783_v24 = vmax.f32 %v2588_v13, %v2782_v12 }
 0x300   : > { %v4010_v23 = vpop.f32.mrf.mxu0  ;;  %v4012_v25 = vpop.f32.mrf.mxu1  ;;  %v4076_v15 = vrot.slane %v3241_v62, %v1095_v44 }
 0x301   : > { %v2767_v8 = vmax.f32 %v2765_v55, %v2766_v19  ;;  %v2779_v28 = vmax.f32 %v2777_v63, %v2778_v20  ;;  %v2772_v30 = vrot.slane %v2771_v22, 2  ;;  %v2784_v31 = vrot.slane %v2783_v24, 2 }
 0x302   : > { %v4014_v38 = vpop.f32.mrf.mxu0  ;;  %v4016_v34 = vpop.f32.mrf.mxu1  ;;  %v1099_v55 = vsub.s32 5, %v3815_v32  ;;  %v1107_v63 = vsub.s32 7, %v3815_v32  ;;  %v4078_v19 = vrot.slane %v3241_v62, %v1103_v56  ;;  %v1862_v32 = vadd.f32 %v4002_v42, %v4076_v15 }
 0x303   : > { %v2768_v35 = vrot.slane %v2767_v8, 1  ;;  %v2780_v26 = vrot.slane %v2779_v28, 1  ;;  %v2773_v29 = vmax.f32 %v2771_v22, %v2772_v30  ;;  %v2785_v36 = vmax.f32 %v2783_v24, %v2784_v31 }
 0x304   : > { %v4018_v37 = vpop.f32.mrf.mxu0  ;;  %v4020_v39 = vpop.f32.mrf.mxu1  ;;  %v4084_v24 = vrot.slane %v3241_v62, %v1099_v55  ;;  %v1858_v33 = vadd.f32 %v3994_v2, %v4076_v15  ;;  %v1868_v2 = vadd.f32 %v4010_v23, %v4076_v15 }
 0x305   : > { %v2774_v40 = vrot.slane %v2773_v29, 1  ;;  %v2786_v41 = vrot.slane %v2785_v36, 1  ;;  %v2769_v46 = vmax.f32 %v2767_v8, %v2768_v35  ;;  %v2781_v47 = vmax.f32 %v2779_v28, %v2780_v26 }
 0x306   : > { %v4025_v43 = vpop.f32.mrf.mxu0  ;;  %v4027_v45 = vpop.f32.mrf.mxu1  ;;  %v4086_v8 = vrot.slane %v3241_v62, %v1107_v63  ;;  %v2055_v28 = vadd.f32 %v4004_v14, %v4078_v19  ;;  %v2051_v35 = vadd.f32 %v3996_v3, %v4078_v19  ;;  %v1864_v26 = vadd.f32 %v4006_v16, %v4084_v24 }
 0x307   : > { %v2775_v48 = vmax.f32 %v2773_v29, %v2774_v40  ;;  %v2787_v49 = vmax.f32 %v2785_v36, %v2786_v41  ;;  %v1860_v14 = vadd.f32 %v3998_v7, %v4084_v24  ;;  %v2061_v3 = vadd.f32 %v4012_v25, %v4078_v19 }
 0x308   : > { %v4029_v50 = vpop.f32.mrf.mxu0  ;;  %v4031_v51 = vpop.f32.mrf.mxu1  ;;  %v2057_v29 = vadd.f32 %v4008_v18, %v4086_v8  ;;  %v2053_v40 = vadd.f32 %v4000_v21, %v4086_v8  ;;  %v2221_v16 = vmax.f32 %v1862_v32, 0.0  ;;  %v2223_v41 = vmax.f32 %v2055_v28, 0.0 }
 0x309   : > { %v2820_v5 = vcombine.low %v2769_v46, %v2775_v48  ;;  %v2821_v52 = vcombine.low %v2781_v47, %v2787_v49  ;;  %v1870_v47 = vadd.f32 %v4014_v38, %v4084_v24  ;;  %v2063_v7 = vadd.f32 %v4016_v34, %v4086_v8 }
 0x30a   : > { %v4033_v54 = vpop.f32.mrf.mxu0  ;;  %v4035_v57 = vpop.f32.mrf.mxu1  ;;  %v1872_v21 = vadd.f32 %v4018_v37, %v4076_v15  ;;  %v2065_v23 = vadd.f32 %v4020_v39, %v4078_v19  ;;  %v2213_v48 = vmax.f32 %v1858_v33, 0.0  ;;  %v2215_v25 = vmax.f32 %v2051_v35, 0.0 }
 0x30b   : > { %v4038_v27 = vrot.slane %v2820_v5, %v4023_v53  ;;  %v4041_v59 = vrot.slane %v2821_v52, %v4023_v53  ;;  %v2222_v49 = vmax.f32 %v1864_v26, 0.0  ;;  %v2224_v5 = vmax.f32 %v2057_v29, 0.0 }
 0x30c   : > { %v4043_v61 = vpop.f32.mrf.mxu0  ;;  %v4045_v10 = vpop.f32.mrf.mxu1  ;;  %v2214_v56 = vmax.f32 %v1860_v14, 0.0  ;;  %v2216_v55 = vmax.f32 %v2053_v40, 0.0  ;;  %v2229_v38 = vmax.f32 %v1868_v2, 0.0  ;;  %v2231_v63 = vmax.f32 %v2061_v3, 0.0 }
 0x30d   : > { %v2852_v60 = vcombine.low %v4038_v27, %v4041_v59  ;;  %v2589_v62 = vmax.f32 %v2213_v48, %v2221_v16  ;;  %v2651_v34 = vmax.f32 %v2215_v25, %v2223_v41  ;;  %v1874_v37 = vadd.f32 %v4025_v43, %v4084_v24 }
 0x30e   : > { %v4049_v0 = vpop.f32.mrf.mxu0  ;;  %v4051_v1 = vpop.f32.mrf.mxu1  ;;  %v2067_v39 = vadd.f32 %v4027_v45, %v4086_v8  ;;  %v2230_v33 = vmax.f32 %v1870_v47, 0.0  ;;  %v2232_v35 = vmax.f32 %v2063_v7, 0.0  ;;  %v2237_v26 = vmax.f32 %v1872_v21, 0.0 }
 0x30f   : > { %v2239_v29 = vmax.f32 %v2065_v23, 0.0  ;;  %v2620_v14 = vmax.f32 %v2214_v56, %v2222_v49  ;;  %v2682_v40 = vmax.f32 %v2216_v55, %v2224_v5  ;;  %v1878_v2 = vadd.f32 %v4029_v50, %v4076_v15 }
 0x310   : > { %v4053_v4 = vpop.f32.mrf.mxu0  ;;  %v4055_v6 = vpop.f32.mrf.mxu1  ;;  %v2071_v3 = vadd.f32 %v4031_v51, %v4078_v19  ;;  %v2590_v45 = vmax.f32 %v2589_v62, %v2229_v38  ;;  %v2652_v41 = vmax.f32 %v2651_v34, %v2231_v63  ;;  %v1880_v47 = vadd.f32 %v4033_v54, %v4084_v24 }
 0x311   : > { %v2073_v7 = vadd.f32 %v4035_v57, %v4086_v8  ;;  %v2238_v21 = vmax.f32 %v1874_v37, 0.0  ;;  %v2240_v23 = vmax.f32 %v2067_v39, 0.0  ;;  %v1882_v50 = vadd.f32 %v4043_v61, %v4076_v15 }
 0x312   : > { %v4057_v58 = vpop.f32.mrf.mxu0  ;;  %v4059_v9 = vpop.f32.mrf.mxu1  ;;  %v2075_v51 = vadd.f32 %v4045_v10, %v4078_v19  ;;  %v2621_v49 = vmax.f32 %v2620_v14, %v2230_v33  ;;  %v2683_v5 = vmax.f32 %v2682_v40, %v2232_v35  ;;  %v2591_v56 = vmax.f32 %v2590_v45, %v2237_v26 }
 0x313   : > { %v2653_v55 = vmax.f32 %v2652_v41, %v2239_v29  ;;  %v2245_v54 = vmax.f32 %v1878_v2, 0.0  ;;  %v2247_v38 = vmax.f32 %v2071_v3, 0.0  ;;  %v1884_v57 = vadd.f32 %v4049_v0, %v4084_v24 }
 0x314   : > { %v4063_v17 = vpop.f32.mrf.mxu0  ;;  %v4065_v13 = vpop.f32.mrf.mxu1  ;;  %v2077_v63 = vadd.f32 %v4051_v1, %v4086_v8  ;;  %v2246_v10 = vmax.f32 %v1880_v47, 0.0  ;;  %v2248_v34 = vmax.f32 %v2073_v7, 0.0  ;;  %v1888_v37 = vadd.f32 %v4053_v4, %v4076_v15 }
 0x315   : > { %v2081_v39 = vadd.f32 %v4055_v6, %v4078_v19  ;;  %v2622_v33 = vmax.f32 %v2621_v49, %v2238_v21  ;;  %v2684_v35 = vmax.f32 %v2683_v5, %v2240_v23  ;;  %v2253_v26 = vmax.f32 %v1882_v50, 0.0 }
 0x316   : > { %v4069_v11 = vpop.f32.mrf.mxu0  ;;  %v4071_v12 = vpop.f32.mrf.mxu1  ;;  %v2255_v29 = vmax.f32 %v2075_v51, 0.0  ;;  %v1890_v1 = vadd.f32 %v4057_v58, %v4084_v24  ;;  %v2083_v40 = vadd.f32 %v4059_v9, %v4086_v8  ;;  %v1892_v4 = vadd.f32 %v4063_v17, %v4076_v15 }
 0x317   : > { %v2085_v6 = vadd.f32 %v4065_v13, %v4078_v19  ;;  %v2592_v2 = vmax.f32 %v2591_v56, %v2245_v54  ;;  %v2654_v3 = vmax.f32 %v2653_v55, %v2247_v38  ;;  %v2254_v45 = vmax.f32 %v1884_v57, 0.0 }
 0x318   : > { %v4080_v20 = vpop.f32.mrf.mxu0  ;;  %v4082_v22 = vpop.f32.mrf.mxu1  ;;  %v2256_v41 = vmax.f32 %v2077_v63, 0.0  ;;  %v2623_v21 = vmax.f32 %v2622_v33, %v2246_v10  ;;  %v2685_v23 = vmax.f32 %v2684_v35, %v2248_v34  ;;  %v2261_v58 = vmax.f32 %v1888_v37, 0.0 }
 0x319   : > { %v2263_v50 = vmax.f32 %v2081_v39, 0.0  ;;  %v2593_v51 = vmax.f32 %v2592_v2, %v2253_v26  ;;  %v2655_v9 = vmax.f32 %v2654_v3, %v2255_v29  ;;  %v1894_v17 = vadd.f32 %v4069_v11, %v4084_v24 }
 0x31a   : > { %v4092_v30 = vpop.f32.mrf.mxu0  ;;  %v4094_v31 = vpop.f32.mrf.mxu1  ;;  %v2087_v13 = vadd.f32 %v4071_v12, %v4086_v8  ;;  %v2262_v56 = vmax.f32 %v1890_v1, 0.0  ;;  %v2264_v55 = vmax.f32 %v2083_v40, 0.0  ;;  %v2269_v54 = vmax.f32 %v1892_v4, 0.0 }
 0x31b   : > { %v2271_v38 = vmax.f32 %v2085_v6, 0.0  ;;  %v2624_v57 = vmax.f32 %v2623_v21, %v2254_v45  ;;  %v2686_v63 = vmax.f32 %v2685_v23, %v2256_v41  ;;  %v1898_v10 = vadd.f32 %v4080_v20, %v4076_v15 }
 0x31c   : > { %v4104_v42 = vpop.f32.mrf.mxu0  ;;  %v4106_v36 = vpop.f32.mrf.mxu1  ;;  %v2091_v34 = vadd.f32 %v4082_v22, %v4078_v19  ;;  %v2594_v12 = vmax.f32 %v2593_v51, %v2261_v58  ;;  %v2656_v39 = vmax.f32 %v2655_v9, %v2263_v50  ;;  %v1900_v33 = vadd.f32 %v4092_v30, %v4084_v24 }
 0x31d   : > { %v2093_v35 = vadd.f32 %v4094_v31, %v4086_v8  ;;  %v2270_v26 = vmax.f32 %v1894_v17, 0.0  ;;  %v2272_v29 = vmax.f32 %v2087_v13, 0.0  ;;  %v1902_v20 = vadd.f32 %v4104_v42, %v4076_v15 }
 0x31e   : > { %v4116_v46 = vpop.f32.mrf.mxu0  ;;  %v4118_v18 = vpop.f32.mrf.mxu1  ;;  %v2095_v22 = vadd.f32 %v4106_v36, %v4078_v19  ;;  %v2625_v4 = vmax.f32 %v2624_v57, %v2262_v56  ;;  %v2687_v6 = vmax.f32 %v2686_v63, %v2264_v55  ;;  %v2595_v2 = vmax.f32 %v2594_v12, %v2269_v54 }
 0x31f   : > { %v2657_v3 = vmax.f32 %v2656_v39, %v2271_v38  ;;  %v2277_v30 = vmax.f32 %v1898_v10, 0.0  ;;  %v2279_v45 = vmax.f32 %v2091_v34, 0.0  ;;  %v1904_v31 = vadd.f32 %v4116_v46, %v4084_v24 }
 0x320   : > { %v4128_v52 = vpop.f32.mrf.mxu0  ;;  %v4130_v44 = vpop.f32.mrf.mxu1  ;;  %v2097_v41 = vadd.f32 %v4118_v18, %v4086_v8  ;;  %v2278_v36 = vmax.f32 %v1900_v33, 0.0  ;;  %v2280_v23 = vmax.f32 %v2093_v35, 0.0  ;;  %v2626_v51 = vmax.f32 %v2625_v4, %v2270_v26 }
 0x321   : > { %v1908_v58 = vadd.f32 %v4128_v52, %v4076_v15  ;;  %v2101_v50 = vadd.f32 %v4130_v44, %v4078_v19  ;;  %v2688_v9 = vmax.f32 %v2687_v6, %v2272_v29  ;;  %v2285_v17 = vmax.f32 %v1902_v20, 0.0 }
 0x322   : > { %v4136_v32 = vpop.f32.mrf.mxu0  ;;  %v4138_v28 = vpop.f32.mrf.mxu1  ;;  %v2287_v13 = vmax.f32 %v2095_v22, 0.0  ;;  %v2596_v54 = vmax.f32 %v2595_v2, %v2277_v30  ;;  %v2658_v38 = vmax.f32 %v2657_v3, %v2279_v45  ;;  %v2286_v57 = vmax.f32 %v1904_v31, 0.0 }
 0x323   : > { %v1910_v18 = vadd.f32 %v4136_v32, %v4084_v24  ;;  %v2103_v55 = vadd.f32 %v4138_v28, %v4086_v8  ;;  %v2288_v63 = vmax.f32 %v2097_v41, 0.0  ;;  %v2627_v12 = vmax.f32 %v2626_v51, %v2278_v36 }
 0x324   : > { %v4144_v43 = vpop.f32.mrf.mxu0  ;;  %v4146_v16 = vpop.f32.mrf.mxu1  ;;  %v2689_v39 = vmax.f32 %v2688_v9, %v2280_v23  ;;  %v2293_v32 = vmax.f32 %v1908_v58, 0.0  ;;  %v2295_v33 = vmax.f32 %v2101_v50, 0.0  ;;  %v2597_v35 = vmax.f32 %v2596_v54, %v2285_v17 }
 0x325   : > { %v1912_v52 = vadd.f32 %v4144_v43, %v4076_v15  ;;  %v2105_v44 = vadd.f32 %v4146_v16, %v4078_v19  ;;  %v2659_v28 = vmax.f32 %v2658_v38, %v2287_v13  ;;  %v2294_v20 = vmax.f32 %v1910_v18, 0.0 }
 0x326   : > { %v4156_v48 = vpop.f32.mrf.mxu0  ;;  %v4158_v25 = vpop.f32.mrf.mxu1  ;;  %v2296_v22 = vmax.f32 %v2103_v55, 0.0  ;;  %v2628_v2 = vmax.f32 %v2627_v12, %v2286_v57  ;;  %v2690_v3 = vmax.f32 %v2689_v39, %v2288_v63 }
 0x327   : > { %v1914_v43 = vadd.f32 %v4156_v48, %v4084_v24  ;;  %v2107_v16 = vadd.f32 %v4158_v25, %v4086_v8  ;;  %v2301_v4 = vmax.f32 %v1912_v52, 0.0  ;;  %v2303_v6 = vmax.f32 %v2105_v44, 0.0 }
 0x328   : > { %v4164_v61 = vpop.f32.mrf.mxu0  ;;  %v4166_v62 = vpop.f32.mrf.mxu1  ;;  %v2598_v25 = vmax.f32 %v2597_v35, %v2293_v32  ;;  %v2660_v41 = vmax.f32 %v2659_v28, %v2295_v33  ;;  %v2629_v17 = vmax.f32 %v2628_v2, %v2294_v20  ;;  %v2691_v13 = vmax.f32 %v2690_v3, %v2296_v22 }
 0x329   : > { %v1918_v30 = vadd.f32 %v4164_v61, %v4076_v15  ;;  %v2111_v45 = vadd.f32 %v4166_v62, %v4078_v19  ;;  %v2302_v58 = vmax.f32 %v1914_v43, 0.0  ;;  %v2304_v50 = vmax.f32 %v2107_v16, 0.0 }
 0x32a   : > { %v4172_v0 = vpop.f32.mrf.mxu0  ;;  %v4174_v14 = vpop.f32.mrf.mxu1  ;;  %v2599_v18 = vmax.f32 %v2598_v25, %v2301_v4  ;;  %v2661_v55 = vmax.f32 %v2660_v41, %v2303_v6 }
 0x32b   : > { %v1920_v36 = vadd.f32 %v4172_v0, %v4084_v24  ;;  %v2113_v23 = vadd.f32 %v4174_v14, %v4086_v8  ;;  %v2309_v0 = vmax.f32 %v1918_v30, 0.0  ;;  %v2311_v52 = vmax.f32 %v2111_v45, 0.0 }
 0x32c   : > { %v4184_v47 = vpop.f32.mrf.mxu0  ;;  %v4186_v7 = vpop.f32.mrf.mxu1  ;;  %v2630_v12 = vmax.f32 %v2629_v17, %v2302_v58  ;;  %v2692_v39 = vmax.f32 %v2691_v13, %v2304_v50 }
 0x32d   : > { %v1922_v61 = vadd.f32 %v4184_v47, %v4076_v15  ;;  %v2115_v62 = vadd.f32 %v4186_v7, %v4078_v19  ;;  %v2310_v7 = vmax.f32 %v1920_v36, 0.0  ;;  %v2312_v38 = vmax.f32 %v2113_v23, 0.0 }
 0x32e   : > { %v4192_v49 = vpop.f32.mrf.mxu0  ;;  %v4194_v5 = vpop.f32.mrf.mxu1  ;;  %v2600_v16 = vmax.f32 %v2599_v18, %v2309_v0 }
 0x32f   : > { %v1924_v14 = vadd.f32 %v4192_v49, %v4084_v24  ;;  %v2117_v44 = vadd.f32 %v4194_v5, %v4086_v8  ;;  %v2317_v32 = vmax.f32 %v1922_v61, 0.0  ;;  %v2319_v33 = vmax.f32 %v2115_v62, 0.0 }
 0x330   : > { %v4200_v11 = vpop.f32.mrf.mxu0  ;;  %v4202_v37 = vpop.f32.mrf.mxu1  ;;  %v2631_v2 = vmax.f32 %v2630_v12, %v2310_v7  ;;  %v2693_v3 = vmax.f32 %v2692_v39, %v2312_v38 }
 0x331   : > { %v1928_v57 = vadd.f32 %v4200_v11, %v4076_v15  ;;  %v2121_v63 = vadd.f32 %v4202_v37, %v4078_v19  ;;  %v2662_v37 = vmax.f32 %v2661_v55, %v2311_v52  ;;  %v2318_v20 = vmax.f32 %v1924_v14, 0.0 }
 0x332   : > { %v4212_v1 = vpop.f32.mrf.mxu0  ;;  %v4214_v40 = vpop.f32.mrf.mxu1  ;;  %v2320_v22 = vmax.f32 %v2117_v44, 0.0 }
 0x333   : > { %v1930_v5 = vadd.f32 %v4212_v1, %v4084_v24  ;;  %v2123_v28 = vadd.f32 %v4214_v40, %v4086_v8  ;;  %v2325_v30 = vmax.f32 %v1928_v57, 0.0  ;;  %v2327_v45 = vmax.f32 %v2121_v63, 0.0 }
 0x334   : > { %v4220_v42 = vpop.f32.mrf.mxu0  ;;  %v4222_v21 = vpop.f32.mrf.mxu1  ;;  %v2601_v1 = vmax.f32 %v2600_v16, %v2317_v32  ;;  %v2663_v25 = vmax.f32 %v2662_v37, %v2319_v33  ;;  %v2632_v61 = vmax.f32 %v2631_v2, %v2318_v20  ;;  %v2694_v62 = vmax.f32 %v2693_v3, %v2320_v22 }
 0x335   : > { %v1932_v43 = vadd.f32 %v4220_v42, %v4076_v15  ;;  %v2125_v11 = vadd.f32 %v4222_v21, %v4078_v19  ;;  %v2326_v36 = vmax.f32 %v1930_v5, 0.0  ;;  %v2328_v23 = vmax.f32 %v2123_v28, 0.0 }
 0x336   : > { %v4228_v46 = vpop.f32.mrf.mxu0  ;;  %v4230_v56 = vpop.f32.mrf.mxu1  ;;  %v2664_v0 = vmax.f32 %v2663_v25, %v2327_v45 }
 0x337   : > { %v1934_v40 = vadd.f32 %v4228_v46, %v4084_v24  ;;  %v2127_v42 = vadd.f32 %v4230_v56, %v4086_v8  ;;  %v2333_v58 = vmax.f32 %v1932_v43, 0.0  ;;  %v2335_v50 = vmax.f32 %v2125_v11, 0.0 }
 0x338   : > { %v4240_v10 = vpop.f32.mrf.mxu0  ;;  %v4242_v34 = vpop.f32.mrf.mxu1  ;;  %v2602_v46 = vmax.f32 %v2601_v1, %v2325_v30  ;;  %v2633_v57 = vmax.f32 %v2632_v61, %v2326_v36  ;;  %v2695_v63 = vmax.f32 %v2694_v62, %v2328_v23 }
 0x339   : > { %v1938_v17 = vadd.f32 %v4240_v10, %v4076_v15  ;;  %v2131_v13 = vadd.f32 %v4242_v34, %v4078_v19  ;;  %v2334_v14 = vmax.f32 %v1934_v40, 0.0  ;;  %v2336_v44 = vmax.f32 %v2127_v42, 0.0 }
 0x33a   : > { %v4248_v26 = vpop.f32.mrf.mxu0  ;;  %v4250_v29 = vpop.f32.mrf.mxu1  ;;  %v2603_v12 = vmax.f32 %v2602_v46, %v2333_v58  ;;  %v2665_v39 = vmax.f32 %v2664_v0, %v2335_v50 }
 0x33b   : > { %v1940_v56 = vadd.f32 %v4248_v26, %v4084_v24  ;;  %v2133_v52 = vadd.f32 %v4250_v29, %v4086_v8  ;;  %v2341_v32 = vmax.f32 %v1938_v17, 0.0  ;;  %v2343_v33 = vmax.f32 %v2131_v13, 0.0 }
 0x33c   : > { %v4256_v48 = vpop.f32.mrf.mxu0  ;;  %v4258_v31 = vpop.f32.mrf.mxu1  ;;  %v2634_v16 = vmax.f32 %v2633_v57, %v2334_v14  ;;  %v2696_v37 = vmax.f32 %v2695_v63, %v2336_v44 }
 0x33d   : > { %v1942_v7 = vadd.f32 %v4256_v48, %v4076_v15  ;;  %v2135_v10 = vadd.f32 %v4258_v31, %v4078_v19  ;;  %v2342_v48 = vmax.f32 %v1940_v56, 0.0  ;;  %v2344_v43 = vmax.f32 %v2133_v52, 0.0 }
 0x33e   : > { %v4268_v51 = vpop.f32.mrf.mxu0  ;;  %v4270_v9 = vpop.f32.mrf.mxu1  ;;  %v2604_v1 = vmax.f32 %v2603_v12, %v2341_v32  ;;  %v2666_v25 = vmax.f32 %v2665_v39, %v2343_v33 }
 0x33f   : > { %v1944_v26 = vadd.f32 %v4268_v51, %v4084_v24  ;;  %v2137_v29 = vadd.f32 %v4270_v9, %v4086_v8  ;;  %v2349_v20 = vmax.f32 %v1942_v7, 0.0  ;;  %v2351_v22 = vmax.f32 %v2135_v10, 0.0 }
 0x340   : > { %v4276_v47 = vpop.f32.mrf.mxu0  ;;  %v4278_v54 = vpop.f32.mrf.mxu1  ;;  %v2635_v36 = vmax.f32 %v2634_v16, %v2342_v48  ;;  %v2697_v23 = vmax.f32 %v2696_v37, %v2344_v43 }
 0x341   : > { %v1948_v31 = vadd.f32 %v4276_v47, %v4076_v15  ;;  %v2141_v11 = vadd.f32 %v4278_v54, %v4078_v19  ;;  %v2350_v47 = vmax.f32 %v1944_v26, 0.0  ;;  %v2352_v40 = vmax.f32 %v2137_v29, 0.0 }
 0x342   : > { %v1949_v49 = vpop.f32.mrf.mxu0  ;;  %v2142_v35 = vpop.f32.mrf.mxu1  ;;  %v2605_v61 = vmax.f32 %v2604_v1, %v2349_v20  ;;  %v2667_v62 = vmax.f32 %v2666_v25, %v2351_v22 }
 0x343   : > { %v1950_v51 = vadd.f32 %v1949_v49, %v4084_v24  ;;  %v2143_v9 = vadd.f32 %v2142_v35, %v4086_v8  ;;  %v2357_v58 = vmax.f32 %v1948_v31, 0.0  ;;  %v2359_v50 = vmax.f32 %v2141_v11, 0.0 }
 0x344   : > { %v1951_v4 = vpop.f32.mrf.mxu0  ;;  %v2144_v6 = vpop.f32.mrf.mxu1  ;;  %v2636_v56 = vmax.f32 %v2635_v36, %v2350_v47  ;;  %v2698_v52 = vmax.f32 %v2697_v23, %v2352_v40 }
 0x345   : > { %v1952_v30 = vadd.f32 %v1951_v4, %v4076_v15  ;;  %v2145_v45 = vadd.f32 %v2144_v6, %v4078_v19  ;;  %v2358_v13 = vmax.f32 %v1950_v51, 0.0  ;;  %v2360_v6 = vmax.f32 %v2143_v9, 0.0 }
 0x346   : > { %v1953_v41 = vpop.f32.mrf.mxu0  ;;  %v2146_v21 = vpop.f32.mrf.mxu1  ;;  %v2606_v57 = vmax.f32 %v2605_v61, %v2357_v58  ;;  %v2668_v63 = vmax.f32 %v2667_v62, %v2359_v50 }
 0x347   : > { %v1954_v49 = vadd.f32 %v1953_v41, %v4084_v24  ;;  %v2147_v35 = vadd.f32 %v2146_v21, %v4086_v8  ;;  %v2365_v46 = vmax.f32 %v1952_v30, 0.0  ;;  %v2367_v0 = vmax.f32 %v2145_v45, 0.0 }
 0x348   : > { %v1957_v18 = vpop.f32.mrf.mxu0  ;;  %v2150_v55 = vpop.f32.mrf.mxu1  ;;  %v2637_v48 = vmax.f32 %v2636_v56, %v2358_v13 }
 0x349   : > { %v1958_v14 = vadd.f32 %v1957_v18, %v4076_v15  ;;  %v2151_v44 = vadd.f32 %v2150_v55, %v4078_v19  ;;  %v2366_v12 = vmax.f32 %v1954_v49, 0.0  ;;  %v2368_v39 = vmax.f32 %v2147_v35, 0.0 }
 0x34a   : > { %v1959_v38 = vpop.f32.mrf.mxu0  ;;  %v2152_v34 = vpop.f32.mrf.mxu1  ;;  %v2699_v18 = vmax.f32 %v2698_v52, %v2360_v6  ;;  %v2607_v43 = vmax.f32 %v2606_v57, %v2365_v46  ;;  %v2669_v55 = vmax.f32 %v2668_v63, %v2367_v0 }
 0x34b   : > { %v1960_v41 = vadd.f32 %v1959_v38, %v4084_v24  ;;  %v2153_v21 = vadd.f32 %v2152_v34, %v4086_v8  ;;  %v2373_v31 = vmax.f32 %v1958_v14, 0.0  ;;  %v2375_v11 = vmax.f32 %v2151_v44, 0.0 }
 0x34c   : > { %v1961_v5 = vpop.f32.mrf.mxu0  ;;  %v2154_v28 = vpop.f32.mrf.mxu1  ;;  %v2638_v51 = vmax.f32 %v2637_v48, %v2366_v12  ;;  %v2700_v9 = vmax.f32 %v2699_v18, %v2368_v39 }
 0x34d   : > { %v1962_v32 = vadd.f32 %v1961_v5, %v4076_v15  ;;  %v2155_v33 = vadd.f32 %v2154_v28, %v4078_v19  ;;  %v2374_v20 = vmax.f32 %v1960_v41, 0.0  ;;  %v2376_v22 = vmax.f32 %v2153_v21, 0.0 }
 0x34e   : > { %v1963_v2 = vpop.f32.mrf.mxu0  ;;  %v2156_v3 = vpop.f32.mrf.mxu1  ;;  %v2608_v36 = vmax.f32 %v2607_v43, %v2373_v31  ;;  %v2670_v23 = vmax.f32 %v2669_v55, %v2375_v11 }
 0x34f   : > { %v1964_v16 = vadd.f32 %v1963_v2, %v4084_v24  ;;  %v2157_v38 = vadd.f32 %v2156_v3, %v4086_v8  ;;  %v2381_v30 = vmax.f32 %v1962_v32, 0.0  ;;  %v2383_v45 = vmax.f32 %v2155_v33, 0.0 }
 0x350   : > { %v1967_v42 = vpop.f32.mrf.mxu0  ;;  %v2160_v54 = vpop.f32.mrf.mxu1  ;;  %v2639_v61 = vmax.f32 %v2638_v51, %v2374_v20  ;;  %v2701_v62 = vmax.f32 %v2700_v9, %v2376_v22 }
 0x351   : > { %v1968_v5 = vadd.f32 %v1967_v42, %v4076_v15  ;;  %v2161_v28 = vadd.f32 %v2160_v54, %v4078_v19  ;;  %v2382_v58 = vmax.f32 %v1964_v16, 0.0  ;;  %v2384_v42 = vmax.f32 %v2157_v38, 0.0 }
 0x352   : > { %v1969_v17 = vpop.f32.mrf.mxu0  ;;  %v2162_v4 = vpop.f32.mrf.mxu1  ;;  %v2609_v13 = vmax.f32 %v2608_v36, %v2381_v30  ;;  %v2671_v6 = vmax.f32 %v2670_v23, %v2383_v45 }
 0x353   : > { %v1970_v47 = vadd.f32 %v1969_v17, %v4084_v24  ;;  %v2163_v2 = vadd.f32 %v2162_v4, %v4086_v8  ;;  %v2389_v49 = vmax.f32 %v1968_v5, 0.0  ;;  %v2391_v35 = vmax.f32 %v2161_v28, 0.0 }
 0x354   : > { %v1971_v7 = vpop.f32.mrf.mxu0  ;;  %v2164_v10 = vpop.f32.mrf.mxu1 }
 0x355   : > { %v1972_v3 = vadd.f32 %v1971_v7, %v4076_v15  ;;  %v2165_v40 = vadd.f32 %v2164_v10, %v4078_v19  ;;  %v2390_v56 = vmax.f32 %v1970_v47, 0.0  ;;  %v2392_v52 = vmax.f32 %v2163_v2, 0.0 }
 0x356   : > { %v1973_v26 = vpop.f32.mrf.mxu0  ;;  %v2166_v29 = vpop.f32.mrf.mxu1  ;;  %v2640_v7 = vmax.f32 %v2639_v61, %v2382_v58  ;;  %v2702_v10 = vmax.f32 %v2701_v62, %v2384_v42  ;;  %v2610_v12 = vmax.f32 %v2609_v13, %v2389_v49  ;;  %v2672_v39 = vmax.f32 %v2671_v6, %v2391_v35 }
 0x357   : > { %v1974_v17 = vadd.f32 %v1973_v26, %v4084_v24  ;;  %v2167_v4 = vadd.f32 %v2166_v29, %v4086_v8  ;;  %v2397_v14 = vmax.f32 %v1972_v3, 0.0  ;;  %v2399_v44 = vmax.f32 %v2165_v40, 0.0 }
 0x358   : > { %v1977_v37 = vpop.f32.mrf.mxu0  ;;  %v2170_v34 = vpop.f32.mrf.mxu1  ;;  %v2641_v31 = vmax.f32 %v2640_v7, %v2390_v56  ;;  %v2703_v11 = vmax.f32 %v2702_v10, %v2392_v52 }
 0x359   : > { %v1978_v57 = vadd.f32 %v1977_v37, %v4076_v15  ;;  %v2171_v63 = vadd.f32 %v2170_v34, %v4078_v19  ;;  %v2398_v26 = vmax.f32 %v1974_v17, 0.0  ;;  %v2400_v29 = vmax.f32 %v2167_v4, 0.0 }
 0x35a   : > { %v1979_v1 = vpop.f32.mrf.mxu0  ;;  %v2172_v25 = vpop.f32.mrf.mxu1  ;;  %v2611_v16 = vmax.f32 %v2610_v12, %v2397_v14  ;;  %v2673_v38 = vmax.f32 %v2672_v39, %v2399_v44 }
 0x35b   : > { %v1980_v32 = vadd.f32 %v1979_v1, %v4084_v24  ;;  %v2173_v33 = vadd.f32 %v2172_v25, %v4086_v8  ;;  %v2405_v37 = vmax.f32 %v1978_v57, 0.0  ;;  %v2407_v34 = vmax.f32 %v2171_v63, 0.0 }
 0x35c   : > { %v1981_v50 = vpop.f32.mrf.mxu0  ;;  %v2174_v54 = vpop.f32.mrf.mxu1  ;;  %v2642_v1 = vmax.f32 %v2641_v31, %v2398_v26  ;;  %v2704_v25 = vmax.f32 %v2703_v11, %v2400_v29 }
 0x35d   : > { %v1982_v48 = vadd.f32 %v1981_v50, %v4076_v15  ;;  %v2175_v18 = vadd.f32 %v2174_v54, %v4078_v19  ;;  %v2406_v51 = vmax.f32 %v1980_v32, 0.0  ;;  %v2408_v9 = vmax.f32 %v2173_v33, 0.0 }
 0x35e   : > { %v1983_v46 = vpop.f32.mrf.mxu0  ;;  %v2176_v0 = vpop.f32.mrf.mxu1  ;;  %v2612_v50 = vmax.f32 %v2611_v16, %v2405_v37  ;;  %v2674_v54 = vmax.f32 %v2673_v38, %v2407_v34 }
 0x35f   : > { %v1984_v20 = vadd.f32 %v1983_v46, %v4084_v24  ;;  %v2177_v22 = vadd.f32 %v2176_v0, %v4086_v8  ;;  %v2413_v47 = vmax.f32 %v1982_v48, 0.0  ;;  %v2415_v2 = vmax.f32 %v2175_v18, 0.0 }
 0x360   : > { %v1987_v41 = vpop.f32.mrf.mxu0  ;;  %v2180_v21 = vpop.f32.mrf.mxu1  ;;  %v2643_v13 = vmax.f32 %v2642_v1, %v2406_v51  ;;  %v2705_v6 = vmax.f32 %v2704_v25, %v2408_v9 }
 0x361   : > { %v1988_v30 = vadd.f32 %v1987_v41, %v4076_v15  ;;  %v2181_v45 = vadd.f32 %v2180_v21, %v4078_v19  ;;  %v2414_v61 = vmax.f32 %v1984_v20, 0.0  ;;  %v2416_v62 = vmax.f32 %v2177_v22, 0.0 }
 0x362   : > { %v1989_v43 = vpop.f32.mrf.mxu0  ;;  %v2182_v55 = vpop.f32.mrf.mxu1  ;;  %v2613_v46 = vmax.f32 %v2612_v50, %v2413_v47  ;;  %v2675_v0 = vmax.f32 %v2674_v54, %v2415_v2 }
 0x363   : > { %v1990_v36 = vadd.f32 %v1989_v43, %v4084_v24  ;;  %v2183_v23 = vadd.f32 %v2182_v55, %v4086_v8  ;;  %v2421_v17 = vmax.f32 %v1988_v30, 0.0  ;;  %v2423_v4 = vmax.f32 %v2181_v45, 0.0 }
 0x364   : > { %v1991_v5 = vpop.f32.mrf.mxu0  ;;  %v2184_v28 = vpop.f32.mrf.mxu1  ;;  %v2644_v41 = vmax.f32 %v2643_v13, %v2414_v61  ;;  %v2706_v21 = vmax.f32 %v2705_v6, %v2416_v62 }
 0x365   : > { %v1992_v58 = vadd.f32 %v1991_v5, %v4076_v15  ;;  %v2185_v42 = vadd.f32 %v2184_v28, %v4078_v19  ;;  %v2422_v7 = vmax.f32 %v1990_v36, 0.0  ;;  %v2424_v10 = vmax.f32 %v2183_v23, 0.0 }
 0x366   : > { %v1993_v3 = vpop.f32.mrf.mxu0  ;;  %v2186_v40 = vpop.f32.mrf.mxu1  ;;  %v2614_v26 = vmax.f32 %v2613_v46, %v2421_v17  ;;  %v2676_v29 = vmax.f32 %v2675_v0, %v2423_v4 }
 0x367   : > { %v1994_v56 = vadd.f32 %v1993_v3, %v4084_v24  ;;  %v2187_v52 = vadd.f32 %v2186_v40, %v4086_v8  ;;  %v2429_v57 = vmax.f32 %v1992_v58, 0.0  ;;  %v2431_v63 = vmax.f32 %v2185_v42, 0.0 }
 0x368   : > { %v1997_v49 = vpop.f32.mrf.mxu0  ;;  %v2190_v35 = vpop.f32.mrf.mxu1  ;;  %v2645_v37 = vmax.f32 %v2644_v41, %v2422_v7  ;;  %v2707_v34 = vmax.f32 %v2706_v21, %v2424_v10 }
 0x369   : > { %v1998_v12 = vadd.f32 %v1997_v49, %v4076_v15  ;;  %v2191_v39 = vadd.f32 %v2190_v35, %v4078_v19  ;;  %v2430_v43 = vmax.f32 %v1994_v56, 0.0  ;;  %v2432_v55 = vmax.f32 %v2187_v52, 0.0 }
 0x36a   : > { %v1999_v14 = vpop.f32.mrf.mxu0  ;;  %v2192_v44 = vpop.f32.mrf.mxu1  ;;  %v2615_v20 = vmax.f32 %v2614_v26, %v2429_v57  ;;  %v2677_v22 = vmax.f32 %v2676_v29, %v2431_v63 }
 0x36b   : > { %v2000_v48 = vadd.f32 %v1999_v14, %v4084_v24  ;;  %v2193_v18 = vadd.f32 %v2192_v44, %v4086_v8  ;;  %v2437_v5 = vmax.f32 %v1998_v12, 0.0  ;;  %v2439_v28 = vmax.f32 %v2191_v39, 0.0 }
 0x36c   : > { %v2001_v32 = vpop.f32.mrf.mxu0  ;;  %v2194_v33 = vpop.f32.mrf.mxu1  ;;  %v2646_v3 = vmax.f32 %v2645_v37, %v2430_v43  ;;  %v2708_v40 = vmax.f32 %v2707_v34, %v2432_v55 }
 0x36d   : > { %v2002_v31 = vadd.f32 %v2001_v32, %v4076_v15  ;;  %v2195_v11 = vadd.f32 %v2194_v33, %v4078_v19  ;;  %v2438_v1 = vmax.f32 %v2000_v48, 0.0  ;;  %v2440_v25 = vmax.f32 %v2193_v18, 0.0 }
 0x36e   : > { %v2003_v16 = vpop.f32.mrf.mxu0  ;;  %v2196_v38 = vpop.f32.mrf.mxu1  ;;  %v2616_v49 = vmax.f32 %v2615_v20, %v2437_v5  ;;  %v2678_v35 = vmax.f32 %v2677_v22, %v2439_v28 }
 0x36f   : > { %v2004_v51 = vadd.f32 %v2003_v16, %v4084_v24  ;;  %v2197_v9 = vadd.f32 %v2196_v38, %v4086_v8  ;;  %v2445_v36 = vmax.f32 %v2002_v31, 0.0  ;;  %v2447_v23 = vmax.f32 %v2195_v11, 0.0 }
 0x370   : > { %v2007_v30 = vpop.f32.mrf.mxu0  ;;  %v2200_v45 = vpop.f32.mrf.mxu1  ;;  %v2647_v46 = vmax.f32 %v2646_v3, %v2438_v1  ;;  %v2709_v0 = vmax.f32 %v2708_v40, %v2440_v25 }
 0x371   : > { %v2008_v47 = vadd.f32 %v2007_v30, %v4076_v15  ;;  %v2201_v2 = vadd.f32 %v2200_v45, %v4078_v19  ;;  %v2446_v50 = vmax.f32 %v2004_v51, 0.0  ;;  %v2448_v54 = vmax.f32 %v2197_v9, 0.0 }
 0x372   : > { %v2009_v58 = vpop.f32.mrf.mxu0  ;;  %v2202_v42 = vpop.f32.mrf.mxu1  ;;  %v2617_v14 = vmax.f32 %v2616_v49, %v2445_v36  ;;  %v2679_v44 = vmax.f32 %v2678_v35, %v2447_v23  ;;  %v2860_v35 = vrot.slane %v2852_v60, %v4023_v53 }
 0x373   : > { %v2010_v61 = vadd.f32 %v2009_v58, %v4084_v24  ;;  %v2203_v62 = vadd.f32 %v2202_v42, %v4086_v8  ;;  %v2453_v13 = vmax.f32 %v2008_v47, 0.0  ;;  %v2455_v6 = vmax.f32 %v2201_v2, 0.0 }
 0x374   : > { %v2011_v17 = vpop.f32.mrf.mxu0  ;;  %v2204_v4 = vpop.f32.mrf.mxu1  ;;  %v2648_v41 = vmax.f32 %v2647_v46, %v2446_v50  ;;  %v2710_v21 = vmax.f32 %v2709_v0, %v2448_v54 }
 0x375   : > { %v2454_v56 = vmax.f32 %v2010_v61, 0.0  ;;  %v2456_v52 = vmax.f32 %v2203_v62, 0.0  ;;  %v2012_v7 = vadd.f32 %v2011_v17, %v4076_v15  ;;  %v2205_v10 = vadd.f32 %v2204_v4, %v4078_v19 }
 0x376   : > { %v2013_v57 = vpop.f32.mrf.mxu0  ;;  %v2206_v63 = vpop.f32.mrf.mxu1  ;;  %v2618_v32 = vmax.f32 %v2617_v14, %v2453_v13  ;;  %v2680_v33 = vmax.f32 %v2679_v44, %v2455_v6 }
 0x377   : > { %v2014_v12 = vadd.f32 %v2013_v57, %v4084_v24  ;;  %v2207_v39 = vadd.f32 %v2206_v63, %v4086_v8  ;;  %v2461_v26 = vmax.f32 %v2012_v7, 0.0  ;;  %v2463_v29 = vmax.f32 %v2205_v10, 0.0 }
 0x378   : > { %v2649_v48 = vmax.f32 %v2648_v41, %v2454_v56  ;;  %v2711_v18 = vmax.f32 %v2710_v21, %v2456_v52 }
 0x379   : > { %v2462_v43 = vmax.f32 %v2014_v12, 0.0  ;;  %v2464_v55 = vmax.f32 %v2207_v39, 0.0  ;;  %v2619_v31 = vmax.f32 %v2618_v32, %v2461_v26  ;;  %v2681_v15 = vmax.f32 %v2680_v33, %v2463_v29 }
 0x37b   : > { %v2650_v11 = vmax.f32 %v2649_v48, %v2462_v43  ;;  %v2712_v19 = vmax.f32 %v2711_v18, %v2464_v55  ;;  %v2788_v16 = vrot.slane %v2619_v31, 4  ;;  %v2800_v38 = vrot.slane %v2681_v15, 4 }
 0x37d   : > { %v2794_v37 = vrot.slane %v2650_v11, 4  ;;  %v2806_v34 = vrot.slane %v2712_v19, 4  ;;  %v2789_v20 = vmax.f32 %v2619_v31, %v2788_v16  ;;  %v2801_v24 = vmax.f32 %v2681_v15, %v2800_v38 }
 0x37f   : > { %v2795_v22 = vmax.f32 %v2650_v11, %v2794_v37  ;;  %v2807_v8 = vmax.f32 %v2712_v19, %v2806_v34  ;;  %v2790_v5 = vrot.slane %v2789_v20, 2  ;;  %v2802_v28 = vrot.slane %v2801_v24, 2 }
 0x381   : > { %v2796_v51 = vrot.slane %v2795_v22, 2  ;;  %v2808_v9 = vrot.slane %v2807_v8, 2  ;;  %v2791_v30 = vmax.f32 %v2789_v20, %v2790_v5  ;;  %v2803_v45 = vmax.f32 %v2801_v24, %v2802_v28 }
 0x383   : > { %v2797_v1 = vmax.f32 %v2795_v22, %v2796_v51  ;;  %v2809_v25 = vmax.f32 %v2807_v8, %v2808_v9  ;;  %v2792_v47 = vrot.slane %v2791_v30, 1  ;;  %v2804_v2 = vrot.slane %v2803_v45, 1 }
 0x385   : > { %v2798_v3 = vrot.slane %v2797_v1, 1  ;;  %v2810_v40 = vrot.slane %v2809_v25, 1  ;;  %v2793_v36 = vmax.f32 %v2791_v30, %v2792_v47  ;;  %v2805_v23 = vmax.f32 %v2803_v45, %v2804_v2 }
 0x387   : > { %v2799_v58 = vmax.f32 %v2797_v1, %v2798_v3  ;;  %v2811_v42 = vmax.f32 %v2809_v25, %v2810_v40 }
 0x389   : > { %v2822_v50 = vcombine.low %v2793_v36, %v2799_v58  ;;  %v2823_v54 = vcombine.low %v2805_v23, %v2811_v42 }
 0x38b   : > { %v2844_v61 = vrot.slane %v2822_v50, %v4023_v53  ;;  %v2851_v62 = vrot.slane %v2823_v54, %v4023_v53 }
 0x38d   : > { %v2853_v49 = vcombine.low %v2844_v61, %v2851_v62 }
 0x38f   : > { %v2867_v13 = vrot.slane %v2853_v49, %v4023_v53 }
 0x391   : > { %v2868_v6 = vcombine.low %v2860_v35, %v2867_v13 }
 0x393   : > { %2870 = vst [vmem:[%s304_s12] sm:$0xff] %v2868_v6 }
 0x394 PF: > { %s17_s26 = sadd.s32 1, %s3264_s26   ;;  %s4398_s24 = smov %s3260_s25 }
 0x395   : > { %p14_p5 = scmp.ge.s32.totalorder %s17_s26, 4   ;;  %s4399_s25 = smov %s4401_s27 }
 0x397   :  { %16 = sbr.rel (!%p14_p5) target bundleno = 2 (0x2), region = 90 }

// kernel: pointnet_cls_forward.7
= control target key start
LH: loop header
LB: loop body
LE: loop exit
PB: predicated region body
PF: predicated region fallthrough
CT: control target
= control target key end

     0   :  { %s2650_s18 = smov 0   ;;  %s2652_s19 = smov 0   ;;  %s3723_s0 = inlined_call_operand.vmem [shape: bf16[2,256,64], index: 0, kind: input, shape index: {}]   ;;  %s3724_s1 = inlined_call_operand.vmem [shape: bf16[2,64,128], index: 1, kind: input, shape index: {}]   ;;  %s3725_s2 = inlined_call_operand.vmem [shape: f32[1,128], index: 2, kind: input, shape index: {}]   ;;  %s3726_s3 = inlined_call_operand.vmem [shape: bf16[128,1024], index: 3, kind: input, shape index: {}]   ;;  %s3727_s4 = inlined_call_operand.vmem [shape: f32[1,1024], index: 4, kind: input, shape index: {}]   ;;  %s3728_s5 = inlined_call_operand.vmem [shape: f32[2,1,1024], index: 5, kind: output, shape index: {}]  }
   0x1   :  { %s2654_s20 = smov 0  }
   0x2 LB: > { %s27_s21 = sadd.s32 1, %s2612_s19  ;;  %p2368_p0 = scmp.ge.s32.totalorder %s2616_s20, 1  ;;  %s2616_s20 = sphi %s2654_s20, %s15_s20   ;;  %s2612_s19 = sphi %s2652_s19, %s3777_s19   ;;  %s2608_s18 = sphi %s2650_s18, %s3776_s18  }
   0x3   : > { %p29_p1 = scmp.ge.s32.totalorder %s27_s21, 2  ;;  %p216_p2 = scmp.lt.s32.totalorder %s2616_s20, 3 }
   0x5   : > { %s3779_s21 = smov (%p29_p1, %s27_s21), 0  ;;  %p217_p3 = pnand %p2368_p0, %p216_p2 }
   0x7   : > { %220 = sbr.rel (%p217_p3) target bundleno = 713 (0x2c9), region = 40 }
   0xc   : > { %p253_p4 = scmp.lt.s32.totalorder %s2608_s18, 1  ;;  %vm423_vm0 = vcmask 523264   ;;  %v721_v4 = vld [vmem:[%s3726_s3 + $0x1c0] sm:$0xff]  ;;  %v722_v6 = vld [vmem:[%s3726_s3 + $0x1c8] sm:$0xff] }
   0xd   : > { %v725_v5 = vld [vmem:[%s3726_s3 + $0x1e0] sm:$0xff]  ;;  %v726_v8 = vld [vmem:[%s3726_s3 + $0x1e8] sm:$0xff] }
   0xe   : > { %s3781_s18 = smov (!%p253_p4, %s2608_s18), 1  ;;  %v2468_v11 = vcombine.high %v721_v4, %v725_v5  ;;  %v2470_v12 = vcombine.high %v722_v6, %v726_v8  ;;  %v713_v13 = vld [vmem:[%s3726_s3 + $0x180] sm:$0xff]  ;;  %v714_v15 = vld [vmem:[%s3726_s3 + $0x188] sm:$0xff]  ;;  %v2467_v20 = vcombine.low %v721_v4, %v725_v5  ;;  %v2469_v21 = vcombine.low %v722_v6, %v726_v8 }
   0xf   : > { %s2477_s22 = sshll.u32 %s3781_s18, 7  ;;  %s2478_s23 = sshll.u32 %s3781_s18, 5  ;;  %v717_v14 = vld [vmem:[%s3726_s3 + $0x1a0] sm:$0xff]  ;;  %v718_v16 = vld [vmem:[%s3726_s3 + $0x1a8] sm:$0xff] }
  0x10   : > { %s266_s26 = scalar_lea.vmem %s3724_s1, %s2478_s23  ;;  %s2678_s29 = scalar_lea.vmem %s3723_s0, %s2477_s22  ;;  %v705_v22 = vld [vmem:[%s3726_s3 + $0x140] sm:$0xff]  ;;  %v2460_v24 = vcombine.high %v713_v13, %v717_v14  ;;  %v2462_v25 = vcombine.high %v714_v15, %v718_v16  ;;  %v706_v26 = vld [vmem:[%s3726_s3 + $0x148] sm:$0xff]  ;;  %v2459_v28 = vcombine.low %v713_v13, %v717_v14  ;;  %v2461_v29 = vcombine.low %v714_v15, %v718_v16 }
  0x11   : > { %v2573_v0 = vld [vmem:[%s266_s26 + $0x18] sm:$0xff]   ;;  %v2574_v1 = vld [vmem:[%s266_s26 + $0x10] sm:$0xff]   ;;  %v2575_v2 = vld [vmem:[%s266_s26 + $0x8] sm:$0xff]   ;;  %s2373_s14 = sshll.u32 %s3781_s18, 3 }
  0x12   : > { %2499 = vmatprep.subr.bf16.mxu0 %v2573_v0  ;;  %2539 = vmatprep.subr.bf16.mxu1 %v2573_v0  ;;  %v2577_v3 = vld [vmem:[%s2678_s29] sm:$0xff]   ;;  %v2578_v9 = vld [vmem:[%s2678_s29 + $0x8] sm:$0xff]   ;;  %v2579_v17 = vld [vmem:[%s2678_s29 + $0x10] sm:$0xff]   ;;  %s270_s17 = scalar_lea.vmem %s3728_s5, %s2373_s14 }
  0x13   : > { %2500 = vmatpush3.bf16.msra.mxu0 %v2573_v0  ;;  %2543 = vmatpush3.bf16.msra.mxu1 %v2573_v0  ;;  %v2576_v7 = vld [vmem:[%s266_s26] sm:$0xff]   ;;  %v2586_v18 = vld [vmem:[%s2678_s29 + $0x48] sm:$0xff]   ;;  %v2587_v19 = vld [vmem:[%s2678_s29 + $0x50] sm:$0xff]  }
  0x14   : > { %2501 = vmatprep.subr.bf16.mxu0 %v2574_v1  ;;  %2540 = vmatprep.subr.bf16.mxu1 %v2574_v1  ;;  %v2585_v10 = vld [vmem:[%s2678_s29 + $0x40] sm:$0xff]   ;;  %v710_v27 = vld [vmem:[%s3726_s3 + $0x168] sm:$0xff]  ;;  %v2580_v35 = vld [vmem:[%s2678_s29 + $0x18] sm:$0xff]  }
  0x15   : > { %2507 = vmatprep.mubr.msk.bf16.mxu0 %vm423_vm0, %v2577_v3  ;;  %2523 = vmatprep.mubr.msk.bf16.mxu1 %vm423_vm0, %v2585_v10  ;;  %v709_v23 = vld [vmem:[%s3726_s3 + $0x160] sm:$0xff]  ;;  %v2454_v31 = vcombine.high %v706_v26, %v710_v27  ;;  %v698_v34 = vld [vmem:[%s3726_s3 + $0x108] sm:$0xff]  ;;  %v2588_v36 = vld [vmem:[%s2678_s29 + $0x58] sm:$0xff]   ;;  %v2453_v41 = vcombine.low %v706_v26, %v710_v27 }
  0x16   : > { %v2452_v30 = vcombine.high %v705_v22, %v709_v23  ;;  %v697_v32 = vld [vmem:[%s3726_s3 + $0x100] sm:$0xff]  ;;  %v702_v37 = vld [vmem:[%s3726_s3 + $0x128] sm:$0xff]  ;;  %v2451_v40 = vcombine.low %v705_v22, %v709_v23  ;;  %v2583_v54 = vld [vmem:[%s2678_s29 + $0x30] sm:$0xff]  }
  0x17   : > { %2502 = vmatpush3.bf16.msra.mxu0 %v2574_v1  ;;  %2544 = vmatpush3.bf16.msra.mxu1 %v2574_v1  ;;  %v701_v33 = vld [vmem:[%s3726_s3 + $0x120] sm:$0xff]  ;;  %v2446_v43 = vcombine.high %v698_v34, %v702_v37  ;;  %v690_v46 = vld [vmem:[%s3726_s3 + $0xc8] sm:$0xff]  ;;  %v2445_v49 = vcombine.low %v698_v34, %v702_v37  ;;  %v2591_v55 = vld [vmem:[%s2678_s29 + $0x70] sm:$0xff]  }
  0x18   : > { %2503 = vmatprep.subr.bf16.mxu0 %v2575_v2  ;;  %2541 = vmatprep.subr.bf16.mxu1 %v2575_v2  ;;  %v2581_v38 = vld [vmem:[%s2678_s29 + $0x20] sm:$0xff]   ;;  %v2444_v42 = vcombine.high %v697_v32, %v701_v33  ;;  %v694_v47 = vld [vmem:[%s3726_s3 + $0xe8] sm:$0xff]  ;;  %v2443_v48 = vcombine.low %v697_v32, %v701_v33  ;;  %v2584_v58 = vld [vmem:[%s2678_s29 + $0x38] sm:$0xff]  }
  0x19   : > { %v2589_v39 = vld [vmem:[%s2678_s29 + $0x60] sm:$0xff]   ;;  %v2438_v51 = vcombine.high %v690_v46, %v694_v47  ;;  %v2582_v52 = vld [vmem:[%s2678_s29 + $0x28] sm:$0xff]   ;;  %v2437_v57 = vcombine.low %v690_v46, %v694_v47  ;;  %v2592_v59 = vld [vmem:[%s2678_s29 + $0x78] sm:$0xff]  }
  0x1a   : > { %v689_v44 = vld [vmem:[%s3726_s3 + $0xc0] sm:$0xff]  ;;  %v2590_v53 = vld [vmem:[%s2678_s29 + $0x68] sm:$0xff]   ;;  %v727_v22 = vld [vmem:[%s3726_s3 + $0x1f0] sm:$0xff] }
  0x1b   : > { %2504 = vmatpush3.bf16.msra.mxu0 %v2575_v2  ;;  %2545 = vmatpush3.bf16.msra.mxu1 %v2575_v2  ;;  %v693_v45 = vld [vmem:[%s3726_s3 + $0xe0] sm:$0xff]  ;;  %v682_v62 = vld [vmem:[%s3726_s3 + $0x88] sm:$0xff]  ;;  %v724_v23 = vld [vmem:[%s3726_s3 + $0x1d8] sm:$0xff] }
  0x1c   : > { %2505 = vmatprep.subr.bf16.mxu0 %v2576_v7  ;;  %2542 = vmatprep.subr.bf16.mxu1 %v2576_v7  ;;  %v2436_v50 = vcombine.high %v689_v44, %v693_v45  ;;  %v2435_v56 = vcombine.low %v689_v44, %v693_v45  ;;  %v681_v60 = vld [vmem:[%s3726_s3 + $0x80] sm:$0xff]  ;;  %v686_v0 = vld [vmem:[%s3726_s3 + $0xa8] sm:$0xff]  ;;  %v728_v26 = vld [vmem:[%s3726_s3 + $0x1f8] sm:$0xff] }
  0x1d   : > { %v685_v61 = vld [vmem:[%s3726_s3 + $0xa0] sm:$0xff]  ;;  %v2429_v2 = vcombine.low %v682_v62, %v686_v0  ;;  %v2430_v3 = vcombine.high %v682_v62, %v686_v0  ;;  %v674_v6 = vld [vmem:[%s3726_s3 + $0x48] sm:$0xff]  ;;  %v2473_v27 = vcombine.low %v724_v23, %v728_v26  ;;  %v715_v37 = vld [vmem:[%s3726_s3 + $0x190] sm:$0xff] }
  0x1e   : > { %v2428_v63 = vcombine.high %v681_v60, %v685_v61  ;;  %v2427_v1 = vcombine.low %v681_v60, %v685_v61  ;;  %v673_v4 = vld [vmem:[%s3726_s3 + $0x40] sm:$0xff]  ;;  %v678_v8 = vld [vmem:[%s3726_s3 + $0x68] sm:$0xff]  ;;  %v707_v46 = vld [vmem:[%s3726_s3 + $0x150] sm:$0xff] }
  0x1f   : > { %2506 = vmatpush3.bf16.msra.mxu0 %v2576_v7  ;;  %2546 = vmatpush3.bf16.msra.mxu1 %v2576_v7  ;;  %v677_v5 = vld [vmem:[%s3726_s3 + $0x60] sm:$0xff]  ;;  %v2421_v10 = vcombine.low %v674_v6, %v678_v8  ;;  %v666_v14 = vld [vmem:[%s3726_s3 + $0x8] sm:$0xff]  ;;  %v699_v60 = vld [vmem:[%s3726_s3 + $0x110] sm:$0xff] }
  0x20   : > { %1107 = vmatprep.subr.bf16.mxu1 %v2468_v11  ;;  %1300 = vmatprep.subr.bf16.mxu0 %v2470_v12  ;;  %v2420_v7 = vcombine.high %v673_v4, %v677_v5  ;;  %v2422_v11 = vcombine.high %v674_v6, %v678_v8  ;;  %v665_v12 = vld [vmem:[%s3726_s3] sm:$0xff]  ;;  %v670_v16 = vld [vmem:[%s3726_s3 + $0x28] sm:$0xff]  ;;  %v703_v62 = vld [vmem:[%s3726_s3 + $0x130] sm:$0xff] }
  0x21   : > { %v669_v13 = vld [vmem:[%s3726_s3 + $0x20] sm:$0xff]  ;;  %v704_v0 = vld [vmem:[%s3726_s3 + $0x138] sm:$0xff] }
  0x22   : > { %2508 = vmatmul.mubr.msk.bf16.vlgmr.msra.gmra.mxu0 %vm423_vm0, %v2578_v9  ;;  %2524 = vmatmul.mubr.msk.bf16.vlgmr.msra.gmra.mxu1 %vm423_vm0, %v2586_v18  ;;  %v2419_v9 = vcombine.low %v673_v4, %v677_v5  ;;  %v2412_v15 = vcombine.high %v665_v12, %v669_v13  ;;  %v2413_v18 = vcombine.low %v666_v14, %v670_v16 }
  0x23   : > { %2511 = vmatprep.mubr.msk.bf16.mxu0 %vm423_vm0, %v2579_v17  ;;  %2527 = vmatprep.mubr.msk.bf16.mxu1 %vm423_vm0, %v2587_v19  ;;  %v2411_v17 = vcombine.low %v665_v12, %v669_v13  ;;  %v2414_v19 = vcombine.high %v666_v14, %v670_v16  ;;  %v696_v12 = vld [vmem:[%s3726_s3 + $0xf8] sm:$0xff] }
  0x24   : > { %1108 = vmatpush1.bf16.msra.mxu1 %v2467_v20  ;;  %1301 = vmatpush1.bf16.msra.mxu0 %v2469_v21  ;;  %v2618_v20 = vmov 0   ;;  %v723_v21 = vld [vmem:[%s3726_s3 + $0x1d0] sm:$0xff] }
  0x25   : > { %1109 = vmatprep.subr.bf16.mxu1 %v2460_v24  ;;  %1302 = vmatprep.subr.bf16.mxu0 %v2462_v25  ;;  %v2471_v24 = vcombine.low %v723_v21, %v727_v22  ;;  %v2472_v25 = vcombine.high %v723_v21, %v727_v22  ;;  %v683_v21 = vld [vmem:[%s3726_s3 + $0x90] sm:$0xff] }
  0x26   : > { %v687_v22 = vld [vmem:[%s3726_s3 + $0xb0] sm:$0xff] }
  0x28   : > { %1110 = vmatpush1.bf16.msra.mxu1 %v2459_v28  ;;  %1303 = vmatpush1.bf16.msra.mxu0 %v2461_v29  ;;  %v2474_v28 = vcombine.high %v724_v23, %v728_v26  ;;  %v684_v23 = vld [vmem:[%s3726_s3 + $0x98] sm:$0xff] }
  0x29   : > { %1111 = vmatprep.subr.bf16.mxu1 %v2452_v30  ;;  %1304 = vmatprep.subr.bf16.mxu0 %v2454_v31  ;;  %v2825_v31 = vld [vmem:[%s3725_s2] ss:$0 sm:$0xff] }
  0x2a   : > { %2512 = vmatmul.mubr.msk.bf16.gmra.mxu0 %vm423_vm0, %v2580_v35  ;;  %2528 = vmatmul.mubr.msk.bf16.gmra.mxu1 %vm423_vm0, %v2588_v36 }
  0x2b   : > { %2515 = vmatprep.mubr.msk.bf16.mxu0 %vm423_vm0, %v2581_v38  ;;  %2531 = vmatprep.mubr.msk.bf16.mxu1 %vm423_vm0, %v2589_v39 }
  0x2c   : > { %1112 = vmatpush1.bf16.msra.mxu1 %v2451_v40  ;;  %1305 = vmatpush1.bf16.msra.mxu0 %v2453_v41  ;;  %v719_v40 = vld [vmem:[%s3726_s3 + $0x1b0] sm:$0xff]  ;;  %v716_v41 = vld [vmem:[%s3726_s3 + $0x198] sm:$0xff] }
  0x2d   : > { %1113 = vmatprep.subr.bf16.mxu1 %v2444_v42  ;;  %1306 = vmatprep.subr.bf16.mxu0 %v2446_v43  ;;  %v720_v42 = vld [vmem:[%s3726_s3 + $0x1b8] sm:$0xff] }
  0x30   : > { %1114 = vmatpush1.bf16.msra.mxu1 %v2443_v48  ;;  %1307 = vmatpush1.bf16.msra.mxu0 %v2445_v49  ;;  %v2464_v48 = vcombine.high %v715_v37, %v719_v40  ;;  %v2466_v49 = vcombine.high %v716_v41, %v720_v42 }
  0x31   : > { %1115 = vmatprep.subr.bf16.mxu1 %v2436_v50  ;;  %1308 = vmatprep.subr.bf16.mxu0 %v2438_v51  ;;  %v711_v50 = vld [vmem:[%s3726_s3 + $0x170] sm:$0xff]  ;;  %v708_v51 = vld [vmem:[%s3726_s3 + $0x158] sm:$0xff] }
  0x32   : > { %2516 = vmatmul.mubr.msk.bf16.gmra.mxu0 %vm423_vm0, %v2582_v52  ;;  %2532 = vmatmul.mubr.msk.bf16.gmra.mxu1 %vm423_vm0, %v2590_v53  ;;  %v712_v52 = vld [vmem:[%s3726_s3 + $0x178] sm:$0xff] }
  0x33   : > { %2519 = vmatprep.mubr.msk.bf16.mxu0 %vm423_vm0, %v2583_v54  ;;  %2535 = vmatprep.mubr.msk.bf16.mxu1 %vm423_vm0, %v2591_v55  ;;  %v2463_v54 = vcombine.low %v715_v37, %v719_v40  ;;  %v2465_v55 = vcombine.low %v716_v41, %v720_v42  ;;  %v680_v37 = vld [vmem:[%s3726_s3 + $0x78] sm:$0xff]  ;;  %v2431_v40 = vcombine.low %v683_v21, %v687_v22 }
  0x34   : > { %1116 = vmatpush1.bf16.msra.mxu1 %v2435_v56  ;;  %1309 = vmatpush1.bf16.msra.mxu0 %v2437_v57  ;;  %v2456_v57 = vcombine.high %v707_v46, %v711_v50 }
  0x35   : > { %1117 = vmatprep.subr.bf16.mxu1 %v2428_v63  ;;  %1310 = vmatprep.subr.bf16.mxu0 %v2430_v3  ;;  %v700_v63 = vld [vmem:[%s3726_s3 + $0x118] sm:$0xff] }
  0x36   : > { %v2450_v8 = vcombine.high %v700_v63, %v704_v0  ;;  %v2449_v16 = vcombine.low %v700_v63, %v704_v0 }
  0x38   : > { %1118 = vmatpush1.bf16.msra.mxu1 %v2427_v1  ;;  %1311 = vmatpush1.bf16.msra.mxu0 %v2429_v2  ;;  %v2455_v1 = vcombine.low %v707_v46, %v711_v50  ;;  %v2457_v2 = vcombine.low %v708_v51, %v712_v52  ;;  %v667_v46 = vld [vmem:[%s3726_s3 + $0x10] sm:$0xff] }
  0x39   : > { %1119 = vmatprep.subr.bf16.mxu1 %v2420_v7  ;;  %1312 = vmatprep.subr.bf16.mxu0 %v2422_v11  ;;  %v2448_v7 = vcombine.high %v699_v60, %v703_v62  ;;  %v692_v11 = vld [vmem:[%s3726_s3 + $0xd8] sm:$0xff] }
  0x3a   : > { %2520 = vmatmul.mubr.msk.bf16.gmra.mxu0 %vm423_vm0, %v2584_v58  ;;  %2536 = vmatmul.mubr.msk.bf16.gmra.mxu1 %vm423_vm0, %v2592_v59  ;;  %v2458_v58 = vcombine.high %v708_v51, %v712_v52  ;;  %v2441_v26 = vcombine.low %v692_v11, %v696_v12 }
  0x3b   : > { %1139 = vmatprep.mubr.bf16.mxu1 %v2618_v20  ;;  %1332 = vmatprep.mubr.bf16.mxu0 %v2618_v20 }
  0x3c   : > { %1120 = vmatpush1.bf16.msra.mxu1 %v2419_v9  ;;  %1313 = vmatpush1.bf16.msra.mxu0 %v2421_v10  ;;  %v691_v9 = vld [vmem:[%s3726_s3 + $0xd0] sm:$0xff] }
  0x3d   : > { %1121 = vmatprep.subr.bf16.mxu1 %v2412_v15  ;;  %1314 = vmatprep.subr.bf16.mxu0 %v2414_v19  ;;  %v695_v10 = vld [vmem:[%s3726_s3 + $0xf0] sm:$0xff]  ;;  %v2447_v15 = vcombine.low %v699_v60, %v703_v62  ;;  %v2442_v19 = vcombine.high %v692_v11, %v696_v12 }
  0x40   : > { %1122 = vmatpush1.bf16.msra.mxu1 %v2411_v17  ;;  %1315 = vmatpush1.bf16.msra.mxu0 %v2413_v18  ;;  %v2440_v18 = vcombine.high %v691_v9, %v695_v10 }
  0x41   : > { %1493 = vmatprep.subr.bf16.mxu1 %v2472_v25  ;;  %1686 = vmatprep.subr.bf16.mxu0 %v2474_v28  ;;  %v2439_v25 = vcombine.low %v691_v9, %v695_v10 }
  0xe2   : > { %v2509_v29 = vpop.f32.mrf.mxu0  ;;  %v2525_v10 = vpop.f32.mrf.mxu1 }
  0xe3   : > { %v515_v53 = vadd.f32 %v2509_v29, %v2825_v31 }
  0xe4   : > { %v506_v30 = vpop.f32.mrf.mxu0 }
  0xe5   : > { %v507_v33 = vadd.f32 %v2825_v31, %v506_v30  ;;  %v635_v61 = vmax.f32 %v515_v53, 0.0 }
  0xe6   : > { %v2510_v32 = vpop.f32.mrf.mxu0 }
  0xe7   : > { %v633_v38 = vmax.f32 %v507_v33, 0.0  ;;  %v518_v44 = vadd.f32 %v2510_v32, %v2825_v31  ;;  %v2432_v32 = vcombine.high %v683_v21, %v687_v22 }
  0xe8   : > { %v509_v34 = vpop.f32.mrf.mxu0 }
  0xe9   : > { %v510_v35 = vadd.f32 %v2825_v31, %v509_v34  ;;  %v636_v56 = vmax.f32 %v518_v44, 0.0  ;;  %v675_v34 = vld [vmem:[%s3726_s3 + $0x50] sm:$0xff] }
  0xea   : > { %v2829_v36 = vpop.f32.mrf.mxu0 }
  0xeb   : > { %v634_v39 = vmax.f32 %v510_v35, 0.0  ;;  %v2877_v3 = vpack.c.bf16 %v636_v56, %v635_v61  ;;  %v679_v35 = vld [vmem:[%s3726_s3 + $0x70] sm:$0xff] }
  0xec   : > { %v522_v43 = vpop.f32.mrf.mxu0  ;;  %v2423_v50 = vcombine.low %v675_v34, %v679_v35 }
  0xed   : > { %v2844_v45 = vpack.c.bf16 %v634_v39, %v633_v38  ;;  %v523_v4 = vadd.f32 %v2825_v31, %v522_v43  ;;  %v2424_v43 = vcombine.high %v675_v34, %v679_v35 }
  0xee   : > { %v2849_v47 = vpop.f32.mrf.mxu0 }
  0xef   : > { %1140 = vmatmul.mubr.bf16.vlgmr.msra.gmra.mxu1 %v2844_v45  ;;  %1333 = vmatmul.mubr.bf16.vlgmr.msra.gmra.mxu0 %v2844_v45  ;;  %v637_v13 = vmax.f32 %v523_v4, 0.0  ;;  %v534_v28 = vadd.f32 %v2849_v47, %v2825_v31  ;;  %v671_v47 = vld [vmem:[%s3726_s3 + $0x30] sm:$0xff] }
  0xf0   : > { %1494 = vmatpush1.bf16.msra.mxu1 %v2471_v24  ;;  %1687 = vmatpush1.bf16.msra.mxu0 %v2473_v27  ;;  %v525_v59 = vpop.f32.mrf.mxu0  ;;  %v688_v24 = vld [vmem:[%s3726_s3 + $0xb8] sm:$0xff]  ;;  %v531_v27 = vadd.f32 %v2829_v36, %v2825_v31  ;;  %v2416_v56 = vcombine.high %v667_v46, %v671_v47  ;;  %v2415_v60 = vcombine.low %v667_v46, %v671_v47 }
  0xf1   : > { %1149 = vmatprep.mubr.bf16.mxu1 %v2618_v20  ;;  %1342 = vmatprep.mubr.bf16.mxu0 %v2618_v20  ;;  %v526_v5 = vadd.f32 %v2825_v31, %v525_v59  ;;  %v2434_v33 = vcombine.high %v684_v23, %v688_v24  ;;  %v676_v36 = vld [vmem:[%s3726_s3 + $0x58] sm:$0xff]  ;;  %v640_v39 = vmax.f32 %v534_v28, 0.0  ;;  %v2433_v41 = vcombine.low %v684_v23, %v688_v24 }
  0xf2   : > { %1495 = vmatprep.subr.bf16.mxu1 %v2464_v48  ;;  %1688 = vmatprep.subr.bf16.mxu0 %v2466_v49  ;;  %v2881_v6 = vpop.f32.mrf.mxu0  ;;  %v639_v38 = vmax.f32 %v531_v27, 0.0  ;;  %v2426_v44 = vcombine.high %v676_v36, %v680_v37  ;;  %v668_v48 = vld [vmem:[%s3726_s3 + $0x18] sm:$0xff]  ;;  %v2425_v51 = vcombine.low %v676_v36, %v680_v37 }
  0xf3   : > { %v638_v14 = vmax.f32 %v526_v5, 0.0  ;;  %v672_v49 = vld [vmem:[%s3726_s3 + $0x38] sm:$0xff]  ;;  %v547_v63 = vadd.f32 %v2881_v6, %v2825_v31 }
  0xf4   : > { %1496 = vmatpush1.bf16.msra.mxu1 %v2463_v54  ;;  %1689 = vmatpush1.bf16.msra.mxu0 %v2465_v55  ;;  %v538_v17 = vpop.f32.mrf.mxu0  ;;  %v2945_v52 = vpack.c.bf16 %v640_v39, %v639_v38  ;;  %v2417_v61 = vcombine.low %v668_v48, %v672_v49 }
  0xf5   : > { %1497 = vmatprep.subr.bf16.mxu1 %v2456_v57  ;;  %1690 = vmatprep.subr.bf16.mxu0 %v2458_v58  ;;  %v2915_v29 = vpack.c.bf16 %v638_v14, %v637_v13  ;;  %v539_v53 = vadd.f32 %v2825_v31, %v538_v17  ;;  %v2418_v57 = vcombine.high %v668_v48, %v672_v49  ;;  %v643_v4 = vmax.f32 %v547_v63, 0.0  ;;  %v570_v13 = vpop.f32.mrf.mxu1 }
  0xf6   : > { %v2518_v30 = vpop.f32.mrf.mxu0  ;;  %v571_v23 = vadd.f32 %v2825_v31, %v570_v13 }
  0xf7   : > { %1150 = vmatmul.mubr.bf16.gmra.mxu1 %v2877_v3  ;;  %1343 = vmatmul.mubr.bf16.gmra.mxu0 %v2877_v3  ;;  %v641_v58 = vmax.f32 %v539_v53, 0.0  ;;  %v550_v0 = vadd.f32 %v2518_v30, %v2825_v31  ;;  %v2526_v17 = vpop.f32.mrf.mxu1  ;;  %v579_v30 = vadd.f32 %v2525_v10, %v2825_v31 }
  0xf8   : > { %1159 = vmatprep.mubr.bf16.mxu1 %v2618_v20  ;;  %1352 = vmatprep.mubr.bf16.mxu0 %v2618_v20  ;;  %v541_v42 = vpop.f32.mrf.mxu0 }
  0xf9   : > { %1498 = vmatpush1.bf16.msra.mxu1 %v2455_v1  ;;  %1691 = vmatpush1.bf16.msra.mxu0 %v2457_v2  ;;  %v542_v54 = vadd.f32 %v2825_v31, %v541_v42  ;;  %v644_v5 = vmax.f32 %v550_v0, 0.0  ;;  %v573_v21 = vpop.f32.mrf.mxu1  ;;  %v651_v35 = vmax.f32 %v579_v30, 0.0 }
  0xfa   : > { %1499 = vmatprep.subr.bf16.mxu1 %v2448_v7  ;;  %1692 = vmatprep.subr.bf16.mxu0 %v2450_v8  ;;  %v2521_v55 = vpop.f32.mrf.mxu0  ;;  %v574_v24 = vadd.f32 %v2825_v31, %v573_v21 }
  0xfb   : > { %v642_v59 = vmax.f32 %v542_v54, 0.0  ;;  %v2962_v8 = vpack.c.bf16 %v644_v5, %v643_v4  ;;  %v563_v14 = vadd.f32 %v2521_v55, %v2825_v31 }
  0xfc   : > { %v554_v62 = vpop.f32.mrf.mxu0  ;;  %v650_v27 = vmax.f32 %v574_v24, 0.0 }
  0xfd   : > { %1500 = vmatpush1.bf16.msra.mxu1 %v2447_v15  ;;  %1693 = vmatpush1.bf16.msra.mxu0 %v2449_v16  ;;  %v2956_v1 = vpack.c.bf16 %v642_v59, %v641_v58  ;;  %v555_v6 = vadd.f32 %v2825_v31, %v554_v62 }
  0xfe   : > { %1501 = vmatprep.subr.bf16.mxu1 %v2440_v18  ;;  %1694 = vmatprep.subr.bf16.mxu0 %v2442_v19  ;;  %v2522_v2 = vpop.f32.mrf.mxu0  ;;  %v647_v18 = vmax.f32 %v563_v14, 0.0 }
  0xff   : > { %1160 = vmatmul.mubr.bf16.gmra.mxu1 %v2915_v29  ;;  %1353 = vmatmul.mubr.bf16.gmra.mxu0 %v2915_v29  ;;  %v645_v11 = vmax.f32 %v555_v6, 0.0  ;;  %v566_v15 = vadd.f32 %v2522_v2, %v2825_v31 }
 0x100   : > { %1169 = vmatprep.mubr.bf16.mxu1 %v2618_v20  ;;  %1362 = vmatprep.mubr.bf16.mxu0 %v2618_v20  ;;  %v557_v7 = vpop.f32.mrf.mxu0 }
 0x101   : > { %1502 = vmatpush1.bf16.msra.mxu1 %v2439_v25  ;;  %1695 = vmatpush1.bf16.msra.mxu0 %v2441_v26  ;;  %v558_v9 = vadd.f32 %v2825_v31, %v557_v7  ;;  %v648_v19 = vmax.f32 %v566_v15, 0.0  ;;  %v2529_v25 = vpop.f32.mrf.mxu1  ;;  %v649_v26 = vmax.f32 %v571_v23, 0.0 }
 0x102   : > { %1503 = vmatprep.subr.bf16.mxu1 %v2432_v32  ;;  %1696 = vmatprep.subr.bf16.mxu0 %v2434_v33  ;;  %v582_v32 = vadd.f32 %v2526_v17, %v2825_v31  ;;  %v595_v46 = vadd.f32 %v2529_v25, %v2825_v31 }
 0x103   : > { %v646_v12 = vmax.f32 %v558_v9, 0.0  ;;  %v2978_v22 = vpack.c.bf16 %v648_v19, %v647_v18  ;;  %v586_v28 = vpop.f32.mrf.mxu1  ;;  %v2988_v33 = vpack.c.bf16 %v650_v27, %v649_v26 }
 0x104   : > { %v652_v36 = vmax.f32 %v582_v32, 0.0  ;;  %v587_v39 = vadd.f32 %v2825_v31, %v586_v28 }
 0x105   : > { %1504 = vmatpush1.bf16.msra.mxu1 %v2431_v40  ;;  %1697 = vmatpush1.bf16.msra.mxu0 %v2433_v41  ;;  %v2972_v16 = vpack.c.bf16 %v646_v12, %v645_v11  ;;  %v2530_v34 = vpop.f32.mrf.mxu1 }
 0x106   : > { %1505 = vmatprep.subr.bf16.mxu1 %v2424_v43  ;;  %1698 = vmatprep.subr.bf16.mxu0 %v2426_v44  ;;  %v2994_v38 = vpack.c.bf16 %v652_v36, %v651_v35  ;;  %v653_v42 = vmax.f32 %v587_v39, 0.0  ;;  %v598_v47 = vadd.f32 %v2530_v34, %v2825_v31 }
 0x107   : > { %1170 = vmatmul.mubr.bf16.gmra.mxu1 %v2945_v52  ;;  %1363 = vmatmul.mubr.bf16.gmra.mxu0 %v2945_v52  ;;  %v589_v37 = vpop.f32.mrf.mxu1 }
 0x108   : > { %1179 = vmatprep.mubr.bf16.mxu1 %v2618_v20  ;;  %1372 = vmatprep.mubr.bf16.mxu0 %v2618_v20  ;;  %v590_v40 = vadd.f32 %v2825_v31, %v589_v37 }
 0x109   : > { %1506 = vmatpush1.bf16.msra.mxu1 %v2423_v50  ;;  %1699 = vmatpush1.bf16.msra.mxu0 %v2425_v51  ;;  %v2533_v41 = vpop.f32.mrf.mxu1  ;;  %v655_v50 = vmax.f32 %v595_v46, 0.0  ;;  %v656_v51 = vmax.f32 %v598_v47, 0.0 }
 0x10a   : > { %1507 = vmatprep.subr.bf16.mxu1 %v2416_v56  ;;  %1700 = vmatprep.subr.bf16.mxu0 %v2418_v57  ;;  %v654_v43 = vmax.f32 %v590_v40, 0.0 }
 0x10b   : > { %v602_v44 = vpop.f32.mrf.mxu1  ;;  %v3010_v54 = vpack.c.bf16 %v656_v51, %v655_v50 }
 0x10c   : > { %v3004_v48 = vpack.c.bf16 %v654_v43, %v653_v42  ;;  %v603_v55 = vadd.f32 %v2825_v31, %v602_v44 }
 0x10d   : > { %1508 = vmatpush1.bf16.msra.mxu1 %v2415_v60  ;;  %1701 = vmatpush1.bf16.msra.mxu0 %v2417_v61  ;;  %v2534_v49 = vpop.f32.mrf.mxu1  ;;  %v611_v61 = vadd.f32 %v2533_v41, %v2825_v31 }
 0x10e   : > { %v657_v58 = vmax.f32 %v603_v55, 0.0  ;;  %v614_v62 = vadd.f32 %v2534_v49, %v2825_v31 }
 0x10f   : > { %1180 = vmatmul.mubr.bf16.gmra.mxu1 %v2956_v1  ;;  %1373 = vmatmul.mubr.bf16.gmra.mxu0 %v2956_v1  ;;  %v605_v53 = vpop.f32.mrf.mxu1  ;;  %v659_v2 = vmax.f32 %v611_v61, 0.0 }
 0x110   : > { %1189 = vmatprep.mubr.bf16.mxu1 %v2618_v20  ;;  %1382 = vmatprep.mubr.bf16.mxu0 %v2618_v20  ;;  %v606_v56 = vadd.f32 %v2825_v31, %v605_v53  ;;  %v660_v4 = vmax.f32 %v614_v62, 0.0 }
 0x111   : > { %v2537_v57 = vpop.f32.mrf.mxu1 }
 0x112   : > { %v658_v59 = vmax.f32 %v606_v56, 0.0  ;;  %v3026_v7 = vpack.c.bf16 %v660_v4, %v659_v2  ;;  %v627_v12 = vadd.f32 %v2537_v57, %v2825_v31 }
 0x113   : > { %v618_v60 = vpop.f32.mrf.mxu1 }
 0x114   : > { %v3020_v63 = vpack.c.bf16 %v658_v59, %v657_v58  ;;  %v619_v6 = vadd.f32 %v2825_v31, %v618_v60  ;;  %v663_v15 = vmax.f32 %v627_v12, 0.0 }
 0x115   : > { %v2538_v0 = vpop.f32.mrf.mxu1 }
 0x116   : > { %v661_v10 = vmax.f32 %v619_v6, 0.0  ;;  %v630_v13 = vadd.f32 %v2538_v0, %v2825_v31 }
 0x117   : > { %1190 = vmatmul.mubr.bf16.gmra.mxu1 %v2962_v8  ;;  %1383 = vmatmul.mubr.bf16.gmra.mxu0 %v2962_v8  ;;  %v621_v5 = vpop.f32.mrf.mxu1 }
 0x118   : > { %1199 = vmatprep.mubr.bf16.mxu1 %v2618_v20  ;;  %1392 = vmatprep.mubr.bf16.mxu0 %v2618_v20  ;;  %v622_v9 = vadd.f32 %v2825_v31, %v621_v5  ;;  %v664_v17 = vmax.f32 %v630_v13, 0.0  ;;  %v747_v31 = vlaneseq }
 0x11a   : > { %v662_v11 = vmax.f32 %v622_v9, 0.0  ;;  %v3042_v18 = vpack.c.bf16 %v664_v17, %v663_v15 }
 0x11c   : > { %v3036_v14 = vpack.c.bf16 %v662_v11, %v661_v10 }
 0x11f   : > { %1200 = vmatmul.mubr.bf16.gmra.mxu1 %v2972_v16  ;;  %1393 = vmatmul.mubr.bf16.gmra.mxu0 %v2972_v16 }
 0x120   : > { %1209 = vmatprep.mubr.bf16.mxu1 %v2618_v20  ;;  %1402 = vmatprep.mubr.bf16.mxu0 %v2618_v20 }
 0x127   : > { %1210 = vmatmul.mubr.bf16.gmra.mxu1 %v2978_v22  ;;  %1403 = vmatmul.mubr.bf16.gmra.mxu0 %v2978_v22 }
 0x128   : > { %1219 = vmatprep.mubr.bf16.mxu1 %v2618_v20  ;;  %1412 = vmatprep.mubr.bf16.mxu0 %v2618_v20 }
 0x12f   : > { %1220 = vmatmul.mubr.bf16.gmra.mxu1 %v2988_v33  ;;  %1413 = vmatmul.mubr.bf16.gmra.mxu0 %v2988_v33 }
 0x130   : > { %1229 = vmatprep.mubr.bf16.mxu1 %v2618_v20  ;;  %1422 = vmatprep.mubr.bf16.mxu0 %v2618_v20 }
 0x137   : > { %1230 = vmatmul.mubr.bf16.gmra.mxu1 %v2994_v38  ;;  %1423 = vmatmul.mubr.bf16.gmra.mxu0 %v2994_v38 }
 0x138   : > { %1239 = vmatprep.mubr.bf16.mxu1 %v2618_v20  ;;  %1432 = vmatprep.mubr.bf16.mxu0 %v2618_v20 }
 0x13f   : > { %1240 = vmatmul.mubr.bf16.gmra.mxu1 %v3004_v48  ;;  %1433 = vmatmul.mubr.bf16.gmra.mxu0 %v3004_v48 }
 0x140   : > { %1249 = vmatprep.mubr.bf16.mxu1 %v2618_v20  ;;  %1442 = vmatprep.mubr.bf16.mxu0 %v2618_v20 }
 0x147   : > { %1250 = vmatmul.mubr.bf16.gmra.mxu1 %v3010_v54  ;;  %1443 = vmatmul.mubr.bf16.gmra.mxu0 %v3010_v54 }
 0x148   : > { %1259 = vmatprep.mubr.bf16.mxu1 %v2618_v20  ;;  %1452 = vmatprep.mubr.bf16.mxu0 %v2618_v20 }
 0x14f   : > { %1260 = vmatmul.mubr.bf16.gmra.mxu1 %v3020_v63  ;;  %1453 = vmatmul.mubr.bf16.gmra.mxu0 %v3020_v63 }
 0x150   : > { %1269 = vmatprep.mubr.bf16.mxu1 %v2618_v20  ;;  %1462 = vmatprep.mubr.bf16.mxu0 %v2618_v20 }
 0x157   : > { %1270 = vmatmul.mubr.bf16.gmra.mxu1 %v3026_v7  ;;  %1463 = vmatmul.mubr.bf16.gmra.mxu0 %v3026_v7 }
 0x158   : > { %1279 = vmatprep.mubr.bf16.mxu1 %v2618_v20  ;;  %1472 = vmatprep.mubr.bf16.mxu0 %v2618_v20 }
 0x15f   : > { %1280 = vmatmul.mubr.bf16.gmra.mxu1 %v3036_v14  ;;  %1473 = vmatmul.mubr.bf16.gmra.mxu0 %v3036_v14 }
 0x160   : > { %1289 = vmatprep.mubr.bf16.mxu1 %v2618_v20  ;;  %1482 = vmatprep.mubr.bf16.mxu0 %v2618_v20 }
 0x167   : > { %1290 = vmatmul.mubr.bf16.gmra.mxu1 %v3042_v18  ;;  %1483 = vmatmul.mubr.bf16.gmra.mxu0 %v3042_v18 }
 0x168   : > { %1525 = vmatprep.mubr.bf16.mxu1 %v2618_v20  ;;  %1718 = vmatprep.mubr.bf16.mxu0 %v2618_v20 }
 0x16f   : > { %1526 = vmatmul.mubr.bf16.vlgmr.msra.gmra.mxu1 %v2844_v45  ;;  %1719 = vmatmul.mubr.bf16.vlgmr.msra.gmra.mxu0 %v2844_v45  ;;  %v3080_v45 = vshrl.u32 %v747_v31, 7 }
 0x170   : > { %1535 = vmatprep.mubr.bf16.mxu1 %v2618_v20  ;;  %1728 = vmatprep.mubr.bf16.mxu0 %v2618_v20 }
 0x177   : > { %1536 = vmatmul.mubr.bf16.gmra.mxu1 %v2877_v3  ;;  %1729 = vmatmul.mubr.bf16.gmra.mxu0 %v2877_v3  ;;  %v749_v3 = vsub.s32 0, %v3080_v45 }
 0x178   : > { %1545 = vmatprep.mubr.bf16.mxu1 %v2618_v20  ;;  %1738 = vmatprep.mubr.bf16.mxu0 %v2618_v20 }
 0x17f   : > { %1546 = vmatmul.mubr.bf16.gmra.mxu1 %v2915_v29  ;;  %1739 = vmatmul.mubr.bf16.gmra.mxu0 %v2915_v29  ;;  %v757_v29 = vsub.s32 2, %v3080_v45 }
 0x180   : > { %1555 = vmatprep.mubr.bf16.mxu1 %v2618_v20  ;;  %1748 = vmatprep.mubr.bf16.mxu0 %v2618_v20 }
 0x187   : > { %1556 = vmatmul.mubr.bf16.gmra.mxu1 %v2945_v52  ;;  %1749 = vmatmul.mubr.bf16.gmra.mxu0 %v2945_v52  ;;  %v745_v52 = vld [vmem:[%s3727_s4] sm:$0xff] }
 0x188   : > { %1565 = vmatprep.mubr.bf16.mxu1 %v2618_v20  ;;  %1758 = vmatprep.mubr.bf16.mxu0 %v2618_v20  ;;  %v3091_v21 = vrot.slane %v745_v52, %v749_v3 }
 0x18f   : > { %1566 = vmatmul.mubr.bf16.gmra.mxu1 %v2956_v1  ;;  %1759 = vmatmul.mubr.bf16.gmra.mxu0 %v2956_v1  ;;  %v753_v1 = vsub.s32 1, %v3080_v45 }
 0x190   : > { %1575 = vmatprep.mubr.bf16.mxu1 %v2618_v20  ;;  %1768 = vmatprep.mubr.bf16.mxu0 %v2618_v20 }
 0x191   : > { %v3097_v23 = vrot.slane %v745_v52, %v753_v1 }
 0x197   : > { %1576 = vmatmul.mubr.bf16.gmra.mxu1 %v2962_v8  ;;  %1769 = vmatmul.mubr.bf16.gmra.mxu0 %v2962_v8  ;;  %v761_v8 = vsub.s32 3, %v3080_v45 }
 0x198   : > { %1585 = vmatprep.mubr.bf16.mxu1 %v2618_v20  ;;  %1778 = vmatprep.mubr.bf16.mxu0 %v2618_v20 }
 0x199   : > { %v3099_v25 = vrot.slane %v745_v52, %v761_v8 }
 0x19f   : > { %1586 = vmatmul.mubr.bf16.gmra.mxu1 %v2972_v16  ;;  %1779 = vmatmul.mubr.bf16.gmra.mxu0 %v2972_v16 }
 0x1a0   : > { %1595 = vmatprep.mubr.bf16.mxu1 %v2618_v20  ;;  %1788 = vmatprep.mubr.bf16.mxu0 %v2618_v20 }
 0x1a7   : > { %1596 = vmatmul.mubr.bf16.gmra.mxu1 %v2978_v22  ;;  %1789 = vmatmul.mubr.bf16.gmra.mxu0 %v2978_v22  ;;  %v3093_v22 = vrot.slane %v745_v52, %v757_v29 }
 0x1a8   : > { %1605 = vmatprep.mubr.bf16.mxu1 %v2618_v20  ;;  %1798 = vmatprep.mubr.bf16.mxu0 %v2618_v20 }
 0x1af   : > { %v1141_v16 = vpop.f32.mrf.mxu1  ;;  %v1334_v19 = vpop.f32.mrf.mxu0  ;;  %1606 = vmatmul.mubr.bf16.gmra.mxu1 %v2988_v33  ;;  %1799 = vmatmul.mubr.bf16.gmra.mxu0 %v2988_v33 }
 0x1b0   : > { %1615 = vmatprep.mubr.bf16.mxu1 %v2618_v20  ;;  %1808 = vmatprep.mubr.bf16.mxu0 %v2618_v20  ;;  %v1142_v30 = vadd.f32 %v1141_v16, %v3091_v21  ;;  %v1335_v32 = vadd.f32 %v1334_v19, %v3093_v22 }
 0x1b1   : > { %v1143_v24 = vpop.f32.mrf.mxu1  ;;  %v1336_v26 = vpop.f32.mrf.mxu0 }
 0x1b2   : > { %v1144_v35 = vadd.f32 %v1143_v24, %v3097_v23  ;;  %v1337_v36 = vadd.f32 %v1336_v26, %v3099_v25 }
 0x1b3   : > { %v1145_v27 = vpop.f32.mrf.mxu1  ;;  %v1338_v28 = vpop.f32.mrf.mxu0 }
 0x1b4   : > { %v1146_v33 = vadd.f32 %v1145_v27, %v3091_v21  ;;  %v1339_v34 = vadd.f32 %v1338_v28, %v3093_v22 }
 0x1b5   : > { %v1147_v37 = vpop.f32.mrf.mxu1  ;;  %v1340_v39 = vpop.f32.mrf.mxu0 }
 0x1b6   : > { %v1879_v40 = vmax.f32 %v1142_v30, %v1146_v33  ;;  %v1941_v41 = vmax.f32 %v1335_v32, %v1339_v34  ;;  %v1148_v42 = vadd.f32 %v1147_v37, %v3097_v23  ;;  %v1341_v43 = vadd.f32 %v1340_v39, %v3099_v25 }
 0x1b7   : > { %v1151_v44 = vpop.f32.mrf.mxu1  ;;  %v1344_v46 = vpop.f32.mrf.mxu0  ;;  %1616 = vmatmul.mubr.bf16.gmra.mxu1 %v2994_v38  ;;  %1809 = vmatmul.mubr.bf16.gmra.mxu0 %v2994_v38 }
 0x1b8   : > { %v1910_v47 = vmax.f32 %v1144_v35, %v1148_v42  ;;  %v1972_v49 = vmax.f32 %v1337_v36, %v1341_v43  ;;  %v1152_v50 = vadd.f32 %v1151_v44, %v3091_v21  ;;  %v1345_v51 = vadd.f32 %v1344_v46, %v3093_v22  ;;  %1625 = vmatprep.mubr.bf16.mxu1 %v2618_v20 }
 0x1b9   : > { %v1153_v53 = vpop.f32.mrf.mxu1  ;;  %v1346_v55 = vpop.f32.mrf.mxu0  ;;  %1818 = vmatprep.mubr.bf16.mxu0 %v2618_v20 }
 0x1ba   : > { %v1880_v56 = vmax.f32 %v1879_v40, %v1152_v50  ;;  %v1942_v57 = vmax.f32 %v1941_v41, %v1345_v51  ;;  %v1154_v58 = vadd.f32 %v1153_v53, %v3097_v23  ;;  %v1347_v59 = vadd.f32 %v1346_v55, %v3099_v25 }
 0x1bb   : > { %v1155_v60 = vpop.f32.mrf.mxu1  ;;  %v1348_v38 = vpop.f32.mrf.mxu0 }
 0x1bc   : > { %v1911_v61 = vmax.f32 %v1910_v47, %v1154_v58  ;;  %v1973_v62 = vmax.f32 %v1972_v49, %v1347_v59  ;;  %v1156_v0 = vadd.f32 %v1155_v60, %v3091_v21  ;;  %v1349_v2 = vadd.f32 %v1348_v38, %v3093_v22 }
 0x1bd   : > { %v1157_v4 = vpop.f32.mrf.mxu1  ;;  %v1350_v5 = vpop.f32.mrf.mxu0 }
 0x1be   : > { %v1881_v6 = vmax.f32 %v1880_v56, %v1156_v0  ;;  %v1943_v9 = vmax.f32 %v1942_v57, %v1349_v2  ;;  %v1158_v10 = vadd.f32 %v1157_v4, %v3097_v23  ;;  %v1351_v11 = vadd.f32 %v1350_v5, %v3099_v25 }
 0x1bf   : > { %v1161_v12 = vpop.f32.mrf.mxu1  ;;  %v1354_v13 = vpop.f32.mrf.mxu0  ;;  %1626 = vmatmul.mubr.bf16.gmra.mxu1 %v3004_v48  ;;  %1819 = vmatmul.mubr.bf16.gmra.mxu0 %v3004_v48 }
 0x1c0   : > { %v1912_v15 = vmax.f32 %v1911_v61, %v1158_v10  ;;  %v1974_v17 = vmax.f32 %v1973_v62, %v1351_v11  ;;  %v1162_v31 = vadd.f32 %v1161_v12, %v3091_v21  ;;  %v1355_v3 = vadd.f32 %v1354_v13, %v3093_v22  ;;  %1635 = vmatprep.mubr.bf16.mxu1 %v2618_v20 }
 0x1c1   : > { %v1163_v29 = vpop.f32.mrf.mxu1  ;;  %v1356_v52 = vpop.f32.mrf.mxu0  ;;  %1828 = vmatprep.mubr.bf16.mxu0 %v2618_v20 }
 0x1c2   : > { %v1882_v1 = vmax.f32 %v1881_v6, %v1162_v31  ;;  %v1944_v8 = vmax.f32 %v1943_v9, %v1355_v3  ;;  %v1164_v16 = vadd.f32 %v1163_v29, %v3097_v23  ;;  %v1357_v19 = vadd.f32 %v1356_v52, %v3099_v25 }
 0x1c3   : > { %v1165_v24 = vpop.f32.mrf.mxu1  ;;  %v1358_v48 = vpop.f32.mrf.mxu0 }
 0x1c4   : > { %v1913_v26 = vmax.f32 %v1912_v15, %v1164_v16  ;;  %v1975_v27 = vmax.f32 %v1974_v17, %v1357_v19  ;;  %v1166_v28 = vadd.f32 %v1165_v24, %v3091_v21  ;;  %v1359_v30 = vadd.f32 %v1358_v48, %v3093_v22 }
 0x1c5   : > { %v1167_v32 = vpop.f32.mrf.mxu1  ;;  %v1360_v33 = vpop.f32.mrf.mxu0 }
 0x1c6   : > { %v1883_v34 = vmax.f32 %v1882_v1, %v1166_v28  ;;  %v1945_v35 = vmax.f32 %v1944_v8, %v1359_v30  ;;  %v1168_v36 = vadd.f32 %v1167_v32, %v3097_v23  ;;  %v1361_v37 = vadd.f32 %v1360_v33, %v3099_v25 }
 0x1c7   : > { %v1171_v39 = vpop.f32.mrf.mxu1  ;;  %v1364_v40 = vpop.f32.mrf.mxu0  ;;  %1636 = vmatmul.mubr.bf16.gmra.mxu1 %v3010_v54  ;;  %1829 = vmatmul.mubr.bf16.gmra.mxu0 %v3010_v54 }
 0x1c8   : > { %v1914_v41 = vmax.f32 %v1913_v26, %v1168_v36  ;;  %v1976_v42 = vmax.f32 %v1975_v27, %v1361_v37  ;;  %v1172_v43 = vadd.f32 %v1171_v39, %v3091_v21  ;;  %v1365_v44 = vadd.f32 %v1364_v40, %v3093_v22  ;;  %1645 = vmatprep.mubr.bf16.mxu1 %v2618_v20 }
 0x1c9   : > { %v1173_v46 = vpop.f32.mrf.mxu1  ;;  %v1366_v47 = vpop.f32.mrf.mxu0  ;;  %1838 = vmatprep.mubr.bf16.mxu0 %v2618_v20 }
 0x1ca   : > { %v1884_v49 = vmax.f32 %v1883_v34, %v1172_v43  ;;  %v1946_v50 = vmax.f32 %v1945_v35, %v1365_v44  ;;  %v1174_v51 = vadd.f32 %v1173_v46, %v3097_v23  ;;  %v1367_v53 = vadd.f32 %v1366_v47, %v3099_v25 }
 0x1cb   : > { %v1175_v55 = vpop.f32.mrf.mxu1  ;;  %v1368_v54 = vpop.f32.mrf.mxu0 }
 0x1cc   : > { %v1915_v56 = vmax.f32 %v1914_v41, %v1174_v51  ;;  %v1977_v57 = vmax.f32 %v1976_v42, %v1367_v53  ;;  %v1176_v58 = vadd.f32 %v1175_v55, %v3091_v21  ;;  %v1369_v59 = vadd.f32 %v1368_v54, %v3093_v22 }
 0x1cd   : > { %v1177_v60 = vpop.f32.mrf.mxu1  ;;  %v1370_v38 = vpop.f32.mrf.mxu0 }
 0x1ce   : > { %v1885_v61 = vmax.f32 %v1884_v49, %v1176_v58  ;;  %v1947_v62 = vmax.f32 %v1946_v50, %v1369_v59  ;;  %v1178_v0 = vadd.f32 %v1177_v60, %v3097_v23  ;;  %v1371_v2 = vadd.f32 %v1370_v38, %v3099_v25 }
 0x1cf   : > { %v1181_v4 = vpop.f32.mrf.mxu1  ;;  %v1374_v5 = vpop.f32.mrf.mxu0  ;;  %1646 = vmatmul.mubr.bf16.gmra.mxu1 %v3020_v63  ;;  %1839 = vmatmul.mubr.bf16.gmra.mxu0 %v3020_v63 }
 0x1d0   : > { %v1916_v6 = vmax.f32 %v1915_v56, %v1178_v0  ;;  %v1978_v9 = vmax.f32 %v1977_v57, %v1371_v2  ;;  %v1182_v10 = vadd.f32 %v1181_v4, %v3091_v21  ;;  %v1375_v11 = vadd.f32 %v1374_v5, %v3093_v22  ;;  %1655 = vmatprep.mubr.bf16.mxu1 %v2618_v20 }
 0x1d1   : > { %v1183_v12 = vpop.f32.mrf.mxu1  ;;  %v1376_v13 = vpop.f32.mrf.mxu0  ;;  %1848 = vmatprep.mubr.bf16.mxu0 %v2618_v20 }
 0x1d2   : > { %v1886_v15 = vmax.f32 %v1885_v61, %v1182_v10  ;;  %v1948_v17 = vmax.f32 %v1947_v62, %v1375_v11  ;;  %v1184_v31 = vadd.f32 %v1183_v12, %v3097_v23  ;;  %v1377_v3 = vadd.f32 %v1376_v13, %v3099_v25 }
 0x1d3   : > { %v1185_v29 = vpop.f32.mrf.mxu1  ;;  %v1378_v63 = vpop.f32.mrf.mxu0 }
 0x1d4   : > { %v1917_v52 = vmax.f32 %v1916_v6, %v1184_v31  ;;  %v1979_v1 = vmax.f32 %v1978_v9, %v1377_v3  ;;  %v1186_v8 = vadd.f32 %v1185_v29, %v3091_v21  ;;  %v1379_v16 = vadd.f32 %v1378_v63, %v3093_v22 }
 0x1d5   : > { %v1187_v19 = vpop.f32.mrf.mxu1  ;;  %v1380_v24 = vpop.f32.mrf.mxu0 }
 0x1d6   : > { %v1887_v48 = vmax.f32 %v1886_v15, %v1186_v8  ;;  %v1949_v26 = vmax.f32 %v1948_v17, %v1379_v16  ;;  %v1188_v27 = vadd.f32 %v1187_v19, %v3097_v23  ;;  %v1381_v28 = vadd.f32 %v1380_v24, %v3099_v25 }
 0x1d7   : > { %v1191_v30 = vpop.f32.mrf.mxu1  ;;  %v1384_v32 = vpop.f32.mrf.mxu0  ;;  %1656 = vmatmul.mubr.bf16.gmra.mxu1 %v3026_v7  ;;  %1849 = vmatmul.mubr.bf16.gmra.mxu0 %v3026_v7 }
 0x1d8   : > { %v1918_v33 = vmax.f32 %v1917_v52, %v1188_v27  ;;  %v1980_v34 = vmax.f32 %v1979_v1, %v1381_v28  ;;  %v1192_v35 = vadd.f32 %v1191_v30, %v3091_v21  ;;  %v1385_v36 = vadd.f32 %v1384_v32, %v3093_v22  ;;  %1665 = vmatprep.mubr.bf16.mxu1 %v2618_v20 }
 0x1d9   : > { %v1193_v37 = vpop.f32.mrf.mxu1  ;;  %v1386_v39 = vpop.f32.mrf.mxu0  ;;  %1858 = vmatprep.mubr.bf16.mxu0 %v2618_v20 }
 0x1da   : > { %v1888_v40 = vmax.f32 %v1887_v48, %v1192_v35  ;;  %v1950_v41 = vmax.f32 %v1949_v26, %v1385_v36  ;;  %v1194_v42 = vadd.f32 %v1193_v37, %v3097_v23  ;;  %v1387_v43 = vadd.f32 %v1386_v39, %v3099_v25 }
 0x1db   : > { %v1195_v44 = vpop.f32.mrf.mxu1  ;;  %v1388_v7 = vpop.f32.mrf.mxu0 }
 0x1dc   : > { %v1919_v46 = vmax.f32 %v1918_v33, %v1194_v42  ;;  %v1981_v47 = vmax.f32 %v1980_v34, %v1387_v43  ;;  %v1196_v49 = vadd.f32 %v1195_v44, %v3091_v21  ;;  %v1389_v50 = vadd.f32 %v1388_v7, %v3093_v22 }
 0x1dd   : > { %v1197_v51 = vpop.f32.mrf.mxu1  ;;  %v1390_v53 = vpop.f32.mrf.mxu0 }
 0x1de   : > { %v1889_v55 = vmax.f32 %v1888_v40, %v1196_v49  ;;  %v1951_v54 = vmax.f32 %v1950_v41, %v1389_v50  ;;  %v1198_v56 = vadd.f32 %v1197_v51, %v3097_v23  ;;  %v1391_v57 = vadd.f32 %v1390_v53, %v3099_v25 }
 0x1df   : > { %v1201_v58 = vpop.f32.mrf.mxu1  ;;  %v1394_v59 = vpop.f32.mrf.mxu0  ;;  %1666 = vmatmul.mubr.bf16.gmra.mxu1 %v3036_v14  ;;  %1859 = vmatmul.mubr.bf16.gmra.mxu0 %v3036_v14 }
 0x1e0   : > { %v1920_v60 = vmax.f32 %v1919_v46, %v1198_v56  ;;  %v1982_v38 = vmax.f32 %v1981_v47, %v1391_v57  ;;  %v1202_v61 = vadd.f32 %v1201_v58, %v3091_v21  ;;  %v1395_v62 = vadd.f32 %v1394_v59, %v3093_v22  ;;  %1675 = vmatprep.mubr.bf16.mxu1 %v2618_v20 }
 0x1e1   : > { %v1203_v0 = vpop.f32.mrf.mxu1  ;;  %v1396_v2 = vpop.f32.mrf.mxu0  ;;  %1868 = vmatprep.mubr.bf16.mxu0 %v2618_v20 }
 0x1e2   : > { %v1890_v4 = vmax.f32 %v1889_v55, %v1202_v61  ;;  %v1952_v5 = vmax.f32 %v1951_v54, %v1395_v62  ;;  %v1204_v6 = vadd.f32 %v1203_v0, %v3097_v23  ;;  %v1397_v9 = vadd.f32 %v1396_v2, %v3099_v25 }
 0x1e3   : > { %v1205_v10 = vpop.f32.mrf.mxu1  ;;  %v1398_v14 = vpop.f32.mrf.mxu0 }
 0x1e4   : > { %v1921_v11 = vmax.f32 %v1920_v60, %v1204_v6  ;;  %v1983_v12 = vmax.f32 %v1982_v38, %v1397_v9  ;;  %v1206_v13 = vadd.f32 %v1205_v10, %v3091_v21  ;;  %v1399_v15 = vadd.f32 %v1398_v14, %v3093_v22 }
 0x1e5   : > { %v1207_v17 = vpop.f32.mrf.mxu1  ;;  %v1400_v31 = vpop.f32.mrf.mxu0 }
 0x1e6   : > { %v1891_v3 = vmax.f32 %v1890_v4, %v1206_v13  ;;  %v1953_v29 = vmax.f32 %v1952_v5, %v1399_v15  ;;  %v1208_v20 = vadd.f32 %v1207_v17, %v3097_v23  ;;  %v1401_v63 = vadd.f32 %v1400_v31, %v3099_v25 }
 0x1e7   : > { %v1211_v52 = vpop.f32.mrf.mxu1  ;;  %v1404_v1 = vpop.f32.mrf.mxu0  ;;  %1676 = vmatmul.mubr.bf16.gmra.mxu1 %v3042_v18  ;;  %1869 = vmatmul.mubr.bf16.gmra.mxu0 %v3042_v18 }
 0x1e8   : > { %v1922_v8 = vmax.f32 %v1921_v11, %v1208_v20  ;;  %v1984_v16 = vmax.f32 %v1983_v12, %v1401_v63  ;;  %v1212_v19 = vadd.f32 %v1211_v52, %v3091_v21  ;;  %v1405_v24 = vadd.f32 %v1404_v1, %v3093_v22 }
 0x1e9   : > { %v1213_v48 = vpop.f32.mrf.mxu1  ;;  %v1406_v26 = vpop.f32.mrf.mxu0 }
 0x1ea   : > { %v1892_v27 = vmax.f32 %v1891_v3, %v1212_v19  ;;  %v1954_v28 = vmax.f32 %v1953_v29, %v1405_v24  ;;  %v1214_v30 = vadd.f32 %v1213_v48, %v3097_v23  ;;  %v1407_v32 = vadd.f32 %v1406_v26, %v3099_v25 }
 0x1eb   : > { %v1215_v33 = vpop.f32.mrf.mxu1  ;;  %v1408_v34 = vpop.f32.mrf.mxu0 }
 0x1ec   : > { %v1923_v35 = vmax.f32 %v1922_v8, %v1214_v30  ;;  %v1985_v36 = vmax.f32 %v1984_v16, %v1407_v32  ;;  %v1216_v18 = vadd.f32 %v1215_v33, %v3091_v21  ;;  %v1409_v37 = vadd.f32 %v1408_v34, %v3093_v22 }
 0x1ed   : > { %v1217_v39 = vpop.f32.mrf.mxu1  ;;  %v1410_v40 = vpop.f32.mrf.mxu0 }
 0x1ee   : > { %v1893_v41 = vmax.f32 %v1892_v27, %v1216_v18  ;;  %v1955_v42 = vmax.f32 %v1954_v28, %v1409_v37  ;;  %v1218_v43 = vadd.f32 %v1217_v39, %v3097_v23  ;;  %v1411_v44 = vadd.f32 %v1410_v40, %v3099_v25 }
 0x1ef   : > { %v1221_v7 = vpop.f32.mrf.mxu1  ;;  %v1414_v46 = vpop.f32.mrf.mxu0 }
 0x1f0   : > { %v1924_v47 = vmax.f32 %v1923_v35, %v1218_v43  ;;  %v1986_v49 = vmax.f32 %v1985_v36, %v1411_v44  ;;  %v1222_v50 = vadd.f32 %v1221_v7, %v3091_v21  ;;  %v1415_v51 = vadd.f32 %v1414_v46, %v3093_v22 }
 0x1f1   : > { %v1223_v53 = vpop.f32.mrf.mxu1  ;;  %v1416_v55 = vpop.f32.mrf.mxu0 }
 0x1f2   : > { %v1894_v54 = vmax.f32 %v1893_v41, %v1222_v50  ;;  %v1956_v56 = vmax.f32 %v1955_v42, %v1415_v51  ;;  %v1224_v57 = vadd.f32 %v1223_v53, %v3097_v23  ;;  %v1417_v58 = vadd.f32 %v1416_v55, %v3099_v25 }
 0x1f3   : > { %v1225_v59 = vpop.f32.mrf.mxu1  ;;  %v1418_v60 = vpop.f32.mrf.mxu0 }
 0x1f4   : > { %v1925_v38 = vmax.f32 %v1924_v47, %v1224_v57  ;;  %v1987_v61 = vmax.f32 %v1986_v49, %v1417_v58  ;;  %v1226_v62 = vadd.f32 %v1225_v59, %v3091_v21  ;;  %v1419_v0 = vadd.f32 %v1418_v60, %v3093_v22 }
 0x1f5   : > { %v1227_v2 = vpop.f32.mrf.mxu1  ;;  %v1420_v4 = vpop.f32.mrf.mxu0 }
 0x1f6   : > { %v1895_v5 = vmax.f32 %v1894_v54, %v1226_v62  ;;  %v1957_v6 = vmax.f32 %v1956_v56, %v1419_v0  ;;  %v1228_v9 = vadd.f32 %v1227_v2, %v3097_v23  ;;  %v1421_v10 = vadd.f32 %v1420_v4, %v3099_v25 }
 0x1f7   : > { %v1231_v14 = vpop.f32.mrf.mxu1  ;;  %v1424_v11 = vpop.f32.mrf.mxu0 }
 0x1f8   : > { %v1926_v12 = vmax.f32 %v1925_v38, %v1228_v9  ;;  %v1988_v13 = vmax.f32 %v1987_v61, %v1421_v10  ;;  %v1232_v15 = vadd.f32 %v1231_v14, %v3091_v21  ;;  %v1425_v17 = vadd.f32 %v1424_v11, %v3093_v22 }
 0x1f9   : > { %v1233_v31 = vpop.f32.mrf.mxu1  ;;  %v1426_v3 = vpop.f32.mrf.mxu0 }
 0x1fa   : > { %v1896_v29 = vmax.f32 %v1895_v5, %v1232_v15  ;;  %v1958_v20 = vmax.f32 %v1957_v6, %v1425_v17  ;;  %v1234_v63 = vadd.f32 %v1233_v31, %v3097_v23  ;;  %v1427_v52 = vadd.f32 %v1426_v3, %v3099_v25 }
 0x1fb   : > { %v1235_v1 = vpop.f32.mrf.mxu1  ;;  %v1428_v8 = vpop.f32.mrf.mxu0 }
 0x1fc   : > { %v1927_v16 = vmax.f32 %v1926_v12, %v1234_v63  ;;  %v1989_v19 = vmax.f32 %v1988_v13, %v1427_v52  ;;  %v1236_v24 = vadd.f32 %v1235_v1, %v3091_v21  ;;  %v1429_v48 = vadd.f32 %v1428_v8, %v3093_v22 }
 0x1fd   : > { %v1237_v26 = vpop.f32.mrf.mxu1  ;;  %v1430_v27 = vpop.f32.mrf.mxu0 }
 0x1fe   : > { %v1897_v28 = vmax.f32 %v1896_v29, %v1236_v24  ;;  %v1959_v30 = vmax.f32 %v1958_v20, %v1429_v48  ;;  %v1238_v32 = vadd.f32 %v1237_v26, %v3097_v23  ;;  %v1431_v33 = vadd.f32 %v1430_v27, %v3099_v25 }
 0x1ff   : > { %v1241_v34 = vpop.f32.mrf.mxu1  ;;  %v1434_v35 = vpop.f32.mrf.mxu0 }
 0x200   : > { %v1928_v36 = vmax.f32 %v1927_v16, %v1238_v32  ;;  %v1990_v18 = vmax.f32 %v1989_v19, %v1431_v33  ;;  %v1242_v37 = vadd.f32 %v1241_v34, %v3091_v21  ;;  %v1435_v39 = vadd.f32 %v1434_v35, %v3093_v22 }
 0x201   : > { %v1243_v40 = vpop.f32.mrf.mxu1  ;;  %v1436_v41 = vpop.f32.mrf.mxu0 }
 0x202   : > { %v1898_v42 = vmax.f32 %v1897_v28, %v1242_v37  ;;  %v1960_v43 = vmax.f32 %v1959_v30, %v1435_v39  ;;  %v1244_v44 = vadd.f32 %v1243_v40, %v3097_v23  ;;  %v1437_v7 = vadd.f32 %v1436_v41, %v3099_v25 }
 0x203   : > { %v1245_v46 = vpop.f32.mrf.mxu1  ;;  %v1438_v47 = vpop.f32.mrf.mxu0 }
 0x204   : > { %v1929_v49 = vmax.f32 %v1928_v36, %v1244_v44  ;;  %v1991_v50 = vmax.f32 %v1990_v18, %v1437_v7  ;;  %v1246_v51 = vadd.f32 %v1245_v46, %v3091_v21  ;;  %v1439_v53 = vadd.f32 %v1438_v47, %v3093_v22 }
 0x205   : > { %v1247_v55 = vpop.f32.mrf.mxu1  ;;  %v1440_v54 = vpop.f32.mrf.mxu0 }
 0x206   : > { %v1899_v56 = vmax.f32 %v1898_v42, %v1246_v51  ;;  %v1961_v57 = vmax.f32 %v1960_v43, %v1439_v53  ;;  %v1248_v58 = vadd.f32 %v1247_v55, %v3097_v23  ;;  %v1441_v59 = vadd.f32 %v1440_v54, %v3099_v25 }
 0x207   : > { %v1251_v60 = vpop.f32.mrf.mxu1  ;;  %v1444_v38 = vpop.f32.mrf.mxu0 }
 0x208   : > { %v1930_v61 = vmax.f32 %v1929_v49, %v1248_v58  ;;  %v1992_v62 = vmax.f32 %v1991_v50, %v1441_v59  ;;  %v1252_v0 = vadd.f32 %v1251_v60, %v3091_v21  ;;  %v1445_v2 = vadd.f32 %v1444_v38, %v3093_v22 }
 0x209   : > { %v1253_v4 = vpop.f32.mrf.mxu1  ;;  %v1446_v5 = vpop.f32.mrf.mxu0 }
 0x20a   : > { %v1900_v6 = vmax.f32 %v1899_v56, %v1252_v0  ;;  %v1962_v9 = vmax.f32 %v1961_v57, %v1445_v2  ;;  %v1254_v10 = vadd.f32 %v1253_v4, %v3097_v23  ;;  %v1447_v14 = vadd.f32 %v1446_v5, %v3099_v25 }
 0x20b   : > { %v1255_v11 = vpop.f32.mrf.mxu1  ;;  %v1448_v12 = vpop.f32.mrf.mxu0 }
 0x20c   : > { %v1931_v13 = vmax.f32 %v1930_v61, %v1254_v10  ;;  %v1993_v15 = vmax.f32 %v1992_v62, %v1447_v14  ;;  %v1256_v17 = vadd.f32 %v1255_v11, %v3091_v21  ;;  %v1449_v31 = vadd.f32 %v1448_v12, %v3093_v22 }
 0x20d   : > { %v1257_v3 = vpop.f32.mrf.mxu1  ;;  %v1450_v29 = vpop.f32.mrf.mxu0 }
 0x20e   : > { %v1901_v20 = vmax.f32 %v1900_v6, %v1256_v17  ;;  %v1963_v63 = vmax.f32 %v1962_v9, %v1449_v31  ;;  %v1258_v52 = vadd.f32 %v1257_v3, %v3097_v23  ;;  %v1451_v1 = vadd.f32 %v1450_v29, %v3099_v25 }
 0x20f   : > { %v1261_v8 = vpop.f32.mrf.mxu1  ;;  %v1454_v16 = vpop.f32.mrf.mxu0 }
 0x210   : > { %v1932_v19 = vmax.f32 %v1931_v13, %v1258_v52  ;;  %v1994_v24 = vmax.f32 %v1993_v15, %v1451_v1  ;;  %v1262_v48 = vadd.f32 %v1261_v8, %v3091_v21  ;;  %v1455_v26 = vadd.f32 %v1454_v16, %v3093_v22 }
 0x211   : > { %v1263_v27 = vpop.f32.mrf.mxu1  ;;  %v1456_v28 = vpop.f32.mrf.mxu0 }
 0x212   : > { %v1902_v30 = vmax.f32 %v1901_v20, %v1262_v48  ;;  %v1964_v32 = vmax.f32 %v1963_v63, %v1455_v26  ;;  %v1264_v33 = vadd.f32 %v1263_v27, %v3097_v23  ;;  %v1457_v34 = vadd.f32 %v1456_v28, %v3099_v25 }
 0x213   : > { %v1265_v35 = vpop.f32.mrf.mxu1  ;;  %v1458_v36 = vpop.f32.mrf.mxu0 }
 0x214   : > { %v1933_v18 = vmax.f32 %v1932_v19, %v1264_v33  ;;  %v1995_v37 = vmax.f32 %v1994_v24, %v1457_v34  ;;  %v1266_v39 = vadd.f32 %v1265_v35, %v3091_v21  ;;  %v1459_v40 = vadd.f32 %v1458_v36, %v3093_v22 }
 0x215   : > { %v1267_v41 = vpop.f32.mrf.mxu1  ;;  %v1460_v42 = vpop.f32.mrf.mxu0 }
 0x216   : > { %v1903_v43 = vmax.f32 %v1902_v30, %v1266_v39  ;;  %v1965_v44 = vmax.f32 %v1964_v32, %v1459_v40  ;;  %v1268_v7 = vadd.f32 %v1267_v41, %v3097_v23  ;;  %v1461_v46 = vadd.f32 %v1460_v42, %v3099_v25 }
 0x217   : > { %v1271_v47 = vpop.f32.mrf.mxu1  ;;  %v1464_v49 = vpop.f32.mrf.mxu0 }
 0x218   : > { %v1934_v50 = vmax.f32 %v1933_v18, %v1268_v7  ;;  %v1996_v51 = vmax.f32 %v1995_v37, %v1461_v46  ;;  %v1272_v53 = vadd.f32 %v1271_v47, %v3091_v21  ;;  %v1465_v55 = vadd.f32 %v1464_v49, %v3093_v22 }
 0x219   : > { %v1273_v54 = vpop.f32.mrf.mxu1  ;;  %v1466_v56 = vpop.f32.mrf.mxu0 }
 0x21a   : > { %v1904_v57 = vmax.f32 %v1903_v43, %v1272_v53  ;;  %v1966_v58 = vmax.f32 %v1965_v44, %v1465_v55  ;;  %v1274_v59 = vadd.f32 %v1273_v54, %v3097_v23  ;;  %v1467_v60 = vadd.f32 %v1466_v56, %v3099_v25 }
 0x21b   : > { %v1275_v38 = vpop.f32.mrf.mxu1  ;;  %v1468_v61 = vpop.f32.mrf.mxu0 }
 0x21c   : > { %v1935_v62 = vmax.f32 %v1934_v50, %v1274_v59  ;;  %v1997_v0 = vmax.f32 %v1996_v51, %v1467_v60  ;;  %v1276_v2 = vadd.f32 %v1275_v38, %v3091_v21  ;;  %v1469_v4 = vadd.f32 %v1468_v61, %v3093_v22 }
 0x21d   : > { %v1277_v5 = vpop.f32.mrf.mxu1  ;;  %v1470_v6 = vpop.f32.mrf.mxu0 }
 0x21e   : > { %v1905_v9 = vmax.f32 %v1904_v57, %v1276_v2  ;;  %v1967_v10 = vmax.f32 %v1966_v58, %v1469_v4  ;;  %v1278_v14 = vadd.f32 %v1277_v5, %v3097_v23  ;;  %v1471_v11 = vadd.f32 %v1470_v6, %v3099_v25 }
 0x21f   : > { %v1281_v12 = vpop.f32.mrf.mxu1  ;;  %v1474_v13 = vpop.f32.mrf.mxu0 }
 0x220   : > { %v1936_v15 = vmax.f32 %v1935_v62, %v1278_v14  ;;  %v1998_v17 = vmax.f32 %v1997_v0, %v1471_v11  ;;  %v1282_v31 = vadd.f32 %v1281_v12, %v3091_v21  ;;  %v1475_v3 = vadd.f32 %v1474_v13, %v3093_v22 }
 0x221   : > { %v1283_v29 = vpop.f32.mrf.mxu1  ;;  %v1476_v20 = vpop.f32.mrf.mxu0  ;;  %v2619_v11 = vmov 1966171168  }
 0x222   : > { %v1906_v63 = vmax.f32 %v1905_v9, %v1282_v31  ;;  %v1968_v52 = vmax.f32 %v1967_v10, %v1475_v3  ;;  %v1284_v1 = vadd.f32 %v1283_v29, %v3097_v23  ;;  %v1477_v8 = vadd.f32 %v1476_v20, %v3099_v25 }
 0x223   : > { %v1285_v16 = vpop.f32.mrf.mxu1  ;;  %v1478_v19 = vpop.f32.mrf.mxu0 }
 0x224   : > { %v1937_v24 = vmax.f32 %v1936_v15, %v1284_v1  ;;  %v1999_v48 = vmax.f32 %v1998_v17, %v1477_v8  ;;  %v1286_v26 = vadd.f32 %v1285_v16, %v3091_v21  ;;  %v1479_v27 = vadd.f32 %v1478_v19, %v3093_v22 }
 0x225   : > { %v1287_v28 = vpop.f32.mrf.mxu1  ;;  %v1480_v30 = vpop.f32.mrf.mxu0 }
 0x226   : > { %v1907_v32 = vmax.f32 %v1906_v63, %v1286_v26  ;;  %v1969_v33 = vmax.f32 %v1968_v52, %v1479_v27  ;;  %v1288_v34 = vadd.f32 %v1287_v28, %v3097_v23  ;;  %v1481_v35 = vadd.f32 %v1480_v30, %v3099_v25 }
 0x227   : > { %v1291_v36 = vpop.f32.mrf.mxu1  ;;  %v1484_v18 = vpop.f32.mrf.mxu0 }
 0x228   : > { %v1938_v37 = vmax.f32 %v1937_v24, %v1288_v34  ;;  %v2000_v39 = vmax.f32 %v1999_v48, %v1481_v35  ;;  %v1292_v40 = vadd.f32 %v1291_v36, %v3091_v21  ;;  %v1485_v41 = vadd.f32 %v1484_v18, %v3093_v22 }
 0x229   : > { %v1293_v42 = vpop.f32.mrf.mxu1  ;;  %v1486_v43 = vpop.f32.mrf.mxu0 }
 0x22a   : > { %v1908_v44 = vmax.f32 %v1907_v32, %v1292_v40  ;;  %v1970_v7 = vmax.f32 %v1969_v33, %v1485_v41  ;;  %v1294_v46 = vadd.f32 %v1293_v42, %v3097_v23  ;;  %v1487_v47 = vadd.f32 %v1486_v43, %v3099_v25 }
 0x22b   : > { %v1295_v49 = vpop.f32.mrf.mxu1  ;;  %v1488_v50 = vpop.f32.mrf.mxu0 }
 0x22c   : > { %v1939_v51 = vmax.f32 %v1938_v37, %v1294_v46  ;;  %v2001_v53 = vmax.f32 %v2000_v39, %v1487_v47  ;;  %v1296_v55 = vadd.f32 %v1295_v49, %v3091_v21  ;;  %v1489_v54 = vadd.f32 %v1488_v50, %v3093_v22 }
 0x22d   : > { %v1297_v56 = vpop.f32.mrf.mxu1  ;;  %v1490_v57 = vpop.f32.mrf.mxu0 }
 0x22e   : > { %v1909_v58 = vmax.f32 %v1908_v44, %v1296_v55  ;;  %v1971_v59 = vmax.f32 %v1970_v7, %v1489_v54  ;;  %v1298_v60 = vadd.f32 %v1297_v56, %v3097_v23  ;;  %v1491_v38 = vadd.f32 %v1490_v57, %v3099_v25 }
 0x22f   : > { %v3255_v61 = vpop.f32.mrf.mxu1  ;;  %v3257_v62 = vpop.f32.mrf.mxu0  ;;  %v2239_v23 = vunpack.c.l.s4 %v2619_v11 }
 0x230   : > { %v2178_v0 = vrot.slane %v1909_v58, 4  ;;  %v2190_v2 = vrot.slane %v1971_v59, 4  ;;  %v1940_v4 = vmax.f32 %v1939_v51, %v1298_v60  ;;  %v2002_v5 = vmax.f32 %v2001_v53, %v1491_v38 }
 0x231   : > { %v3259_v6 = vpop.f32.mrf.mxu1  ;;  %v3261_v21 = vpop.f32.mrf.mxu0  ;;  %v2240_v8 = vunpack.c.0.s8 %v2239_v23  ;;  %v773_v53 = vsub.s32 6, %v3080_v45 }
 0x232   : > { %v2179_v22 = vmax.f32 %v1909_v58, %v2178_v0  ;;  %v2191_v9 = vmax.f32 %v1971_v59, %v2190_v2  ;;  %v2184_v10 = vrot.slane %v1940_v4, 4  ;;  %v2196_v14 = vrot.slane %v2002_v5, 4 }
 0x233   : > { %v3263_v12 = vpop.f32.mrf.mxu1  ;;  %v3265_v25 = vpop.f32.mrf.mxu0  ;;  %v3280_v34 = vsub.s32 %v2240_v8, %v3080_v45 }
 0x234   : > { %v2180_v13 = vrot.slane %v2179_v22, 2  ;;  %v2192_v15 = vrot.slane %v2191_v9, 2  ;;  %v2185_v17 = vmax.f32 %v1940_v4, %v2184_v10  ;;  %v2197_v31 = vmax.f32 %v2002_v5, %v2196_v14 }
 0x235   : > { %v3267_v3 = vpop.f32.mrf.mxu1  ;;  %v3269_v29 = vpop.f32.mrf.mxu0  ;;  %3733 = vst [vmem:[#allocation3_spill] sm:$0xff] %v3280_v34 }
 0x236   : > { %v2181_v20 = vmax.f32 %v2179_v22, %v2180_v13  ;;  %v2193_v63 = vmax.f32 %v2191_v9, %v2192_v15  ;;  %v2186_v52 = vrot.slane %v2185_v17, 2  ;;  %v2198_v1 = vrot.slane %v2197_v31, 2 }
 0x237   : > { %v3271_v16 = vpop.f32.mrf.mxu1  ;;  %v3273_v19 = vpop.f32.mrf.mxu0 }
 0x238   : > { %v2182_v24 = vrot.slane %v2181_v20, 1  ;;  %v2194_v48 = vrot.slane %v2193_v63, 1  ;;  %v2187_v26 = vmax.f32 %v2185_v17, %v2186_v52  ;;  %v2199_v27 = vmax.f32 %v2197_v31, %v2198_v1 }
 0x239   : > { %v3275_v28 = vpop.f32.mrf.mxu1  ;;  %v3277_v30 = vpop.f32.mrf.mxu0 }
 0x23a   : > { %v2188_v32 = vrot.slane %v2187_v26, 1  ;;  %v2200_v33 = vrot.slane %v2199_v27, 1  ;;  %v2183_v18 = vmax.f32 %v2181_v20, %v2182_v24  ;;  %v2195_v37 = vmax.f32 %v2193_v63, %v2194_v48 }
 0x23b   : > { %v3282_v35 = vpop.f32.mrf.mxu1  ;;  %v3284_v36 = vpop.f32.mrf.mxu0 }
 0x23c   : > { %v2189_v39 = vmax.f32 %v2187_v26, %v2188_v32  ;;  %v2201_v40 = vmax.f32 %v2199_v27, %v2200_v33 }
 0x23d   : > { %v3286_v41 = vpop.f32.mrf.mxu1  ;;  %v3288_v42 = vpop.f32.mrf.mxu0 }
 0x23e   : > { %v2234_v43 = vcombine.low %v2183_v18, %v2189_v39  ;;  %v2235_v44 = vcombine.low %v2195_v37, %v2201_v40 }
 0x23f   : > { %v3290_v7 = vpop.f32.mrf.mxu1  ;;  %v3292_v46 = vpop.f32.mrf.mxu0 }
 0x240   : > { %v3295_v47 = vrot.slane %v2234_v43, %v3280_v34  ;;  %v3298_v49 = vrot.slane %v2235_v44, %v3280_v34  ;;  %v765_v44 = vsub.s32 4, %v3080_v45 }
 0x241   : > { %v3300_v50 = vpop.f32.mrf.mxu1  ;;  %v3302_v51 = vpop.f32.mrf.mxu0 }
 0x242   : > { %3734 = vst [vmem:[#allocation4_spill] sm:$0xff] %v3295_v47  ;;  %3735 = vst [vmem:[#allocation5_spill] sm:$0xff] %v3298_v49  ;;  %v769_v49 = vsub.s32 5, %v3080_v45  ;;  %v777_v47 = vsub.s32 7, %v3080_v45 }
 0x243   : > { %v3306_v55 = vpop.f32.mrf.mxu1  ;;  %v3308_v54 = vpop.f32.mrf.mxu0 }
 0x245   : > { %v3310_v56 = vpop.f32.mrf.mxu1  ;;  %v3312_v57 = vpop.f32.mrf.mxu0 }
 0x247   : > { %v3314_v58 = vpop.f32.mrf.mxu1  ;;  %v3316_v59 = vpop.f32.mrf.mxu0 }
 0x249   : > { %v3318_v60 = vpop.f32.mrf.mxu1  ;;  %v3320_v38 = vpop.f32.mrf.mxu0 }
 0x24b   : > { %v3322_v0 = vpop.f32.mrf.mxu1  ;;  %v3324_v2 = vpop.f32.mrf.mxu0 }
 0x24d   : > { %v3326_v4 = vpop.f32.mrf.mxu1  ;;  %v3328_v5 = vpop.f32.mrf.mxu0 }
 0x24f   : > { %v3330_v22 = vpop.f32.mrf.mxu1  ;;  %v3332_v9 = vpop.f32.mrf.mxu0 }
 0x251   : > { %v3334_v10 = vpop.f32.mrf.mxu1  ;;  %v3336_v14 = vpop.f32.mrf.mxu0 }
 0x253   : > { %v3338_v11 = vpop.f32.mrf.mxu1  ;;  %v3340_v23 = vpop.f32.mrf.mxu0 }
 0x255   : > { %v3342_v13 = vpop.f32.mrf.mxu1  ;;  %v3344_v15 = vpop.f32.mrf.mxu0 }
 0x257   : > { %v3346_v17 = vpop.f32.mrf.mxu1  ;;  %v3348_v31 = vpop.f32.mrf.mxu0 }
 0x259   : > { %v3350_v20 = vpop.f32.mrf.mxu1  ;;  %v3352_v63 = vpop.f32.mrf.mxu0 }
 0x25b   : > { %v3354_v52 = vpop.f32.mrf.mxu1  ;;  %v3356_v1 = vpop.f32.mrf.mxu0 }
 0x25d   : > { %v3358_v8 = vpop.f32.mrf.mxu1  ;;  %v3360_v24 = vpop.f32.mrf.mxu0 }
 0x25f   : > { %v3362_v48 = vpop.f32.mrf.mxu1  ;;  %v3364_v26 = vpop.f32.mrf.mxu0 }
 0x260   : > { %3736 = vst [vmem:[#allocation6_spill] sm:$0xff] %v3364_v26 }
 0x261   : > { %v3366_v27 = vpop.f32.mrf.mxu1  ;;  %v3368_v32 = vpop.f32.mrf.mxu0 }
 0x262   : > { %3737 = vst [vmem:[#allocation7_spill] sm:$0xff] %v3366_v27  ;;  %3738 = vst [vmem:[#allocation8_spill] sm:$0xff] %v3368_v32 }
 0x263   : > { %v3370_v33 = vpop.f32.mrf.mxu1  ;;  %v3372_v18 = vpop.f32.mrf.mxu0 }
 0x264   : > { %3739 = vst [vmem:[#allocation9_spill] sm:$0xff] %v3370_v33  ;;  %3740 = vst [vmem:[#allocation10_spill] sm:$0xff] %v3372_v18 }
 0x265   : > { %v3374_v37 = vpop.f32.mrf.mxu1  ;;  %v3376_v39 = vpop.f32.mrf.mxu0 }
 0x266   : > { %3741 = vst [vmem:[#allocation11_spill] sm:$0xff] %v3374_v37  ;;  %3742 = vst [vmem:[#allocation12_spill] sm:$0xff] %v3376_v39 }
 0x267   : > { %v3378_v40 = vpop.f32.mrf.mxu1  ;;  %v3380_v43 = vpop.f32.mrf.mxu0 }
 0x268   : > { %3743 = vst [vmem:[#allocation13_spill] sm:$0xff] %v3378_v40  ;;  %3744 = vst [vmem:[#allocation14_spill] sm:$0xff] %v3380_v43  ;;  %v2593_v43 = vld [vmem:[%s3727_s4] sm:$0xff] }
 0x269   : > { %v3386_v34 = vpop.f32.mrf.mxu1  ;;  %v3388_v33 = vpop.f32.mrf.mxu0  ;;  %v3397_v40 = vrot.slane %v2593_v43, %v765_v44  ;;  %v3399_v39 = vrot.slane %v2593_v43, %v773_v53  ;;  %v3401_v32 = vrot.slane %v2593_v43, %v769_v49  ;;  %v3403_v27 = vrot.slane %v2593_v43, %v777_v47 }
 0x26a   : > { %3745 = vst [vmem:[#allocation15_spill] sm:$0xff] %v3386_v34  ;;  %3746 = vst [vmem:[#allocation16_spill] sm:$0xff] %v3388_v33 }
 0x26b   : > { %v3390_v18 = vpop.f32.mrf.mxu1  ;;  %v3392_v37 = vpop.f32.mrf.mxu0  ;;  %v1534_v44 = vadd.f32 %v3267_v3, %v3401_v32  ;;  %v1727_v53 = vadd.f32 %v3269_v29, %v3403_v27  ;;  %v1528_v43 = vadd.f32 %v3255_v61, %v3397_v40  ;;  %v1530_v3 = vadd.f32 %v3259_v6, %v3401_v32 }
 0x26c   : > { %3747 = vst [vmem:[#allocation17_spill] sm:$0xff] %v3390_v18  ;;  %3748 = vst [vmem:[#allocation18_spill] sm:$0xff] %v3392_v37  ;;  %v1532_v18 = vadd.f32 %v3263_v12, %v3397_v40  ;;  %v1725_v37 = vadd.f32 %v3265_v25, %v3399_v39  ;;  %v1538_v12 = vadd.f32 %v3271_v16, %v3397_v40 }
 0x26d   : > { %v3405_v45 = vpop.f32.mrf.mxu1  ;;  %v3407_v34 = vpop.f32.mrf.mxu0  ;;  %v1731_v25 = vadd.f32 %v3273_v19, %v3399_v39  ;;  %v1723_v29 = vadd.f32 %v3261_v21, %v3403_v27  ;;  %v1733_v61 = vadd.f32 %v3277_v30, %v3403_v27  ;;  %v1542_v19 = vadd.f32 %v3282_v35, %v3397_v40 }
 0x26e   : > { %3749 = vst [vmem:[#allocation19_spill] sm:$0xff] %v3405_v45  ;;  %3750 = vst [vmem:[#allocation20_spill] sm:$0xff] %v3407_v34  ;;  %v1721_v34 = vadd.f32 %v3257_v62, %v3399_v39  ;;  %v2003_v16 = vmax.f32 %v1528_v43, %v1532_v18  ;;  %v1735_v6 = vadd.f32 %v3284_v36, %v3399_v39 }
 0x26f   : > { %v3417_v49 = vpop.f32.mrf.mxu1  ;;  %v3419_v47 = vpop.f32.mrf.mxu0  ;;  %v2034_v33 = vmax.f32 %v1530_v3, %v1534_v44  ;;  %v2096_v21 = vmax.f32 %v1723_v29, %v1727_v53  ;;  %v1737_v30 = vadd.f32 %v3288_v42, %v3403_v27  ;;  %v1548_v35 = vadd.f32 %v3290_v7, %v3397_v40 }
 0x270   : > { %3751 = vst [vmem:[#allocation21_spill] sm:$0xff] %v3417_v49  ;;  %3752 = vst [vmem:[#allocation22_spill] sm:$0xff] %v3419_v47  ;;  %v1540_v47 = vadd.f32 %v3275_v28, %v3401_v32  ;;  %v2065_v45 = vmax.f32 %v1721_v34, %v1725_v37  ;;  %v1544_v28 = vadd.f32 %v3286_v41, %v3401_v32 }
 0x271   : > { %v3437_v49 = vpop.f32.mrf.mxu1  ;;  %v3439_v62 = vpop.f32.mrf.mxu0  ;;  %v2004_v18 = vmax.f32 %v2003_v16, %v1538_v12  ;;  %v1741_v36 = vadd.f32 %v3292_v46, %v3399_v39  ;;  %v2097_v44 = vmax.f32 %v2096_v21, %v1733_v61  ;;  %v1550_v41 = vadd.f32 %v3300_v50, %v3401_v32 }
 0x272   : > { %3753 = vst [vmem:[#allocation23_spill] sm:$0xff] %v3437_v49  ;;  %v2066_v34 = vmax.f32 %v2065_v45, %v1731_v25  ;;  %v2035_v37 = vmax.f32 %v2034_v33, %v1540_v47  ;;  %v1743_v42 = vadd.f32 %v3302_v51, %v3403_v27  ;;  %v1552_v7 = vadd.f32 %v3306_v55, %v3397_v40 }
 0x273   : > { %v3449_v26 = vpop.f32.mrf.mxu1  ;;  %v3451_v49 = vpop.f32.mrf.mxu0  ;;  %v2005_v12 = vmax.f32 %v2004_v18, %v1542_v19  ;;  %v1745_v46 = vadd.f32 %v3308_v54, %v3399_v39  ;;  %v2098_v47 = vmax.f32 %v2097_v44, %v1737_v30  ;;  %v1554_v50 = vadd.f32 %v3310_v56, %v3401_v32 }
 0x274   : > { %v2067_v45 = vmax.f32 %v2066_v34, %v1735_v6  ;;  %v2036_v33 = vmax.f32 %v2035_v37, %v1544_v28  ;;  %v1747_v51 = vadd.f32 %v3312_v57, %v3403_v27  ;;  %v1558_v55 = vadd.f32 %v3314_v58, %v3397_v40 }
 0x275   : > { %v3461_v53 = vpop.f32.mrf.mxu1  ;;  %v3463_v43 = vpop.f32.mrf.mxu0  ;;  %v2006_v29 = vmax.f32 %v2005_v12, %v1548_v35  ;;  %v1751_v54 = vadd.f32 %v3316_v59, %v3399_v39  ;;  %v2099_v19 = vmax.f32 %v2098_v47, %v1743_v42  ;;  %v1560_v56 = vadd.f32 %v3318_v60, %v3401_v32 }
 0x276   : > { %v2068_v61 = vmax.f32 %v2067_v45, %v1741_v36  ;;  %v2037_v16 = vmax.f32 %v2036_v33, %v1550_v41  ;;  %v1753_v57 = vadd.f32 %v3320_v38, %v3403_v27  ;;  %v1562_v58 = vadd.f32 %v3322_v0, %v3397_v40 }
 0x277   : > { %v3473_v25 = vpop.f32.mrf.mxu1  ;;  %v3475_v3 = vpop.f32.mrf.mxu0  ;;  %v2007_v28 = vmax.f32 %v2006_v29, %v1552_v7  ;;  %v1755_v59 = vadd.f32 %v3324_v2, %v3399_v39  ;;  %v2100_v34 = vmax.f32 %v2099_v19, %v1747_v51  ;;  %v1564_v60 = vadd.f32 %v3326_v4, %v3401_v32 }
 0x278   : > { %v2069_v30 = vmax.f32 %v2068_v61, %v1745_v46  ;;  %v2038_v18 = vmax.f32 %v2037_v16, %v1554_v50  ;;  %v1757_v38 = vadd.f32 %v3328_v5, %v3403_v27  ;;  %v1568_v0 = vadd.f32 %v3330_v22, %v3397_v40 }
 0x279   : > { %v3485_v6 = vpop.f32.mrf.mxu1  ;;  %v3487_v21 = vpop.f32.mrf.mxu0  ;;  %v2008_v37 = vmax.f32 %v2007_v28, %v1558_v55  ;;  %v1761_v2 = vadd.f32 %v3332_v9, %v3399_v39  ;;  %v2101_v42 = vmax.f32 %v2100_v34, %v1753_v57  ;;  %v1570_v4 = vadd.f32 %v3334_v10, %v3401_v32 }
 0x27a   : > { %v2070_v44 = vmax.f32 %v2069_v30, %v1751_v54  ;;  %v2039_v41 = vmax.f32 %v2038_v18, %v1560_v56  ;;  %v1763_v5 = vadd.f32 %v3336_v14, %v3403_v27  ;;  %v1572_v22 = vadd.f32 %v3338_v11, %v3397_v40 }
 0x27b   : > { %v3497_v35 = vpop.f32.mrf.mxu1  ;;  %v3499_v36 = vpop.f32.mrf.mxu0  ;;  %v2009_v7 = vmax.f32 %v2008_v37, %v1562_v58  ;;  %v1765_v9 = vadd.f32 %v3340_v23, %v3399_v39  ;;  %v2102_v47 = vmax.f32 %v2101_v42, %v1757_v38  ;;  %v1574_v10 = vadd.f32 %v3342_v13, %v3401_v32 }
 0x27c   : > { %v2071_v46 = vmax.f32 %v2070_v44, %v1755_v59  ;;  %v2040_v33 = vmax.f32 %v2039_v41, %v1564_v60  ;;  %v1767_v14 = vadd.f32 %v3344_v15, %v3403_v27  ;;  %v1578_v11 = vadd.f32 %v3346_v17, %v3397_v40  ;;  %v3754_v60 = vld [vmem:[#allocation6_spill] sm:$0xff]  ;;  %v3755_v44 = vld [vmem:[#allocation7_spill] sm:$0xff] }
 0x27d   : > { %v3509_v12 = vpop.f32.mrf.mxu1  ;;  %v3511_v45 = vpop.f32.mrf.mxu0  ;;  %v2010_v29 = vmax.f32 %v2009_v7, %v1568_v0  ;;  %v1771_v23 = vadd.f32 %v3348_v31, %v3399_v39  ;;  %v2103_v54 = vmax.f32 %v2102_v47, %v1763_v5  ;;  %v1580_v13 = vadd.f32 %v3350_v20, %v3401_v32  ;;  %v3756_v0 = vld [vmem:[#allocation8_spill] sm:$0xff]  ;;  %v3757_v5 = vld [vmem:[#allocation9_spill] sm:$0xff]  ;;  %v3758_v7 = vld [vmem:[#allocation10_spill] sm:$0xff] }
 0x27e   : > { %v2072_v61 = vmax.f32 %v2071_v46, %v1761_v2  ;;  %v2041_v55 = vmax.f32 %v2040_v33, %v1570_v4  ;;  %v1773_v15 = vadd.f32 %v3352_v63, %v3403_v27  ;;  %v1582_v17 = vadd.f32 %v3354_v52, %v3397_v40  ;;  %v3759_v33 = vld [vmem:[#allocation11_spill] sm:$0xff] }
 0x27f   : > { %v3521_v50 = vpop.f32.mrf.mxu1  ;;  %v3523_v51 = vpop.f32.mrf.mxu0  ;;  %v2011_v56 = vmax.f32 %v2010_v29, %v1572_v22  ;;  %v1775_v31 = vadd.f32 %v3356_v1, %v3399_v39  ;;  %v2104_v30 = vmax.f32 %v2103_v54, %v1767_v14  ;;  %v1584_v20 = vadd.f32 %v3358_v8, %v3401_v32 }
 0x280   : > { %v2073_v57 = vmax.f32 %v2072_v61, %v1765_v9  ;;  %v2042_v28 = vmax.f32 %v2041_v55, %v1574_v10  ;;  %v1777_v63 = vadd.f32 %v3360_v24, %v3403_v27  ;;  %v1588_v52 = vadd.f32 %v3362_v48, %v3397_v40  ;;  %v3760_v10 = vld [vmem:[#allocation12_spill] sm:$0xff]  ;;  %v3761_v55 = vld [vmem:[#allocation13_spill] sm:$0xff] }
 0x281   : > { %v3533_v16 = vpop.f32.mrf.mxu1  ;;  %v3535_v19 = vpop.f32.mrf.mxu0  ;;  %v2012_v18 = vmax.f32 %v2011_v56, %v1578_v11  ;;  %v1781_v1 = vadd.f32 %v3754_v60, %v3399_v39  ;;  %v2105_v37 = vmax.f32 %v2104_v30, %v1773_v15  ;;  %v1590_v8 = vadd.f32 %v3755_v44, %v3401_v32 }
 0x282   : > { %v2074_v34 = vmax.f32 %v2073_v57, %v1771_v23  ;;  %v2043_v38 = vmax.f32 %v2042_v28, %v1580_v13  ;;  %v1783_v24 = vadd.f32 %v3756_v0, %v3403_v27  ;;  %v1592_v48 = vadd.f32 %v3757_v5, %v3397_v40  ;;  %v3762_v13 = vld [vmem:[#allocation14_spill] sm:$0xff]  ;;  %v3764_v28 = vld [vmem:[#allocation16_spill] sm:$0xff] }
 0x283   : > { %v3545_v58 = vpop.f32.mrf.mxu1  ;;  %v3547_v59 = vpop.f32.mrf.mxu0  ;;  %v2013_v42 = vmax.f32 %v2012_v18, %v1582_v17  ;;  %v1785_v46 = vadd.f32 %v3758_v7, %v3399_v39  ;;  %v2106_v9 = vmax.f32 %v2105_v37, %v1777_v63  ;;  %v1594_v47 = vadd.f32 %v3759_v33, %v3401_v32  ;;  %v3763_v17 = vld [vmem:[#allocation15_spill] sm:$0xff] }
 0x284   : > { %v2075_v4 = vmax.f32 %v2074_v34, %v1775_v31  ;;  %v2044_v22 = vmax.f32 %v2043_v38, %v1584_v20  ;;  %v1787_v14 = vadd.f32 %v3760_v10, %v3403_v27  ;;  %v1598_v54 = vadd.f32 %v3761_v55, %v3397_v40 }
 0x285   : > { %v3557_v2 = vpop.f32.mrf.mxu1  ;;  %v3559_v41 = vpop.f32.mrf.mxu0  ;;  %v2014_v11 = vmax.f32 %v2013_v42, %v1588_v52  ;;  %v1791_v15 = vadd.f32 %v3762_v13, %v3399_v39  ;;  %v2107_v57 = vmax.f32 %v2106_v9, %v1783_v24  ;;  %v1600_v31 = vadd.f32 %v3763_v17, %v3401_v32  ;;  %v3765_v52 = vld [vmem:[#allocation17_spill] sm:$0xff]  ;;  %v3768_v24 = vld [vmem:[#allocation20_spill] sm:$0xff]  ;;  %v3770_v9 = vld [vmem:[#allocation22_spill] sm:$0xff] }
 0x286   : > { %v2076_v23 = vmax.f32 %v2075_v4, %v1781_v1  ;;  %v2045_v56 = vmax.f32 %v2044_v22, %v1590_v8  ;;  %v1793_v30 = vadd.f32 %v3764_v28, %v3403_v27  ;;  %v1602_v60 = vadd.f32 %v3765_v52, %v3397_v40  ;;  %v3766_v1 = vld [vmem:[#allocation18_spill] sm:$0xff]  ;;  %v3767_v8 = vld [vmem:[#allocation19_spill] sm:$0xff] }
 0x287   : > { %v3569_v29 = vpop.f32.mrf.mxu1  ;;  %v3571_v61 = vpop.f32.mrf.mxu0  ;;  %v2015_v18 = vmax.f32 %v2014_v11, %v1592_v48  ;;  %v1795_v38 = vadd.f32 %v3766_v1, %v3399_v39  ;;  %v2108_v44 = vmax.f32 %v2107_v57, %v1787_v14  ;;  %v1604_v0 = vadd.f32 %v3767_v8, %v3401_v32  ;;  %v3771_v14 = vld [vmem:[#allocation23_spill] sm:$0xff] }
 0x288   : > { %v2077_v34 = vmax.f32 %v2076_v23, %v1785_v46  ;;  %v2046_v37 = vmax.f32 %v2045_v56, %v1594_v47  ;;  %v1797_v42 = vadd.f32 %v3768_v24, %v3403_v27  ;;  %v3769_v46 = vld [vmem:[#allocation21_spill] sm:$0xff]  ;;  %v1801_v33 = vadd.f32 %v3770_v9, %v3399_v39 }
 0x289   : > { %v3581_v20 = vpop.f32.mrf.mxu1  ;;  %v3583_v63 = vpop.f32.mrf.mxu0  ;;  %v2016_v48 = vmax.f32 %v2015_v18, %v1598_v54  ;;  %v1608_v22 = vadd.f32 %v3769_v46, %v3397_v40  ;;  %v2109_v10 = vmax.f32 %v2108_v44, %v1793_v30  ;;  %v1610_v11 = vadd.f32 %v3771_v14, %v3401_v32 }
 0x28a   : > { %v2078_v7 = vmax.f32 %v2077_v34, %v1791_v15  ;;  %v2047_v47 = vmax.f32 %v2046_v37, %v1600_v31  ;;  %v1803_v23 = vadd.f32 %v3439_v62, %v3403_v27  ;;  %v1612_v56 = vadd.f32 %v3449_v26, %v3397_v40 }
 0x28b   : > { %v3593_v4 = vpop.f32.mrf.mxu1  ;;  %v3595_v5 = vpop.f32.mrf.mxu0  ;;  %v2017_v54 = vmax.f32 %v2016_v48, %v1602_v60  ;;  %v1805_v57 = vadd.f32 %v3451_v49, %v3399_v39  ;;  %v2110_v31 = vmax.f32 %v2109_v10, %v1797_v42  ;;  %v1614_v28 = vadd.f32 %v3461_v53, %v3401_v32 }
 0x28c   : > { %v2079_v15 = vmax.f32 %v2078_v7, %v1795_v38  ;;  %v2048_v17 = vmax.f32 %v2047_v47, %v1604_v0  ;;  %v1807_v62 = vadd.f32 %v3463_v43, %v3403_v27  ;;  %v1618_v26 = vadd.f32 %v3473_v25, %v3397_v40 }
 0x28d   : > { %v3605_v55 = vpop.f32.mrf.mxu1  ;;  %v3607_v13 = vpop.f32.mrf.mxu0  ;;  %v2018_v34 = vmax.f32 %v2017_v54, %v1608_v22  ;;  %v1811_v49 = vadd.f32 %v3475_v3, %v3399_v39  ;;  %v2111_v1 = vmax.f32 %v2110_v31, %v1803_v23  ;;  %v1620_v53 = vadd.f32 %v3485_v6, %v3401_v32 }
 0x28e   : > { %v2080_v52 = vmax.f32 %v2079_v15, %v1801_v33  ;;  %v2049_v60 = vmax.f32 %v2048_v17, %v1610_v11  ;;  %v1813_v43 = vadd.f32 %v3487_v21, %v3403_v27  ;;  %v1622_v0 = vadd.f32 %v3497_v35, %v3397_v40 }
 0x28f   : > { %v3617_v30 = vpop.f32.mrf.mxu1  ;;  %v3619_v18 = vpop.f32.mrf.mxu0  ;;  %v2019_v44 = vmax.f32 %v2018_v34, %v1612_v56  ;;  %v1815_v25 = vadd.f32 %v3499_v36, %v3399_v39  ;;  %v2112_v3 = vmax.f32 %v2111_v1, %v1807_v62  ;;  %v1624_v42 = vadd.f32 %v3509_v12, %v3401_v32 }
 0x290   : > { %v2081_v8 = vmax.f32 %v2080_v52, %v1805_v57  ;;  %v2050_v24 = vmax.f32 %v2049_v60, %v1614_v28  ;;  %v1817_v6 = vadd.f32 %v3511_v45, %v3403_v27  ;;  %v1628_v22 = vadd.f32 %v3521_v50, %v3397_v40 }
 0x291   : > { %v1649_v38 = vpop.f32.mrf.mxu1  ;;  %v1842_v37 = vpop.f32.mrf.mxu0  ;;  %v2020_v7 = vmax.f32 %v2019_v44, %v1618_v26  ;;  %v1821_v35 = vadd.f32 %v3523_v51, %v3399_v39  ;;  %v2113_v36 = vmax.f32 %v2112_v3, %v1813_v43  ;;  %v1630_v33 = vadd.f32 %v3533_v16, %v3401_v32 }
 0x292   : > { %v2082_v46 = vmax.f32 %v2081_v8, %v1811_v49  ;;  %v2051_v9 = vmax.f32 %v2050_v24, %v1620_v53  ;;  %v1823_v12 = vadd.f32 %v3535_v19, %v3403_v27  ;;  %v1632_v11 = vadd.f32 %v3545_v58, %v3397_v40 }
 0x293   : > { %v1651_v48 = vpop.f32.mrf.mxu1  ;;  %v1844_v21 = vpop.f32.mrf.mxu0  ;;  %v2021_v10 = vmax.f32 %v2020_v7, %v1622_v0  ;;  %v1825_v50 = vadd.f32 %v3547_v59, %v3399_v39  ;;  %v2114_v51 = vmax.f32 %v2113_v36, %v1817_v6  ;;  %v1634_v54 = vadd.f32 %v3557_v2, %v3401_v32 }
 0x294   : > { %v2083_v14 = vmax.f32 %v2082_v46, %v1815_v25  ;;  %v2052_v23 = vmax.f32 %v2051_v9, %v1624_v42  ;;  %v1827_v16 = vadd.f32 %v3559_v41, %v3403_v27  ;;  %v1638_v17 = vadd.f32 %v3569_v29, %v3397_v40 }
 0x295   : > { %v1653_v47 = vpop.f32.mrf.mxu1  ;;  %v1846_v45 = vpop.f32.mrf.mxu0  ;;  %v2022_v56 = vmax.f32 %v2021_v10, %v1628_v22  ;;  %v1831_v58 = vadd.f32 %v3571_v61, %v3399_v39  ;;  %v2115_v59 = vmax.f32 %v2114_v51, %v1823_v12  ;;  %v1640_v28 = vadd.f32 %v3581_v20, %v3401_v32 }
 0x296   : > { %v2084_v57 = vmax.f32 %v2083_v14, %v1821_v35  ;;  %v2053_v31 = vmax.f32 %v2052_v23, %v1630_v33  ;;  %v1833_v2 = vadd.f32 %v3583_v63, %v3403_v27  ;;  %v1642_v26 = vadd.f32 %v3593_v4, %v3397_v40 }
 0x297   : > { %v1657_v15 = vpop.f32.mrf.mxu1  ;;  %v1850_v19 = vpop.f32.mrf.mxu0  ;;  %v2023_v34 = vmax.f32 %v2022_v56, %v1632_v11  ;;  %v1835_v29 = vadd.f32 %v3595_v5, %v3399_v39  ;;  %v2116_v61 = vmax.f32 %v2115_v59, %v1827_v16  ;;  %v1644_v60 = vadd.f32 %v3605_v55, %v3401_v32 }
 0x298   : > { %v2085_v52 = vmax.f32 %v2084_v57, %v1825_v50  ;;  %v2054_v49 = vmax.f32 %v2053_v31, %v1634_v54  ;;  %v1837_v20 = vadd.f32 %v3607_v13, %v3403_v27  ;;  %v1648_v44 = vadd.f32 %v3617_v30, %v3397_v40 }
 0x299   : > { %v1659_v62 = vpop.f32.mrf.mxu1  ;;  %v1852_v41 = vpop.f32.mrf.mxu0  ;;  %v2024_v53 = vmax.f32 %v2023_v34, %v1638_v17  ;;  %v1841_v4 = vadd.f32 %v3619_v18, %v3399_v39  ;;  %v2117_v5 = vmax.f32 %v2116_v61, %v1833_v2  ;;  %v1650_v0 = vadd.f32 %v1649_v38, %v3401_v32 }
 0x29a   : > { %v2086_v43 = vmax.f32 %v2085_v52, %v1831_v58  ;;  %v2055_v8 = vmax.f32 %v2054_v49, %v1640_v28  ;;  %v1843_v25 = vadd.f32 %v1842_v37, %v3403_v27  ;;  %v1652_v42 = vadd.f32 %v1651_v48, %v3397_v40 }
 0x29b   : > { %v1661_v1 = vpop.f32.mrf.mxu1  ;;  %v1854_v63 = vpop.f32.mrf.mxu0  ;;  %v2025_v3 = vmax.f32 %v2024_v53, %v1642_v26  ;;  %v1845_v6 = vadd.f32 %v1844_v21, %v3399_v39  ;;  %v2118_v46 = vmax.f32 %v2117_v5, %v1837_v20  ;;  %v1654_v30 = vadd.f32 %v1653_v47, %v3401_v32 }
 0x29c   : > { %v2087_v13 = vmax.f32 %v2086_v43, %v1835_v29  ;;  %v2056_v7 = vmax.f32 %v2055_v8, %v1644_v60  ;;  %v1847_v18 = vadd.f32 %v1846_v45, %v3403_v27  ;;  %v1658_v37 = vadd.f32 %v1657_v15, %v3397_v40 }
 0x29d   : > { %v1663_v55 = vpop.f32.mrf.mxu1  ;;  %v1856_v24 = vpop.f32.mrf.mxu0  ;;  %v2026_v9 = vmax.f32 %v2025_v3, %v1648_v44  ;;  %v1851_v36 = vadd.f32 %v1850_v19, %v3399_v39  ;;  %v2119_v12 = vmax.f32 %v2118_v46, %v1843_v25  ;;  %v1660_v48 = vadd.f32 %v1659_v62, %v3401_v32 }
 0x29e   : > { %v2088_v38 = vmax.f32 %v2087_v13, %v1841_v4  ;;  %v2057_v33 = vmax.f32 %v2056_v7, %v1650_v0  ;;  %v1853_v21 = vadd.f32 %v1852_v41, %v3403_v27  ;;  %v1662_v45 = vadd.f32 %v1661_v1, %v3397_v40 }
 0x29f   : > { %v1667_v22 = vpop.f32.mrf.mxu1  ;;  %v1860_v35 = vpop.f32.mrf.mxu0  ;;  %v2027_v11 = vmax.f32 %v2026_v9, %v1652_v42  ;;  %v1855_v50 = vadd.f32 %v1854_v63, %v3399_v39  ;;  %v2120_v51 = vmax.f32 %v2119_v12, %v1847_v18  ;;  %v1664_v54 = vadd.f32 %v1663_v55, %v3401_v32 }
 0x2a0   : > { %v2089_v47 = vmax.f32 %v2088_v38, %v1845_v6  ;;  %v2058_v23 = vmax.f32 %v2057_v33, %v1654_v30  ;;  %v1857_v16 = vadd.f32 %v1856_v24, %v3403_v27  ;;  %v1668_v17 = vadd.f32 %v1667_v22, %v3397_v40 }
 0x2a1   : > { %v1669_v10 = vpop.f32.mrf.mxu1  ;;  %v1862_v14 = vpop.f32.mrf.mxu0  ;;  %v2028_v56 = vmax.f32 %v2027_v11, %v1658_v37  ;;  %v1861_v58 = vadd.f32 %v1860_v35, %v3399_v39  ;;  %v2121_v59 = vmax.f32 %v2120_v51, %v1853_v21 }
 0x2a2   : > { %v2090_v57 = vmax.f32 %v2089_v47, %v1851_v36  ;;  %v2059_v31 = vmax.f32 %v2058_v23, %v1660_v48  ;;  %v1670_v28 = vadd.f32 %v1669_v10, %v3401_v32  ;;  %v1863_v2 = vadd.f32 %v1862_v14, %v3403_v27 }
 0x2a3   : > { %v1671_v15 = vpop.f32.mrf.mxu1  ;;  %v1864_v19 = vpop.f32.mrf.mxu0  ;;  %v2029_v34 = vmax.f32 %v2028_v56, %v1662_v45  ;;  %v2122_v61 = vmax.f32 %v2121_v59, %v1857_v16 }
 0x2a4   : > { %v2091_v52 = vmax.f32 %v2090_v57, %v1855_v50  ;;  %v1672_v26 = vadd.f32 %v1671_v15, %v3397_v40  ;;  %v1865_v29 = vadd.f32 %v1864_v19, %v3399_v39  ;;  %v2060_v49 = vmax.f32 %v2059_v31, %v1664_v54 }
 0x2a5   : > { %v1673_v62 = vpop.f32.mrf.mxu1  ;;  %v1866_v41 = vpop.f32.mrf.mxu0  ;;  %v2030_v53 = vmax.f32 %v2029_v34, %v1668_v17  ;;  %v2123_v5 = vmax.f32 %v2122_v61, %v1863_v2 }
 0x2a6   : > { %v1674_v60 = vadd.f32 %v1673_v62, %v3401_v32  ;;  %v1867_v20 = vadd.f32 %v1866_v41, %v3403_v27  ;;  %v2092_v43 = vmax.f32 %v2091_v52, %v1861_v58  ;;  %v2061_v8 = vmax.f32 %v2060_v49, %v1670_v28 }
 0x2a7   : > { %v1677_v1 = vpop.f32.mrf.mxu1  ;;  %v1870_v63 = vpop.f32.mrf.mxu0  ;;  %v2031_v55 = vmax.f32 %v2030_v53, %v1672_v26  ;;  %v3772_v26 = vld [vmem:[#allocation3_spill] sm:$0xff] }
 0x2a8   : > { %v1678_v44 = vadd.f32 %v1677_v1, %v3397_v40  ;;  %v1871_v4 = vadd.f32 %v1870_v63, %v3399_v39  ;;  %v2093_v24 = vmax.f32 %v2092_v43, %v1865_v29  ;;  %v2062_v42 = vmax.f32 %v2061_v8, %v1674_v60  ;;  %v3773_v60 = vld [vmem:[#allocation4_spill] sm:$0xff] }
 0x2a9   : > { %v1679_v0 = vpop.f32.mrf.mxu1  ;;  %v1872_v25 = vpop.f32.mrf.mxu0  ;;  %v2124_v6 = vmax.f32 %v2123_v5, %v1867_v20  ;;  %v3774_v20 = vld [vmem:[#allocation5_spill] sm:$0xff] }
 0x2aa   : > { %v1680_v3 = vadd.f32 %v1679_v0, %v3401_v32  ;;  %v1873_v13 = vadd.f32 %v1872_v25, %v3403_v27  ;;  %v2032_v30 = vmax.f32 %v2031_v55, %v1678_v44  ;;  %v2094_v18 = vmax.f32 %v2093_v24, %v1871_v4 }
 0x2ab   : > { %v1681_v7 = vpop.f32.mrf.mxu1  ;;  %v1874_v46 = vpop.f32.mrf.mxu0  ;;  %v3775_v1 = vcombine.low %v3773_v60, %v3774_v20 }
 0x2ac   : > { %v1682_v22 = vadd.f32 %v1681_v7, %v3397_v40  ;;  %v1875_v35 = vadd.f32 %v1874_v46, %v3399_v39  ;;  %v2063_v9 = vmax.f32 %v2062_v42, %v1680_v3  ;;  %v2125_v38 = vmax.f32 %v2124_v6, %v1873_v13 }
 0x2ad   : > { %v1683_v37 = vpop.f32.mrf.mxu1  ;;  %v1876_v36 = vpop.f32.mrf.mxu0  ;;  %v2274_v63 = vrot.slane %v3775_v1, %v3772_v26 }
 0x2ae   : > { %v2033_v33 = vmax.f32 %v2032_v30, %v1682_v22  ;;  %v2095_v12 = vmax.f32 %v2094_v18, %v1875_v35  ;;  %v1684_v48 = vadd.f32 %v1683_v37, %v3401_v32  ;;  %v1877_v21 = vadd.f32 %v1876_v36, %v3403_v27 }
 0x2b0   : > { %v2202_v10 = vrot.slane %v2033_v33, 4  ;;  %v2214_v14 = vrot.slane %v2095_v12, 4  ;;  %v2064_v11 = vmax.f32 %v2063_v9, %v1684_v48  ;;  %v2126_v47 = vmax.f32 %v2125_v38, %v1877_v21 }
 0x2b2   : > { %v2203_v45 = vmax.f32 %v2033_v33, %v2202_v10  ;;  %v2215_v50 = vmax.f32 %v2095_v12, %v2214_v14  ;;  %v2208_v23 = vrot.slane %v2064_v11, 4  ;;  %v2220_v40 = vrot.slane %v2126_v47, 4 }
 0x2b4   : > { %v2204_v51 = vrot.slane %v2203_v45, 2  ;;  %v2216_v39 = vrot.slane %v2215_v50, 2  ;;  %v2209_v54 = vmax.f32 %v2064_v11, %v2208_v23  ;;  %v2221_v16 = vmax.f32 %v2126_v47, %v2220_v40 }
 0x2b6   : > { %v2205_v15 = vmax.f32 %v2203_v45, %v2204_v51  ;;  %v2217_v19 = vmax.f32 %v2215_v50, %v2216_v39  ;;  %v2210_v56 = vrot.slane %v2209_v54, 2  ;;  %v2222_v57 = vrot.slane %v2221_v16, 2 }
 0x2b8   : > { %v2206_v32 = vrot.slane %v2205_v15, 1  ;;  %v2218_v17 = vrot.slane %v2217_v19, 1  ;;  %v2211_v27 = vmax.f32 %v2209_v54, %v2210_v56  ;;  %v2223_v58 = vmax.f32 %v2221_v16, %v2222_v57 }
 0x2ba   : > { %v2212_v31 = vrot.slane %v2211_v27, 1  ;;  %v2224_v59 = vrot.slane %v2223_v58, 1  ;;  %v2207_v28 = vmax.f32 %v2205_v15, %v2206_v32  ;;  %v2219_v2 = vmax.f32 %v2217_v19, %v2218_v17 }
 0x2bc   : > { %v2213_v62 = vmax.f32 %v2211_v27, %v2212_v31  ;;  %v2225_v41 = vmax.f32 %v2223_v58, %v2224_v59 }
 0x2be   : > { %v2236_v34 = vcombine.low %v2207_v28, %v2213_v62  ;;  %v2237_v52 = vcombine.low %v2219_v2, %v2225_v41 }
 0x2c0   : > { %v2258_v29 = vrot.slane %v2236_v34, %v3772_v26  ;;  %v2265_v49 = vrot.slane %v2237_v52, %v3772_v26 }
 0x2c2   : > { %v2267_v61 = vcombine.low %v2258_v29, %v2265_v49 }
 0x2c4   : > { %v2281_v53 = vrot.slane %v2267_v61, %v3772_v26 }
 0x2c6   : > { %v2282_v43 = vcombine.low %v2274_v63, %v2281_v53 }
 0x2c8   : > { %2284 = vst [vmem:[%s270_s17] sm:$0xff] %v2282_v43 }
 0x2c9 PF: > { %s15_s20 = sadd.s32 1, %s2616_s20   ;;  %s3776_s18 = smov %s2612_s19 }
 0x2ca   : > { %p12_p5 = scmp.ge.s32.totalorder %s15_s20, 4   ;;  %s3777_s19 = smov %s3779_s21 }
 0x2cc   :  { %14 = sbr.rel (!%p12_p5) target bundleno = 2 (0x2), region = 85 }

</bundles_post_ra>
